<compile_context>
chip_gen: v5e
topology: v5e:2x2
jax: 0.10.0
libtpu: 0.0.40
codegen_flags: <defaults>
</compile_context>

<pallas_src>
import jax
import jax.numpy as jnp
import numpy as np
from jax.experimental import pallas as pl
from jax.experimental.pallas import tpu as pltpu


# ----------------------------------------------------------------------------
# Fused kernel: up-conv(x1) -> concat([x2, up]) -> (3x3 conv + BN + ReLU) x 2
# ----------------------------------------------------------------------------
def _up_fused_kernel(x1_ref, x2_ref, wup_ref, bup_ref,
                     w1_ref, s1_ref, b1_ref, w2_ref, s2_ref, b2_ref,
                     o_ref, cat_pad, h_pad):
    # x1_ref : (1, H,  W,  Cin)  bf16        (Cin = in_ch)
    # x2_ref : (1, 2H, 2W, Cx2)  bf16        (Cx2 = in_ch - out_ch)
    # wup_ref: (4, Cin, Cout)    bf16        tap t = ki*2 + kj
    # bup_ref: (1, Cout)         f32
    # w1_ref : (3, 3*Cin,  Cout) bf16        [dy, dx*Cin + ci, co]
    # w2_ref : (3, 3*Cout, Cout) bf16
    # s*/b*  : (1, Cout) f32 folded BatchNorm scale / bias (conv bias included)
    # o_ref  : (1, 2H, 2W, Cout) f32
    # cat_pad: (2H+2, 2W+2, Cin)  bf16 scratch (concat of x2 | up(x1), halo-padded)
    # h_pad  : (2H+2, 2W+2, Cout) bf16 scratch (conv1 output, halo-padded)
    _, Hh, Wh, Cout = o_ref.shape
    _, H, W, Cin = x1_ref.shape
    Cx2 = x2_ref.shape[3]
    Hp, Wp = Hh + 2, Wh + 2
    HW = Hh * Wh
    HW0 = H * W

    # ---- zero ONLY the 1-pixel halo border (interiors are overwritten) -----
    cat_pad[0:1, :, :] = jnp.zeros((1, Wp, Cin), cat_pad.dtype)
    cat_pad[Hp - 1:Hp, :, :] = jnp.zeros((1, Wp, Cin), cat_pad.dtype)
    cat_pad[:, 0:1, :] = jnp.zeros((Hp, 1, Cin), cat_pad.dtype)
    cat_pad[:, Wp - 1:Wp, :] = jnp.zeros((Hp, 1, Cin), cat_pad.dtype)
    h_pad[0:1, :, :] = jnp.zeros((1, Wp, Cout), h_pad.dtype)
    h_pad[Hp - 1:Hp, :, :] = jnp.zeros((1, Wp, Cout), h_pad.dtype)
    h_pad[:, 0:1, :] = jnp.zeros((Hp, 1, Cout), h_pad.dtype)
    h_pad[:, Wp - 1:Wp, :] = jnp.zeros((Hp, 1, Cout), h_pad.dtype)

    # ---- x2 half of the (virtual) channel concat ---------------------------
    cat_pad[1:Hh + 1, 1:Wh + 1, 0:Cx2] = x2_ref[0]

    # ---- fused ConvTranspose2d(k=2, s=2): up(x1) -> other half of concat ---
    # out[2y+ki, 2x+kj, co] = sum_ci x1[y, x, ci] * Wup[ci, co, ki, kj] + b[co]
    x1_2d = x1_ref[0].reshape(HW0, Cin)
    b_up = bup_ref[...]                                        # (1, Cout) f32
    taps = []
    for t in range(4):                                         # static unroll
        y = jnp.dot(x1_2d, wup_ref[t], preferred_element_type=jnp.float32)
        taps.append(y + b_up)                                  # (HW0, Cout)

    def interleave_cols(t0, t1):
        # two (HW0, C) -> (H, 2W, C), column index 2x+kj
        z = jnp.concatenate([t0.reshape(HW0, 1, Cout),
                             t1.reshape(HW0, 1, Cout)], axis=1)
        return z.reshape(H, 2 * W, Cout)

    r0 = interleave_cols(taps[0], taps[1])                     # rows 2y
    r1 = interleave_cols(taps[2], taps[3])                     # rows 2y+1
    up = jnp.concatenate([r0.reshape(H, 1, 2 * W, Cout),
                          r1.reshape(H, 1, 2 * W, Cout)],
                         axis=1).reshape(Hh, Wh, Cout)
    cat_pad[1:Hh + 1, 1:Wh + 1, Cx2:Cx2 + Cout] = up.astype(cat_pad.dtype)

    # ---- 3x3 conv as matmuls: one matmul per row tap dy (K = 3*C) ----------
    def row_patch(pad, dy, C):
        # (2H*2W, 3*C): for every output pixel, the 3 dx-shifted input pixels
        # of row-tap dy, concatenated along the lane (channel) axis.
        return jnp.concatenate(
            [pad[dy:dy + Hh, dx:dx + Wh, :].reshape(HW, C) for dx in range(3)],
            axis=-1)

    # conv1 on the concat [x2 | up(x1)] + folded BN + ReLU
    acc = jnp.dot(row_patch(cat_pad, 0, Cin), w1_ref[0],
                  preferred_element_type=jnp.float32)
    for dy in range(1, 3):                                     # static unroll
        acc = acc + jnp.dot(row_patch(cat_pad, dy, Cin), w1_ref[dy],
                            preferred_element_type=jnp.float32)
    h = jnp.maximum(acc * s1_ref[...] + b1_ref[...], 0.0)
    h_pad[1:Hh + 1, 1:Wh + 1, :] = h.reshape(Hh, Wh, Cout).astype(h_pad.dtype)

    # conv2 + folded BN + ReLU
    acc2 = jnp.dot(row_patch(h_pad, 0, Cout), w2_ref[0],
                   preferred_element_type=jnp.float32)
    for dy in range(1, 3):
        acc2 = acc2 + jnp.dot(row_patch(h_pad, dy, Cout), w2_ref[dy],
                              preferred_element_type=jnp.float32)
    y = jnp.maximum(acc2 * s2_ref[...] + b2_ref[...], 0.0)
    o_ref[...] = y.reshape(1, Hh, Wh, Cout).astype(o_ref.dtype)


def up_fused(x1_nhwc, x2_nhwc, p):
    N, H, W, Cin = x1_nhwc.shape
    _, Hh, Wh, Cx2 = x2_nhwc.shape
    Cout = p["w_up"].shape[2]
    assert Hh == 2 * H and Wh == 2 * W and Cx2 + Cout == Cin

    return pl.pallas_call(
        _up_fused_kernel,
        out_shape=jax.ShapeDtypeStruct((N, Hh, Wh, Cout), jnp.float32),
        grid=(N,),
        in_specs=[
            pl.BlockSpec((1, H, W, Cin), lambda n: (n, 0, 0, 0)),
            pl.BlockSpec((1, Hh, Wh, Cx2), lambda n: (n, 0, 0, 0)),
            pl.BlockSpec((4, Cin, Cout), lambda n: (0, 0, 0)),
            pl.BlockSpec((1, Cout), lambda n: (0, 0)),
            pl.BlockSpec((3, 3 * Cin, Cout), lambda n: (0, 0, 0)),
            pl.BlockSpec((1, Cout), lambda n: (0, 0)),
            pl.BlockSpec((1, Cout), lambda n: (0, 0)),
            pl.BlockSpec((3, 3 * Cout, Cout), lambda n: (0, 0, 0)),
            pl.BlockSpec((1, Cout), lambda n: (0, 0)),
            pl.BlockSpec((1, Cout), lambda n: (0, 0)),
        ],
        out_specs=pl.BlockSpec((1, Hh, Wh, Cout), lambda n: (n, 0, 0, 0)),
        scratch_shapes=[
            pltpu.VMEM((Hh + 2, Wh + 2, Cin), jnp.bfloat16),
            pltpu.VMEM((Hh + 2, Wh + 2, Cout), jnp.bfloat16),
        ],
        compiler_params=pltpu.CompilerParams(
            dimension_semantics=("parallel",),
            vmem_limit_bytes=48 * 1024 * 1024),
    )(x1_nhwc, x2_nhwc, p["w_up"], p["b_up"], p["w1"], p["s1"], p["bias1"],
      p["w2"], p["s2"], p["bias2"])


# ----------------------------------------------------------------------------
# Parameter preparation (glue) and the full `Up.forward`
# ----------------------------------------------------------------------------
def fold_bn(conv_b, gamma, beta, mean, var, eps=1e-5):
    scale = gamma / jnp.sqrt(var + eps)
    bias = (conv_b - mean) * scale + beta
    return (scale.reshape(1, -1).astype(jnp.float32),
            bias.reshape(1, -1).astype(jnp.float32))


def prepare_params(raw):
    cin = raw["w_up"].shape[0]          # in_ch
    cout = raw["w_up"].shape[1]         # out_ch
    p = {}
    # ConvTranspose2d weight (Cin, Cout, 2, 2) -> (ki*2+kj, Cin, Cout)
    p["w_up"] = (jnp.transpose(raw["w_up"], (2, 3, 0, 1))
                 .reshape(4, cin, cout).astype(jnp.bfloat16))
    p["b_up"] = raw["b_up"].reshape(1, cout).astype(jnp.float32)
    # Conv1 weight (Cout, Cin, 3, 3) -> (dy, dx*Cin + ci, co); cat order
    # [x2 | up(x1)] matches PyTorch's in-channel order, so no split needed.
    p["w1"] = (jnp.transpose(raw["w1"], (2, 3, 1, 0))
               .reshape(3, 3 * cin, cout).astype(jnp.bfloat16))
    # Conv2 weight (Cout, Cout, 3, 3) -> (dy, dx*Cout + ci, co)
    p["w2"] = (jnp.transpose(raw["w2"], (2, 3, 1, 0))
               .reshape(3, 3 * cout, cout).astype(jnp.bfloat16))
    p["s1"], p["bias1"] = fold_bn(raw["b1"], raw["g1"], raw["be1"], raw["m1"], raw["v1"])
    p["s2"], p["bias2"] = fold_bn(raw["b2"], raw["g2"], raw["be2"], raw["m2"], raw["v2"])
    return p


@jax.jit
def up_forward(x1_nchw, x2_nchw, p):
    x1 = jnp.transpose(x1_nchw, (0, 2, 3, 1)).astype(jnp.bfloat16)  # NCHW -> NHWC
    x2 = jnp.transpose(x2_nchw, (0, 2, 3, 1)).astype(jnp.bfloat16)
    y = up_fused(x1, x2, p)                                         # (N,2H,2W,Cout) f32
    return jnp.transpose(y, (0, 3, 1, 2))                           # back to NCHW


# ----------------------------------------------------------------------------
# Pure-JAX f32 reference (for correctness check)
# ----------------------------------------------------------------------------
def ref_forward(x1_nchw, x2_nchw, raw, eps=1e-5):
    x1 = jnp.transpose(x1_nchw, (0, 2, 3, 1))
    x2 = jnp.transpose(x2_nchw, (0, 2, 3, 1))
    N, H, W, _ = x1.shape
    Cout = raw["w_up"].shape[1]
    y = jnp.einsum("nhwi,iokl->nhkwlo", x1, raw["w_up"]).reshape(
        N, 2 * H, 2 * W, Cout) + raw["b_up"]
    x = jnp.concatenate([x2, y], axis=-1)

    def conv_bn_relu(x, w_oihw, b, g, be, m, v):
        w_hwio = jnp.transpose(w_oihw, (2, 3, 1, 0))
        out = jax.lax.conv_general_dilated(
            x, w_hwio, (1, 1), "SAME",
            dimension_numbers=("NHWC", "HWIO", "NHWC")) + b
        out = (out - m) / jnp.sqrt(v + eps) * g + be
        return jnp.maximum(out, 0.0)

    x = conv_bn_relu(x, raw["w1"], raw["b1"], raw["g1"], raw["be1"], raw["m1"], raw["v1"])
    x = conv_bn_relu(x, raw["w2"], raw["b2"], raw["g2"], raw["be2"], raw["m2"], raw["v2"])
    return jnp.transpose(x, (0, 3, 1, 2))


if __name__ == "__main__":
    key = jax.random.PRNGKey(0)
    ks = jax.random.split(key, 16)

    N, in_ch, out_ch, H, W = 2, 8, 4, 8, 8      # x1: (2,8,8,8), x2: (2,4,16,16)

    x1 = jax.random.normal(ks[0], (N, in_ch, H, W), jnp.float32)
    x2 = jax.random.normal(ks[1], (N, in_ch - out_ch, 2 * H, 2 * W), jnp.float32)

    raw = {
        # ConvTranspose2d(in_ch, out_ch, 2, 2): weight (in_ch, out_ch, 2, 2)
        "w_up": 0.2 * jax.random.normal(ks[2], (in_ch, out_ch, 2, 2), jnp.float32),
        "b_up": 0.1 * jax.random.normal(ks[3], (out_ch,), jnp.float32),
        # Conv2d(in_ch, out_ch, 3, padding=1)
        "w1": 0.2 * jax.random.normal(ks[4], (out_ch, in_ch, 3, 3), jnp.float32),
        "b1": 0.1 * jax.random.normal(ks[5], (out_ch,), jnp.float32),
        "g1": 1.0 + 0.1 * jax.random.normal(ks[6], (out_ch,), jnp.float32),
        "be1": 0.1 * jax.random.normal(ks[7], (out_ch,), jnp.float32),
        "m1": 0.1 * jax.random.normal(ks[8], (out_ch,), jnp.float32),
        "v1": 1.0 + 0.1 * jnp.abs(jax.random.normal(ks[9], (out_ch,), jnp.float32)),
        # Conv2d(out_ch, out_ch, 3, padding=1)
        "w2": 0.2 * jax.random.normal(ks[10], (out_ch, out_ch, 3, 3), jnp.float32),
        "b2": 0.1 * jax.random.normal(ks[11], (out_ch,), jnp.float32),
        "g2": 1.0 + 0.1 * jax.random.normal(ks[12], (out_ch,), jnp.float32),
        "be2": 0.1 * jax.random.normal(ks[13], (out_ch,), jnp.float32),
        "m2": 0.1 * jax.random.normal(ks[14], (out_ch,), jnp.float32),
        "v2": 1.0 + 0.1 * jnp.abs(jax.random.normal(ks[15], (out_ch,), jnp.float32)),
    }

    params = prepare_params(raw)

    out = up_forward(x1, x2, params)
    out = jax.block_until_ready(out)

    ref = jax.block_until_ready(ref_forward(x1, x2, raw))
    # bf16 activations/weights (f32 accumulation) -> loosened tolerance.
    np.testing.assert_allclose(np.asarray(out), np.asarray(ref),
                               rtol=5e-2, atol=1e-1)
    assert out.shape == (N, out_ch, 2 * H, 2 * W)

    print("KERNEL_OK")
</pallas_src>

<mosaic_0001>
module attributes {stable_mosaic.version = 11 : i64} {
  func.func @_up_fused_kernel(%arg0: i32, %arg1: memref<1x8x8x8xbf16, #tpu.memory_space<vmem>>, %arg2: memref<1x16x16x4xbf16, #tpu.memory_space<vmem>>, %arg3: memref<4x8x4xbf16, #tpu.memory_space<vmem>>, %arg4: memref<1x4xf32, #tpu.memory_space<vmem>>, %arg5: memref<3x24x4xbf16, #tpu.memory_space<vmem>>, %arg6: memref<1x4xf32, #tpu.memory_space<vmem>>, %arg7: memref<1x4xf32, #tpu.memory_space<vmem>>, %arg8: memref<3x12x4xbf16, #tpu.memory_space<vmem>>, %arg9: memref<1x4xf32, #tpu.memory_space<vmem>>, %arg10: memref<1x4xf32, #tpu.memory_space<vmem>>, %arg11: memref<1x16x16x4xf32, #tpu.memory_space<vmem>>, %arg12: memref<18x18x8xbf16, #tpu.memory_space<vmem>>, %arg13: memref<18x18x4xbf16, #tpu.memory_space<vmem>>) attributes {dimension_semantics = [#tpu.dimension_semantics<parallel>], iteration_bounds = array<i64: 2>, scalar_prefetch = 0 : i64, scratch_operands = 2 : i64, tpu.core_type = #tpu.core_type<tc>, window_params = [{transform_indices = @transform_0, window_bounds = array<i64: 1, 8, 8, 8>}, {transform_indices = @transform_1, window_bounds = array<i64: 1, 16, 16, 4>}, {pipeline_mode = #tpu.pipeline_mode<synchronous>, transform_indices = @transform_2, window_bounds = array<i64: 4, 8, 4>}, {pipeline_mode = #tpu.pipeline_mode<synchronous>, transform_indices = @transform_3, window_bounds = array<i64: 1, 4>}, {pipeline_mode = #tpu.pipeline_mode<synchronous>, transform_indices = @transform_4, window_bounds = array<i64: 3, 24, 4>}, {pipeline_mode = #tpu.pipeline_mode<synchronous>, transform_indices = @transform_5, window_bounds = array<i64: 1, 4>}, {pipeline_mode = #tpu.pipeline_mode<synchronous>, transform_indices = @transform_6, window_bounds = array<i64: 1, 4>}, {pipeline_mode = #tpu.pipeline_mode<synchronous>, transform_indices = @transform_7, window_bounds = array<i64: 3, 12, 4>}, {pipeline_mode = #tpu.pipeline_mode<synchronous>, transform_indices = @transform_8, window_bounds = array<i64: 1, 4>}, {pipeline_mode = #tpu.pipeline_mode<synchronous>, transform_indices = @transform_9, window_bounds = array<i64: 1, 4>}, {transform_indices = @transform_10, window_bounds = array<i64: 1, 16, 16, 4>}]} {
    %cst = arith.constant 0.000000e+00 : bf16
    %0 = vector.broadcast %cst : bf16 to vector<1x18x8xbf16>
    %c0 = arith.constant 0 : index
    %c0_0 = arith.constant 0 : index
    %c0_1 = arith.constant 0 : index
    %1 = vector.load %arg12[%c0, %c0_0, %c0_1] : memref<18x18x8xbf16, #tpu.memory_space<vmem>>, vector<1x18x8xbf16>
    tpu.vector_store %arg12[%c0, %c0_0, %c0_1], %0 {strides = array<i32>} : memref<18x18x8xbf16, #tpu.memory_space<vmem>>, vector<1x18x8xbf16>,
    %cst_2 = arith.constant 0.000000e+00 : bf16
    %2 = vector.broadcast %cst_2 : bf16 to vector<1x18x8xbf16>
    %c17 = arith.constant 17 : index
    %c0_3 = arith.constant 0 : index
    %c0_4 = arith.constant 0 : index
    %3 = vector.load %arg12[%c17, %c0_3, %c0_4] : memref<18x18x8xbf16, #tpu.memory_space<vmem>>, vector<1x18x8xbf16>
    tpu.vector_store %arg12[%c17, %c0_3, %c0_4], %2 {strides = array<i32>} : memref<18x18x8xbf16, #tpu.memory_space<vmem>>, vector<1x18x8xbf16>,
    %cst_5 = arith.constant 0.000000e+00 : bf16
    %4 = vector.broadcast %cst_5 : bf16 to vector<18x1x8xbf16>
    %c0_6 = arith.constant 0 : index
    %c0_7 = arith.constant 0 : index
    %c0_8 = arith.constant 0 : index
    %5 = vector.load %arg12[%c0_6, %c0_7, %c0_8] : memref<18x18x8xbf16, #tpu.memory_space<vmem>>, vector<18x1x8xbf16>
    tpu.vector_store %arg12[%c0_6, %c0_7, %c0_8], %4 {strides = array<i32>} : memref<18x18x8xbf16, #tpu.memory_space<vmem>>, vector<18x1x8xbf16>,
    %cst_9 = arith.constant 0.000000e+00 : bf16
    %6 = vector.broadcast %cst_9 : bf16 to vector<18x1x8xbf16>
    %c0_10 = arith.constant 0 : index
    %c17_11 = arith.constant 17 : index
    %c0_12 = arith.constant 0 : index
    %7 = vector.load %arg12[%c0_10, %c17_11, %c0_12] : memref<18x18x8xbf16, #tpu.memory_space<vmem>>, vector<18x1x8xbf16>
    tpu.vector_store %arg12[%c0_10, %c17_11, %c0_12], %6 {strides = array<i32>} : memref<18x18x8xbf16, #tpu.memory_space<vmem>>, vector<18x1x8xbf16>,
    %cst_13 = arith.constant 0.000000e+00 : bf16
    %8 = vector.broadcast %cst_13 : bf16 to vector<1x18x4xbf16>
    %c0_14 = arith.constant 0 : index
    %c0_15 = arith.constant 0 : index
    %c0_16 = arith.constant 0 : index
    %9 = vector.load %arg13[%c0_14, %c0_15, %c0_16] : memref<18x18x4xbf16, #tpu.memory_space<vmem>>, vector<1x18x4xbf16>
    tpu.vector_store %arg13[%c0_14, %c0_15, %c0_16], %8 {strides = array<i32>} : memref<18x18x4xbf16, #tpu.memory_space<vmem>>, vector<1x18x4xbf16>,
    %cst_17 = arith.constant 0.000000e+00 : bf16
    %10 = vector.broadcast %cst_17 : bf16 to vector<1x18x4xbf16>
    %c17_18 = arith.constant 17 : index
    %c0_19 = arith.constant 0 : index
    %c0_20 = arith.constant 0 : index
    %11 = vector.load %arg13[%c17_18, %c0_19, %c0_20] : memref<18x18x4xbf16, #tpu.memory_space<vmem>>, vector<1x18x4xbf16>
    tpu.vector_store %arg13[%c17_18, %c0_19, %c0_20], %10 {strides = array<i32>} : memref<18x18x4xbf16, #tpu.memory_space<vmem>>, vector<1x18x4xbf16>,
    %cst_21 = arith.constant 0.000000e+00 : bf16
    %12 = vector.broadcast %cst_21 : bf16 to vector<18x1x4xbf16>
    %c0_22 = arith.constant 0 : index
    %c0_23 = arith.constant 0 : index
    %c0_24 = arith.constant 0 : index
    %13 = vector.load %arg13[%c0_22, %c0_23, %c0_24] : memref<18x18x4xbf16, #tpu.memory_space<vmem>>, vector<18x1x4xbf16>
    tpu.vector_store %arg13[%c0_22, %c0_23, %c0_24], %12 {strides = array<i32>} : memref<18x18x4xbf16, #tpu.memory_space<vmem>>, vector<18x1x4xbf16>,
    %cst_25 = arith.constant 0.000000e+00 : bf16
    %14 = vector.broadcast %cst_25 : bf16 to vector<18x1x4xbf16>
    %c0_26 = arith.constant 0 : index
    %c17_27 = arith.constant 17 : index
    %c0_28 = arith.constant 0 : index
    %15 = vector.load %arg13[%c0_26, %c17_27, %c0_28] : memref<18x18x4xbf16, #tpu.memory_space<vmem>>, vector<18x1x4xbf16>
    tpu.vector_store %arg13[%c0_26, %c17_27, %c0_28], %14 {strides = array<i32>} : memref<18x18x4xbf16, #tpu.memory_space<vmem>>, vector<18x1x4xbf16>,
    %c0_29 = arith.constant 0 : index
    %c0_30 = arith.constant 0 : index
    %c0_31 = arith.constant 0 : index
    %c0_32 = arith.constant 0 : index
    %16 = vector.load %arg2[%c0_29, %c0_30, %c0_31, %c0_32] : memref<1x16x16x4xbf16, #tpu.memory_space<vmem>>, vector<1x16x16x4xbf16>
    %17 = vector.shape_cast %16 : vector<1x16x16x4xbf16> to vector<16x16x4xbf16>
    %c1 = arith.constant 1 : index
    %c1_33 = arith.constant 1 : index
    %c0_34 = arith.constant 0 : index
    %18 = vector.load %arg12[%c1, %c1_33, %c0_34] : memref<18x18x8xbf16, #tpu.memory_space<vmem>>, vector<16x16x4xbf16>
    tpu.vector_store %arg12[%c1, %c1_33, %c0_34], %17 {strides = array<i32>} : memref<18x18x8xbf16, #tpu.memory_space<vmem>>, vector<16x16x4xbf16>,
    %c0_35 = arith.constant 0 : index
    %c0_36 = arith.constant 0 : index
    %c0_37 = arith.constant 0 : index
    %c0_38 = arith.constant 0 : index
    %19 = vector.load %arg1[%c0_35, %c0_36, %c0_37, %c0_38] : memref<1x8x8x8xbf16, #tpu.memory_space<vmem>>, vector<1x8x8x8xbf16>
    %20 = vector.shape_cast %19 : vector<1x8x8x8xbf16> to vector<8x8x8xbf16>
    %21 = vector.shape_cast %20 : vector<8x8x8xbf16> to vector<64x8xbf16>
    %c0_39 = arith.constant 0 : index
    %c0_40 = arith.constant 0 : index
    %22 = vector.load %arg4[%c0_39, %c0_40] : memref<1x4xf32, #tpu.memory_space<vmem>>, vector<1x4xf32>
    %c0_41 = arith.constant 0 : index
    %c0_42 = arith.constant 0 : index
    %c0_43 = arith.constant 0 : index
    %23 = vector.load %arg3[%c0_41, %c0_42, %c0_43] : memref<4x8x4xbf16, #tpu.memory_space<vmem>>, vector<1x8x4xbf16>
    %24 = vector.shape_cast %23 : vector<1x8x4xbf16> to vector<8x4xbf16>
    %cst_44 = arith.constant dense<0.000000e+00> : vector<64x4xf32>
    %25 = tpu.matmul %21, %24, %cst_44 {dimension_numbers = #tpu.dot_dimension_numbers<[1], [0], [0], [1], [0, 0, 1, 1], [], []>} : vector<64x8xbf16>, vector<8x4xbf16>, vector<64x4xf32> -> vector<64x4xf32>
    %26 = vector.broadcast %22 : vector<1x4xf32> to vector<64x4xf32>
    %27 = arith.addf %25, %26 : vector<64x4xf32>
    %c1_45 = arith.constant 1 : index
    %c0_46 = arith.constant 0 : index
    %c0_47 = arith.constant 0 : index
    %28 = vector.load %arg3[%c1_45, %c0_46, %c0_47] : memref<4x8x4xbf16, #tpu.memory_space<vmem>>, vector<1x8x4xbf16>
    %29 = vector.shape_cast %28 : vector<1x8x4xbf16> to vector<8x4xbf16>
    %cst_48 = arith.constant dense<0.000000e+00> : vector<64x4xf32>
    %30 = tpu.matmul %21, %29, %cst_48 {dimension_numbers = #tpu.dot_dimension_numbers<[1], [0], [0], [1], [0, 0, 1, 1], [], []>} : vector<64x8xbf16>, vector<8x4xbf16>, vector<64x4xf32> -> vector<64x4xf32>
    %31 = vector.broadcast %22 : vector<1x4xf32> to vector<64x4xf32>
    %32 = arith.addf %30, %31 : vector<64x4xf32>
    %c2 = arith.constant 2 : index
    %c0_49 = arith.constant 0 : index
    %c0_50 = arith.constant 0 : index
    %33 = vector.load %arg3[%c2, %c0_49, %c0_50] : memref<4x8x4xbf16, #tpu.memory_space<vmem>>, vector<1x8x4xbf16>
    %34 = vector.shape_cast %33 : vector<1x8x4xbf16> to vector<8x4xbf16>
    %cst_51 = arith.constant dense<0.000000e+00> : vector<64x4xf32>
    %35 = tpu.matmul %21, %34, %cst_51 {dimension_numbers = #tpu.dot_dimension_numbers<[1], [0], [0], [1], [0, 0, 1, 1], [], []>} : vector<64x8xbf16>, vector<8x4xbf16>, vector<64x4xf32> -> vector<64x4xf32>
    %36 = vector.broadcast %22 : vector<1x4xf32> to vector<64x4xf32>
    %37 = arith.addf %35, %36 : vector<64x4xf32>
    %c3 = arith.constant 3 : index
    %c0_52 = arith.constant 0 : index
    %c0_53 = arith.constant 0 : index
    %38 = vector.load %arg3[%c3, %c0_52, %c0_53] : memref<4x8x4xbf16, #tpu.memory_space<vmem>>, vector<1x8x4xbf16>
    %39 = vector.shape_cast %38 : vector<1x8x4xbf16> to vector<8x4xbf16>
    %cst_54 = arith.constant dense<0.000000e+00> : vector<64x4xf32>
    %40 = tpu.matmul %21, %39, %cst_54 {dimension_numbers = #tpu.dot_dimension_numbers<[1], [0], [0], [1], [0, 0, 1, 1], [], []>} : vector<64x8xbf16>, vector<8x4xbf16>, vector<64x4xf32> -> vector<64x4xf32>
    %41 = vector.broadcast %22 : vector<1x4xf32> to vector<64x4xf32>
    %42 = arith.addf %40, %41 : vector<64x4xf32>
    %43 = vector.shape_cast %27 : vector<64x4xf32> to vector<64x1x4xf32>
    %44 = vector.shape_cast %32 : vector<64x4xf32> to vector<64x1x4xf32>
    %45 = tpu.concatenate %43, %44 in 1 : vector<64x1x4xf32>, vector<64x1x4xf32> -> vector<64x2x4xf32>
    %46 = vector.shape_cast %45 : vector<64x2x4xf32> to vector<8x16x4xf32>
    %47 = vector.shape_cast %37 : vector<64x4xf32> to vector<64x1x4xf32>
    %48 = vector.shape_cast %42 : vector<64x4xf32> to vector<64x1x4xf32>
    %49 = tpu.concatenate %47, %48 in 1 : vector<64x1x4xf32>, vector<64x1x4xf32> -> vector<64x2x4xf32>
    %50 = vector.shape_cast %49 : vector<64x2x4xf32> to vector<8x16x4xf32>
    %51 = vector.shape_cast %46 : vector<8x16x4xf32> to vector<8x1x16x4xf32>
    %52 = vector.shape_cast %50 : vector<8x16x4xf32> to vector<8x1x16x4xf32>
    %53 = tpu.concatenate %51, %52 in 1 : vector<8x1x16x4xf32>, vector<8x1x16x4xf32> -> vector<8x2x16x4xf32>
    %54 = vector.shape_cast %53 : vector<8x2x16x4xf32> to vector<16x16x4xf32>
    %55 = arith.truncf %54 : vector<16x16x4xf32> to vector<16x16x4xbf16>
    %c1_55 = arith.constant 1 : index
    %c1_56 = arith.constant 1 : index
    %c4 = arith.constant 4 : index
    %56 = vector.load %arg12[%c1_55, %c1_56, %c4] : memref<18x18x8xbf16, #tpu.memory_space<vmem>>, vector<16x16x4xbf16>
    tpu.vector_store %arg12[%c1_55, %c1_56, %c4], %55 {strides = array<i32>} : memref<18x18x8xbf16, #tpu.memory_space<vmem>>, vector<16x16x4xbf16>,
    %c0_57 = arith.constant 0 : index
    %c0_58 = arith.constant 0 : index
    %c0_59 = arith.constant 0 : index
    %57 = vector.load %arg12[%c0_57, %c0_58, %c0_59] : memref<18x18x8xbf16, #tpu.memory_space<vmem>>, vector<16x16x8xbf16>
    %58 = vector.shape_cast %57 : vector<16x16x8xbf16> to vector<256x8xbf16>
    %c0_60 = arith.constant 0 : index
    %c1_61 = arith.constant 1 : index
    %c0_62 = arith.constant 0 : index
    %59 = vector.load %arg12[%c0_60, %c1_61, %c0_62] : memref<18x18x8xbf16, #tpu.memory_space<vmem>>, vector<16x16x8xbf16>
    %60 = vector.shape_cast %59 : vector<16x16x8xbf16> to vector<256x8xbf16>
    %c0_63 = arith.constant 0 : index
    %c2_64 = arith.constant 2 : index
    %c0_65 = arith.constant 0 : index
    %61 = vector.load %arg12[%c0_63, %c2_64, %c0_65] : memref<18x18x8xbf16, #tpu.memory_space<vmem>>, vector<16x16x8xbf16>
    %62 = vector.shape_cast %61 : vector<16x16x8xbf16> to vector<256x8xbf16>
    %63 = tpu.concatenate %58, %60, %62 in 1 : vector<256x8xbf16>, vector<256x8xbf16>, vector<256x8xbf16> -> vector<256x24xbf16>
    %c0_66 = arith.constant 0 : index
    %c0_67 = arith.constant 0 : index
    %c0_68 = arith.constant 0 : index
    %64 = vector.load %arg5[%c0_66, %c0_67, %c0_68] : memref<3x24x4xbf16, #tpu.memory_space<vmem>>, vector<1x24x4xbf16>
    %65 = vector.shape_cast %64 : vector<1x24x4xbf16> to vector<24x4xbf16>
    %cst_69 = arith.constant dense<0.000000e+00> : vector<256x4xf32>
    %66 = tpu.matmul %63, %65, %cst_69 {dimension_numbers = #tpu.dot_dimension_numbers<[1], [0], [0], [1], [0, 0, 1, 1], [], []>} : vector<256x24xbf16>, vector<24x4xbf16>, vector<256x4xf32> -> vector<256x4xf32>
    %c1_70 = arith.constant 1 : index
    %c0_71 = arith.constant 0 : index
    %c0_72 = arith.constant 0 : index
    %67 = vector.load %arg12[%c1_70, %c0_71, %c0_72] : memref<18x18x8xbf16, #tpu.memory_space<vmem>>, vector<16x16x8xbf16>
    %68 = vector.shape_cast %67 : vector<16x16x8xbf16> to vector<256x8xbf16>
    %c1_73 = arith.constant 1 : index
    %c1_74 = arith.constant 1 : index
    %c0_75 = arith.constant 0 : index
    %69 = vector.load %arg12[%c1_73, %c1_74, %c0_75] : memref<18x18x8xbf16, #tpu.memory_space<vmem>>, vector<16x16x8xbf16>
    %70 = vector.shape_cast %69 : vector<16x16x8xbf16> to vector<256x8xbf16>
    %c1_76 = arith.constant 1 : index
    %c2_77 = arith.constant 2 : index
    %c0_78 = arith.constant 0 : index
    %71 = vector.load %arg12[%c1_76, %c2_77, %c0_78] : memref<18x18x8xbf16, #tpu.memory_space<vmem>>, vector<16x16x8xbf16>
    %72 = vector.shape_cast %71 : vector<16x16x8xbf16> to vector<256x8xbf16>
    %73 = tpu.concatenate %68, %70, %72 in 1 : vector<256x8xbf16>, vector<256x8xbf16>, vector<256x8xbf16> -> vector<256x24xbf16>
    %c1_79 = arith.constant 1 : index
    %c0_80 = arith.constant 0 : index
    %c0_81 = arith.constant 0 : index
    %74 = vector.load %arg5[%c1_79, %c0_80, %c0_81] : memref<3x24x4xbf16, #tpu.memory_space<vmem>>, vector<1x24x4xbf16>
    %75 = vector.shape_cast %74 : vector<1x24x4xbf16> to vector<24x4xbf16>
    %cst_82 = arith.constant dense<0.000000e+00> : vector<256x4xf32>
    %76 = tpu.matmul %73, %75, %cst_82 {dimension_numbers = #tpu.dot_dimension_numbers<[1], [0], [0], [1], [0, 0, 1, 1], [], []>} : vector<256x24xbf16>, vector<24x4xbf16>, vector<256x4xf32> -> vector<256x4xf32>
    %77 = arith.addf %66, %76 : vector<256x4xf32>
    %c2_83 = arith.constant 2 : index
    %c0_84 = arith.constant 0 : index
    %c0_85 = arith.constant 0 : index
    %78 = vector.load %arg12[%c2_83, %c0_84, %c0_85] : memref<18x18x8xbf16, #tpu.memory_space<vmem>>, vector<16x16x8xbf16>
    %79 = vector.shape_cast %78 : vector<16x16x8xbf16> to vector<256x8xbf16>
    %c2_86 = arith.constant 2 : index
    %c1_87 = arith.constant 1 : index
    %c0_88 = arith.constant 0 : index
    %80 = vector.load %arg12[%c2_86, %c1_87, %c0_88] : memref<18x18x8xbf16, #tpu.memory_space<vmem>>, vector<16x16x8xbf16>
    %81 = vector.shape_cast %80 : vector<16x16x8xbf16> to vector<256x8xbf16>
    %c2_89 = arith.constant 2 : index
    %c2_90 = arith.constant 2 : index
    %c0_91 = arith.constant 0 : index
    %82 = vector.load %arg12[%c2_89, %c2_90, %c0_91] : memref<18x18x8xbf16, #tpu.memory_space<vmem>>, vector<16x16x8xbf16>
    %83 = vector.shape_cast %82 : vector<16x16x8xbf16> to vector<256x8xbf16>
    %84 = tpu.concatenate %79, %81, %83 in 1 : vector<256x8xbf16>, vector<256x8xbf16>, vector<256x8xbf16> -> vector<256x24xbf16>
    %c2_92 = arith.constant 2 : index
    %c0_93 = arith.constant 0 : index
    %c0_94 = arith.constant 0 : index
    %85 = vector.load %arg5[%c2_92, %c0_93, %c0_94] : memref<3x24x4xbf16, #tpu.memory_space<vmem>>, vector<1x24x4xbf16>
    %86 = vector.shape_cast %85 : vector<1x24x4xbf16> to vector<24x4xbf16>
    %cst_95 = arith.constant dense<0.000000e+00> : vector<256x4xf32>
    %87 = tpu.matmul %84, %86, %cst_95 {dimension_numbers = #tpu.dot_dimension_numbers<[1], [0], [0], [1], [0, 0, 1, 1], [], []>} : vector<256x24xbf16>, vector<24x4xbf16>, vector<256x4xf32> -> vector<256x4xf32>
    %88 = arith.addf %77, %87 : vector<256x4xf32>
    %c0_96 = arith.constant 0 : index
    %c0_97 = arith.constant 0 : index
    %89 = vector.load %arg6[%c0_96, %c0_97] : memref<1x4xf32, #tpu.memory_space<vmem>>, vector<1x4xf32>
    %90 = vector.broadcast %89 : vector<1x4xf32> to vector<256x4xf32>
    %91 = arith.mulf %88, %90 : vector<256x4xf32>
    %c0_98 = arith.constant 0 : index
    %c0_99 = arith.constant 0 : index
    %92 = vector.load %arg7[%c0_98, %c0_99] : memref<1x4xf32, #tpu.memory_space<vmem>>, vector<1x4xf32>
    %93 = vector.broadcast %92 : vector<1x4xf32> to vector<256x4xf32>
    %94 = arith.addf %91, %93 : vector<256x4xf32>
    %cst_100 = arith.constant 0.000000e+00 : f32
    %95 = vector.broadcast %cst_100 : f32 to vector<256x4xf32>
    %96 = arith.maximumf %94, %95 : vector<256x4xf32>
    %97 = vector.shape_cast %96 : vector<256x4xf32> to vector<16x16x4xf32>
    %98 = arith.truncf %97 : vector<16x16x4xf32> to vector<16x16x4xbf16>
    %c1_101 = arith.constant 1 : index
    %c1_102 = arith.constant 1 : index
    %c0_103 = arith.constant 0 : index
    %99 = vector.load %arg13[%c1_101, %c1_102, %c0_103] : memref<18x18x4xbf16, #tpu.memory_space<vmem>>, vector<16x16x4xbf16>
    tpu.vector_store %arg13[%c1_101, %c1_102, %c0_103], %98 {strides = array<i32>} : memref<18x18x4xbf16, #tpu.memory_space<vmem>>, vector<16x16x4xbf16>,
    %c0_104 = arith.constant 0 : index
    %c0_105 = arith.constant 0 : index
    %c0_106 = arith.constant 0 : index
    %100 = vector.load %arg13[%c0_104, %c0_105, %c0_106] : memref<18x18x4xbf16, #tpu.memory_space<vmem>>, vector<16x16x4xbf16>
    %101 = vector.shape_cast %100 : vector<16x16x4xbf16> to vector<256x4xbf16>
    %c0_107 = arith.constant 0 : index
    %c1_108 = arith.constant 1 : index
    %c0_109 = arith.constant 0 : index
    %102 = vector.load %arg13[%c0_107, %c1_108, %c0_109] : memref<18x18x4xbf16, #tpu.memory_space<vmem>>, vector<16x16x4xbf16>
    %103 = vector.shape_cast %102 : vector<16x16x4xbf16> to vector<256x4xbf16>
    %c0_110 = arith.constant 0 : index
    %c2_111 = arith.constant 2 : index
    %c0_112 = arith.constant 0 : index
    %104 = vector.load %arg13[%c0_110, %c2_111, %c0_112] : memref<18x18x4xbf16, #tpu.memory_space<vmem>>, vector<16x16x4xbf16>
    %105 = vector.shape_cast %104 : vector<16x16x4xbf16> to vector<256x4xbf16>
    %106 = tpu.concatenate %101, %103, %105 in 1 : vector<256x4xbf16>, vector<256x4xbf16>, vector<256x4xbf16> -> vector<256x12xbf16>
    %c0_113 = arith.constant 0 : index
    %c0_114 = arith.constant 0 : index
    %c0_115 = arith.constant 0 : index
    %107 = vector.load %arg8[%c0_113, %c0_114, %c0_115] : memref<3x12x4xbf16, #tpu.memory_space<vmem>>, vector<1x12x4xbf16>
    %108 = vector.shape_cast %107 : vector<1x12x4xbf16> to vector<12x4xbf16>
    %cst_116 = arith.constant dense<0.000000e+00> : vector<256x4xf32>
    %109 = tpu.matmul %106, %108, %cst_116 {dimension_numbers = #tpu.dot_dimension_numbers<[1], [0], [0], [1], [0, 0, 1, 1], [], []>} : vector<256x12xbf16>, vector<12x4xbf16>, vector<256x4xf32> -> vector<256x4xf32>
    %c1_117 = arith.constant 1 : index
    %c0_118 = arith.constant 0 : index
    %c0_119 = arith.constant 0 : index
    %110 = vector.load %arg13[%c1_117, %c0_118, %c0_119] : memref<18x18x4xbf16, #tpu.memory_space<vmem>>, vector<16x16x4xbf16>
    %111 = vector.shape_cast %110 : vector<16x16x4xbf16> to vector<256x4xbf16>
    %c1_120 = arith.constant 1 : index
    %c1_121 = arith.constant 1 : index
    %c0_122 = arith.constant 0 : index
    %112 = vector.load %arg13[%c1_120, %c1_121, %c0_122] : memref<18x18x4xbf16, #tpu.memory_space<vmem>>, vector<16x16x4xbf16>
    %113 = vector.shape_cast %112 : vector<16x16x4xbf16> to vector<256x4xbf16>
    %c1_123 = arith.constant 1 : index
    %c2_124 = arith.constant 2 : index
    %c0_125 = arith.constant 0 : index
    %114 = vector.load %arg13[%c1_123, %c2_124, %c0_125] : memref<18x18x4xbf16, #tpu.memory_space<vmem>>, vector<16x16x4xbf16>
    %115 = vector.shape_cast %114 : vector<16x16x4xbf16> to vector<256x4xbf16>
    %116 = tpu.concatenate %111, %113, %115 in 1 : vector<256x4xbf16>, vector<256x4xbf16>, vector<256x4xbf16> -> vector<256x12xbf16>
    %c1_126 = arith.constant 1 : index
    %c0_127 = arith.constant 0 : index
    %c0_128 = arith.constant 0 : index
    %117 = vector.load %arg8[%c1_126, %c0_127, %c0_128] : memref<3x12x4xbf16, #tpu.memory_space<vmem>>, vector<1x12x4xbf16>
    %118 = vector.shape_cast %117 : vector<1x12x4xbf16> to vector<12x4xbf16>
    %cst_129 = arith.constant dense<0.000000e+00> : vector<256x4xf32>
    %119 = tpu.matmul %116, %118, %cst_129 {dimension_numbers = #tpu.dot_dimension_numbers<[1], [0], [0], [1], [0, 0, 1, 1], [], []>} : vector<256x12xbf16>, vector<12x4xbf16>, vector<256x4xf32> -> vector<256x4xf32>
    %120 = arith.addf %109, %119 : vector<256x4xf32>
    %c2_130 = arith.constant 2 : index
    %c0_131 = arith.constant 0 : index
    %c0_132 = arith.constant 0 : index
    %121 = vector.load %arg13[%c2_130, %c0_131, %c0_132] : memref<18x18x4xbf16, #tpu.memory_space<vmem>>, vector<16x16x4xbf16>
    %122 = vector.shape_cast %121 : vector<16x16x4xbf16> to vector<256x4xbf16>
    %c2_133 = arith.constant 2 : index
    %c1_134 = arith.constant 1 : index
    %c0_135 = arith.constant 0 : index
    %123 = vector.load %arg13[%c2_133, %c1_134, %c0_135] : memref<18x18x4xbf16, #tpu.memory_space<vmem>>, vector<16x16x4xbf16>
    %124 = vector.shape_cast %123 : vector<16x16x4xbf16> to vector<256x4xbf16>
    %c2_136 = arith.constant 2 : index
    %c2_137 = arith.constant 2 : index
    %c0_138 = arith.constant 0 : index
    %125 = vector.load %arg13[%c2_136, %c2_137, %c0_138] : memref<18x18x4xbf16, #tpu.memory_space<vmem>>, vector<16x16x4xbf16>
    %126 = vector.shape_cast %125 : vector<16x16x4xbf16> to vector<256x4xbf16>
    %127 = tpu.concatenate %122, %124, %126 in 1 : vector<256x4xbf16>, vector<256x4xbf16>, vector<256x4xbf16> -> vector<256x12xbf16>
    %c2_139 = arith.constant 2 : index
    %c0_140 = arith.constant 0 : index
    %c0_141 = arith.constant 0 : index
    %128 = vector.load %arg8[%c2_139, %c0_140, %c0_141] : memref<3x12x4xbf16, #tpu.memory_space<vmem>>, vector<1x12x4xbf16>
    %129 = vector.shape_cast %128 : vector<1x12x4xbf16> to vector<12x4xbf16>
    %cst_142 = arith.constant dense<0.000000e+00> : vector<256x4xf32>
    %130 = tpu.matmul %127, %129, %cst_142 {dimension_numbers = #tpu.dot_dimension_numbers<[1], [0], [0], [1], [0, 0, 1, 1], [], []>} : vector<256x12xbf16>, vector<12x4xbf16>, vector<256x4xf32> -> vector<256x4xf32>
    %131 = arith.addf %120, %130 : vector<256x4xf32>
    %c0_143 = arith.constant 0 : index
    %c0_144 = arith.constant 0 : index
    %132 = vector.load %arg9[%c0_143, %c0_144] : memref<1x4xf32, #tpu.memory_space<vmem>>, vector<1x4xf32>
    %133 = vector.broadcast %132 : vector<1x4xf32> to vector<256x4xf32>
    %134 = arith.mulf %131, %133 : vector<256x4xf32>
    %c0_145 = arith.constant 0 : index
    %c0_146 = arith.constant 0 : index
    %135 = vector.load %arg10[%c0_145, %c0_146] : memref<1x4xf32, #tpu.memory_space<vmem>>, vector<1x4xf32>
    %136 = vector.broadcast %135 : vector<1x4xf32> to vector<256x4xf32>
    %137 = arith.addf %134, %136 : vector<256x4xf32>
    %cst_147 = arith.constant 0.000000e+00 : f32
    %138 = vector.broadcast %cst_147 : f32 to vector<256x4xf32>
    %139 = arith.maximumf %137, %138 : vector<256x4xf32>
    %140 = vector.shape_cast %139 : vector<256x4xf32> to vector<1x16x16x4xf32>
    %c0_148 = arith.constant 0 : index
    %c0_149 = arith.constant 0 : index
    %c0_150 = arith.constant 0 : index
    %c0_151 = arith.constant 0 : index
    %141 = vector.load %arg11[%c0_148, %c0_149, %c0_150, %c0_151] : memref<1x16x16x4xf32, #tpu.memory_space<vmem>>, vector<1x16x16x4xf32>
    tpu.vector_store %arg11[%c0_148, %c0_149, %c0_150, %c0_151], %140 {strides = array<i32>} : memref<1x16x16x4xf32, #tpu.memory_space<vmem>>, vector<1x16x16x4xf32>,
    return
  }
  func.func @transform_0(%arg0: i32) -> (i32, i32, i32, i32) {
    %c0_i32 = arith.constant 0 : i32
    %c0_i32_0 = arith.constant 0 : i32
    %c0_i32_1 = arith.constant 0 : i32
    %c0_i32_2 = arith.constant 0 : i32
    return %arg0, %c0_i32, %c0_i32_0, %c0_i32_1 : i32, i32, i32, i32
  }
  func.func @transform_1(%arg0: i32) -> (i32, i32, i32, i32) {
    %c0_i32 = arith.constant 0 : i32
    %c0_i32_0 = arith.constant 0 : i32
    %c0_i32_1 = arith.constant 0 : i32
    %c0_i32_2 = arith.constant 0 : i32
    return %arg0, %c0_i32, %c0_i32_0, %c0_i32_1 : i32, i32, i32, i32
  }
  func.func @transform_2(%arg0: i32) -> (i32, i32, i32) {
    %c0_i32 = arith.constant 0 : i32
    %c0_i32_0 = arith.constant 0 : i32
    %c0_i32_1 = arith.constant 0 : i32
    %c0_i32_2 = arith.constant 0 : i32
    return %c0_i32, %c0_i32_0, %c0_i32_1 : i32, i32, i32
  }
  func.func @transform_3(%arg0: i32) -> (i32, i32) {
    %c0_i32 = arith.constant 0 : i32
    %c0_i32_0 = arith.constant 0 : i32
    %c0_i32_1 = arith.constant 0 : i32
    return %c0_i32, %c0_i32_0 : i32, i32
  }
  func.func @transform_4(%arg0: i32) -> (i32, i32, i32) {
    %c0_i32 = arith.constant 0 : i32
    %c0_i32_0 = arith.constant 0 : i32
    %c0_i32_1 = arith.constant 0 : i32
    %c0_i32_2 = arith.constant 0 : i32
    return %c0_i32, %c0_i32_0, %c0_i32_1 : i32, i32, i32
  }
  func.func @transform_5(%arg0: i32) -> (i32, i32) {
    %c0_i32 = arith.constant 0 : i32
    %c0_i32_0 = arith.constant 0 : i32
    %c0_i32_1 = arith.constant 0 : i32
    return %c0_i32, %c0_i32_0 : i32, i32
  }
  func.func @transform_6(%arg0: i32) -> (i32, i32) {
    %c0_i32 = arith.constant 0 : i32
    %c0_i32_0 = arith.constant 0 : i32
    %c0_i32_1 = arith.constant 0 : i32
    return %c0_i32, %c0_i32_0 : i32, i32
  }
  func.func @transform_7(%arg0: i32) -> (i32, i32, i32) {
    %c0_i32 = arith.constant 0 : i32
    %c0_i32_0 = arith.constant 0 : i32
    %c0_i32_1 = arith.constant 0 : i32
    %c0_i32_2 = arith.constant 0 : i32
    return %c0_i32, %c0_i32_0, %c0_i32_1 : i32, i32, i32
  }
  func.func @transform_8(%arg0: i32) -> (i32, i32) {
    %c0_i32 = arith.constant 0 : i32
    %c0_i32_0 = arith.constant 0 : i32
    %c0_i32_1 = arith.constant 0 : i32
    return %c0_i32, %c0_i32_0 : i32, i32
  }
  func.func @transform_9(%arg0: i32) -> (i32, i32) {
    %c0_i32 = arith.constant 0 : i32
    %c0_i32_0 = arith.constant 0 : i32
    %c0_i32_1 = arith.constant 0 : i32
    return %c0_i32, %c0_i32_0 : i32, i32
  }
  func.func @transform_10(%arg0: i32) -> (i32, i32, i32, i32) {
    %c0_i32 = arith.constant 0 : i32
    %c0_i32_0 = arith.constant 0 : i32
    %c0_i32_1 = arith.constant 0 : i32
    %c0_i32_2 = arith.constant 0 : i32
    return %arg0, %c0_i32, %c0_i32_0, %c0_i32_1 : i32, i32, i32, i32
  }
}

</mosaic_0001>

<bundles_post_ra>
// kernel: up_forward.1
= control target key start
LH: loop header
LB: loop body
LE: loop exit
PB: predicated region body
PF: predicated region fallthrough
CT: control target
= control target key end

     0   :  { %s10908_s13 = smov 0   ;;  %s15340_s0 = inlined_call_operand.vmem [shape: bf16[2,8,8,8], index: 0, kind: input, shape index: {}]   ;;  %s15341_s1 = inlined_call_operand.vmem [shape: bf16[2,16,16,4], index: 1, kind: input, shape index: {}]   ;;  %s15342_s2 = inlined_call_operand.vmem [shape: bf16[4,8,4], index: 2, kind: input, shape index: {}]   ;;  %s15343_s3 = inlined_call_operand.vmem [shape: f32[1,4], index: 3, kind: input, shape index: {}]   ;;  %s15344_s4 = inlined_call_operand.vmem [shape: bf16[3,24,4], index: 4, kind: input, shape index: {}]   ;;  %s15345_s5 = inlined_call_operand.vmem [shape: f32[1,4], index: 5, kind: input, shape index: {}]   ;;  %s15346_s6 = inlined_call_operand.vmem [shape: f32[1,4], index: 6, kind: input, shape index: {}]   ;;  %s15347_s7 = inlined_call_operand.vmem [shape: bf16[3,12,4], index: 7, kind: input, shape index: {}]   ;;  %s15348_s8 = inlined_call_operand.vmem [shape: f32[1,4], index: 8, kind: input, shape index: {}]   ;;  %s15349_s9 = inlined_call_operand.vmem [shape: f32[1,4], index: 9, kind: input, shape index: {}]   ;;  %s15350_s10 = inlined_call_operand.vmem [shape: f32[2,16,16,4], index: 10, kind: output, shape index: {}]  }
   0x1 LB: > { %s10044_s14 = sadd.s32 4294967295, %s10847_s13   ;;  %p10048_p0 = scmp.ge.s32.totalorder %s10847_s13, 1  ;;  %s10847_s13 = sphi %s10908_s13, %s20_s13  }
   0x2   : > { %p322_p1 = scmp.lt.s32.totalorder %s10847_s13, 3 }
   0x4   : > { %p323_p2 = pnand %p10048_p0, %p322_p1 }
   0x6   : > { %326 = sbr.rel (%p323_p2) target bundleno = 1641 (0x669), region = 60 }
   0xb   : > { %v1101_v0 = vld [vmem:[%s15342_s2] sm:$0xf]  ;;  %vm15354_vm0 = vcmask 1043456   ;;  %v10075_v1 = vld [vmem:[%s15342_s2 + $0x4] sm:$0xf]  ;;  %p365_p3 = scmp.lt.s32.totalorder %s10044_s14, 1 }
   0xc   : > { %v1140_v2 = vsel %vm15354_vm0, %v1101_v0, 0  ;;  %v1174_v3 = vsel %vm15354_vm0, %v10075_v1, 0  ;;  %v10080_v4 = vld [vmem:[%s15342_s2 + $0x8] sm:$0xf]  ;;  %v10085_v5 = vld [vmem:[%s15342_s2 + $0xc] sm:$0xf] }
   0xd   : > { %1149 = vmatpush.bf16.msra.mxu0 %v1140_v2  ;;  %1183 = vmatpush.bf16.msra.mxu1 %v1174_v3  ;;  %v1208_v6 = vsel %vm15354_vm0, %v10080_v4, 0  ;;  %v1242_v7 = vsel %vm15354_vm0, %v10085_v5, 0  ;;  %s15446_s14 = smov (!%p365_p3, %s10044_s14), 1  ;;  %vm1125_vm1 = vcmask 64512   ;;  %v10957_v12 = vld [vmem:[%s15343_s3] ss:$0 sm:$0xff] }
   0xe   : > { %1217 = vmatpush.bf16.msra.mxu2 %v1208_v6  ;;  %1251 = vmatpush.bf16.msra.mxu3 %v1242_v7  ;;  %s10702_s23 = sshll.u32 %s15446_s14, 5  ;;  %vm1585_vm2 = vcmask 1040384   ;;  %vm391_vm3 = vsmask.f32 256  ;;  %vm655_vm4 = vsmask.f32 4368 }
   0xf   : > { %s369_s26 = scalar_lea.vmem %s15340_s0, %s10702_s23  ;;  %s10849_s29 = smov 4   ;;  %vm11150_vm5 = vmor %vm391_vm3, %vm655_vm4  ;;  %vm15353_vm6 = vcmask 57344   ;;  %vm15351_vm7 = vsmask.f32 7938  ;;  %vm15352_vm9 = vcmask 24576   ;;  %vm503_vm12 = vcmask 27648  }
  0x10   : > { %v10705_v8 = vld [vmem:[%s369_s26] sm:$0xff]  ;;  %v10706_v9 = vld [vmem:[%s369_s26 + $0x8] sm:$0xff]  ;;  %v10707_v10 = vld [vmem:[%s369_s26 + $0x10] sm:$0xff]  ;;  %s10703_s12 = sshll.u32 %s15446_s14, 7  ;;  %vm2808_vm14 = vcmask 57376   ;;  %vm3417_vm4 = vcmask 1042432  }
  0x11   : > { %10071 = vmatmul.msk.bf16.vlgmr.msra.gmra.mxu0 %vm1125_vm1, %v10705_v8  ;;  %10076 = vmatmul.msk.bf16.vlgmr.msra.gmra.mxu1 %vm1125_vm1, %v10705_v8  ;;  %v10708_v11 = vld [vmem:[%s369_s26 + $0x18] sm:$0xff]  ;;  %s11283_s17 = scalar_lea.vmem %s15341_s1, %s10703_s12  ;;  %vm11306_vm8 = vmand %vm15353_vm6, %vm15351_vm7  ;;  %s10850_s18 = smov 16  }
  0x12   : > { %10081 = vmatmul.msk.bf16.vlgmr.msra.gmra.mxu2 %vm1125_vm1, %v10705_v8  ;;  %10086 = vmatmul.msk.bf16.vlgmr.msra.gmra.mxu3 %vm1125_vm1, %v10705_v8  ;;  %vm11325_vm10 = vmand %vm15352_vm9, %vm391_vm3  ;;  %vm2966_vm9 = vsmask.f32 3328  ;;  %s10851_s19 = smov 8   ;;  %s10704_s15 = sshll.u32 %s15446_s14, 8 }
  0x13   : > { %vm11364_vm11 = vmand %vm15353_vm6, %vm391_vm3  ;;  %vm2967_vm6 = vsmask.f32 7440 }
  0x14   : > { %vm11408_vm13 = vmand %vm503_vm12, %vm15351_vm7 }
  0x15   : > { %vm11428_vm15 = vmand %vm2808_vm14, %vm391_vm3  ;;  %vm3418_vm14 = vcmask 1046532  }
  0x21   : > { %10077 = vmatmul.msk.bf16.gmra.mxu1 %vm1125_vm1, %v10706_v9  ;;  %10072 = vmatmul.msk.bf16.gmra.mxu0 %vm1125_vm1, %v10706_v9 }
  0x22   : > { %10087 = vmatmul.msk.bf16.gmra.mxu3 %vm1125_vm1, %v10706_v9  ;;  %10082 = vmatmul.msk.bf16.gmra.mxu2 %vm1125_vm1, %v10706_v9 }
  0x31   : > { %10078 = vmatmul.msk.bf16.gmra.mxu1 %vm1125_vm1, %v10707_v10  ;;  %10073 = vmatmul.msk.bf16.gmra.mxu0 %vm1125_vm1, %v10707_v10 }
  0x32   : > { %10088 = vmatmul.msk.bf16.gmra.mxu3 %vm1125_vm1, %v10707_v10  ;;  %10083 = vmatmul.msk.bf16.gmra.mxu2 %vm1125_vm1, %v10707_v10 }
  0x41   : > { %10079 = vmatmul.msk.bf16.gmra.mxu1 %vm1125_vm1, %v10708_v11  ;;  %10074 = vmatmul.msk.bf16.gmra.mxu0 %vm1125_vm1, %v10708_v11 }
  0x42   : > { %10089 = vmatmul.msk.bf16.gmra.mxu3 %vm1125_vm1, %v10708_v11  ;;  %10084 = vmatmul.msk.bf16.gmra.mxu2 %vm1125_vm1, %v10708_v11 }
  0x8e   : > { %v1151_v13 = vpop.f32.mrf.mxu0  ;;  %v1185_v14 = vpop.f32.mrf.mxu1 }
  0x8f   : > { %v1152_v15 = vadd.f32 %v10957_v12, %v1151_v13  ;;  %v1186_v16 = vadd.f32 %v10957_v12, %v1185_v14 }
  0x91   : > { %v1281_v17 = vrot.slane %v1152_v15, 1  ;;  %v1282_v18 = vrot.slane %v1152_v15, 2  ;;  %v1283_v19 = vrot.slane %v1152_v15, 3  ;;  %v1284_v20 = vrot.slane %v1152_v15, 4 }
  0x92   : > { %v1285_v21 = vrot.slane %v1152_v15, 5  ;;  %v1401_v22 = vrot.slane %v1186_v16, 1  ;;  %v1402_v23 = vrot.slane %v1186_v16, 2  ;;  %v1403_v24 = vrot.slane %v1186_v16, 3 }
  0x93   : > { %v1404_v25 = vrot.slane %v1186_v16, 4  ;;  %v1405_v26 = vrot.slane %v1186_v16, 5  ;;  %v1406_v27 = vrot.slane %v1186_v16, 6  ;;  %v1407_v28 = vrot.slane %v1186_v16, 7 }
  0x94   : > { %v1457_v29 = vperm.slane %v1186_v16, 0  ;;  %v1458_v30 = vperm.slane %v1401_v22, 0  ;;  %v1459_v31 = vperm.slane %v1402_v23, 0  ;;  %v1460_v32 = vperm.slane %v1403_v24, 0 }
  0x95   : > { %v1461_v33 = vperm.slane %v1404_v25, 0  ;;  %v1462_v34 = vperm.slane %v1405_v26, 0  ;;  %v1286_v35 = vrot.slane %v1152_v15, 6  ;;  %v1463_v36 = vperm.slane %v1406_v27, 0  ;;  %v1219_v43 = vpop.f32.mrf.mxu2  ;;  %v1253_v44 = vpop.f32.mrf.mxu3 }
  0x96   : > { %v1586_v37 = vsel %vm1585_vm2, %v1152_v15, %v1457_v29  ;;  %v1587_v38 = vsel %vm1585_vm2, %v1281_v17, %v1458_v30  ;;  %v1287_v39 = vrot.slane %v1152_v15, 7  ;;  %v1464_v40 = vperm.slane %v1407_v28, 0  ;;  %v1187_v61 = vpop.f32.mrf.mxu1 }
  0x97   : > { %v1588_v41 = vsel %vm1585_vm2, %v1282_v18, %v1459_v31  ;;  %v1589_v42 = vsel %vm1585_vm2, %v1283_v19, %v1460_v32  ;;  %2154 = vst [vmem:[#allocation1] ss:$4 sm:$0xff] %v1586_v37  ;;  %v1590_v45 = vsel %vm1585_vm2, %v1284_v20, %v1461_v33  ;;  %v1220_v46 = vadd.f32 %v10957_v12, %v1219_v43  ;;  %v1153_v19 = vpop.f32.mrf.mxu0 }
  0x98   : > { %2156 = vst [vmem:[#allocation1 + $0x1] ss:$4 sm:$0xff] %v1587_v38  ;;  %v1254_v47 = vadd.f32 %v10957_v12, %v1253_v44  ;;  %v1591_v48 = vsel %vm1585_vm2, %v1285_v21, %v1462_v34  ;;  %v1592_v49 = vsel %vm1585_vm2, %v1286_v35, %v1463_v36  ;;  %v1593_v50 = vsel %vm1585_vm2, %v1287_v39, %v1464_v40 }
  0x99   : > { %2158 = vst [vmem:[#allocation1 + $0x2] ss:$4 sm:$0xff] %v1588_v41  ;;  %v1658_v51 = vrot.slane %v1220_v46, 1  ;;  %v1659_v57 = vrot.slane %v1220_v46, 2  ;;  %v1660_v62 = vrot.slane %v1220_v46, 3  ;;  %v1661_v2 = vrot.slane %v1220_v46, 4 }
  0x9a   : > { %2160 = vst [vmem:[#allocation1 + $0x3] ss:$4 sm:$0xff] %v1589_v42  ;;  %v1778_v52 = vrot.slane %v1254_v47, 1  ;;  %v1779_v53 = vrot.slane %v1254_v47, 2  ;;  %v1780_v54 = vrot.slane %v1254_v47, 3  ;;  %v1781_v55 = vrot.slane %v1254_v47, 4 }
  0x9b   : > { %2162 = vst [vmem:[#allocation1 + $0x20] ss:$4 sm:$0xff] %v1590_v45  ;;  %v1782_v56 = vrot.slane %v1254_v47, 5  ;;  %v1783_v58 = vrot.slane %v1254_v47, 6  ;;  %v1834_v59 = vperm.slane %v1254_v47, 0  ;;  %v1784_v63 = vrot.slane %v1254_v47, 7 }
  0x9c   : > { %2164 = vst [vmem:[#allocation1 + $0x21] ss:$4 sm:$0xff] %v1591_v48  ;;  %v1835_v60 = vperm.slane %v1778_v52, 0  ;;  %v1836_v0 = vperm.slane %v1779_v53, 0  ;;  %v1837_v1 = vperm.slane %v1780_v54, 0  ;;  %v1838_v3 = vperm.slane %v1781_v55, 0 }
  0x9d   : > { %2166 = vst [vmem:[#allocation1 + $0x22] ss:$4 sm:$0xff] %v1592_v49  ;;  %v1662_v4 = vrot.slane %v1220_v46, 5  ;;  %v1839_v5 = vperm.slane %v1782_v56, 0  ;;  %v1188_v7 = vadd.f32 %v10957_v12, %v1187_v61  ;;  %v1663_v9 = vrot.slane %v1220_v46, 6  ;;  %v1255_v31 = vpop.f32.mrf.mxu3  ;;  %v1221_v52 = vpop.f32.mrf.mxu2 }
  0x9e   : > { %2168 = vst [vmem:[#allocation1 + $0x23] ss:$4 sm:$0xff] %v1593_v50  ;;  %v1963_v6 = vsel %vm1585_vm2, %v1658_v51, %v1835_v60  ;;  %v1840_v10 = vperm.slane %v1783_v58, 0  ;;  %v1962_v11 = vsel %vm1585_vm2, %v1220_v46, %v1834_v59  ;;  %v1964_v13 = vsel %vm1585_vm2, %v1659_v57, %v1836_v0 }
  0x9f   : > { %v1664_v14 = vrot.slane %v1220_v46, 7  ;;  %v1841_v15 = vperm.slane %v1784_v63, 0  ;;  %v1965_v16 = vsel %vm1585_vm2, %v1660_v62, %v1837_v1  ;;  %v1966_v17 = vsel %vm1585_vm2, %v1661_v2, %v1838_v3 }
  0xa0   : > { %v1967_v18 = vsel %vm1585_vm2, %v1662_v4, %v1839_v5  ;;  %v1968_v21 = vsel %vm1585_vm2, %v1663_v9, %v1840_v10  ;;  %v1408_v22 = vrot.slane %v1188_v7, 1  ;;  %v1409_v24 = vrot.slane %v1188_v7, 2  ;;  %v1190_v4 = vpop.f32.mrf.mxu1 }
  0xa1   : > { %v10973_v8 = vld.sshfl [vmem:[#allocation1] sm:$0xff pattern:$0x73625140]  ;;  %v1969_v23 = vsel %vm1585_vm2, %v1664_v14, %v1841_v15  ;;  %v1154_v25 = vadd.f32 %v10957_v12, %v1153_v19  ;;  %v1410_v26 = vrot.slane %v1188_v7, 3  ;;  %v1411_v27 = vrot.slane %v1188_v7, 4 }
  0xa2   : > { %2171 = vst [vmem:[#allocation1] ss:$4 sm:$0xff] %v1962_v11  ;;  %v1465_v28 = vperm.slane %v1188_v7, 0  ;;  %v1412_v29 = vrot.slane %v1188_v7, 5  ;;  %v1466_v30 = vperm.slane %v1408_v22, 0  ;;  %v1413_v32 = vrot.slane %v1188_v7, 6 }
  0xa3   : > { %2172 = vst [vmem:[#allocation1 + $0x1] ss:$4 sm:$0xff] %v1963_v6  ;;  %v1467_v33 = vperm.slane %v1409_v24, 0  ;;  %v1288_v34 = vrot.slane %v1154_v25, 1  ;;  %v1414_v35 = vrot.slane %v1188_v7, 7  ;;  %v1468_v36 = vperm.slane %v1410_v26, 0 }
  0xa4   : > { %2173 = vst [vmem:[#allocation1 + $0x2] ss:$4 sm:$0xff] %v1964_v13  ;;  %v1289_v38 = vrot.slane %v1154_v25, 2  ;;  %v1469_v39 = vperm.slane %v1411_v27, 0  ;;  %v1594_v40 = vsel %vm1585_vm2, %v1154_v25, %v1465_v28  ;;  %v1256_v41 = vadd.f32 %v10957_v12, %v1255_v31 }
  0xa5   : > { %v10980_v20 = vld.sshfl [vmem:[#allocation1 + $0x20] sm:$0xff pattern:$0x73625140]  ;;  %2174 = vst [vmem:[#allocation1 + $0x3] ss:$4 sm:$0xff] %v1965_v16  ;;  %v1290_v42 = vrot.slane %v1154_v25, 3  ;;  %v1595_v44 = vsel %vm1585_vm2, %v1288_v34, %v1466_v30  ;;  %v1222_v60 = vadd.f32 %v10957_v12, %v1221_v52  ;;  %v1191_v7 = vadd.f32 %v10957_v12, %v1190_v4 }
  0xa6   : > { %2175 = vst [vmem:[#allocation1 + $0x20] ss:$4 sm:$0xff] %v1966_v17  ;;  %v1470_v43 = vperm.slane %v1412_v29, 0  ;;  %v1291_v45 = vrot.slane %v1154_v25, 4  ;;  %v1471_v46 = vperm.slane %v1413_v32, 0  ;;  %v1596_v47 = vsel %vm1585_vm2, %v1289_v38, %v1467_v33 }
  0xa7   : > { %2176 = vst [vmem:[#allocation1 + $0x21] ss:$4 sm:$0xff] %v1967_v18  ;;  %v1292_v48 = vrot.slane %v1154_v25, 5  ;;  %v1293_v49 = vrot.slane %v1154_v25, 6  ;;  %v1472_v50 = vperm.slane %v1414_v35, 0  ;;  %v1597_v51 = vsel %vm1585_vm2, %v1290_v42, %v1468_v36 }
  0xa8   : > { %2177 = vst [vmem:[#allocation1 + $0x22] ss:$4 sm:$0xff] %v1968_v21  ;;  %v1598_v54 = vsel %vm1585_vm2, %v1291_v45, %v1469_v39  ;;  %v1785_v55 = vrot.slane %v1256_v41, 1  ;;  %v1294_v56 = vrot.slane %v1154_v25, 7  ;;  %v1786_v58 = vrot.slane %v1256_v41, 2 }
  0xa9   : > { %2178 = vst [vmem:[#allocation1 + $0x23] ss:$4 sm:$0xff] %v1969_v23  ;;  %v1599_v57 = vsel %vm1585_vm2, %v1292_v48, %v1470_v43  ;;  %v1600_v59 = vsel %vm1585_vm2, %v1293_v49, %v1471_v46  ;;  %v1787_v61 = vrot.slane %v1256_v41, 3  ;;  %v1788_v63 = vrot.slane %v1256_v41, 4  ;;  %v1156_v23 = vpop.f32.mrf.mxu0 }
  0xaa   : > { %v1601_v62 = vsel %vm1585_vm2, %v1294_v56, %v1472_v50  ;;  %v1842_v0 = vperm.slane %v1256_v41, 0  ;;  %v1789_v1 = vrot.slane %v1256_v41, 5  ;;  %v1790_v2 = vrot.slane %v1256_v41, 6  ;;  %v1258_v50 = vpop.f32.mrf.mxu3 }
  0xab   : > { %v1843_v3 = vperm.slane %v1785_v55, 0  ;;  %v1791_v5 = vrot.slane %v1256_v41, 7  ;;  %v1844_v6 = vperm.slane %v1786_v58, 0  ;;  %v1665_v9 = vrot.slane %v1222_v60, 1 }
  0xac   : > { %v10985_v37 = vld.sshfl [vmem:[#allocation1] sm:$0xff pattern:$0x73625140]  ;;  %v1666_v10 = vrot.slane %v1222_v60, 2  ;;  %v1845_v11 = vperm.slane %v1787_v61, 0  ;;  %v1667_v14 = vrot.slane %v1222_v60, 3  ;;  %v1970_v17 = vsel %vm1585_vm2, %v1222_v60, %v1842_v0 }
  0xad   : > { %2181 = vst [vmem:[#allocation1] ss:$4 sm:$0xff] %v1594_v40  ;;  %v1668_v15 = vrot.slane %v1222_v60, 4  ;;  %v1846_v16 = vperm.slane %v1788_v63, 0  ;;  %v1669_v18 = vrot.slane %v1222_v60, 5  ;;  %v1847_v19 = vperm.slane %v1789_v1, 0 }
  0xae   : > { %2182 = vst [vmem:[#allocation1 + $0x1] ss:$4 sm:$0xff] %v1595_v44  ;;  %v1848_v21 = vperm.slane %v1790_v2, 0  ;;  %v1971_v22 = vsel %vm1585_vm2, %v1665_v9, %v1843_v3  ;;  %v1849_v24 = vperm.slane %v1791_v5, 0  ;;  %v1972_v25 = vsel %vm1585_vm2, %v1666_v10, %v1844_v6  ;;  %v1224_v2 = vpop.f32.mrf.mxu2 }
  0xaf   : > { %2183 = vst [vmem:[#allocation1 + $0x2] ss:$4 sm:$0xff] %v1596_v47  ;;  %v1415_v26 = vrot.slane %v1191_v7, 1  ;;  %v1157_v27 = vadd.f32 %v10957_v12, %v1156_v23  ;;  %v1670_v28 = vrot.slane %v1222_v60, 6  ;;  %v1671_v29 = vrot.slane %v1222_v60, 7 }
  0xb0   : > { %v10992_v53 = vld.sshfl [vmem:[#allocation1 + $0x20] sm:$0xff pattern:$0x73625140]  ;;  %2184 = vst [vmem:[#allocation1 + $0x3] ss:$4 sm:$0xff] %v1597_v51  ;;  %v1973_v30 = vsel %vm1585_vm2, %v1667_v14, %v1845_v11  ;;  %v1416_v31 = vrot.slane %v1191_v7, 2  ;;  %v1974_v33 = vsel %vm1585_vm2, %v1668_v15, %v1846_v16  ;;  %v1975_v35 = vsel %vm1585_vm2, %v1669_v18, %v1847_v19  ;;  %v1192_v19 = vpop.f32.mrf.mxu1 }
  0xb1   : > { %2185 = vst [vmem:[#allocation1 + $0x20] ss:$4 sm:$0xff] %v1598_v54  ;;  %v1417_v34 = vrot.slane %v1191_v7, 3  ;;  %v1976_v36 = vsel %vm1585_vm2, %v1670_v28, %v1848_v21  ;;  %v1418_v38 = vrot.slane %v1191_v7, 4  ;;  %v1977_v39 = vsel %vm1585_vm2, %v1671_v29, %v1849_v24 }
  0xb2   : > { %2186 = vst [vmem:[#allocation1 + $0x21] ss:$4 sm:$0xff] %v1599_v57  ;;  %v1419_v40 = vrot.slane %v1191_v7, 5  ;;  %v1474_v41 = vperm.slane %v1415_v26, 0  ;;  %v1295_v42 = vrot.slane %v1157_v27, 1  ;;  %v1420_v43 = vrot.slane %v1191_v7, 6 }
  0xb3   : > { %2187 = vst [vmem:[#allocation1 + $0x22] ss:$4 sm:$0xff] %v1600_v59  ;;  %v1473_v44 = vperm.slane %v1191_v7, 0  ;;  %v1475_v45 = vperm.slane %v1416_v31, 0  ;;  %v1296_v46 = vrot.slane %v1157_v27, 2  ;;  %v1421_v47 = vrot.slane %v1191_v7, 7 }
  0xb4   : > { %2188 = vst [vmem:[#allocation1 + $0x23] ss:$4 sm:$0xff] %v1601_v62  ;;  %v1476_v48 = vperm.slane %v1417_v34, 0  ;;  %v1297_v49 = vrot.slane %v1157_v27, 3  ;;  %v1477_v51 = vperm.slane %v1418_v38, 0  ;;  %v1298_v52 = vrot.slane %v1157_v27, 4 }
  0xb5   : > { %v1259_v54 = vadd.f32 %v10957_v12, %v1258_v50  ;;  %v1478_v55 = vperm.slane %v1419_v40, 0  ;;  %v1299_v56 = vrot.slane %v1157_v27, 5  ;;  %v1603_v57 = vsel %vm1585_vm2, %v1295_v42, %v1474_v41  ;;  %v1158_v42 = vpop.f32.mrf.mxu0 }
  0xb6   : > { %v1479_v59 = vperm.slane %v1420_v43, 0  ;;  %v1300_v60 = vrot.slane %v1157_v27, 6  ;;  %v1602_v61 = vsel %vm1585_vm2, %v1157_v27, %v1473_v44  ;;  %v1604_v62 = vsel %vm1585_vm2, %v1296_v46, %v1475_v45 }
  0xb7   : > { %v11000_v13 = vld.sshfl [vmem:[#allocation1] sm:$0xff pattern:$0x73625140]  ;;  %v1480_v63 = vperm.slane %v1421_v47, 0  ;;  %v1301_v0 = vrot.slane %v1157_v27, 7  ;;  %v1605_v1 = vsel %vm1585_vm2, %v1297_v49, %v1476_v48  ;;  %v1606_v3 = vsel %vm1585_vm2, %v1298_v52, %v1477_v51 }
  0xb8   : > { %2191 = vst [vmem:[#allocation1] ss:$4 sm:$0xff] %v1970_v17  ;;  %v1792_v4 = vrot.slane %v1259_v54, 1  ;;  %v1225_v5 = vadd.f32 %v10957_v12, %v1224_v2  ;;  %v1607_v6 = vsel %vm1585_vm2, %v1299_v56, %v1478_v55  ;;  %v1793_v7 = vrot.slane %v1259_v54, 2 }
  0xb9   : > { %2192 = vst [vmem:[#allocation1 + $0x1] ss:$4 sm:$0xff] %v1971_v22  ;;  %v1608_v10 = vsel %vm1585_vm2, %v1300_v60, %v1479_v59  ;;  %v1794_v11 = vrot.slane %v1259_v54, 3  ;;  %v1609_v14 = vsel %vm1585_vm2, %v1301_v0, %v1480_v63  ;;  %v1795_v15 = vrot.slane %v1259_v54, 4 }
  0xba   : > { %2193 = vst [vmem:[#allocation1 + $0x2] ss:$4 sm:$0xff] %v1972_v25  ;;  %v1796_v16 = vrot.slane %v1259_v54, 5  ;;  %v1851_v17 = vperm.slane %v1792_v4, 0  ;;  %v1672_v18 = vrot.slane %v1225_v5, 1  ;;  %v1797_v21 = vrot.slane %v1259_v54, 6 }
  0xbb   : > { %v11007_v32 = vld.sshfl [vmem:[#allocation1 + $0x20] sm:$0xff pattern:$0x73625140]  ;;  %2194 = vst [vmem:[#allocation1 + $0x3] ss:$4 sm:$0xff] %v1973_v30  ;;  %v1850_v22 = vperm.slane %v1259_v54, 0  ;;  %v1193_v30 = vadd.f32 %v10957_v12, %v1192_v19  ;;  %v1159_v49 = vadd.f32 %v10957_v12, %v1158_v42 }
  0xbc   : > { %2195 = vst [vmem:[#allocation1 + $0x20] ss:$4 sm:$0xff] %v1974_v33  ;;  %v1852_v23 = vperm.slane %v1793_v7, 0  ;;  %v1673_v24 = vrot.slane %v1225_v5, 2  ;;  %v1798_v25 = vrot.slane %v1259_v54, 7  ;;  %v1853_v26 = vperm.slane %v1794_v11, 0 }
  0xbd   : > { %2196 = vst [vmem:[#allocation1 + $0x21] ss:$4 sm:$0xff] %v1975_v35  ;;  %v1674_v27 = vrot.slane %v1225_v5, 3  ;;  %v1854_v28 = vperm.slane %v1795_v15, 0  ;;  %v1675_v29 = vrot.slane %v1225_v5, 4  ;;  %v1855_v31 = vperm.slane %v1796_v16, 0  ;;  %v1226_v16 = vpop.f32.mrf.mxu2 }
  0xbe   : > { %2197 = vst [vmem:[#allocation1 + $0x22] ss:$4 sm:$0xff] %v1976_v36  ;;  %v1676_v33 = vrot.slane %v1225_v5, 5  ;;  %v1979_v34 = vsel %vm1585_vm2, %v1672_v18, %v1851_v17  ;;  %v1856_v36 = vperm.slane %v1797_v21, 0  ;;  %v1677_v38 = vrot.slane %v1225_v5, 6 }
  0xbf   : > { %2198 = vst [vmem:[#allocation1 + $0x23] ss:$4 sm:$0xff] %v1977_v39  ;;  %v1978_v39 = vsel %vm1585_vm2, %v1225_v5, %v1850_v22  ;;  %v1980_v40 = vsel %vm1585_vm2, %v1673_v24, %v1852_v23  ;;  %v1857_v41 = vperm.slane %v1798_v25, 0  ;;  %v1678_v43 = vrot.slane %v1225_v5, 7 }
  0xc0   : > { %v1981_v44 = vsel %vm1585_vm2, %v1674_v27, %v1853_v26  ;;  %v1982_v45 = vsel %vm1585_vm2, %v1675_v29, %v1854_v28  ;;  %v1983_v46 = vsel %vm1585_vm2, %v1676_v33, %v1855_v31  ;;  %v1422_v48 = vrot.slane %v1193_v30, 1 }
  0xc1   : > { %v1984_v50 = vsel %vm1585_vm2, %v1677_v38, %v1856_v36  ;;  %v1423_v51 = vrot.slane %v1193_v30, 2  ;;  %v1985_v52 = vsel %vm1585_vm2, %v1678_v43, %v1857_v41  ;;  %v1424_v54 = vrot.slane %v1193_v30, 3  ;;  %v1195_v43 = vpop.f32.mrf.mxu1 }
  0xc2   : > { %v11015_v58 = vld.sshfl [vmem:[#allocation1] sm:$0xff pattern:$0x73625140]  ;;  %v1425_v55 = vrot.slane %v1193_v30, 4  ;;  %v1481_v56 = vperm.slane %v1193_v30, 0  ;;  %v1482_v59 = vperm.slane %v1422_v48, 0  ;;  %v1227_v27 = vadd.f32 %v10957_v12, %v1226_v16 }
  0xc3   : > { %2201 = vst [vmem:[#allocation1] ss:$4 sm:$0xff] %v1602_v61  ;;  %v1302_v60 = vrot.slane %v1159_v49, 1  ;;  %v1260_v61 = vpop.f32.mrf.mxu3  ;;  %v1483_v63 = vperm.slane %v1423_v51, 0  ;;  %v1303_v0 = vrot.slane %v1159_v49, 2  ;;  %v1484_v2 = vperm.slane %v1424_v54, 0 }
  0xc4   : > { %2202 = vst [vmem:[#allocation1 + $0x1] ss:$4 sm:$0xff] %v1603_v57  ;;  %v1426_v57 = vrot.slane %v1193_v30, 5  ;;  %v1485_v4 = vperm.slane %v1425_v55, 0  ;;  %v1305_v5 = vrot.slane %v1159_v49, 4  ;;  %v1307_v18 = vrot.slane %v1159_v49, 6 }
  0xc5   : > { %2203 = vst [vmem:[#allocation1 + $0x2] ss:$4 sm:$0xff] %v1604_v62  ;;  %v1427_v62 = vrot.slane %v1193_v30, 6  ;;  %v1611_v15 = vsel %vm1585_vm2, %v1302_v60, %v1482_v59  ;;  %v1612_v19 = vsel %vm1585_vm2, %v1303_v0, %v1483_v63  ;;  %v1308_v22 = vrot.slane %v1159_v49, 7 }
  0xc6   : > { %v11023_v9 = vld.sshfl [vmem:[#allocation1 + $0x20] sm:$0xff pattern:$0x73625140]  ;;  %2204 = vst [vmem:[#allocation1 + $0x3] ss:$4 sm:$0xff] %v1605_v1  ;;  %v1428_v1 = vrot.slane %v1193_v30, 7  ;;  %v1614_v24 = vsel %vm1585_vm2, %v1305_v5, %v1485_v4 }
  0xc7   : > { %2205 = vst [vmem:[#allocation1 + $0x20] ss:$4 sm:$0xff] %v1606_v3  ;;  %v1304_v3 = vrot.slane %v1159_v49, 3  ;;  %v1486_v11 = vperm.slane %v1426_v57, 0  ;;  %v1487_v17 = vperm.slane %v1427_v62, 0  ;;  %v1679_v42 = vrot.slane %v1227_v27, 1  ;;  %v1161_v62 = vpop.f32.mrf.mxu0 }
  0xc8   : > { %2206 = vst [vmem:[#allocation1 + $0x21] ss:$4 sm:$0xff] %v1607_v6  ;;  %v1610_v6 = vsel %vm1585_vm2, %v1159_v49, %v1481_v56  ;;  %v1488_v21 = vperm.slane %v1428_v1, 0  ;;  %v1682_v55 = vrot.slane %v1227_v27, 4  ;;  %v1683_v59 = vrot.slane %v1227_v27, 5 }
  0xc9   : > { %2207 = vst [vmem:[#allocation1 + $0x22] ss:$4 sm:$0xff] %v1608_v10  ;;  %v1261_v10 = vadd.f32 %v10957_v12, %v1260_v61  ;;  %v1613_v23 = vsel %vm1585_vm2, %v1304_v3, %v1484_v2  ;;  %v1616_v30 = vsel %vm1585_vm2, %v1307_v18, %v1487_v17  ;;  %v1684_v60 = vrot.slane %v1227_v27, 6 }
  0xca   : > { %2208 = vst [vmem:[#allocation1 + $0x23] ss:$4 sm:$0xff] %v1609_v14  ;;  %v1306_v14 = vrot.slane %v1159_v49, 5  ;;  %v1685_v63 = vrot.slane %v1227_v27, 7  ;;  %v1162_v2 = vadd.f32 %v10957_v12, %v1161_v62 }
  0xcb   : > { %v1799_v26 = vrot.slane %v1261_v10, 1  ;;  %v1800_v29 = vrot.slane %v1261_v10, 2  ;;  %v1801_v31 = vrot.slane %v1261_v10, 3  ;;  %v1802_v33 = vrot.slane %v1261_v10, 4 }
  0xcc   : > { %v1615_v28 = vsel %vm1585_vm2, %v1306_v14, %v1486_v11  ;;  %v1803_v36 = vrot.slane %v1261_v10, 5  ;;  %v1804_v38 = vrot.slane %v1261_v10, 6 }
  0xcd   : > { %v11029_v35 = vld.sshfl [vmem:[#allocation1] sm:$0xff pattern:$0x73625140]  ;;  %v1859_v41 = vperm.slane %v1799_v26, 0  ;;  %v1861_v48 = vperm.slane %v1801_v31, 0  ;;  %v1862_v49 = vperm.slane %v1802_v33, 0 }
  0xce   : > { %2211 = vst [vmem:[#allocation1] ss:$4 sm:$0xff] %v1978_v39  ;;  %v1858_v39 = vperm.slane %v1261_v10, 0  ;;  %v1864_v54 = vperm.slane %v1804_v38, 0  ;;  %v1310_v26 = vrot.slane %v1162_v2, 2  ;;  %v1312_v33 = vrot.slane %v1162_v2, 4 }
  0xcf   : > { %2212 = vst [vmem:[#allocation1 + $0x1] ss:$4 sm:$0xff] %v1979_v34  ;;  %v1617_v34 = vsel %vm1585_vm2, %v1308_v22, %v1488_v21  ;;  %v1987_v61 = vsel %vm1585_vm2, %v1679_v42, %v1859_v41  ;;  %v1263_v21 = vpop.f32.mrf.mxu3  ;;  %v1313_v38 = vrot.slane %v1162_v2, 5  ;;  %v1229_v41 = vpop.f32.mrf.mxu2 }
  0xd0   : > { %2213 = vst [vmem:[#allocation1 + $0x2] ss:$4 sm:$0xff] %v1980_v40  ;;  %v1805_v40 = vrot.slane %v1261_v10, 7  ;;  %v1986_v56 = vsel %vm1585_vm2, %v1227_v27, %v1858_v39  ;;  %v1992_v14 = vsel %vm1585_vm2, %v1684_v60, %v1864_v54 }
  0xd1   : > { %v11036_v47 = vld.sshfl [vmem:[#allocation1 + $0x20] sm:$0xff pattern:$0x73625140]  ;;  %2214 = vst [vmem:[#allocation1 + $0x3] ss:$4 sm:$0xff] %v1981_v44  ;;  %v1860_v44 = vperm.slane %v1800_v29, 0 }
  0xd2   : > { %2215 = vst [vmem:[#allocation1 + $0x20] ss:$4 sm:$0xff] %v1982_v45  ;;  %v1680_v45 = vrot.slane %v1227_v27, 2  ;;  %v1865_v57 = vperm.slane %v1805_v40, 0 }
  0xd3   : > { %2216 = vst [vmem:[#allocation1 + $0x21] ss:$4 sm:$0xff] %v1983_v46  ;;  %v1196_v46 = vadd.f32 %v10957_v12, %v1195_v43 }
  0xd4   : > { %2217 = vst [vmem:[#allocation1 + $0x22] ss:$4 sm:$0xff] %v1984_v50  ;;  %v1681_v50 = vrot.slane %v1227_v27, 3  ;;  %v1988_v0 = vsel %vm1585_vm2, %v1680_v45, %v1860_v44  ;;  %v1993_v16 = vsel %vm1585_vm2, %v1685_v63, %v1865_v57  ;;  %v1197_v27 = vpop.f32.mrf.mxu1  ;;  %v1314_v44 = vrot.slane %v1162_v2, 6 }
  0xd5   : > { %2218 = vst [vmem:[#allocation1 + $0x23] ss:$4 sm:$0xff] %v1985_v52  ;;  %v1863_v52 = vperm.slane %v1803_v36, 0  ;;  %v1429_v1 = vrot.slane %v1196_v46, 1  ;;  %v1430_v4 = vrot.slane %v1196_v46, 2  ;;  %v1431_v10 = vrot.slane %v1196_v46, 3 }
  0xd6   : > { %v1989_v3 = vsel %vm1585_vm2, %v1681_v50, %v1861_v48  ;;  %v1433_v17 = vrot.slane %v1196_v46, 5  ;;  %v1434_v22 = vrot.slane %v1196_v46, 6  ;;  %v11072_v40 = vadd.f32 %v10957_v12, %v1197_v27 }
  0xd7   : > { %v1991_v11 = vsel %vm1585_vm2, %v1683_v59, %v1863_v52  ;;  %v1490_v18 = vperm.slane %v1429_v1, 0  ;;  %v1492_v29 = vperm.slane %v1431_v10, 0  ;;  %v1163_v52 = vpop.f32.mrf.mxu0 }
  0xd8   : > { %v11042_v7 = vld.sshfl [vmem:[#allocation1] sm:$0xff pattern:$0x73625140]  ;;  %v1494_v36 = vperm.slane %v1433_v17, 0  ;;  %v1495_v43 = vperm.slane %v1434_v22, 0  ;;  %v1436_v59 = vrot.slane %v11072_v40, 1  ;;  %v11089_v63 = vadd.f32 %v10957_v12, %v1163_v52 }
  0xd9   : > { %2221 = vst [vmem:[#allocation1] ss:$4 sm:$0xff] %v1610_v6  ;;  %v1990_v6 = vsel %vm1585_vm2, %v1682_v55, %v1862_v49  ;;  %v1315_v49 = vrot.slane %v1162_v2, 7 }
  0xda   : > { %2222 = vst [vmem:[#allocation1 + $0x1] ss:$4 sm:$0xff] %v1611_v15  ;;  %v1432_v15 = vrot.slane %v1196_v46, 4  ;;  %v1623_v57 = vsel %vm1585_vm2, %v1313_v38, %v1494_v36  ;;  %v1624_v62 = vsel %vm1585_vm2, %v1314_v44, %v1495_v43  ;;  %v1442_v43 = vrot.slane %v11072_v40, 7 }
  0xdb   : > { %2223 = vst [vmem:[#allocation1 + $0x2] ss:$4 sm:$0xff] %v1612_v19  ;;  %v1309_v19 = vrot.slane %v1162_v2, 1  ;;  %v1497_v44 = vperm.slane %v11072_v40, 0 }
  0xdc   : > { %v11049_v25 = vld.sshfl [vmem:[#allocation1 + $0x20] sm:$0xff pattern:$0x73625140]  ;;  %2224 = vst [vmem:[#allocation1 + $0x3] ss:$4 sm:$0xff] %v1613_v23  ;;  %v1489_v23 = vperm.slane %v1196_v46, 0 }
  0xdd   : > { %2225 = vst [vmem:[#allocation1 + $0x20] ss:$4 sm:$0xff] %v1614_v24  ;;  %v1491_v24 = vperm.slane %v1430_v4, 0  ;;  %v1493_v31 = vperm.slane %v1432_v15, 0  ;;  %v1619_v39 = vsel %vm1585_vm2, %v1309_v19, %v1490_v18  ;;  %v1438_v15 = vrot.slane %v11072_v40, 3 }
  0xde   : > { %2226 = vst [vmem:[#allocation1 + $0x21] ss:$4 sm:$0xff] %v1615_v28  ;;  %v1435_v28 = vrot.slane %v1196_v46, 7  ;;  %v1618_v45 = vsel %vm1585_vm2, %v1162_v2, %v1489_v23  ;;  %v1439_v19 = vrot.slane %v11072_v40, 4 }
  0xdf   : > { %2227 = vst [vmem:[#allocation1 + $0x22] ss:$4 sm:$0xff] %v1616_v30  ;;  %v1311_v30 = vrot.slane %v1162_v2, 3  ;;  %v1620_v46 = vsel %vm1585_vm2, %v1310_v26, %v1491_v24  ;;  %v1622_v54 = vsel %vm1585_vm2, %v1312_v33, %v1493_v31  ;;  %v1437_v2 = vrot.slane %v11072_v40, 2 }
  0xe0   : > { %2228 = vst [vmem:[#allocation1 + $0x23] ss:$4 sm:$0xff] %v1617_v34  ;;  %v1264_v34 = vadd.f32 %v10957_v12, %v1263_v21  ;;  %v1496_v48 = vperm.slane %v1435_v28, 0  ;;  %v1440_v21 = vrot.slane %v11072_v40, 5  ;;  %v1441_v24 = vrot.slane %v11072_v40, 6 }
  0xe1   : > { %v1621_v50 = vsel %vm1585_vm2, %v1311_v30, %v1492_v29  ;;  %v1317_v40 = vrot.slane %v11089_v63, 2 }
  0xe2   : > { %v1806_v55 = vrot.slane %v1264_v34, 1  ;;  %v1807_v60 = vrot.slane %v1264_v34, 2  ;;  %v1625_v1 = vsel %vm1585_vm2, %v1315_v49, %v1496_v48  ;;  %v1866_v4 = vperm.slane %v1264_v34, 0 }
  0xe3   : > { %v11056_v51 = vld.sshfl [vmem:[#allocation1] sm:$0xff pattern:$0x73625140]  ;;  %v1811_v10 = vrot.slane %v1264_v34, 6  ;;  %v1498_v48 = vperm.slane %v1436_v59, 0  ;;  %v1499_v49 = vperm.slane %v1437_v2, 0 }
  0xe4   : > { %2231 = vst [vmem:[#allocation1] ss:$4 sm:$0xff] %v1986_v56  ;;  %v11081_v56 = vadd.f32 %v10957_v12, %v1229_v41  ;;  %v1868_v17 = vperm.slane %v1807_v60, 0 }
  0xe5   : > { %2232 = vst [vmem:[#allocation1 + $0x1] ss:$4 sm:$0xff] %v1987_v61  ;;  %v1872_v30 = vperm.slane %v1811_v10, 0  ;;  %v1503_v10 = vperm.slane %v1441_v24, 0  ;;  %v1231_v24 = vpop.f32.mrf.mxu2 }
  0xe6   : > { %2233 = vst [vmem:[#allocation1 + $0x2] ss:$4 sm:$0xff] %v1988_v0  ;;  %v1808_v0 = vrot.slane %v1264_v34, 3  ;;  %v1687_v18 = vrot.slane %v11081_v56, 2  ;;  %v1688_v23 = vrot.slane %v11081_v56, 3  ;;  %v1689_v27 = vrot.slane %v11081_v56, 4 }
  0xe7   : > { %v11063_v5 = vld.sshfl [vmem:[#allocation1 + $0x20] sm:$0xff pattern:$0x73625140]  ;;  %2234 = vst [vmem:[#allocation1 + $0x3] ss:$4 sm:$0xff] %v1989_v3  ;;  %v1809_v3 = vrot.slane %v1264_v34, 4  ;;  %v1994_v28 = vsel %vm1585_vm2, %v11081_v56, %v1866_v4 }
  0xe8   : > { %2235 = vst [vmem:[#allocation1 + $0x20] ss:$4 sm:$0xff] %v1990_v6  ;;  %v1810_v6 = vrot.slane %v1264_v34, 5  ;;  %v1869_v22 = vperm.slane %v1808_v0, 0  ;;  %v1690_v31 = vrot.slane %v11081_v56, 5  ;;  %v1691_v38 = vrot.slane %v11081_v56, 6 }
  0xe9   : > { %2236 = vst [vmem:[#allocation1 + $0x21] ss:$4 sm:$0xff] %v1991_v11  ;;  %v1867_v11 = vperm.slane %v1806_v55, 0  ;;  %v1870_v26 = vperm.slane %v1809_v3, 0  ;;  %v1996_v41 = vsel %vm1585_vm2, %v1687_v18, %v1868_v17  ;;  %v1501_v55 = vperm.slane %v1439_v19, 0 }
  0xea   : > { %2237 = vst [vmem:[#allocation1 + $0x22] ss:$4 sm:$0xff] %v1992_v14  ;;  %v1686_v14 = vrot.slane %v11081_v56, 1  ;;  %v1871_v29 = vperm.slane %v1810_v6, 0  ;;  %v2000_v0 = vsel %vm1585_vm2, %v1691_v38, %v1872_v30  ;;  %v1502_v6 = vperm.slane %v1440_v21, 0 }
  0xeb   : > { %2238 = vst [vmem:[#allocation1 + $0x23] ss:$4 sm:$0xff] %v1993_v16  ;;  %v1812_v16 = vrot.slane %v1264_v34, 7  ;;  %v1998_v52 = vsel %vm1585_vm2, %v1689_v27, %v1870_v26  ;;  %v1321_v19 = vrot.slane %v11089_v63, 6  ;;  %v1628_v26 = vsel %vm1585_vm2, %v1317_v40, %v1499_v49 }
  0xec   : > { %v1995_v33 = vsel %vm1585_vm2, %v1686_v14, %v1867_v11  ;;  %v1504_v11 = vperm.slane %v1442_v43, 0  ;;  %v1318_v14 = vrot.slane %v11089_v63, 3 }
  0xed   : > { %v1873_v36 = vperm.slane %v1812_v16, 0  ;;  %v1320_v16 = vrot.slane %v11089_v63, 5 }
  0xee   : > { %v11074_v42 = vld.sshfl [vmem:[#allocation1] sm:$0xff pattern:$0x73625140] }
  0xef   : > { %2241 = vst [vmem:[#allocation1] ss:$4 sm:$0xff] %v1618_v45  ;;  %v1997_v45 = vsel %vm1585_vm2, %v1688_v23, %v1869_v22  ;;  %v1322_v22 = vrot.slane %v11089_v63, 7  ;;  %v1626_v23 = vsel %vm1585_vm2, %v11089_v63, %v1497_v44 }
  0xf0   : > { %2242 = vst [vmem:[#allocation1 + $0x1] ss:$4 sm:$0xff] %v1619_v39  ;;  %v1692_v39 = vrot.slane %v11081_v56, 7  ;;  %v1316_v56 = vrot.slane %v11089_v63, 1 }
  0xf1   : > { %2243 = vst [vmem:[#allocation1 + $0x2] ss:$4 sm:$0xff] %v1620_v46 }
  0xf2   : > { %v11085_v61 = vld.sshfl [vmem:[#allocation1 + $0x20] sm:$0xff pattern:$0x73625140]  ;;  %2244 = vst [vmem:[#allocation1 + $0x3] ss:$4 sm:$0xff] %v1621_v50  ;;  %v1500_v50 = vperm.slane %v1438_v15, 0  ;;  %v2001_v59 = vsel %vm1585_vm2, %v1692_v39, %v1873_v36  ;;  %v1627_v21 = vsel %vm1585_vm2, %v1316_v56, %v1498_v48 }
  0xf3   : > { %2245 = vst [vmem:[#allocation1 + $0x20] ss:$4 sm:$0xff] %v1622_v54  ;;  %v1265_v54 = vpop.f32.mrf.mxu3  ;;  %v1319_v15 = vrot.slane %v11089_v63, 4 }
  0xf4   : > { %2246 = vst [vmem:[#allocation1 + $0x21] ss:$4 sm:$0xff] %v1623_v57  ;;  %v1999_v57 = vsel %vm1585_vm2, %v1690_v31, %v1871_v29  ;;  %v1629_v30 = vsel %vm1585_vm2, %v1318_v14, %v1500_v50 }
  0xf5   : > { %2247 = vst [vmem:[#allocation1 + $0x22] ss:$4 sm:$0xff] %v1624_v62 }
  0xf6   : > { %2248 = vst [vmem:[#allocation1 + $0x23] ss:$4 sm:$0xff] %v1625_v1  ;;  %v11118_v1 = vadd.f32 %v10957_v12, %v1265_v54 }
  0xf8   : > { %v1813_v27 = vrot.slane %v11118_v1, 1  ;;  %v1815_v31 = vrot.slane %v11118_v1, 3  ;;  %v1816_v63 = vrot.slane %v11118_v1, 4  ;;  %v1817_v38 = vrot.slane %v11118_v1, 5 }
  0xf9   : > { %v2249_v34 = vld.sshfl [vmem:[#allocation1] sm:$0xff pattern:$0x73625140]  ;;  %v1818_v43 = vrot.slane %v11118_v1, 6  ;;  %v1819_v48 = vrot.slane %v11118_v1, 7  ;;  %v1874_v49 = vperm.slane %v11118_v1, 0 }
  0xfa   : > { %2251 = vst [vmem:[#allocation1] ss:$4 sm:$0xff] %v1994_v28  ;;  %v2369_v46 = vpack.c.bf16 %v2249_v34, %v2249_v34  ;;  %v1814_v28 = vrot.slane %v11118_v1, 2  ;;  %v1630_v34 = vsel %vm1585_vm2, %v1319_v15, %v1501_v55  ;;  %v1875_v50 = vperm.slane %v1813_v27, 0  ;;  %v1200_v1 = vpop.f32.mrf.mxu1  ;;  %v11164_v15 = vld [vmem:[%s15343_s3] ss:$0 sm:$0xff] }
  0xfb   : > { %2252 = vst [vmem:[#allocation1 + $0x1] ss:$4 sm:$0xff] %v1995_v33  ;;  %v1877_v54 = vperm.slane %v1815_v31, 0  ;;  %v1878_v55 = vperm.slane %v1816_v63, 0  ;;  %v1166_v31 = vpop.f32.mrf.mxu0 }
  0xfc   : > { %2253 = vst [vmem:[#allocation1 + $0x2] ss:$4 sm:$0xff] %v1996_v41  ;;  %v2522_v60 = vshrl.u32 %v2369_v46, 16  ;;  %v2525_v4 = vshll.u32 %v2369_v46, 16  ;;  %v11138_v41 = vadd.f32 %v10957_v12, %v1231_v24 }
  0xfd   : > { %v2250_v62 = vld.sshfl [vmem:[#allocation1 + $0x20] sm:$0xff pattern:$0x73625140]  ;;  %2254 = vst [vmem:[#allocation1 + $0x3] ss:$4 sm:$0xff] %v1997_v45 }
  0xfe   : > { %2255 = vst [vmem:[#allocation1 + $0x20] ss:$4 sm:$0xff] %v1998_v52  ;;  %v2370_v2 = vpack.c.bf16 %v2250_v62, %v2250_v62  ;;  %v2524_v3 = vrot.slane %v2522_v60, 7  ;;  %v1876_v52 = vperm.slane %v1814_v28, 0  ;;  %v1632_v60 = vsel %vm1585_vm2, %v1321_v19, %v1503_v10 }
  0xff   : > { %2256 = vst [vmem:[#allocation1 + $0x21] ss:$4 sm:$0xff] %v1999_v57  ;;  %v1631_v57 = vsel %vm1585_vm2, %v1320_v16, %v1502_v6  ;;  %v1633_v62 = vsel %vm1585_vm2, %v1322_v22, %v1504_v11  ;;  %v1879_v10 = vperm.slane %v1817_v38, 0  ;;  %v1880_v11 = vperm.slane %v1818_v43, 0 }
 0x100   : > { %2257 = vst [vmem:[#allocation1 + $0x22] ss:$4 sm:$0xff] %v2000_v0  ;;  %v2530_v17 = vshrl.u32 %v2370_v2, 16  ;;  %v2527_v18 = vor.u32 %v2525_v4, %v2524_v3  ;;  %v2533_v33 = vshll.u32 %v2370_v2, 16  ;;  %v2528_v45 = vrot.slane %v2524_v3, 4 }
 0x101   : > { %2258 = vst [vmem:[#allocation1 + $0x23] ss:$4 sm:$0xff] %v2001_v59  ;;  %v1693_v0 = vrot.slane %v11138_v41, 1  ;;  %v15365_v59 = vmov 0  ;;  %v1694_v2 = vrot.slane %v11138_v41, 2  ;;  %v1695_v14 = vrot.slane %v11138_v41, 3 }
 0x102   : > { %v2532_v29 = vrot.slane %v2530_v17, 7  ;;  %2705 = vrot.lane.b32.xlu0 %v2527_v18, %s10849_s29  ;;  %v15366_v59 = vsel %vm11150_vm5, 4294967295, %v15365_v59  ;;  %v11167_v16 = vadd.f32 %v11164_v15, %v1200_v1  ;;  %v1696_v17 = vrot.slane %v11138_v41, 4 }
 0x103   : > { %15367 = vst [vmem:[#allocation4_spill] sm:$0xff] %v15366_v59  ;;  %v1697_v18 = vrot.slane %v11138_v41, 5  ;;  %v1699_v24 = vrot.slane %v11138_v41, 7  ;;  %v2003_v27 = vsel %vm1585_vm2, %v1693_v0, %v1875_v50  ;;  %v2004_v28 = vsel %vm1585_vm2, %v1694_v2, %v1876_v52 }
 0x104   : > { %v2259_v36 = vld.sshfl [vmem:[#allocation1] sm:$0xff pattern:$0x73625140]  ;;  %v2537_v39 = vrot.slane %v2532_v29, 4  ;;  %v2535_v44 = vor.u32 %v2533_v33, %v2532_v29  ;;  %v2005_v63 = vsel %vm1585_vm2, %v1695_v14, %v1877_v54  ;;  %v1443_v33 = vrot.slane %v11167_v16, 1 }
 0x105   : > { %2261 = vst [vmem:[#allocation1] ss:$4 sm:$0xff] %v1626_v23  ;;  %v2371_v46 = vpack.c.bf16 %v2259_v36, %v2259_v36  ;;  %v1881_v23 = vperm.slane %v1819_v48, 0  ;;  %v1445_v36 = vrot.slane %v11167_v16, 3  ;;  %v1447_v48 = vrot.slane %v11167_v16, 5 }
 0x106   : > { %2262 = vst [vmem:[#allocation1 + $0x1] ss:$4 sm:$0xff] %v1627_v21  ;;  %2709 = vrot.lane.b32.xlu1 %v2537_v39, %s10849_s29  ;;  %v2536_v4 = vsel %vm11150_vm5, %v2528_v45, %v2535_v44  ;;  %v1698_v21 = vrot.slane %v11138_v41, 6  ;;  %v2006_v39 = vsel %vm1585_vm2, %v1696_v17, %v1878_v55  ;;  %v1446_v44 = vrot.slane %v11167_v16, 4 }
 0x107   : > { %2263 = vst [vmem:[#allocation1 + $0x2] ss:$4 sm:$0xff] %v1628_v26  ;;  %v2539_v12 = vshrl.u32 %v2371_v46, 16  ;;  %v2542_v56 = vshll.u32 %v2371_v46, 16  ;;  %v2002_v26 = vsel %vm1585_vm2, %v11138_v41, %v1874_v49  ;;  %v2007_v41 = vsel %vm1585_vm2, %v1697_v18, %v1879_v10  ;;  %v1268_v10 = vpop.f32.mrf.mxu3 }
 0x108   : > { %v2260_v40 = vld.sshfl [vmem:[#allocation1 + $0x20] sm:$0xff pattern:$0x73625140]  ;;  %2264 = vst [vmem:[#allocation1 + $0x3] ss:$4 sm:$0xff] %v1629_v30  ;;  %v11189_v49 = vadd.f32 %v11164_v15, %v1166_v31  ;;  %v1448_v52 = vrot.slane %v11167_v16, 6  ;;  %v2009_v0 = vsel %vm1585_vm2, %v1699_v24, %v1881_v23 }
 0x109   : > { %2265 = vst [vmem:[#allocation1 + $0x20] ss:$4 sm:$0xff] %v1630_v34  ;;  %v2372_v3 = vpack.c.bf16 %v2260_v40, %v2260_v40  ;;  %v11157_v6 = vrot.slane %v2539_v12, 7  ;;  %v1444_v34 = vrot.slane %v11167_v16, 2  ;;  %v1449_v54 = vrot.slane %v11167_v16, 7 }
 0x10a   : > { %2266 = vst [vmem:[#allocation1 + $0x21] ss:$4 sm:$0xff] %v1631_v57  ;;  %2707 = vrot.lane.b32.xlu0 %v2536_v4, %s10849_s29  ;;  %v1505_v55 = vperm.slane %v11167_v16, 0  ;;  %v2008_v40 = vsel %vm1585_vm2, %v1698_v21, %v1880_v11  ;;  %v1509_v1 = vperm.slane %v1446_v44, 0  ;;  %v1323_v16 = vrot.slane %v11189_v49, 1 }
 0x10b   : > { %2267 = vst [vmem:[#allocation1 + $0x22] ss:$4 sm:$0xff] %v1632_v60  ;;  %v2547_v19 = vshrl.u32 %v2372_v3, 16  ;;  %v2544_v22 = vor.u32 %v2542_v56, %v11157_v6  ;;  %v2550_v30 = vshll.u32 %v2372_v3, 16  ;;  %v2545_v45 = vrot.slane %v11157_v6, 4 }
 0x10c   : > { %2268 = vst [vmem:[#allocation1 + $0x23] ss:$4 sm:$0xff] %v1633_v62  ;;  %v1506_v56 = vperm.slane %v1443_v33, 0  ;;  %v1507_v57 = vperm.slane %v1444_v34, 0  ;;  %v1508_v60 = vperm.slane %v1445_v36, 0  ;;  %v1510_v6 = vperm.slane %v1447_v48, 0  ;;  %v1234_v36 = vpop.f32.mrf.mxu2 }
 0x10d   : > { %v2549_v29 = vrot.slane %v2547_v19, 7  ;;  %v1324_v17 = vrot.slane %v11189_v49, 2  ;;  %v1325_v11 = vrot.slane %v11189_v49, 3  ;;  %v1327_v23 = vrot.slane %v11189_v49, 5 }
 0x10e   : > { %2711 = vrot.lane.b32.xlu1 %v2544_v22, %s10849_s29  ;;  %v1326_v22 = vrot.slane %v11189_v49, 4  ;;  %v1511_v21 = vperm.slane %v1448_v52, 0  ;;  %v1512_v24 = vperm.slane %v1449_v54, 0  ;;  %v1328_v31 = vrot.slane %v11189_v49, 6 }
 0x10f   : > { %v2269_v38 = vld.sshfl [vmem:[#allocation1] sm:$0xff pattern:$0x73625140]  ;;  %v2554_v43 = vrot.slane %v2549_v29, 4  ;;  %v2552_v50 = vor.u32 %v2550_v30, %v2549_v29  ;;  %v1634_v30 = vsel %vm1585_vm2, %v11189_v49, %v1505_v55  ;;  %v1635_v33 = vsel %vm1585_vm2, %v1323_v16, %v1506_v56 }
 0x110   : > { %2271 = vst [vmem:[#allocation1] ss:$4 sm:$0xff] %v2002_v26  ;;  %v2373_v46 = vpack.c.bf16 %v2269_v38, %v2269_v38  ;;  %v11205_v26 = vadd.f32 %v11164_v15, %v1268_v10  ;;  %v1636_v34 = vsel %vm1585_vm2, %v1324_v17, %v1507_v57  ;;  %v1639_v44 = vsel %vm1585_vm2, %v1327_v23, %v1510_v6 }
 0x111   : > { %2272 = vst [vmem:[#allocation1 + $0x1] ss:$4 sm:$0xff] %v2003_v27  ;;  %2715 = vrot.lane.b32.xlu2 %v2554_v43, %s10849_s29  ;;  %v2553_v14 = vsel %vm11150_vm5, %v2545_v45, %v2552_v50  ;;  %v1638_v43 = vsel %vm1585_vm2, %v1326_v22, %v1509_v1  ;;  %v11226_v55 = vadd.f32 %v11164_v15, %v1234_v36 }
 0x112   : > { %2273 = vst [vmem:[#allocation1 + $0x2] ss:$4 sm:$0xff] %v2004_v28  ;;  %v2556_v12 = vshrl.u32 %v2373_v46, 16  ;;  %v2559_v3 = vshll.u32 %v2373_v46, 16  ;;  %v1820_v46 = vrot.slane %v11205_v26, 1  ;;  %v1821_v48 = vrot.slane %v11205_v26, 2 }
 0x113   : > { %v2270_v62 = vld.sshfl [vmem:[#allocation1 + $0x20] sm:$0xff pattern:$0x73625140]  ;;  %2274 = vst [vmem:[#allocation1 + $0x3] ss:$4 sm:$0xff] %v2005_v63  ;;  %v1329_v63 = vrot.slane %v11189_v49, 7 }
 0x114   : > { %2275 = vst [vmem:[#allocation1 + $0x20] ss:$4 sm:$0xff] %v2006_v39  ;;  %v2558_v2 = vrot.slane %v2556_v12, 7  ;;  %v2374_v4 = vpack.c.bf16 %v2270_v62, %v2270_v62  ;;  %v1822_v49 = vrot.slane %v11205_v26, 3  ;;  %v1823_v52 = vrot.slane %v11205_v26, 4 }
 0x115   : > { %2276 = vst [vmem:[#allocation1 + $0x21] ss:$4 sm:$0xff] %v2007_v41  ;;  %v1637_v41 = vsel %vm1585_vm2, %v1325_v11, %v1508_v60  ;;  %v1824_v54 = vrot.slane %v11205_v26, 5  ;;  %v1825_v57 = vrot.slane %v11205_v26, 6  ;;  %v1826_v60 = vrot.slane %v11205_v26, 7  ;;  %v1202_v11 = vpop.f32.mrf.mxu1 }
 0x116   : > { %2277 = vst [vmem:[#allocation1 + $0x22] ss:$4 sm:$0xff] %v2008_v40  ;;  %v2561_v18 = vor.u32 %v2559_v3, %v2558_v2  ;;  %v2564_v19 = vshrl.u32 %v2374_v4, 16  ;;  %v2562_v27 = vrot.slane %v2558_v2, 4  ;;  %v2567_v29 = vshll.u32 %v2374_v4, 16 }
 0x117   : > { %2278 = vst [vmem:[#allocation1 + $0x23] ss:$4 sm:$0xff] %v2009_v0  ;;  %v1640_v40 = vsel %vm1585_vm2, %v1328_v31, %v1511_v21  ;;  %v1641_v0 = vsel %vm1585_vm2, %v1329_v63, %v1512_v24  ;;  %v1882_v1 = vperm.slane %v11205_v26, 0  ;;  %v1883_v6 = vperm.slane %v1820_v46, 0  ;;  %v1168_v21 = vpop.f32.mrf.mxu0 }
 0x118   : > { %2717 = vrot.lane.b32.xlu0 %v2561_v18, %s10849_s29  ;;  %v2566_v28 = vrot.slane %v2564_v19, 7  ;;  %v1884_v10 = vperm.slane %v1821_v48, 0  ;;  %v1886_v16 = vperm.slane %v1823_v52, 0  ;;  %v1700_v17 = vrot.slane %v11226_v55, 1 }
 0x119   : > { %2713 = vrot.lane.b32.xlu2 %v2553_v14, %s10849_s29  ;;  %v1885_v14 = vperm.slane %v1822_v49, 0  ;;  %v1701_v23 = vrot.slane %v11226_v55, 2  ;;  %v1887_v24 = vperm.slane %v1824_v54, 0  ;;  %v1702_v26 = vrot.slane %v11226_v55, 3 }
 0x11a   : > { %v2569_v38 = vor.u32 %v2567_v29, %v2566_v28  ;;  %v2279_v39 = vld.sshfl [vmem:[#allocation1] sm:$0xff pattern:$0x73625140]  ;;  %v2571_v2 = vrot.slane %v2566_v28, 4  ;;  %v1704_v28 = vrot.slane %v11226_v55, 5  ;;  %v2010_v31 = vsel %vm1585_vm2, %v11226_v55, %v1882_v1 }
 0x11b   : > { %v2375_v45 = vpack.c.bf16 %v2279_v39, %v2279_v39  ;;  %2281 = vst [vmem:[#allocation1] ss:$4 sm:$0xff] %v1634_v30  ;;  %v11244_v63 = vadd.f32 %v11164_v15, %v1202_v11  ;;  %v2011_v36 = vsel %vm1585_vm2, %v1700_v17, %v1883_v6  ;;  %v2013_v48 = vsel %vm1585_vm2, %v1702_v26, %v1885_v14 }
 0x11c   : > { %v2570_v50 = vsel %vm11150_vm5, %v2562_v27, %v2569_v38  ;;  %2282 = vst [vmem:[#allocation1 + $0x1] ss:$4 sm:$0xff] %v1635_v33  ;;  %v1703_v27 = vrot.slane %v11226_v55, 4  ;;  %v1888_v33 = vperm.slane %v1825_v57, 0  ;;  %v11248_v38 = vadd.f32 %v11164_v15, %v1168_v21 }
 0x11d   : > { %2719 = vrot.lane.b32.xlu1 %v2570_v50, %s10849_s29  ;;  %v2573_v12 = vshrl.u32 %v2375_v45, 16  ;;  %v2576_v56 = vshll.u32 %v2375_v45, 16  ;;  %2283 = vst [vmem:[#allocation1 + $0x2] ss:$4 sm:$0xff] %v1636_v34  ;;  %v1889_v34 = vperm.slane %v1826_v60, 0  ;;  %v2012_v45 = vsel %vm1585_vm2, %v1701_v23, %v1884_v10 }
 0x11e   : > { %v2280_v62 = vld.sshfl [vmem:[#allocation1 + $0x20] sm:$0xff pattern:$0x73625140]  ;;  %2284 = vst [vmem:[#allocation1 + $0x3] ss:$4 sm:$0xff] %v1637_v41  ;;  %v2014_v49 = vsel %vm1585_vm2, %v1703_v27, %v1886_v16  ;;  %v2015_v50 = vsel %vm1585_vm2, %v1704_v28, %v1887_v24  ;;  %v1452_v57 = vrot.slane %v11244_v63, 3 }
 0x11f   : > { %v2575_v3 = vrot.slane %v2573_v12, 7  ;;  %v2376_v4 = vpack.c.bf16 %v2280_v62, %v2280_v62  ;;  %2285 = vst [vmem:[#allocation1 + $0x20] ss:$4 sm:$0xff] %v1638_v43  ;;  %v1705_v43 = vrot.slane %v11226_v55, 6  ;;  %v1450_v12 = vrot.slane %v11244_v63, 1 }
 0x120   : > { %2286 = vst [vmem:[#allocation1 + $0x21] ss:$4 sm:$0xff] %v1639_v44  ;;  %v1706_v44 = vrot.slane %v11226_v55, 7  ;;  %v1453_v60 = vrot.slane %v11244_v63, 4  ;;  %v1454_v62 = vrot.slane %v11244_v63, 5  ;;  %v1513_v1 = vperm.slane %v11244_v63, 0 }
 0x121   : > { %2721 = vrot.lane.b32.xlu2 %v2571_v2, %s10849_s29  ;;  %v2578_v18 = vor.u32 %v2576_v56, %v2575_v3  ;;  %v2581_v19 = vshrl.u32 %v2376_v4, 16  ;;  %v2584_v22 = vshll.u32 %v2376_v4, 16  ;;  %2287 = vst [vmem:[#allocation1 + $0x22] ss:$4 sm:$0xff] %v1640_v40  ;;  %v2579_v29 = vrot.slane %v2575_v3, 4 }
 0x122   : > { %2288 = vst [vmem:[#allocation1 + $0x23] ss:$4 sm:$0xff] %v1641_v0  ;;  %v1451_v56 = vrot.slane %v11244_v63, 2  ;;  %v2016_v0 = vsel %vm1585_vm2, %v1705_v43, %v1888_v33  ;;  %v2017_v4 = vsel %vm1585_vm2, %v1706_v44, %v1889_v34  ;;  %v1455_v6 = vrot.slane %v11244_v63, 6 }
 0x123   : > { %2723 = vrot.lane.b32.xlu0 %v2578_v18, %s10849_s29  ;;  %v2583_v30 = vrot.slane %v2581_v19, 7  ;;  %v1456_v10 = vrot.slane %v11244_v63, 7  ;;  %v1514_v14 = vperm.slane %v1450_v12, 0  ;;  %v1330_v17 = vrot.slane %v11248_v38, 1 }
 0x124   : > { %v1515_v16 = vperm.slane %v1451_v56, 0  ;;  %v1516_v19 = vperm.slane %v1452_v57, 0  ;;  %v1517_v23 = vperm.slane %v1453_v60, 0  ;;  %v1518_v21 = vperm.slane %v1454_v62, 0 }
 0x125   : > { %v2586_v39 = vor.u32 %v2584_v22, %v2583_v30  ;;  %v2289_v41 = vld.sshfl [vmem:[#allocation1] sm:$0xff pattern:$0x73625140]  ;;  %v2588_v54 = vrot.slane %v2583_v30, 4  ;;  %v1331_v22 = vrot.slane %v11248_v38, 2  ;;  %v1332_v24 = vrot.slane %v11248_v38, 3 }
 0x126   : > { %v2377_v46 = vpack.c.bf16 %v2289_v41, %v2289_v41  ;;  %2291 = vst [vmem:[#allocation1] ss:$4 sm:$0xff] %v2010_v31  ;;  %v1642_v26 = vsel %vm1585_vm2, %v11248_v38, %v1513_v1  ;;  %v1519_v31 = vperm.slane %v1455_v6, 0  ;;  %v1334_v63 = vrot.slane %v11248_v38, 5 }
 0x127   : > { %v2587_v52 = vsel %vm11150_vm5, %v2579_v29, %v2586_v39  ;;  %2292 = vst [vmem:[#allocation1 + $0x1] ss:$4 sm:$0xff] %v2011_v36  ;;  %v1333_v29 = vrot.slane %v11248_v38, 4  ;;  %v1335_v33 = vrot.slane %v11248_v38, 6  ;;  %v1643_v34 = vsel %vm1585_vm2, %v1330_v17, %v1514_v14 }
 0x128   : > { %2725 = vrot.lane.b32.xlu1 %v2587_v52, %s10849_s29  ;;  %v2590_v55 = vshrl.u32 %v2377_v46, 16  ;;  %2293 = vst [vmem:[#allocation1 + $0x2] ss:$4 sm:$0xff] %v2012_v45  ;;  %v2593_v30 = vshll.u32 %v2377_v46, 16  ;;  %v1644_v41 = vsel %vm1585_vm2, %v1331_v22, %v1515_v16  ;;  %v1520_v45 = vperm.slane %v1456_v10, 0 }
 0x129   : > { %2727 = vrot.lane.b32.xlu2 %v2588_v54, %s10849_s29  ;;  %v2290_v40 = vld.sshfl [vmem:[#allocation1 + $0x20] sm:$0xff pattern:$0x73625140]  ;;  %2294 = vst [vmem:[#allocation1 + $0x3] ss:$4 sm:$0xff] %v2013_v48  ;;  %v1336_v46 = vrot.slane %v11248_v38, 7  ;;  %v1645_v48 = vsel %vm1585_vm2, %v1332_v24, %v1516_v19  ;;  %v1646_v54 = vsel %vm1585_vm2, %v1333_v29, %v1517_v23  ;;  %v1647_v38 = vsel %vm1585_vm2, %v1334_v63, %v1518_v21 }
 0x12a   : > { %v2378_v2 = vpack.c.bf16 %v2290_v40, %v2290_v40  ;;  %v2592_v3 = vrot.slane %v2590_v55, 7  ;;  %2295 = vst [vmem:[#allocation1 + $0x20] ss:$4 sm:$0xff] %v2014_v49  ;;  %v479_v55 = vld [vmem:[#allocation2 + $0x80] sm:$0x1]  ;;  %v1648_v57 = vsel %vm1585_vm2, %v1335_v33, %v1519_v31  ;;  %v15368_v1 = vmov 0 }
 0x12b   : > { %2296 = vst [vmem:[#allocation1 + $0x21] ss:$4 sm:$0xff] %v2015_v50  ;;  %v11289_v50 = vld [vmem:[%s11283_s17 + $0x4c] sm:$0xf]  ;;  %v1649_v62 = vsel %vm1585_vm2, %v1336_v46, %v1520_v45  ;;  %v15369_v1 = vsel %vm11306_vm8, 4294967295, %v15368_v1  ;;  %v15371_v21 = vmov 0 }
 0x12c   : > { %v2598_v11 = vshrl.u32 %v2378_v2, 16  ;;  %v2601_v18 = vshll.u32 %v2378_v2, 16  ;;  %2297 = vst [vmem:[#allocation1 + $0x22] ss:$4 sm:$0xff] %v2016_v0  ;;  %v2596_v27 = vrot.slane %v2592_v3, 4  ;;  %v2595_v43 = vor.u32 %v2593_v30, %v2592_v3 }
 0x12d   : > { %2298 = vst [vmem:[#allocation1 + $0x23] ss:$4 sm:$0xff] %v2017_v4  ;;  %v819_v2 = vshrl.u32 %v11289_v50, 16  ;;  %v480_v3 = vsel %vm11306_vm8, 0, %v479_v55  ;;  %v15372_v21 = vsel %vm11325_vm10, 4294967295, %v15371_v21 }
 0x12e   : > { %v2600_v28 = vrot.slane %v2598_v11, 7  ;;  %15370 = vst [vmem:[#allocation5_spill] sm:$0xff] %v15369_v1 }
 0x12f   : > { %481 = vst [vmem:[#allocation2 + $0x80] sm:$0x1] %v480_v3  ;;  %v11317_v14 = vrot.slane %v819_v2, 7 }
 0x130   : > { %v2603_v36 = vor.u32 %v2601_v18, %v2600_v28  ;;  %v2605_v39 = vrot.slane %v2600_v28, 4  ;;  %v2299_v44 = vld.sshfl [vmem:[#allocation1] sm:$0xff pattern:$0x73625140]  ;;  %15373 = vst [vmem:[#allocation6_spill] sm:$0xff] %v15372_v21 }
 0x131   : > { %v2379_v49 = vpack.c.bf16 %v2299_v44, %v2299_v44  ;;  %2301 = vst [vmem:[#allocation1] ss:$4 sm:$0xff] %v1642_v26  ;;  %2729 = vrot.lane.b32.xlu2 %v2595_v43, %s10849_s29  ;;  %v826_v18 = vrot.slane %v11317_v14, 4 }
 0x132   : > { %v2604_v52 = vsel %vm11150_vm5, %v2596_v27, %v2603_v36  ;;  %2733 = vrot.lane.b32.xlu1 %v2605_v39, %s10849_s29  ;;  %2302 = vst [vmem:[#allocation1 + $0x1] ss:$4 sm:$0xff] %v1643_v34  ;;  %v1270_v39 = vpop.f32.mrf.mxu3 }
 0x133   : > { %2731 = vrot.lane.b32.xlu0 %v2604_v52, %s10849_s29  ;;  %v2607_v12 = vshrl.u32 %v2379_v49, 16  ;;  %v2610_v56 = vshll.u32 %v2379_v49, 16  ;;  %2303 = vst [vmem:[#allocation1 + $0x2] ss:$4 sm:$0xff] %v1644_v41  ;;  %v1236_v41 = vpop.f32.mrf.mxu2  ;;  %v1271_v43 = vadd.f32 %v11164_v15, %v1270_v39  ;;  %v11341_v52 = vld [vmem:[%s11283_s17 + $0x48] sm:$0xf] }
 0x134   : > { %v2300_v60 = vld.sshfl [vmem:[#allocation1 + $0x20] sm:$0xff pattern:$0x73625140]  ;;  %2304 = vst [vmem:[#allocation1 + $0x3] ss:$4 sm:$0xff] %v1645_v48  ;;  %v1237_v44 = vadd.f32 %v11164_v15, %v1236_v41  ;;  %v811_v15 = vshrl.u32 %v11341_v52, 16 }
 0x135   : > { %v11300_v40 = vpack.c.bf16 %v2300_v60, %v2300_v60  ;;  %2305 = vst [vmem:[#allocation1 + $0x20] ss:$4 sm:$0xff] %v1646_v54  ;;  %v11302_v0 = vrot.slane %v2607_v12, 7  ;;  %v1827_v45 = vrot.slane %v1271_v43, 1  ;;  %v1828_v46 = vrot.slane %v1271_v43, 2 }
 0x136   : > { %2306 = vst [vmem:[#allocation1 + $0x21] ss:$4 sm:$0xff] %v1647_v38  ;;  %v1047_v27 = vld [vmem:[#allocation2 + $0x80] sm:$0x1]  ;;  %v1829_v48 = vrot.slane %v1271_v43, 3  ;;  %v1830_v49 = vrot.slane %v1271_v43, 4 }
 0x137   : > { %v2615_v4 = vshrl.u32 %v11300_v40, 16  ;;  %2307 = vst [vmem:[#allocation1 + $0x22] ss:$4 sm:$0xff] %v1648_v57  ;;  %v2612_v6 = vor.u32 %v2610_v56, %v11302_v0  ;;  %v1048_v28 = vsel %vm11325_vm10, %v826_v18, %v1047_v27  ;;  %v1831_v54 = vrot.slane %v1271_v43, 5 }
 0x138   : > { %2308 = vst [vmem:[#allocation1 + $0x23] ss:$4 sm:$0xff] %v1649_v62  ;;  %v1832_v38 = vrot.slane %v1271_v43, 6  ;;  %v1890_v12 = vperm.slane %v1271_v43, 0  ;;  %v822_v56 = vshll.u32 %v11289_v50, 16  ;;  %v1833_v55 = vrot.slane %v1271_v43, 7 }
 0x139   : > { %v11315_v10 = vrot.slane %v2615_v4, 7  ;;  %1049 = vst [vmem:[#allocation2 + $0x80] sm:$0x1] %v1048_v28  ;;  %v1891_v57 = vperm.slane %v1827_v45, 0  ;;  %v1892_v60 = vperm.slane %v1828_v46, 0  ;;  %v1893_v62 = vperm.slane %v1829_v48, 0 }
 0x13a   : > { %2735 = vrot.lane.b32.xlu1 %v2612_v6, %s10849_s29  ;;  %v1894_v2 = vperm.slane %v1830_v49, 0  ;;  %v1895_v3 = vperm.slane %v1831_v54, 0  ;;  %v1707_v4 = vrot.slane %v1237_v44, 1  ;;  %v1708_v6 = vrot.slane %v1237_v44, 2  ;;  %v420_v43 = vld [vmem:[#allocation2 + $0x6c] sm:$0x1] }
 0x13b   : > { %v2622_v16 = vrot.slane %v11315_v10, 4  ;;  %v2309_v17 = vld.sshfl [vmem:[#allocation1] sm:$0xff pattern:$0x73625140]  ;;  %v1896_v18 = vperm.slane %v1832_v38, 0  ;;  %v2613_v39 = vrot.slane %v11302_v0, 4 }
 0x13c   : > { %v2381_v11 = vpack.c.bf16 %v2309_v17, %v2309_v17  ;;  %v1710_v17 = vrot.slane %v1237_v44, 4  ;;  %v2019_v50 = vsel %vm1585_vm2, %v1707_v4, %v1891_v57  ;;  %v2020_v27 = vsel %vm1585_vm2, %v1708_v6, %v1892_v60  ;;  %v482_v49 = vld [vmem:[#allocation2 + $0x8c] sm:$0x1]  ;;  %v11383_v60 = vld [vmem:[%s11283_s17 + $0x5c] sm:$0xf] }
 0x13d   : > { %2739 = vrot.lane.b32.xlu0 %v2622_v16, %s10849_s29  ;;  %v1709_v16 = vrot.slane %v1237_v44, 3  ;;  %2312 = vst [vmem:[#allocation1 + $0x1] ss:$4 sm:$0xff] %v2019_v50  ;;  %v2618_v41 = vshll.u32 %v11300_v40, 16  ;;  %v11372_v54 = vld [vmem:[%s11283_s17 + $0x54] sm:$0xf] }
 0x13e   : > { %v2624_v19 = vshrl.u32 %v2381_v11, 16  ;;  %v2627_v22 = vshll.u32 %v2381_v11, 16  ;;  %v1711_v11 = vrot.slane %v1237_v44, 5  ;;  %2313 = vst [vmem:[#allocation1 + $0x2] ss:$4 sm:$0xff] %v2020_v27 }
 0x13f   : > { %v2310_v23 = vld.sshfl [vmem:[#allocation1 + $0x20] sm:$0xff pattern:$0x73625140]  ;;  %v2021_v28 = vsel %vm1585_vm2, %v1709_v16, %v1893_v62  ;;  %v2620_v40 = vor.u32 %v2618_v41, %v11315_v10  ;;  %v421_v10 = vsel %vm11364_vm11, 0, %v420_v43 }
 0x140   : > { %v2626_v24 = vrot.slane %v2624_v19, 7  ;;  %v2382_v26 = vpack.c.bf16 %v2310_v23, %v2310_v23  ;;  %v1712_v19 = vrot.slane %v1237_v44, 6  ;;  %v640_v23 = vld [vmem:[%s11283_s17 + $0x44] sm:$0xf]  ;;  %2314 = vst [vmem:[#allocation1 + $0x3] ss:$4 sm:$0xff] %v2021_v28 }
 0x141   : > { %v802_v46 = vshrl.u32 %v640_v23, 16  ;;  %v805_v4 = vshll.u32 %v640_v23, 16  ;;  %v423_v6 = vld [vmem:[#allocation2 + $0x78] sm:$0x1]  ;;  %422 = vst [vmem:[#allocation2 + $0x6c] sm:$0x1] %v421_v10 }
 0x142   : > { %v2629_v29 = vor.u32 %v2627_v22, %v2626_v24  ;;  %v2632_v30 = vshrl.u32 %v2382_v26, 16  ;;  %v2635_v31 = vshll.u32 %v2382_v26, 16  ;;  %v2630_v63 = vrot.slane %v2626_v24, 4  ;;  %v2873_v10 = vld [vmem:[#allocation2 + $0x80] sm:$0x1] }
 0x143   : > { %v2018_v22 = vsel %vm1585_vm2, %v1237_v44, %v1890_v12  ;;  %v1897_v24 = vperm.slane %v1833_v55, 0  ;;  %v1713_v26 = vrot.slane %v1237_v44, 7  ;;  %v2024_v44 = vsel %vm1585_vm2, %v1712_v19, %v1896_v18 }
 0x144   : > { %v11331_v33 = vrot.slane %v2632_v30, 7  ;;  %2311 = vst [vmem:[#allocation1] ss:$4 sm:$0xff] %v2018_v22  ;;  %v2022_v30 = vsel %vm1585_vm2, %v1710_v17, %v1894_v2  ;;  %v2621_v55 = vsel %vm11150_vm5, %v2613_v39, %v2620_v40  ;;  %v804_v62 = vrot.slane %v802_v46, 7 }
 0x145   : > { %2741 = vrot.lane.b32.xlu0 %v2629_v29, %s10849_s29  ;;  %v11351_v29 = vld [vmem:[%s11283_s17 + $0x40] sm:$0xf]  ;;  %v2025_v0 = vsel %vm1585_vm2, %v1713_v26, %v1897_v24  ;;  %2315 = vst [vmem:[#allocation1 + $0x20] ss:$4 sm:$0xff] %v2022_v30  ;;  %2737 = vrot.lane.b32.xlu2 %v2621_v55, %s10849_s29  ;;  %v836_v2 = vshrl.u32 %v11372_v54, 16  ;;  %v853_v17 = vshrl.u32 %v11383_v60, 16 }
 0x146   : > { %v2637_v34 = vor.u32 %v2635_v31, %v11331_v33  ;;  %v11354_v31 = vrot.slane %v811_v15, 7  ;;  %v794_v48 = vshrl.u32 %v11351_v29, 16  ;;  %2317 = vst [vmem:[#allocation1 + $0x22] ss:$4 sm:$0xff] %v2024_v44  ;;  %v483_v15 = vsel %vm11306_vm8, 0, %v482_v49 }
 0x147   : > { %2318 = vst [vmem:[#allocation1 + $0x23] ss:$4 sm:$0xff] %v2025_v0  ;;  %v807_v16 = vor.u32 %v805_v4, %v804_v62  ;;  %v797_v18 = vshll.u32 %v11351_v29, 16  ;;  %v838_v22 = vrot.slane %v836_v2, 7  ;;  %v2639_v50 = vrot.slane %v11331_v33, 4 }
 0x148   : > { %v2638_v36 = vsel %vm11150_vm5, %v2630_v63, %v2637_v34  ;;  %v824_v63 = vor.u32 %v822_v56, %v11317_v14  ;;  %v476_v34 = vld [vmem:[#allocation2 + $0x74] sm:$0x1]  ;;  %v817_v45 = vrot.slane %v11354_v31, 4  ;;  %v15374_v14 = vmov 0  ;;  %v485_v56 = vld [vmem:[#allocation2 + $0x98] sm:$0x1] }
 0x149   : > { %2743 = vrot.lane.b32.xlu1 %v2638_v36, %s10849_s29  ;;  %v2023_v36 = vsel %vm1585_vm2, %v1711_v11, %v1895_v3  ;;  %v15375_v14 = vsel %vm11364_vm11, 4294967295, %v15374_v14  ;;  %v796_v12 = vrot.slane %v794_v48, 7  ;;  %v477_v57 = vsel %vm11306_vm8, 0, %v476_v34  ;;  %v426_v11 = vld [vmem:[#allocation2 + $0x84] sm:$0x1] }
 0x14a   : > { %15376 = vst [vmem:[#allocation7_spill] sm:$0xff] %v15375_v14  ;;  %v825_v38 = vsel %vm11150_vm5, %v817_v45, %v824_v63  ;;  %v486_v19 = vsel %vm11306_vm8, 0, %v485_v56  ;;  %v424_v24 = vsel %vm11364_vm11, 0, %v423_v6  ;;  %v427_v27 = vsel %vm11364_vm11, 0, %v426_v11  ;;  %v643_v63 = vld [vmem:[%s11283_s17 + $0x50] sm:$0xf] }
 0x14b   : > { %2316 = vst [vmem:[#allocation1 + $0x21] ss:$4 sm:$0xff] %v2023_v36  ;;  %v800_v3 = vrot.slane %v796_v12, 4  ;;  %v2319_v26 = vld.sshfl [vmem:[#allocation1] sm:$0xff pattern:$0x73625140]  ;;  %v799_v34 = vor.u32 %v797_v18, %v796_v12 }
 0x14c   : > { %1046 = vst.msk [vmem:[#allocation2 + $0x7c] sm:$0xf] %vm503_vm12, %v825_v38  ;;  %v809_v28 = vrot.slane %v804_v62, 4  ;;  %v11402_v29 = vrot.slane %v853_v17, 7  ;;  %v2383_v30 = vpack.c.bf16 %v2319_v26, %v2319_v26  ;;  %v814_v33 = vshll.u32 %v11341_v52, 16 }
 0x14d   : > { %478 = vst [vmem:[#allocation2 + $0x74] sm:$0x1] %v477_v57  ;;  %v808_v23 = vsel %vm11150_vm5, %v800_v3, %v807_v16  ;;  %v828_v36 = vshrl.u32 %v643_v63, 16  ;;  %v15377_v39 = vmov 0  ;;  %v843_v41 = vrot.slane %v838_v22, 4  ;;  %2745 = vrot.lane.b32.xlu2 %v2639_v50, %s10849_s29 }
 0x14e   : > { %484 = vst [vmem:[#allocation2 + $0x8c] sm:$0x1] %v483_v15  ;;  %v15378_v39 = vsel %vm11408_vm13, 4294967295, %v15377_v39  ;;  %v2641_v43 = vshrl.u32 %v2383_v30, 16  ;;  %v2644_v44 = vshll.u32 %v2383_v30, 16  ;;  %v831_v45 = vshll.u32 %v643_v63, 16 }
 0x14f   : > { %1039 = vst.msk [vmem:[#allocation2 + $0x70] sm:$0xf] %vm503_vm12, %v808_v23  ;;  %v830_v48 = vrot.slane %v828_v36, 7  ;;  %v1036_v0 = vld [vmem:[#allocation2 + $0x6c] sm:$0xf]  ;;  %v860_v40 = vrot.slane %v11402_v29, 4  ;;  %v816_v12 = vor.u32 %v814_v33, %v11354_v31 }
 0x150   : > { %487 = vst [vmem:[#allocation2 + $0x98] sm:$0x1] %v486_v19  ;;  %v11416_v49 = vrot.slane %v2641_v43, 7  ;;  %v429_v38 = vld [vmem:[#allocation2 + $0x90] sm:$0x1]  ;;  %v1037_v56 = vsel %vm11408_vm13, %v799_v34, %v1036_v0  ;;  %vm2801_vm2 = vcmask 60448   ;;  %v11460_v0 = vpack.c.bf16 %v10985_v37, %v10985_v37 }
 0x151   : > { %425 = vst [vmem:[#allocation2 + $0x78] sm:$0x1] %v424_v24  ;;  %v430_v57 = vsel %vm11364_vm11, 0, %v429_v38  ;;  %v833_v3 = vor.u32 %v831_v45, %v830_v48  ;;  %v645_v15 = vld [vmem:[%s11283_s17 + $0x58] sm:$0xf]  ;;  %v834_v23 = vrot.slane %v830_v48, 4  ;;  %vm11447_vm3 = vmand %vm2801_vm2, %vm15351_vm7 }
 0x152   : > { %15379 = vst [vmem:[#allocation8_spill] sm:$0xff] %v15378_v39  ;;  %v2646_v2 = vor.u32 %v2644_v44, %v11416_v49  ;;  %v845_v11 = vshrl.u32 %v645_v15, 16  ;;  %v839_v24 = vshll.u32 %v11372_v54, 16  ;;  %v856_v45 = vshll.u32 %v11383_v60, 16  ;;  %vm11507_vm7 = vmor %vm3417_vm4, %vm3418_vm14  ;;  %v638_v14 = vld [vmem:[%s11283_s17 + $0x3c] sm:$0xf] }
 0x153   : > { %428 = vst [vmem:[#allocation2 + $0x84] sm:$0x1] %v427_v27  ;;  %v11469_v60 = vpack.c.bf16 %v10992_v53, %v10992_v53  ;;  %vm11523_vm4 = vmor %vm2966_vm9, %vm2967_vm6  ;;  %vm3804_vm6 = vcmask 130048   ;;  %vm4765_vm9 = vcmask 195584   ;;  %vm381_vm14 = vcmask 60416  }
 0x154   : > { %v1040_v46 = vld [vmem:[#allocation2 + $0x74] sm:$0x1]  ;;  %1038 = vst [vmem:[#allocation2 + $0x6c] sm:$0xf] %v1037_v56  ;;  %v847_v27 = vrot.slane %v845_v11, 7  ;;  %v841_v30 = vor.u32 %v839_v24, %v838_v22 }
 0x155   : > { %v1041_v52 = vsel %vm11325_vm10, %v809_v28, %v1040_v46  ;;  %v1054_v55 = vld [vmem:[#allocation2 + $0x8c] sm:$0x1]  ;;  %431 = vst [vmem:[#allocation2 + $0x90] sm:$0x1] %v430_v57  ;;  %2747 = vrot.lane.b32.xlu2 %v2646_v2, %s10849_s29  ;;  %v848_v28 = vshll.u32 %v645_v15, 16  ;;  %v2411_v53 = vshrl.u32 %v11469_v60, 16 }
 0x156   : > { %1042 = vst [vmem:[#allocation2 + $0x74] sm:$0x1] %v1041_v52  ;;  %v1055_v62 = vsel %vm11325_vm10, %v843_v41, %v1054_v55  ;;  %v842_v33 = vsel %vm11150_vm5, %v834_v23, %v841_v30  ;;  %v851_v48 = vrot.slane %v847_v27, 4  ;;  %v858_v52 = vor.u32 %v856_v45, %v11402_v29 }
 0x157   : > { %1056 = vst [vmem:[#allocation2 + $0x8c] sm:$0x1] %v1055_v62  ;;  %v1061_v4 = vld [vmem:[#allocation2 + $0x98] sm:$0x1]  ;;  %v850_v63 = vor.u32 %v848_v28, %v847_v27  ;;  %v2403_v29 = vshrl.u32 %v11460_v0, 16  ;;  %v2414_v27 = vshll.u32 %v11469_v60, 16 }
 0x158   : > { %v1062_v16 = vsel %vm11325_vm10, %v860_v40, %v1061_v4  ;;  %v1043_v17 = vld [vmem:[#allocation2 + $0x78] sm:$0xf]  ;;  %1053 = vst.msk [vmem:[#allocation2 + $0x88] sm:$0xf] %vm503_vm12, %v842_v33  ;;  %v859_v56 = vsel %vm11150_vm5, %v851_v48, %v858_v52  ;;  %v11490_v30 = vrot.slane %v2411_v53, 7 }
 0x159   : > { %1063 = vst [vmem:[#allocation2 + $0x98] sm:$0x1] %v1062_v16  ;;  %v1044_v19 = vsel %vm11408_vm13, %v816_v12, %v1043_v17  ;;  %v11477_v15 = vrot.slane %v2403_v29, 7  ;;  %v2320_v17 = vld.sshfl [vmem:[#allocation1 + $0x20] sm:$0xff pattern:$0x73625140] }
 0x15a   : > { %v1050_v50 = vld [vmem:[#allocation2 + $0x84] sm:$0xf]  ;;  %1045 = vst [vmem:[#allocation2 + $0x78] sm:$0xf] %v1044_v19  ;;  %v11498_v45 = vpack.c.bf16 %v2320_v17, %v2320_v17 }
 0x15b   : > { %v1051_v26 = vsel %vm11408_vm13, %v833_v3, %v1050_v50  ;;  %v2862_v34 = vld [vmem:[#allocation2 + $0x6c] sm:$0xf]  ;;  %1060 = vst.msk [vmem:[#allocation2 + $0x94] sm:$0xf] %vm503_vm12, %v859_v56 }
 0x15c   : > { %1052 = vst [vmem:[#allocation2 + $0x84] sm:$0xf] %v1051_v26  ;;  %v1057_v36 = vld [vmem:[#allocation2 + $0x90] sm:$0xf] }
 0x15d   : > { %v1058_v22 = vsel %vm11408_vm13, %v850_v63, %v1057_v36  ;;  %v2866_v46 = vld [vmem:[#allocation2 + $0x74] sm:$0x1]  ;;  %v2406_v63 = vshll.u32 %v11460_v0, 16 }
 0x15e   : > { %1059 = vst [vmem:[#allocation2 + $0x90] sm:$0xf] %v1058_v22  ;;  %v2880_v12 = vld [vmem:[#allocation2 + $0x8c] sm:$0x1] }
 0x160   : > { %v2887_v11 = vld [vmem:[#allocation2 + $0x98] sm:$0x1] }
 0x16b   : > { %v2716_v6 = vpop.permute.xlu2 %2715 }
 0x16c   : > { %v2874_v18 = vsel %vm11428_vm15, %v2716_v6, %v2873_v10  ;;  %v2869_v10 = vld [vmem:[#allocation2 + $0x78] sm:$0xf]  ;;  %v11482_v6 = vpack.c.bf16 %v10973_v8, %v10973_v8  ;;  %v2409_v8 = vrot.slane %v11477_v15, 4 }
 0x16d   : > { %2875 = vst [vmem:[#allocation2 + $0x80] sm:$0x1] %v2874_v18 }
 0x16e   : > { %v2386_v33 = vshrl.u32 %v11482_v6, 16  ;;  %v2389_v17 = vshll.u32 %v11482_v6, 16 }
 0x173   : > { %v2714_v41 = vpop.permute.xlu2 %2713 }
 0x174   : > { %2872 = vst.msk [vmem:[#allocation2 + $0x7c] sm:$0xf] %vm2801_vm2, %v2714_v41  ;;  %v2706_v43 = vpop.permute.xlu0 %2705 }
 0x175   : > { %v2863_v44 = vsel %vm11447_vm3, %v2706_v43, %v2862_v34 }
 0x176   : > { %2864 = vst [vmem:[#allocation2 + $0x6c] sm:$0xf] %v2863_v44 }
 0x178   : > { %v2710_v40 = vpop.permute.xlu1 %2709 }
 0x179   : > { %v2867_v38 = vsel %vm11428_vm15, %v2710_v40, %v2866_v46  ;;  %v11502_v46 = vpack.c.bf16 %v10980_v20, %v10980_v20 }
 0x17a   : > { %2868 = vst [vmem:[#allocation2 + $0x74] sm:$0x1] %v2867_v38 }
 0x17b   : > { %v2722_v55 = vpop.permute.xlu2 %2721  ;;  %v11475_v4 = vld [vmem:[#allocation2 + $0x7c] sm:$0xf] }
 0x17c   : > { %v2881_v37 = vsel %vm11428_vm15, %v2722_v55, %v2880_v12  ;;  %v2708_v57 = vpop.permute.xlu0 %2707  ;;  %v4114_v50 = vshll.u32 %v11475_v4, 16  ;;  %v4118_v23 = vshrl.u32 %v11475_v4, 16  ;;  %v11504_v12 = vld [vmem:[#allocation2 + $0x80] sm:$0x1] }
 0x17d   : > { %2882 = vst [vmem:[#allocation2 + $0x8c] sm:$0x1] %v2881_v37  ;;  %v3856_v62 = vld [vmem:[#allocation2 + $0x6c] sm:$0xf]  ;;  %v2876_v37 = vld [vmem:[#allocation2 + $0x84] sm:$0xf] }
 0x17e   : > { %2865 = vst.msk [vmem:[#allocation2 + $0x70] sm:$0xf] %vm2801_vm2, %v2708_v57  ;;  %v4081_v2 = vshrl.u32 %v3856_v62, 16  ;;  %v4084_v3 = vshll.u32 %v3856_v62, 16  ;;  %v4280_v19 = vld [vmem:[#allocation2 + $0x6c] sm:$0xe] }
 0x17f   : > { %v10178_v41 = vrot.slane %v4280_v19, 9  ;;  %v11496_v43 = vrot.slane %v4114_v50, 5  ;;  %v4120_v44 = vrot.slane %v4118_v23, 4  ;;  %v4124_v53 = vshll.u32 %v11504_v12, 16 }
 0x180   : > { %v2712_v16 = vpop.permute.xlu1 %2711  ;;  %v4083_v24 = vrot.slane %v4081_v2, 4  ;;  %v4086_v26 = vrot.slane %v4084_v3, 5 }
 0x181   : > { %v2870_v18 = vsel %vm11447_vm3, %v2712_v16, %v2869_v10  ;;  %v3880_v36 = vld [vmem:[#allocation2 + $0x74] sm:$0x1]  ;;  %v4121_v3 = vor.u32 %v4120_v44, %v11496_v43  ;;  %v2649_v16 = vshrl.u32 %v11498_v45, 16 }
 0x182   : > { %2871 = vst [vmem:[#allocation2 + $0x78] sm:$0xf] %v2870_v18  ;;  %v4087_v52 = vor.u32 %v4086_v26, %v4083_v24  ;;  %v4397_v55 = vrot.slane %v3880_v36, 5  ;;  %v4100_v29 = vshll.u32 %v3880_v36, 16 }
 0x183   : > { %v2728_v28 = vpop.permute.xlu2 %2727 }
 0x184   : > { %v2888_v34 = vsel %vm11428_vm15, %v2728_v28, %v2887_v11  ;;  %v4088_v19 = vrot.slane %v4087_v52, 4  ;;  %v4102_v44 = vrot.slane %v4100_v29, 5 }
 0x185   : > { %2889 = vst [vmem:[#allocation2 + $0x98] sm:$0x1] %v2888_v34  ;;  %v3857_v22 = vld [vmem:[#allocation2 + $0x70] sm:$0xf] }
 0x186   : > { %v4394_v48 = vrot.slane %v3857_v22, 5  ;;  %v4090_v40 = vshll.u32 %v3857_v22, 16  ;;  %v4094_v38 = vshrl.u32 %v3857_v22, 16 }
 0x188   : > { %v4395_v20 = vsel %vm11507_vm7, %v10178_v41, %v4394_v48  ;;  %v4396_v57 = vrot.slane %v4394_v48, 4  ;;  %v4092_v10 = vrot.slane %v4090_v40, 5  ;;  %v4096_v62 = vrot.slane %v4094_v38, 4 }
 0x189   : > { %v3858_v2 = vld [vmem:[#allocation2 + $0x78] sm:$0xf]  ;;  %v4608_v26 = vunpack.c.l.b16 %v4395_v20  ;;  %v4122_v38 = vrot.slane %v4121_v3, 4  ;;  %v2651_v20 = vrot.slane %v2649_v16, 7  ;;  %v2647_v3 = vrot.slane %v11416_v49, 4 }
 0x18a   : > { %v2718_v11 = vpop.permute.xlu0 %2717  ;;  %v4398_v18 = vsel %vm11507_vm7, %v4396_v57, %v4397_v55  ;;  %v4097_v50 = vor.u32 %v4096_v62, %v4092_v10  ;;  %v4105_v23 = vshrl.u32 %v3858_v2, 16  ;;  %v4108_v36 = vshll.u32 %v3858_v2, 16  ;;  %v2883_v16 = vld [vmem:[#allocation2 + $0x90] sm:$0xf] }
 0x18b   : > { %v2877_v24 = vsel %vm11447_vm3, %v2718_v11, %v2876_v37  ;;  %v4609_v28 = vunpack.c.l.b16 %v4398_v18  ;;  %v4093_v41 = vsel %vm11523_vm4, %v4088_v19, %v4092_v10  ;;  %v4126_v55 = vrot.slane %v4124_v53, 5  ;;  %v4281_v53 = vld [vmem:[#allocation2 + $0x78] sm:$0xe]  ;;  %v432_v18 = vld [vmem:[#allocation2 + $0x9c] sm:$0x1] }
 0x18c   : > { %2878 = vst [vmem:[#allocation2 + $0x84] sm:$0xf] %v2877_v24  ;;  %v4098_v22 = vrot.slane %v4097_v50, 4  ;;  %v4107_v48 = vrot.slane %v4105_v23, 4  ;;  %v4110_v40 = vrot.slane %v4108_v36, 5  ;;  %v2652_v57 = vshll.u32 %v11498_v45, 16 }
 0x18d   : > { %v4632_v52 = vpack.c.b16 %v4609_v28, %v4608_v26  ;;  %v2394_v62 = vshrl.u32 %v11502_v46, 16  ;;  %v4528_v29 = vunpack.c.l.b16 %v4093_v41  ;;  %v647_v19 = vld [vmem:[%s11283_s17 + $0x60] sm:$0xf]  ;;  %v4127_v23 = vsel %vm11523_vm4, %v4122_v38, %v4126_v55  ;;  %v648_v26 = vld [vmem:[%s11283_s17 + $0x64] sm:$0xf] }
 0x18e   : > { %v4103_v37 = vsel %vm11523_vm4, %v4098_v22, %v4102_v44  ;;  %v4111_v11 = vor.u32 %v4110_v40, %v4107_v48  ;;  %v433_v24 = vsel %vm11364_vm11, 0, %v432_v18  ;;  %v488_v28 = vld [vmem:[#allocation2 + $0xa4] sm:$0x1]  ;;  %v2654_v36 = vor.u32 %v2652_v57, %v2651_v20 }
 0x18f   : > { %v2720_v2 = vpop.permute.xlu1 %2719  ;;  %4656 = vrot.lane.b32.xlu1 %v4632_v52, %s10850_s18  ;;  %v4529_v10 = vunpack.c.l.b16 %v4103_v37  ;;  %434 = vst [vmem:[#allocation2 + $0x9c] sm:$0x1] %v433_v24  ;;  %v862_v41 = vshrl.u32 %v647_v19, 16  ;;  %v865_v49 = vshll.u32 %v647_v19, 16  ;;  %v870_v22 = vshrl.u32 %v648_v26, 16 }
 0x190   : > { %2879 = vst.msk [vmem:[#allocation2 + $0x88] sm:$0xf] %vm2801_vm2, %v2720_v2  ;;  %v4112_v45 = vrot.slane %v4111_v11, 4  ;;  %v4401_v48 = vrot.slane %v11475_v4, 5  ;;  %v873_v52 = vshll.u32 %v648_v26, 16  ;;  %v489_v38 = vsel %vm11306_vm8, 0, %v488_v28 }
 0x191   : > { %v4552_v50 = vpack.c.b16 %v4529_v10, %v4528_v29  ;;  %v4531_v37 = vunpack.c.l.b16 %v4127_v23  ;;  %v864_v57 = vrot.slane %v862_v41, 7  ;;  %v872_v2 = vrot.slane %v870_v22, 7  ;;  %490 = vst [vmem:[#allocation2 + $0xa4] sm:$0x1] %v489_v38 }
 0x192   : > { %v4117_v44 = vsel %vm11523_vm4, %v4112_v45, %v11496_v43  ;;  %v2656_v10 = vrot.slane %v2651_v20, 4  ;;  %v10179_v11 = vrot.slane %v4281_v53, 9  ;;  %v4403_v24 = vrot.slane %v4401_v48, 4  ;;  %v11558_v53 = vld [vmem:[#allocation2 + $0x8c] sm:$0x1] }
 0x193   : > { %4576 = vrot.lane.b32.xlu0 %v4552_v50, %s10851_s19  ;;  %v3860_v40 = vld [vmem:[#allocation2 + $0x84] sm:$0xf]  ;;  %v4530_v55 = vunpack.c.l.b16 %v4117_v44  ;;  %v867_v4 = vor.u32 %v865_v49, %v864_v57  ;;  %v868_v45 = vrot.slane %v864_v57, 4  ;;  %v4404_v23 = vrot.slane %v11504_v12, 5 }
 0x194   : > { %v4129_v18 = vshrl.u32 %v3860_v40, 16  ;;  %v4132_v19 = vshll.u32 %v3860_v40, 16  ;;  %v875_v28 = vor.u32 %v873_v52, %v872_v2  ;;  %v11555_v20 = vpack.c.bf16 %v11007_v32, %v11007_v32  ;;  %v4282_v44 = vld [vmem:[#allocation2 + $0x84] sm:$0xe] }
 0x195   : > { %v2724_v29 = vpop.permute.xlu0 %2723  ;;  %v4553_v50 = vpack.c.b16 %v4531_v37, %v4530_v55  ;;  %v877_v41 = vrot.slane %v872_v2, 4  ;;  %v11564_v52 = vpack.c.bf16 %v11000_v13, %v11000_v13  ;;  %v2655_v37 = vsel %vm11150_vm5, %v2647_v3, %v2654_v36 }
 0x196   : > { %v2884_v43 = vsel %vm11447_vm3, %v2724_v29, %v2883_v16  ;;  %v1064_v40 = vld [vmem:[#allocation2 + $0x9c] sm:$0xf]  ;;  %v876_v38 = vsel %vm11150_vm5, %v868_v45, %v875_v28  ;;  %v4131_v12 = vrot.slane %v4129_v18, 4  ;;  %v4134_v55 = vrot.slane %v4132_v19, 5 }
 0x197   : > { %2885 = vst [vmem:[#allocation2 + $0x90] sm:$0xf] %v2884_v43  ;;  %2751 = vrot.lane.b32.xlu1 %v2656_v10, %s10849_s29  ;;  %v3861_v26 = vld [vmem:[#allocation2 + $0x88] sm:$0xf]  ;;  %4578 = vrot.lane.b32.xlu2 %v4553_v50, %s10851_s19  ;;  %v4402_v57 = vsel %vm11507_vm7, %v10179_v11, %v4401_v48  ;;  %v1065_v29 = vsel %vm11408_vm13, %v867_v4, %v1064_v40  ;;  %v10180_v11 = vrot.slane %v4282_v44, 9  ;;  %v4411_v18 = vrot.slane %v11558_v53, 5 }
 0x198   : > { %v4408_v16 = vrot.slane %v3861_v26, 5  ;;  %v4138_v49 = vshll.u32 %v3861_v26, 16  ;;  %v4142_v22 = vshrl.u32 %v3861_v26, 16  ;;  %1067 = vst.msk [vmem:[#allocation2 + $0xa0] sm:$0xf] %vm503_vm12, %v876_v38  ;;  %v2416_v13 = vor.u32 %v2414_v27, %v11490_v30 }
 0x199   : > { %v1068_v36 = vld [vmem:[#allocation2 + $0xa4] sm:$0x1]  ;;  %v4405_v48 = vsel %vm11507_vm7, %v4403_v24, %v4404_v23  ;;  %1066 = vst [vmem:[#allocation2 + $0x9c] sm:$0xf] %v1065_v29  ;;  %v2408_v43 = vor.u32 %v2406_v63, %v11477_v15  ;;  %v4610_v60 = vunpack.c.l.b16 %v4402_v57  ;;  %v2388_v27 = vrot.slane %v2386_v33, 7 }
 0x19a   : > { %v2726_v32 = vpop.permute.xlu1 %2725  ;;  %v4410_v2 = vrot.slane %v4408_v16, 4  ;;  %v11578_v10 = vrot.slane %v4138_v49, 5  ;;  %v4144_v3 = vrot.slane %v4142_v22, 4  ;;  %v1069_v19 = vsel %vm11325_vm10, %v877_v41, %v1068_v36 }
 0x19b   : > { %2886 = vst.msk [vmem:[#allocation2 + $0x94] sm:$0xf] %vm2801_vm2, %v2726_v32  ;;  %2749 = vrot.lane.b32.xlu0 %v2655_v37, %s10849_s29  ;;  %v4135_v50 = vor.u32 %v4134_v55, %v4131_v12  ;;  %v2428_v24 = vshrl.u32 %v11555_v20, 16  ;;  %v2420_v23 = vshrl.u32 %v11564_v52, 16  ;;  %v2417_v0 = vsel %vm11150_vm5, %v2409_v8, %v2416_v13 }
 0x19c   : > { %1070 = vst [vmem:[#allocation2 + $0xa4] sm:$0x1] %v1069_v19  ;;  %v4412_v4 = vsel %vm11507_vm7, %v4410_v2, %v4411_v18  ;;  %v4145_v45 = vor.u32 %v4144_v3, %v11578_v10  ;;  %v4611_v63 = vunpack.c.l.b16 %v4405_v48  ;;  %v2418_v33 = vrot.slane %v11490_v30, 4  ;;  %v2730_v30 = vpop.permute.xlu2 %2729 }
 0x19d   : > { %v2397_v26 = vshll.u32 %v11502_v46, 16  ;;  %v4409_v28 = vsel %vm11507_vm7, %v10180_v11, %v4408_v16  ;;  %v11607_v41 = vrot.slane %v2394_v62, 7  ;;  %v4148_v15 = vshll.u32 %v11558_v53, 16 }
 0x19e   : > { %v11612_v8 = vpack.c.bf16 %v11015_v58, %v11015_v58  ;;  %v4633_v49 = vpack.c.b16 %v4611_v63, %v4610_v60  ;;  %v4613_v22 = vunpack.c.l.b16 %v4412_v4  ;;  %v4136_v44 = vrot.slane %v4135_v50, 4  ;;  %v3862_v58 = vld [vmem:[#allocation2 + $0x90] sm:$0xf] }
 0x19f   : > { %2663 = vrot.lane.b32.xlu1 %v2408_v43, %s10849_s29  ;;  %2665 = vrot.lane.b32.xlu2 %v2417_v0, %s10849_s29  ;;  %v2431_v40 = vshll.u32 %v11555_v20, 16  ;;  %v2392_v38 = vrot.slane %v2388_v27, 4  ;;  %v4146_v12 = vrot.slane %v4145_v45, 4  ;;  %v11615_v55 = vrot.slane %v2428_v24, 7  ;;  %v11646_v0 = vld [vmem:[#allocation2 + $0x98] sm:$0x1] }
 0x1a0   : > { %v11617_v16 = vrot.slane %v2420_v23, 7  ;;  %v4612_v46 = vunpack.c.l.b16 %v4409_v28  ;;  %v2890_v62 = vld [vmem:[#allocation2 + $0x9c] sm:$0xf]  ;;  %v2399_v32 = vor.u32 %v2397_v26, %v11607_v41  ;;  %v4150_v57 = vrot.slane %v4148_v15, 5  ;;  %v650_v26 = vld [vmem:[%s11283_s17 + $0x6c] sm:$0xf] }
 0x1a1   : > { %v2891_v37 = vsel %vm11447_vm3, %v2730_v30, %v2890_v62  ;;  %v2423_v29 = vshll.u32 %v11564_v52, 16  ;;  %v4141_v36 = vsel %vm11523_vm4, %v4136_v44, %v11578_v10  ;;  %v2437_v11 = vshrl.u32 %v11612_v8, 16  ;;  %v649_v28 = vld [vmem:[%s11283_s17 + $0x68] sm:$0xf] }
 0x1a2   : > { %v11620_v53 = vld [vmem:[#allocation2 + $0x94] sm:$0xf]  ;;  %v4634_v13 = vpack.c.b16 %v4613_v22, %v4612_v46  ;;  %2892 = vst [vmem:[#allocation2 + $0x9c] sm:$0xf] %v2891_v37  ;;  %v4151_v18 = vsel %vm11523_vm4, %v4146_v12, %v4150_v57  ;;  %v4153_v19 = vshrl.u32 %v3862_v58, 16  ;;  %v4156_v52 = vshll.u32 %v3862_v58, 16 }
 0x1a3   : > { %4658 = vrot.lane.b32.xlu0 %v4633_v49, %s10850_s18  ;;  %v2894_v20 = vld [vmem:[#allocation2 + $0xa4] sm:$0x1]  ;;  %v4162_v43 = vshll.u32 %v11620_v53, 16  ;;  %v2401_v10 = vrot.slane %v11607_v41, 4  ;;  %v2435_v60 = vrot.slane %v11615_v55, 4  ;;  %v2426_v50 = vrot.slane %v11617_v16, 4 }
 0x1a4   : > { %v2734_v2 = vpop.permute.xlu1 %2733  ;;  %v4166_v4 = vshrl.u32 %v11620_v53, 16  ;;  %v2391_v45 = vor.u32 %v2389_v17, %v2388_v27  ;;  %v2400_v24 = vsel %vm11150_vm5, %v2392_v38, %v2399_v32  ;;  %v4532_v23 = vunpack.c.l.b16 %v4141_v36  ;;  %v435_v17 = vld [vmem:[#allocation2 + $0xa8] sm:$0x1] }
 0x1a5   : > { %v2732_v3 = vpop.permute.xlu0 %2731  ;;  %v2895_v48 = vsel %vm11428_vm15, %v2734_v2, %v2894_v20  ;;  %v11650_v63 = vpack.c.bf16 %v11023_v9, %v11023_v9  ;;  %v4533_v15 = vunpack.c.l.b16 %v4151_v18  ;;  %v887_v22 = vshrl.u32 %v650_v26, 16  ;;  %v4283_v9 = vld [vmem:[#allocation2 + $0x90] sm:$0xe] }
 0x1a6   : > { %2893 = vst.msk [vmem:[#allocation2 + $0xa0] sm:$0xf] %vm2801_vm2, %v2732_v3  ;;  %v879_v6 = vshrl.u32 %v649_v28, 16  ;;  %v4415_v27 = vrot.slane %v11620_v53, 5  ;;  %v4155_v30 = vrot.slane %v4153_v19, 4  ;;  %v4158_v44 = vrot.slane %v4156_v52, 5 }
 0x1a7   : > { %2667 = vrot.lane.b32.xlu1 %v2418_v33, %s10849_s29  ;;  %2896 = vst [vmem:[#allocation2 + $0xa4] sm:$0x1] %v2895_v48  ;;  %4660 = vrot.lane.b32.xlu2 %v4634_v13, %s10850_s18  ;;  %v491_v33 = vld [vmem:[#allocation2 + $0xb0] sm:$0x1]  ;;  %v11657_v38 = vrot.slane %v4162_v43, 5  ;;  %v4168_v12 = vrot.slane %v4166_v4, 4  ;;  %v2433_v32 = vor.u32 %v2431_v40, %v11615_v55  ;;  %v11664_v37 = vor.u32 %v2423_v29, %v11617_v16 }
 0x1a8   : > { %v492_v49 = vsel %vm11306_vm8, 0, %v491_v33  ;;  %v889_v46 = vrot.slane %v887_v22, 7  ;;  %v882_v62 = vshll.u32 %v649_v28, 16  ;;  %v436_v58 = vsel %vm11364_vm11, 0, %v435_v17  ;;  %v651_v22 = vld [vmem:[%s11283_s17 + $0x70] sm:$0xf] }
 0x1a9   : > { %493 = vst [vmem:[#allocation2 + $0xb0] sm:$0x1] %v492_v49  ;;  %v3864_v53 = vld [vmem:[#allocation2 + $0x9c] sm:$0xf]  ;;  %v881_v57 = vrot.slane %v879_v6, 7  ;;  %v890_v20 = vshll.u32 %v650_v26, 16  ;;  %v4554_v2 = vpack.c.b16 %v4533_v15, %v4532_v23  ;;  %v4159_v4 = vor.u32 %v4158_v44, %v4155_v30 }
 0x1aa   : > { %437 = vst [vmem:[#allocation2 + $0xa8] sm:$0x1] %v436_v58  ;;  %v4418_v13 = vrot.slane %v11646_v0, 5  ;;  %v4177_v36 = vshrl.u32 %v3864_v53, 16  ;;  %v4180_v48 = vshll.u32 %v3864_v53, 16  ;;  %v894_v40 = vrot.slane %v889_v46, 4 }
 0x1ab   : > { %2657 = vrot.lane.b32.xlu0 %v2391_v45, %s10849_s29  ;;  %v885_v52 = vrot.slane %v881_v57, 4  ;;  %v10181_v29 = vrot.slane %v4283_v9, 9  ;;  %v4417_v43 = vrot.slane %v4415_v27, 4  ;;  %v4169_v45 = vor.u32 %v4168_v12, %v11657_v38  ;;  %v438_v49 = vld [vmem:[#allocation2 + $0xb4] sm:$0x1] }
 0x1ac   : > { %v4179_v33 = vrot.slane %v4177_v36, 4  ;;  %v4182_v26 = vrot.slane %v4180_v48, 5  ;;  %v884_v28 = vor.u32 %v882_v62, %v881_v57  ;;  %v892_v15 = vor.u32 %v890_v20, %v889_v46  ;;  %v494_v62 = vld [vmem:[#allocation2 + $0xbc] sm:$0x1] }
 0x1ad   : > { %v11667_v3 = vld [vmem:[#allocation2 + $0xa0] sm:$0xf]  ;;  %v439_v9 = vsel %vm11364_vm11, 0, %v438_v49  ;;  %v896_v30 = vshrl.u32 %v651_v22, 16  ;;  %v4172_v44 = vshll.u32 %v11646_v0, 16  ;;  %v899_v46 = vshll.u32 %v651_v22, 16 }
 0x1ae   : > { %v4186_v18 = vshll.u32 %v11667_v3, 16  ;;  %v4190_v19 = vshrl.u32 %v11667_v3, 16  ;;  %v11673_v23 = vld [vmem:[#allocation2 + $0xa4] sm:$0x1]  ;;  %440 = vst [vmem:[#allocation2 + $0xb4] sm:$0x1] %v439_v9  ;;  %v4416_v53 = vsel %vm11507_vm7, %v10181_v29, %v4415_v27  ;;  %v4419_v0 = vsel %vm11507_vm7, %v4417_v43, %v4418_v13 }
 0x1af   : > { %4580 = vrot.lane.b32.xlu1 %v4554_v2, %s10851_s19  ;;  %2659 = vrot.lane.b32.xlu2 %v2400_v24, %s10849_s29  ;;  %v893_v24 = vsel %vm11150_vm5, %v885_v52, %v892_v15  ;;  %v4160_v57 = vrot.slane %v4159_v4, 4  ;;  %v11693_v2 = vpop.permute.xlu1 %2735  ;;  %v898_v36 = vrot.slane %v896_v30, 7  ;;  %v4183_v48 = vor.u32 %v4182_v26, %v4179_v33  ;;  %v652_v27 = vld [vmem:[%s11283_s17 + $0x74] sm:$0xf]  ;;  %v2740_v4 = vpop.permute.xlu0 %2739  ;;  %v653_v49 = vld [vmem:[%s11283_s17 + $0x78] sm:$0xf] }
 0x1b0   : > { %v11677_v6 = vrot.slane %v4186_v18, 5  ;;  %v4192_v17 = vrot.slane %v4190_v19, 4  ;;  %v1075_v58 = vld [vmem:[#allocation2 + $0xb0] sm:$0x1]  ;;  %v4196_v18 = vshll.u32 %v11673_v23, 16  ;;  %v2434_v13 = vsel %vm11150_vm5, %v2426_v50, %v2433_v32  ;;  %v2738_v50 = vpop.permute.xlu2 %2737 }
 0x1b1   : > { %v1076_v12 = vsel %vm11325_vm10, %v894_v40, %v1075_v58  ;;  %v1071_v20 = vld [vmem:[#allocation2 + $0xa8] sm:$0xf]  ;;  %1074 = vst.msk [vmem:[#allocation2 + $0xac] sm:$0xf] %vm503_vm12, %v893_v24  ;;  %v4170_v19 = vrot.slane %v4169_v45, 4  ;;  %v904_v52 = vshrl.u32 %v652_v27, 16  ;;  %v4614_v29 = vunpack.c.l.b16 %v4416_v53 }
 0x1b2   : > { %1077 = vst [vmem:[#allocation2 + $0xb0] sm:$0x1] %v1076_v12  ;;  %v1072_v41 = vsel %vm11408_vm13, %v884_v28, %v1071_v20  ;;  %v4193_v40 = vor.u32 %v4192_v17, %v11677_v6  ;;  %v4174_v43 = vrot.slane %v4172_v44, 5  ;;  %v901_v33 = vor.u32 %v899_v46, %v898_v36  ;;  %v441_v28 = vld [vmem:[#allocation2 + $0xc0] sm:$0x1] }
 0x1b3   : > { %2661 = vrot.lane.b32.xlu0 %v2401_v10, %s10849_s29  ;;  %v495_v10 = vsel %vm11306_vm8, 0, %v494_v62  ;;  %1073 = vst [vmem:[#allocation2 + $0xa8] sm:$0xf] %v1072_v41  ;;  %v907_v26 = vshll.u32 %v652_v27, 16  ;;  %v4615_v15 = vunpack.c.l.b16 %v4419_v0  ;;  %v4165_v16 = vsel %vm11523_vm4, %v4160_v57, %v11657_v38 }
 0x1b4   : > { %496 = vst [vmem:[#allocation2 + $0xbc] sm:$0x1] %v495_v10  ;;  %v906_v32 = vrot.slane %v904_v52, 7  ;;  %v902_v45 = vrot.slane %v898_v36, 4  ;;  %v4184_v22 = vrot.slane %v4183_v48, 4  ;;  %v4198_v17 = vrot.slane %v4196_v18, 5 }
 0x1b5   : > { %2900 = vst.msk [vmem:[#allocation2 + $0xac] sm:$0xf] %vm2801_vm2, %v2738_v50  ;;  %v442_v58 = vsel %vm11364_vm11, 0, %v441_v28  ;;  %v913_v9 = vshrl.u32 %v653_v49, 16  ;;  %v4175_v30 = vsel %vm11523_vm4, %v4170_v19, %v4174_v43  ;;  %v4194_v38 = vrot.slane %v4193_v40, 4 }
 0x1b6   : > { %v1078_v44 = vld [vmem:[#allocation2 + $0xb4] sm:$0xf]  ;;  %v909_v12 = vor.u32 %v907_v26, %v906_v32  ;;  %443 = vst [vmem:[#allocation2 + $0xc0] sm:$0x1] %v442_v58  ;;  %v916_v24 = vshll.u32 %v653_v49, 16  ;;  %v11722_v55 = vrot.slane %v2437_v11, 7  ;;  %v4635_v20 = vpack.c.b16 %v4615_v15, %v4614_v29 }
 0x1b7   : > { %2671 = vrot.lane.b32.xlu1 %v2434_v13, %s10849_s29  ;;  %2673 = vrot.lane.b32.xlu2 %v2435_v60, %s10849_s29  ;;  %v1079_v46 = vsel %vm11408_vm13, %v901_v33, %v1078_v44  ;;  %v911_v62 = vrot.slane %v906_v32, 4  ;;  %v11726_v53 = vrot.slane %v913_v9, 7  ;;  %v2440_v0 = vshll.u32 %v11612_v8, 16  ;;  %v4284_v43 = vld [vmem:[#allocation2 + $0x9c] sm:$0xe]  ;;  %v2742_v26 = vpop.permute.xlu0 %2741 }
 0x1b8   : > { %1080 = vst [vmem:[#allocation2 + $0xb4] sm:$0xf] %v1079_v46  ;;  %v910_v11 = vsel %vm11150_vm5, %v902_v45, %v909_v12  ;;  %v4534_v36 = vunpack.c.l.b16 %v4165_v16  ;;  %v4535_v48 = vunpack.c.l.b16 %v4175_v30  ;;  %v2445_v18 = vshrl.u32 %v11650_v63, 16  ;;  %v2746_v29 = vpop.permute.xlu2 %2745 }
 0x1b9   : > { %v2901_v60 = vld [vmem:[#allocation2 + $0xb0] sm:$0x1]  ;;  %v4199_v8 = vsel %vm11523_vm4, %v4194_v38, %v4198_v17  ;;  %1081 = vst.msk [vmem:[#allocation2 + $0xb8] sm:$0xf] %vm503_vm12, %v910_v11  ;;  %v918_v19 = vor.u32 %v916_v24, %v11726_v53  ;;  %v2442_v40 = vor.u32 %v2440_v0, %v11722_v55  ;;  %v4422_v28 = vrot.slane %v11667_v3, 5 }
 0x1ba   : > { %v2902_v57 = vsel %vm11428_vm15, %v2740_v4, %v2901_v60  ;;  %v2897_v41 = vld [vmem:[#allocation2 + $0xa8] sm:$0xf]  ;;  %v4537_v33 = vunpack.c.l.b16 %v4199_v8  ;;  %v4555_v16 = vpack.c.b16 %v4535_v48, %v4534_v36  ;;  %v2447_v50 = vrot.slane %v2445_v18, 7 }
 0x1bb   : > { %2669 = vrot.lane.b32.xlu0 %v11664_v37, %s10849_s29  ;;  %2903 = vst [vmem:[#allocation2 + $0xb0] sm:$0x1] %v2902_v57  ;;  %v4189_v37 = vsel %vm11523_vm4, %v4184_v22, %v11677_v6  ;;  %v2898_v10 = vsel %vm11447_vm3, %v11693_v2, %v2897_v41  ;;  %v1082_v27 = vld [vmem:[#allocation2 + $0xbc] sm:$0x1]  ;;  %v2744_v13 = vpop.permute.xlu1 %2743  ;;  %v2361_v6 = vpack.c.bf16 %v11029_v35, %v11029_v35  ;;  %v10182_v17 = vrot.slane %v4284_v43, 9 }
 0x1bc   : > { %2899 = vst [vmem:[#allocation2 + $0xa8] sm:$0xf] %v2898_v10  ;;  %v1083_v52 = vsel %vm11325_vm10, %v911_v62, %v1082_v27  ;;  %v2362_v2 = vpack.c.bf16 %v11036_v47, %v11036_v47  ;;  %v4536_v4 = vunpack.c.l.b16 %v4189_v37  ;;  %v2448_v47 = vshll.u32 %v11650_v63, 16  ;;  %v11764_v30 = vld [vmem:[#allocation2 + $0xac] sm:$0xf] }
 0x1bd   : > { %1084 = vst [vmem:[#allocation2 + $0xbc] sm:$0x1] %v1083_v52  ;;  %v1085_v15 = vld [vmem:[#allocation2 + $0xc0] sm:$0xf]  ;;  %v2454_v45 = vshrl.u32 %v2361_v6, 16  ;;  %v4424_v3 = vrot.slane %v4422_v28, 4 }
 0x1be   : > { %2907 = vst.msk [vmem:[#allocation2 + $0xb8] sm:$0xf] %vm2801_vm2, %v2744_v13  ;;  %v1086_v35 = vsel %vm11408_vm13, %v918_v19, %v1085_v15  ;;  %v2462_v49 = vshrl.u32 %v2362_v2, 16  ;;  %v4556_v58 = vpack.c.b16 %v4537_v33, %v4536_v4  ;;  %v4425_v9 = vrot.slane %v11673_v23, 5 }
 0x1bf   : > { %4662 = vrot.lane.b32.xlu1 %v4635_v20, %s10850_s18  ;;  %2675 = vrot.lane.b32.xlu2 %v2442_v40, %s10849_s29  ;;  %v2904_v32 = vld [vmem:[#allocation2 + $0xb4] sm:$0xf]  ;;  %1087 = vst [vmem:[#allocation2 + $0xc0] sm:$0xf] %v1086_v35  ;;  %v2452_v38 = vrot.slane %v2447_v50, 4  ;;  %v2443_v63 = vrot.slane %v11722_v55, 4  ;;  %v2450_v12 = vor.u32 %v2448_v47, %v2447_v50  ;;  %v4423_v55 = vsel %vm11507_vm7, %v10182_v17, %v4422_v28 }
 0x1c0   : > { %v2905_v22 = vsel %vm11447_vm3, %v2742_v26, %v2904_v32  ;;  %v4429_v44 = vrot.slane %v11764_v30, 5  ;;  %v2456_v62 = vrot.slane %v2454_v45, 7  ;;  %v2464_v0 = vrot.slane %v2462_v49, 7  ;;  %v2748_v23 = vpop.permute.xlu2 %2747  ;;  %v11794_v26 = vld [vmem:[%s11283_s17 + $0x8] sm:$0xf] }
 0x1c1   : > { %2906 = vst [vmem:[#allocation2 + $0xb4] sm:$0xf] %v2905_v22  ;;  %v4426_v11 = vsel %vm11507_vm7, %v4424_v3, %v4425_v9  ;;  %v2465_v20 = vshll.u32 %v2362_v2, 16  ;;  %v2451_v37 = vsel %vm11150_vm5, %v2443_v63, %v2450_v12  ;;  %v2457_v8 = vshll.u32 %v2361_v6, 16  ;;  %v626_v28 = vld [vmem:[%s11283_s17 + $0xc] sm:$0xf] }
 0x1c2   : > { %v11768_v60 = vld [vmem:[#allocation2 + $0xb0] sm:$0x1]  ;;  %v4431_v18 = vrot.slane %v4429_v44, 4  ;;  %v2460_v27 = vrot.slane %v2456_v62, 4  ;;  %v4616_v19 = vunpack.c.l.b16 %v4423_v55  ;;  %v4617_v40 = vunpack.c.l.b16 %v4426_v11  ;;  %v10252_v63 = vld [vmem:[%s15344_s4 + $0x14] sm:$0xf] }
 0x1c3   : > { %4582 = vrot.lane.b32.xlu0 %v4555_v16, %s10851_s19  ;;  %v4285_v46 = vld [vmem:[#allocation2 + $0xa8] sm:$0xe]  ;;  %v4432_v41 = vrot.slane %v11768_v60, 5  ;;  %v2467_v13 = vor.u32 %v2465_v20, %v2464_v0  ;;  %v2459_v52 = vor.u32 %v2457_v8, %v2456_v62  ;;  %v675_v16 = vshrl.u32 %v11794_v26, 16 }
 0x1c4   : > { %v2908_v24 = vld [vmem:[#allocation2 + $0xbc] sm:$0x1]  ;;  %v10183_v48 = vrot.slane %v4285_v46, 9  ;;  %v4636_v43 = vpack.c.b16 %v4617_v40, %v4616_v19  ;;  %v683_v50 = vshrl.u32 %v626_v28, 16  ;;  %v686_v35 = vshll.u32 %v626_v28, 16 }
 0x1c5   : > { %v2909_v57 = vsel %vm11428_vm15, %v2746_v29, %v2908_v24  ;;  %v4433_v29 = vsel %vm11507_vm7, %v4431_v18, %v4432_v41  ;;  %v2468_v6 = vsel %vm11150_vm5, %v2460_v27, %v2467_v13  ;;  %v2363_v47 = vpack.c.bf16 %v11042_v7, %v11042_v7  ;;  %v11819_v24 = vld [vmem:[%s11283_s17] sm:$0xf]  ;;  %v624_v46 = vld [vmem:[%s11283_s17 + $0x4] sm:$0xf]  ;;  %v497_v18 = vld [vmem:[#allocation2 + $0xc8] sm:$0x1] }
 0x1c6   : > { %2910 = vst [vmem:[#allocation2 + $0xbc] sm:$0x1] %v2909_v57  ;;  %v2911_v36 = vld [vmem:[#allocation2 + $0xc0] sm:$0xf]  ;;  %v4430_v2 = vsel %vm11507_vm7, %v10183_v48, %v4429_v44  ;;  %v4619_v33 = vunpack.c.l.b16 %v4433_v29  ;;  %v11800_v32 = vrot.slane %v675_v16, 7  ;;  %v11802_v45 = vrot.slane %v683_v50, 7 }
 0x1c7   : > { %2679 = vrot.lane.b32.xlu1 %v2452_v38, %s10849_s29  ;;  %4584 = vrot.lane.b32.xlu2 %v4556_v58, %s10851_s19  ;;  %v2912_v10 = vsel %vm11447_vm3, %v2748_v23, %v2911_v36  ;;  %v4618_v4 = vunpack.c.l.b16 %v4430_v2  ;;  %v2469_v17 = vrot.slane %v2464_v0, 4  ;;  %v2471_v58 = vshrl.u32 %v2363_v47, 16  ;;  %v10742_v23 = vld [vmem:[%s15344_s4 + $0xc] sm:$0xff]  ;;  %v654_v41 = vld [vmem:[%s11283_s17 + $0x7c] sm:$0xf] }
 0x1c8   : > { %2913 = vst [vmem:[#allocation2 + $0xc0] sm:$0xf] %v2912_v10  ;;  %v681_v49 = vrot.slane %v11800_v32, 4  ;;  %v688_v22 = vor.u32 %v686_v35, %v11802_v45  ;;  %v2474_v9 = vshll.u32 %v2363_v47, 16  ;;  %v4761_v44 = vunpack.c.l.b16 %v10252_v63  ;;  %v458_v40 = vld [vmem:[#allocation2 + $0x2c] sm:$0x1] }
 0x1c9   : > { %v4637_v15 = vpack.c.b16 %v4619_v33, %v4618_v4  ;;  %v11811_v7 = vrot.slane %v2471_v58, 7  ;;  %v658_v0 = vshrl.u32 %v11819_v24, 16  ;;  %v666_v57 = vshrl.u32 %v624_v46, 16  ;;  %v11843_v2 = vld [vmem:[%s11283_s17 + $0x14] sm:$0xf] }
 0x1ca   : > { %v689_v3 = vsel %vm11150_vm5, %v681_v49, %v688_v22  ;;  %v4763_v12 = vpack.c.b16 %v4761_v44, %v4761_v44  ;;  %v669_v55 = vshll.u32 %v624_v46, 16  ;;  %v921_v8 = vshrl.u32 %v654_v41, 16  ;;  %v399_v50 = vld [vmem:[#allocation2 + $0x18] sm:$0x1]  ;;  %v405_v49 = vld [vmem:[#allocation2 + $0x30] sm:$0x1] }
 0x1cb   : > { %2677 = vrot.lane.b32.xlu0 %v2451_v37, %s10849_s29  ;;  %990 = vst.msk [vmem:[#allocation2 + $0x1c] sm:$0xf] %vm503_vm12, %v689_v3  ;;  %v2476_v38 = vor.u32 %v2474_v9, %v11811_v7  ;;  %v11827_v11 = vrot.slane %v658_v0, 7  ;;  %v11829_v20 = vrot.slane %v666_v57, 7  ;;  %v498_v37 = vsel %vm11306_vm8, 0, %v497_v18 }
 0x1cc   : > { %v4799_v62 = vsel %vm15354_vm0, %v4763_v12, 0  ;;  %499 = vst [vmem:[#allocation2 + $0xc8] sm:$0x1] %v498_v37  ;;  %v924_v27 = vshll.u32 %v654_v41, 16  ;;  %v923_v13 = vrot.slane %v921_v8, 7  ;;  %v919_v19 = vrot.slane %v11726_v53, 4 }
 0x1cd   : > { %10811 = vmatpush.bf16.msrb.mxu2 %v4799_v62  ;;  %4807 = vmatpush.bf16.msrb.mxu0 %v4799_v62  ;;  %v664_v36 = vrot.slane %v11827_v11, 4  ;;  %v671_v48 = vor.u32 %v669_v55, %v11829_v20  ;;  %v11855_v53 = vpack.c.bf16 %v11049_v25, %v11049_v25  ;;  %v400_v47 = vsel %vm11364_vm11, 0, %v399_v50  ;;  %v629_v22 = vld [vmem:[%s11283_s17 + $0x18] sm:$0xf]  ;;  %v3866_v12 = vld [vmem:[#allocation2 + $0xa8] sm:$0xf] }
 0x1ce   : > { %v926_v29 = vor.u32 %v924_v27, %v923_v13  ;;  %v709_v58 = vshrl.u32 %v629_v22, 16  ;;  %v678_v25 = vshll.u32 %v11794_v26, 16  ;;  %401 = vst [vmem:[#allocation2 + $0x18] sm:$0x1] %v400_v47  ;;  %v712_v44 = vshll.u32 %v629_v22, 16 }
 0x1cf   : > { %2681 = vrot.lane.b32.xlu1 %v2459_v52, %s10849_s29  ;;  %2683 = vrot.lane.b32.xlu2 %v2468_v6, %s10849_s29  ;;  %v672_v10 = vsel %vm11150_vm5, %v664_v36, %v671_v48  ;;  %v459_v52 = vsel %vm11306_vm8, 0, %v458_v40  ;;  %v700_v6 = vshrl.u32 %v11843_v2, 16  ;;  %v2479_v9 = vshrl.u32 %v11855_v53, 16  ;;  %v455_v48 = vld [vmem:[#allocation2 + $0x20] sm:$0x1] }
 0x1d0   : > { %983 = vst.msk [vmem:[#allocation2 + $0x10] sm:$0xf] %vm503_vm12, %v672_v10  ;;  %v927_v33 = vsel %vm11150_vm5, %v919_v19, %v926_v29  ;;  %v11869_v63 = vrot.slane %v709_v58, 7  ;;  %v4201_v62 = vshrl.u32 %v3866_v12, 16  ;;  %v4204_v0 = vshll.u32 %v3866_v12, 16 }
 0x1d1   : > { %10812 = vmatpush.bf16.msrb.mxu2 %v10742_v23  ;;  %4808 = vmatpush.bf16.msrb.mxu0 %v10742_v23  ;;  %460 = vst [vmem:[#allocation2 + $0x2c] sm:$0x1] %v459_v52  ;;  %v11850_v28 = vrot.slane %v700_v6, 7  ;;  %v4210_v57 = vshll.u32 %v11764_v30, 16  ;;  %v680_v26 = vor.u32 %v678_v25, %v11800_v32  ;;  %v4214_v23 = vshrl.u32 %v11764_v30, 16 }
 0x1d2   : > { %1088 = vst.msk [vmem:[#allocation2 + $0xc4] sm:$0xf] %vm503_vm12, %v927_v33  ;;  %v11875_v55 = vrot.slane %v2479_v9, 7  ;;  %v714_v36 = vor.u32 %v712_v44, %v11869_v63  ;;  %v396_v18 = vld [vmem:[#allocation2 + $0xc] sm:$0x1]  ;;  %v4203_v41 = vrot.slane %v4201_v62, 4  ;;  %v11880_v8 = vpack.c.bf16 %v11056_v51, %v11056_v51 }
 0x1d3   : > { %4664 = vrot.lane.b32.xlu0 %v4636_v43, %s10850_s18  ;;  %v928_v43 = vrot.slane %v923_v13, 4  ;;  %v707_v16 = vrot.slane %v11850_v28, 4  ;;  %v4206_v37 = vrot.slane %v4204_v0, 5  ;;  %v456_v10 = vsel %vm11306_vm8, 0, %v455_v48  ;;  %v3868_v25 = vld [vmem:[#allocation2 + $0xb4] sm:$0xf] }
 0x1d4   : > { %v397_v32 = vsel %vm11364_vm11, 0, %v396_v18  ;;  %v4212_v27 = vrot.slane %v4210_v57, 5  ;;  %v4216_v30 = vrot.slane %v4214_v23, 4  ;;  %457 = vst [vmem:[#allocation2 + $0x20] sm:$0x1] %v456_v10  ;;  %v4220_v40 = vshll.u32 %v11768_v60, 16 }
 0x1d5   : > { %v987_v13 = vld [vmem:[#allocation2 + $0x18] sm:$0xf]  ;;  %v4207_v19 = vor.u32 %v4206_v37, %v4203_v41  ;;  %v11889_v52 = vpack.c.bf16 %v11063_v5, %v11063_v5  ;;  %v661_v51 = vshll.u32 %v11819_v24, 16  ;;  %398 = vst [vmem:[#allocation2 + $0xc] sm:$0x1] %v397_v32  ;;  %v2482_v33 = vshll.u32 %v11855_v53, 16 }
 0x1d6   : > { %v988_v29 = vsel %vm11408_vm13, %v680_v26, %v987_v13  ;;  %v4222_v60 = vrot.slane %v4220_v40, 5  ;;  %v11899_v5 = vpack.c.bf16 %v11074_v42, %v11074_v42  ;;  %v690_v22 = vrot.slane %v11802_v45, 4  ;;  %v11921_v57 = vld [vmem:[#allocation2 + $0xb8] sm:$0xf]  ;;  %v632_v40 = vld [vmem:[%s11283_s17 + $0x24] sm:$0xf] }
 0x1d7   : > { %4666 = vrot.lane.b32.xlu2 %v4637_v15, %s10850_s18  ;;  %v1089_v15 = vld [vmem:[#allocation2 + $0xc8] sm:$0x1]  ;;  %989 = vst [vmem:[#allocation2 + $0x18] sm:$0xf] %v988_v29  ;;  %v663_v9 = vor.u32 %v661_v51, %v11827_v11  ;;  %v4228_v10 = vshll.u32 %v3868_v25, 16  ;;  %v4234_v51 = vshll.u32 %v11921_v57, 16 }
 0x1d8   : > { %v1090_v35 = vsel %vm11325_vm10, %v928_v43, %v1089_v15  ;;  %v998_v3 = vld [vmem:[#allocation2 + $0x2c] sm:$0x1]  ;;  %v4217_v43 = vor.u32 %v4216_v30, %v4212_v27  ;;  %v11933_v13 = vld [vmem:[%s11283_s17 + $0x20] sm:$0xf]  ;;  %vm15388_vm0 = vcmask 57344  }
 0x1d9   : > { %1091 = vst [vmem:[#allocation2 + $0xc8] sm:$0x1] %v1090_v35  ;;  %v2477_v35 = vrot.slane %v11811_v7, 4 }
 0x1da   : > { %v4218_v24 = vrot.slane %v4217_v43, 4  ;;  %v734_v43 = vshrl.u32 %v632_v40, 16 }
 0x1db   : > { %2685 = vrot.lane.b32.xlu0 %v2469_v17, %s10849_s29  ;;  %v406_v17 = vsel %vm11364_vm11, 0, %v405_v49  ;;  %v2488_v49 = vshrl.u32 %v11880_v8, 16  ;;  %v991_v23 = vld [vmem:[#allocation2 + $0x20] sm:$0x1] }
 0x1dc   : > { %407 = vst [vmem:[#allocation2 + $0x30] sm:$0x1] %v406_v17  ;;  %v4223_v44 = vsel %vm11523_vm4, %v4218_v24, %v4222_v60  ;;  %v992_v18 = vsel %vm11325_vm10, %v690_v22, %v991_v23  ;;  %v980_v41 = vld [vmem:[#allocation2 + $0xc] sm:$0xf] }
 0x1dd   : > { %v11919_v0 = vunpack.c.l.b16 %v4223_v44  ;;  %993 = vst [vmem:[#allocation2 + $0x20] sm:$0x1] %v992_v18  ;;  %v981_v30 = vsel %vm11408_vm13, %v663_v9, %v980_v41  ;;  %v11943_v22 = vrot.slane %v2488_v49, 7  ;;  %v627_v9 = vld [vmem:[%s11283_s17 + $0x10] sm:$0xf] }
 0x1de   : > { %982 = vst [vmem:[#allocation2 + $0xc] sm:$0xf] %v981_v30  ;;  %v692_v44 = vshrl.u32 %v627_v9, 16  ;;  %v3870_v18 = vld [vmem:[#allocation2 + $0xc0] sm:$0xf] }
 0x1df   : > { %v2813_v30 = vld [vmem:[#allocation2 + $0x18] sm:$0xf] }
 0x1e0   : > { %v694_v41 = vrot.slane %v692_v44, 7  ;;  %v11978_v44 = vld [vmem:[#allocation2 + $0xb4] sm:$0xe] }
 0x1e3   : > { %2687 = vrot.lane.b32.xlu0 %v2476_v38, %s10849_s29  ;;  %v999_v38 = vsel %vm11325_vm10, %v707_v16, %v998_v3  ;;  %v1001_v6 = vld [vmem:[#allocation2 + $0x30] sm:$0xf]  ;;  %v4208_v16 = vrot.slane %v4207_v19, 4  ;;  %v2496_v3 = vshrl.u32 %v11889_v52, 16  ;;  %v673_v19 = vrot.slane %v11829_v20, 4 }
 0x1e4   : > { %1000 = vst [vmem:[#allocation2 + $0x2c] sm:$0x1] %v999_v38  ;;  %v1002_v15 = vsel %vm11408_vm13, %v714_v36, %v1001_v6  ;;  %v452_v38 = vld [vmem:[#allocation2 + $0x14] sm:$0x1]  ;;  %v4225_v36 = vshrl.u32 %v3868_v25, 16  ;;  %v726_v6 = vshrl.u32 %v11933_v13, 16 }
 0x1e5   : > { %1003 = vst [vmem:[#allocation2 + $0x30] sm:$0xf] %v1002_v15  ;;  %v4213_v58 = vsel %vm11523_vm4, %v4208_v16, %v4212_v27  ;;  %v453_v62 = vsel %vm11306_vm8, 0, %v452_v38  ;;  %v2915_v27 = vld [vmem:[#allocation2 + $0xc8] sm:$0x1]  ;;  %v737_v15 = vshll.u32 %v632_v40, 16 }
 0x1e6   : > { %v11914_v12 = vunpack.c.l.b16 %v4213_v58  ;;  %454 = vst [vmem:[#allocation2 + $0x14] sm:$0x1] %v453_v62  ;;  %v4238_v16 = vshrl.u32 %v11921_v57, 16  ;;  %v4227_v24 = vrot.slane %v4225_v36, 4  ;;  %v4230_v20 = vrot.slane %v4228_v10, 5 }
 0x1e7   : > { %v11946_v58 = vrot.slane %v726_v6, 7  ;;  %v11948_v25 = vrot.slane %v734_v43, 7  ;;  %v11957_v36 = vld [vmem:[#allocation2 + $0xbc] sm:$0x1]  ;;  %v402_v10 = vld [vmem:[#allocation2 + $0x24] sm:$0x1]  ;;  %v2484_v6 = vor.u32 %v2482_v33, %v11875_v55 }
 0x1e8   : > { %v703_v40 = vshll.u32 %v11843_v2, 16  ;;  %v4231_v43 = vor.u32 %v4230_v20, %v4227_v24  ;;  %v403_v2 = vsel %vm11364_vm11, 0, %v402_v10  ;;  %v695_v24 = vshll.u32 %v627_v9, 16 }
 0x1e9   : > { %v732_v23 = vrot.slane %v11946_v58, 4  ;;  %v739_v49 = vor.u32 %v737_v15, %v11948_v25  ;;  %404 = vst [vmem:[#allocation2 + $0x24] sm:$0x1] %v403_v2  ;;  %v4249_v20 = vshrl.u32 %v3870_v18, 16  ;;  %v10184_v10 = vrot.slane %v11978_v44, 9 }
 0x1ed   : > { %v984_v38 = vld [vmem:[#allocation2 + $0x14] sm:$0x1] }
 0x1f1   : > { %v11846_v4 = vpop.permute.xlu2 %4578 }
 0x1f9   : > { %v2666_v46 = vpop.permute.xlu2 %2665 }
 0x1fa   : > { %2816 = vst.msk [vmem:[#allocation2 + $0x1c] sm:$0xf] %vm2801_vm2, %v2666_v46  ;;  %v10734_v46 = vld [vmem:[#allocation2 + $0x6c] sm:$0xff] }
 0x201   : > { %v4657_v50 = vpop.permute.xlu1 %4656  ;;  %v11905_v17 = vpop.permute.xlu2 %4660 }
 0x205   : > { %v4577_v26 = vpop.permute.xlu0 %4576 }
 0x206   : > { %v4698_v48 = vsel %vm1125_vm1, %v10734_v46, %v4577_v26  ;;  %v11951_v46 = vrot.slane %v4234_v51, 5  ;;  %v985_v26 = vsel %vm11325_vm10, %v673_v19, %v984_v38  ;;  %v740_v19 = vsel %vm11150_vm5, %v732_v23, %v739_v49  ;;  %v2824_v51 = vld [vmem:[#allocation2 + $0x2c] sm:$0x1] }
 0x207   : > { %v4737_v32 = vsel %vm3804_vm6, %v4698_v48, %v4657_v50  ;;  %v4240_v48 = vrot.slane %v4238_v16, 4  ;;  %986 = vst [vmem:[#allocation2 + $0x14] sm:$0x1] %v985_v26  ;;  %v11988_v49 = vrot.slane %v4231_v43, 4 }
 0x208   : > { %10265 = vmatmul.msk.bf16.vlgmr.msrb.gmra.mxu2 %vm4765_vm9, %v4737_v32  ;;  %v11960_v32 = vrot.slane %v2496_v3, 7  ;;  %1011 = vst.msk [vmem:[#allocation2 + $0x40] sm:$0xf] %vm503_vm12, %v740_v19  ;;  %v4244_v3 = vshll.u32 %v11957_v36, 16 }
 0x209   : > { %v2752_v29 = vpop.permute.xlu1 %2751  ;;  %v2660_v60 = vpop.permute.xlu2 %2659  ;;  %v4241_v38 = vor.u32 %v4240_v48, %v11951_v46 }
 0x20a   : > { %v2916_v50 = vsel %vm11428_vm15, %v2752_v29, %v2915_v27  ;;  %2807 = vst.msk [vmem:[#allocation2 + $0x10] sm:$0xf] %vm2801_vm2, %v2660_v60  ;;  %v10735_v27 = vld [vmem:[#allocation2 + $0x78] sm:$0xff]  ;;  %v698_v29 = vrot.slane %v694_v41, 4  ;;  %v705_v60 = vor.u32 %v703_v40, %v11850_v28  ;;  %v11990_v48 = vrot.slane %v4244_v3, 5 }
 0x20b   : > { %2917 = vst [vmem:[#allocation2 + $0xc8] sm:$0x1] %v2916_v50  ;;  %v4701_v15 = vsel %vm1125_vm1, %v10735_v27, %v11846_v4  ;;  %v11973_v50 = vld [vmem:[#allocation2 + $0x1c] sm:$0xf]  ;;  %v4252_v4 = vshll.u32 %v3870_v18, 16  ;;  %v11993_v18 = vrot.slane %v4241_v38, 4  ;;  %v697_v40 = vor.u32 %v695_v24, %v694_v41 }
 0x20c   : > { %v5082_v26 = vshll.u32 %v11973_v50, 16  ;;  %v5086_v23 = vshrl.u32 %v11973_v50, 16  ;;  %v4436_v27 = vrot.slane %v11921_v57, 5  ;;  %v2827_v3 = vld [vmem:[#allocation2 + $0x30] sm:$0xf]  ;;  %v5522_v7 = vrot.slane %v11973_v50, 5 }
 0x20d   : > { %v2750_v62 = vpop.permute.xlu0 %2749  ;;  %v12003_v43 = vrot.slane %v4252_v4, 5  ;;  %v994_v38 = vld [vmem:[#allocation2 + $0x24] sm:$0xf] }
 0x20e   : > { %2914 = vst.msk [vmem:[#allocation2 + $0xc4] sm:$0xf] %vm2801_vm2, %v2750_v62  ;;  %v706_v62 = vsel %vm11150_vm5, %v698_v29, %v705_v60  ;;  %v12001_v29 = vrot.slane %v4249_v20, 4  ;;  %v12008_v60 = vrot.slane %v5082_v26, 5  ;;  %v12010_v2 = vrot.slane %v5086_v23, 4 }
 0x20f   : > { %997 = vst.msk [vmem:[#allocation2 + $0x28] sm:$0xf] %vm503_vm12, %v706_v62  ;;  %v995_v62 = vsel %vm11408_vm13, %v697_v40, %v994_v38  ;;  %v12030_v26 = vsel %vm11150_vm5, %v2477_v35, %v2484_v6  ;;  %v4237_v40 = vsel %vm11523_vm4, %v11988_v49, %v11951_v46  ;;  %v12043_v35 = vrot.slane %v4436_v27, 4 }
 0x210   : > { %996 = vst [vmem:[#allocation2 + $0x24] sm:$0xf] %v995_v62  ;;  %v4247_v46 = vsel %vm11523_vm4, %v11993_v18, %v11990_v48  ;;  %v12051_v49 = vpack.c.bf16 %v11085_v61, %v11085_v61  ;;  %v12065_v61 = vld [vmem:[#allocation2 + $0x38] sm:$0x1] }
 0x211   : > { %v2664_v16 = vpop.permute.xlu1 %2663  ;;  %v2674_v53 = vpop.permute.xlu2 %2673  ;;  %v12014_v41 = vld [vmem:[#allocation2 + $0x10] sm:$0xf]  ;;  %v12077_v11 = vunpack.c.l.b16 %v4247_v46  ;;  %v12092_v46 = vsel %vm11507_vm7, %v10184_v10, %v4436_v27  ;;  %v715_v27 = vrot.slane %v11869_v63, 4 }
 0x212   : > { %v2814_v33 = vsel %vm11447_vm3, %v2664_v16, %v2813_v30  ;;  %v2825_v28 = vsel %vm11428_vm15, %v2674_v53, %v2824_v51  ;;  %v4439_v30 = vrot.slane %v11957_v36, 5  ;;  %v10852_v51 = vmov 0   ;;  %v2817_v16 = vld [vmem:[#allocation2 + $0x20] sm:$0x1] }
 0x213   : > { %2815 = vst [vmem:[#allocation2 + $0x18] sm:$0xf] %v2814_v33  ;;  %v3898_v53 = vshll.u32 %v12014_v41, 16  ;;  %v3902_v33 = vshrl.u32 %v12014_v41, 16  ;;  %v15391_v36 = vshll.u32 %v11933_v13, 16 }
 0x214   : > { %2826 = vst [vmem:[#allocation2 + $0x2c] sm:$0x1] %v2825_v28 }
 0x215   : > { %v4659_v9 = vpop.permute.xlu0 %4658  ;;  %382 = vst.msk [vmem:[#allocation2] sm:$0xf] %vm381_vm14, %v10852_v51  ;;  %v12039_v38 = vrot.slane %v3898_v53, 5  ;;  %v10736_v53 = vld [vmem:[#allocation2 + $0x84] sm:$0xff]  ;;  %v12063_v48 = vrot.slane %v3902_v33, 4 }
 0x216   : > { %v4739_v19 = vsel %vm3804_vm6, %v4701_v15, %v4659_v9  ;;  %383 = vst.msk [vmem:[#allocation2 + $0x4] sm:$0xf] %vm381_vm14, %v10852_v51  ;;  %v2803_v9 = vld [vmem:[#allocation2 + $0xc] sm:$0xf] }
 0x217   : > { %385 = vst.msk [vmem:[#allocation2 + $0x8] sm:$0x1] %vm15388_vm0, %v10852_v51 }
 0x218   : > { %10266 = vmatmul.msk.bf16.gmra.mxu2 %vm4765_vm9, %v4739_v19  ;;  %387 = vst.msk [vmem:[#allocation2 + $0xcc] sm:$0xf] %vm381_vm14, %v10852_v51 }
 0x219   : > { %v2668_v15 = vpop.permute.xlu1 %2667  ;;  %v2676_v24 = vpop.permute.xlu2 %2675  ;;  %388 = vst.msk [vmem:[#allocation2 + $0xd0] sm:$0xf] %vm381_vm14, %v10852_v51  ;;  %vm15389_vm14 = vcmask 24576  }
 0x21a   : > { %v2818_v20 = vsel %vm11428_vm15, %v2668_v15, %v2817_v16  ;;  %v5456_v4 = vld [vmem:[#allocation2 + $0x18] sm:$0xe]  ;;  %v2828_v23 = vsel %vm11447_vm3, %v2676_v24, %v2827_v3  ;;  %389 = vst.msk [vmem:[#allocation2 + $0xd4] sm:$0x1] %vm15388_vm0, %v10852_v51  ;;  %vm15390_vm0 = vmmov %vm15389_vm14 }
 0x21b   : > { %v5024_v28 = vld [vmem:[#allocation2 + $0x18] sm:$0xf]  ;;  %2819 = vst [vmem:[#allocation2 + $0x20] sm:$0x1] %v2818_v20  ;;  %v10293_v15 = vrot.slane %v5456_v4, 9  ;;  %v5089_v4 = vor.u32 %v12010_v2, %v12008_v60 }
 0x21c   : > { %v5073_v19 = vshrl.u32 %v5024_v28, 16  ;;  %v5076_v16 = vshll.u32 %v5024_v28, 16  ;;  %2829 = vst [vmem:[#allocation2 + $0x30] sm:$0xf] %v2828_v23  ;;  %v393_v20 = vld [vmem:[#allocation2] sm:$0x1] }
 0x21d   : > { %v2658_v6 = vpop.permute.xlu0 %2657  ;;  %v394_v28 = vsel %vm11364_vm11, 0, %v393_v20  ;;  %v12059_v62 = vld [vmem:[#allocation2 + $0x4] sm:$0xf]  ;;  %v630_v20 = vld [vmem:[%s11283_s17 + $0x1c] sm:$0xf] }
 0x21e   : > { %v5075_v3 = vrot.slane %v5073_v19, 4  ;;  %v5078_v24 = vrot.slane %v5076_v16, 5  ;;  %v2804_v50 = vsel %vm11447_vm3, %v2658_v6, %v2803_v9  ;;  %v449_v23 = vld [vmem:[#allocation2 + $0x8] sm:$0x1]  ;;  %v2979_v9 = vshll.u32 %v12059_v62, 16 }
 0x21f   : > { %2805 = vst [vmem:[#allocation2 + $0xc] sm:$0xf] %v2804_v50  ;;  %v2983_v2 = vshrl.u32 %v12059_v62, 16  ;;  %v12069_v19 = vunpack.c.l.b16 %v4237_v40  ;;  %v5523_v6 = vsel %vm11507_vm7, %v10293_v15, %v5522_v7  ;;  %v450_v33 = vsel %vm11306_vm8, 0, %v449_v23 }
 0x220   : > { %v5079_v18 = vor.u32 %v5078_v24, %v5075_v3  ;;  %395 = vst [vmem:[#allocation2] sm:$0x1] %v394_v28  ;;  %v12079_v50 = vrot.slane %v2979_v9, 5  ;;  %v717_v40 = vshrl.u32 %v630_v20, 16  ;;  %v5524_v15 = vrot.slane %v5522_v7, 4 }
 0x221   : > { %v4581_v3 = vpop.permute.xlu1 %4580  ;;  %451 = vst [vmem:[#allocation2 + $0x8] sm:$0x1] %v450_v33  ;;  %v2985_v42 = vrot.slane %v2983_v2, 4  ;;  %v12081_v47 = vpop.permute.xlu2 %4584  ;;  %v5090_v28 = vrot.slane %v5089_v4, 4  ;;  %v5776_v9 = vunpack.c.l.b16 %v5523_v6 }
 0x222   : > { %v5080_v24 = vrot.slane %v5079_v18, 4  ;;  %v4704_v45 = vsel %vm1125_vm1, %v10736_v53, %v4581_v3  ;;  %v5056_v37 = vld [vmem:[#allocation2 + $0x20] sm:$0x1]  ;;  %504 = vst.msk [vmem:[#allocation3] sm:$0xf] %vm503_vm12, %v10852_v51  ;;  %v462_v53 = vsel %vm11306_vm8, 0, %v12065_v61 }
 0x223   : > { %v2810_v18 = vld [vmem:[#allocation2 + $0x14] sm:$0x1]  ;;  %v5525_v23 = vrot.slane %v5056_v37, 5  ;;  %505 = vst.msk [vmem:[#allocation3 + $0x4] sm:$0xf] %vm503_vm12, %v10852_v51  ;;  %v5092_v44 = vshll.u32 %v5056_v37, 16  ;;  %v2986_v10 = vor.u32 %v2985_v42, %v12079_v50  ;;  %v4741_v2 = vsel %vm3804_vm6, %v4704_v45, %v11905_v17 }
 0x224   : > { %v5085_v57 = vsel %vm11523_vm4, %v5080_v24, %v12008_v60  ;;  %507 = vst.msk [vmem:[#allocation3 + $0x8] sm:$0x1] %vm15389_vm14, %v10852_v51  ;;  %v12114_v61 = vrot.slane %v717_v40, 7  ;;  %v720_v37 = vshll.u32 %v630_v20, 16  ;;  %v408_v60 = vld [vmem:[#allocation2 + $0x3c] sm:$0x1] }
 0x225   : > { %v2662_v4 = vpop.permute.xlu0 %2661  ;;  %v5526_v6 = vsel %vm11507_vm7, %v5524_v15, %v5525_v23  ;;  %509 = vst.msk [vmem:[#allocation3 + $0xcc] sm:$0xf] %vm503_vm12, %v10852_v51  ;;  %v5094_v3 = vrot.slane %v5092_v44, 5  ;;  %v2987_v63 = vrot.slane %v2986_v10, 4  ;;  %v12120_v45 = vld [vmem:[#allocation2 + $0xc4] sm:$0xf]  ;;  %v5696_v24 = vunpack.c.l.b16 %v5085_v57 }
 0x226   : > { %v2811_v42 = vsel %vm11428_vm15, %v2662_v4, %v2810_v18  ;;  %v5777_v33 = vunpack.c.l.b16 %v5526_v6  ;;  %510 = vst.msk [vmem:[#allocation3 + $0xd0] sm:$0xf] %vm503_vm12, %v10852_v51  ;;  %v3840_v17 = vld [vmem:[#allocation2 + $0xc] sm:$0xf]  ;;  %v722_v20 = vor.u32 %v720_v37, %v12114_v61  ;;  %vm15398_vm14 = vcmask 1043456  }
 0x227   : > { %2812 = vst [vmem:[#allocation2 + $0x14] sm:$0x1] %v2811_v42  ;;  %v2918_v15 = vld [vmem:[#allocation2] sm:$0xf]  ;;  %v3889_v23 = vshrl.u32 %v3840_v17, 16  ;;  %v3892_v40 = vshll.u32 %v3840_v17, 16  ;;  %v5095_v18 = vsel %vm11523_vm4, %v5090_v28, %v5094_v3 }
 0x228   : > { %10267 = vmatmul.msk.bf16.gmra.mxu2 %vm4765_vm9, %v4741_v2  ;;  %v5808_v7 = vpack.c.b16 %v5777_v33, %v5776_v9  ;;  %v12126_v44 = vld [vmem:[#allocation2 + $0x8] sm:$0x1]  ;;  %v2970_v10 = vshrl.u32 %v2918_v15, 16  ;;  %v2973_v4 = vshll.u32 %v2918_v15, 16  ;;  %511 = vst.msk [vmem:[#allocation3 + $0xd4] sm:$0x1] %vm15390_vm0, %v10852_v51  ;;  %v5697_v57 = vunpack.c.l.b16 %v5095_v18  ;;  %vm15399_vm0 = vmmov %vm15398_vm14 }
 0x229   : > { %v2672_v6 = vpop.permute.xlu1 %2671  ;;  %v2989_v42 = vshll.u32 %v12126_v44, 16  ;;  %v3891_v17 = vrot.slane %v3889_v23, 4  ;;  %v3894_v16 = vrot.slane %v3892_v40, 5  ;;  %463 = vst [vmem:[#allocation2 + $0x38] sm:$0x1] %v462_v53  ;;  %v2684_v37 = vpop.permute.xlu2 %2683  ;;  %v723_v2 = vsel %vm11150_vm5, %v715_v27, %v722_v20 }
 0x22a   : > { %2823 = vst.msk [vmem:[#allocation2 + $0x28] sm:$0xf] %vm2801_vm2, %v2672_v6  ;;  %5824 = vrot.lane.b32.xlu2 %v5808_v7, %s10850_s18  ;;  %v2972_v28 = vrot.slane %v2970_v10, 4  ;;  %v2975_v9 = vrot.slane %v2973_v4, 5  ;;  %v409_v51 = vsel %vm11364_vm11, 0, %v408_v60  ;;  %v5728_v33 = vpack.c.b16 %v5697_v57, %v5696_v24 }
 0x22b   : > { %2837 = vst.msk [vmem:[#allocation2 + $0x40] sm:$0xf] %vm2801_vm2, %v2684_v37  ;;  %v2820_v3 = vld [vmem:[#allocation2 + $0x24] sm:$0xf]  ;;  %v2991_v15 = vrot.slane %v2989_v42, 5  ;;  %v3895_v23 = vor.u32 %v3894_v16, %v3891_v17  ;;  %v4258_v53 = vshll.u32 %v12120_v45, 16  ;;  %v4255_v18 = vor.u32 %v12003_v43, %v12001_v29 }
 0x22c   : > { %v2976_v40 = vor.u32 %v2975_v9, %v2972_v28  ;;  %1004 = vst.msk [vmem:[#allocation2 + $0x34] sm:$0xf] %vm503_vm12, %v723_v2  ;;  %v12140_v7 = vld [vmem:[#allocation2 + $0xc8] sm:$0x1]  ;;  %v4262_v27 = vshrl.u32 %v12120_v45, 16  ;;  %v12150_v60 = vsel %vm11507_vm7, %v12043_v35, %v4439_v30  ;;  %5744 = vrot.lane.b32.xlu1 %v5728_v33, %s10851_s19  ;;  %v724_v10 = vrot.slane %v12114_v61, 4 }
 0x22d   : > { %v2670_v16 = vpop.permute.xlu0 %2669  ;;  %v2992_v24 = vsel %vm11523_vm4, %v2987_v63, %v2991_v15  ;;  %v3896_v20 = vrot.slane %v3895_v23, 4  ;;  %v4338_v29 = vrot.slane %v12014_v41, 5  ;;  %410 = vst [vmem:[#allocation2 + $0x3c] sm:$0x1] %v409_v51  ;;  %v731_v43 = vor.u32 %v15391_v36, %v11946_v58  ;;  %v4272_v6 = vld [vmem:[#allocation2 + $0xc] sm:$0xe] }
 0x22e   : > { %v2821_v30 = vsel %vm11447_vm3, %v2670_v16, %v2820_v3  ;;  %v2977_v35 = vrot.slane %v2976_v40, 4  ;;  %v3872_v4 = vld [vmem:[#allocation2 + $0x14] sm:$0x1]  ;;  %v12162_v57 = vrot.slane %v4258_v53, 5  ;;  %v3597_v63 = vunpack.c.l.b16 %v2992_v24 }
 0x22f   : > { %2822 = vst [vmem:[#allocation2 + $0x24] sm:$0xf] %v2821_v30  ;;  %v15392_v61 = vor.u32 %v12063_v48, %v12039_v38  ;;  %v3908_v41 = vshll.u32 %v3872_v4, 16  ;;  %v4268_v17 = vshll.u32 %v12140_v7, 16  ;;  %v3901_v58 = vsel %vm11523_vm4, %v3896_v20, %v12039_v38  ;;  %v10737_v16 = vld [vmem:[#allocation2 + $0x90] sm:$0xff] }
 0x230   : > { %v2982_v13 = vsel %vm11523_vm4, %v2977_v35, %v12079_v50  ;;  %v1005_v37 = vld [vmem:[#allocation2 + $0x38] sm:$0x1]  ;;  %v4341_v28 = vrot.slane %v3872_v4, 5  ;;  %v4264_v9 = vrot.slane %v4262_v27, 4  ;;  %v10170_v3 = vrot.slane %v4272_v6, 9 }
 0x231   : > { %v3906_v42 = vrot.slane %v15392_v61, 4  ;;  %v4663_v2 = vpop.permute.xlu1 %4662  ;;  %v3596_v51 = vunpack.c.l.b16 %v2982_v13  ;;  %v3910_v33 = vrot.slane %v3908_v41, 5  ;;  %v1006_v48 = vsel %vm11325_vm10, %v724_v10, %v1005_v37  ;;  %v12176_v15 = vld [vmem:[#allocation2 + $0x28] sm:$0xf]  ;;  %v464_v10 = vld [vmem:[#allocation2 + $0x44] sm:$0x1] }
 0x232   : > { %1007 = vst [vmem:[#allocation2 + $0x38] sm:$0x1] %v1006_v48  ;;  %v4340_v23 = vrot.slane %v4338_v29, 4  ;;  %v4265_v50 = vor.u32 %v4264_v9, %v12162_v57  ;;  %v4620_v53 = vunpack.c.l.b16 %v12092_v46  ;;  %v4621_v38 = vunpack.c.l.b16 %v12150_v60  ;;  %v3353_v61 = vld [vmem:[#allocation2] sm:$0xe] }
 0x233   : > { %v3628_v40 = vpack.c.b16 %v3597_v63, %v3596_v51  ;;  %v3911_v27 = vsel %vm11523_vm4, %v3906_v42, %v3910_v33  ;;  %v4512_v24 = vunpack.c.l.b16 %v3901_v58  ;;  %v5529_v20 = vrot.slane %v12176_v15, 5  ;;  %v12195_v13 = vld [vmem:[#allocation2 + $0x2c] sm:$0x1] }
 0x234   : > { %v4513_v36 = vunpack.c.l.b16 %v3911_v27  ;;  %v4342_v30 = vsel %vm11507_vm7, %v4340_v23, %v4341_v28  ;;  %v1008_v35 = vld [vmem:[#allocation2 + $0x3c] sm:$0xf]  ;;  %v4266_v4 = vrot.slane %v4265_v50, 4  ;;  %v4270_v6 = vrot.slane %v4268_v17, 5 }
 0x235   : > { %3644 = vrot.lane.b32.xlu2 %v3628_v40, %s10851_s19  ;;  %v15393_v46 = vpack.c.b16 %v11919_v0, %v11914_v12  ;;  %v4583_v60 = vpop.permute.xlu0 %4582  ;;  %v4339_v63 = vsel %vm11507_vm7, %v10170_v3, %v4338_v29  ;;  %v1009_v42 = vsel %vm11408_vm13, %v731_v43, %v1008_v35  ;;  %v4256_v41 = vrot.slane %v4255_v18, 4  ;;  %v12213_v3 = vld [vmem:[#allocation2 + $0xc0] sm:$0xe] }
 0x236   : > { %v5531_v17 = vrot.slane %v5529_v20, 4  ;;  %v4707_v58 = vsel %vm1125_vm1, %v10737_v16, %v4583_v60  ;;  %v4544_v37 = vpack.c.b16 %v4513_v36, %v4512_v24  ;;  %1010 = vst [vmem:[#allocation2 + $0x3c] sm:$0xf] %v1009_v42  ;;  %v4271_v12 = vsel %vm11523_vm4, %v4266_v4, %v4270_v6  ;;  %v5457_v43 = vld [vmem:[#allocation2 + $0x24] sm:$0xe] }
 0x237   : > { %4586 = vrot.lane.b32.xlu1 %v15393_v46, %s10851_s19  ;;  %v465_v0 = vsel %vm11306_vm8, 0, %v464_v10  ;;  %v4743_v29 = vsel %vm3804_vm6, %v4707_v58, %v4663_v2  ;;  %v4593_v28 = vunpack.c.l.b16 %v4342_v30  ;;  %v10090_v18 = vrot.slane %v3353_v61, 9  ;;  %v12229_v24 = vld [vmem:[#allocation2 + $0x10] sm:$0xf]  ;;  %v10738_v10 = vld [vmem:[#allocation2 + $0x9c] sm:$0xff] }
 0x238   : > { %v3422_v9 = vrot.slane %v12059_v62, 5  ;;  %466 = vst [vmem:[#allocation2 + $0x44] sm:$0x1] %v465_v0  ;;  %10268 = vmatmul.msk.bf16.gmra.mxu2 %vm4765_vm9, %v4743_v29  ;;  %4560 = vrot.lane.b32.xlu0 %v4544_v37, %s10851_s19  ;;  %v4558_v51 = vpack.c.b16 %v12077_v11, %v12069_v19  ;;  %v12210_v33 = vpack.c.b16 %v4621_v38, %v4620_v53  ;;  %v5532_v48 = vrot.slane %v12195_v13, 5  ;;  %v2920_v11 = vld [vmem:[#allocation2 + $0xc] sm:$0xf] }
 0x239   : > { %v2494_v2 = vrot.slane %v11943_v22, 4  ;;  %v741_v23 = vrot.slane %v11948_v25, 4  ;;  %v2831_v50 = vld [vmem:[#allocation2 + $0x38] sm:$0x1]  ;;  %v2680_v62 = vpop.permute.xlu1 %2679  ;;  %v4592_v40 = vunpack.c.l.b16 %v4339_v63  ;;  %v4261_v16 = vsel %vm11523_vm4, %v4256_v41, %v12162_v57  ;;  %v5026_v60 = vld [vmem:[#allocation2 + $0x24] sm:$0xf] }
 0x23a   : > { %v12220_v27 = vunpack.c.l.b16 %v4271_v12  ;;  %v2832_v19 = vsel %vm11428_vm15, %v2680_v62, %v2831_v50  ;;  %v10294_v53 = vrot.slane %v5457_v43, 9  ;;  %v12226_v38 = vsel %vm11507_vm7, %v5531_v17, %v5532_v48  ;;  %v12252_v12 = vld [vmem:[#allocation2 + $0x14] sm:$0x1] }
 0x23b   : > { %v4443_v25 = vrot.slane %v12120_v45, 5  ;;  %2833 = vst [vmem:[#allocation2 + $0x38] sm:$0x1] %v2832_v19  ;;  %v4624_v36 = vpack.c.b16 %v4593_v28, %v4592_v40  ;;  %v12233_v57 = vsel %vm11507_vm7, %v10090_v18, %v3422_v9  ;;  %v3424_v30 = vrot.slane %v3422_v9, 4  ;;  %v411_v9 = vld [vmem:[#allocation2 + $0x48] sm:$0x1] }
 0x23c   : > { %v3425_v35 = vrot.slane %v12126_v44, 5  ;;  %v4542_v4 = vunpack.c.l.b16 %v4261_v16  ;;  %v10185_v6 = vrot.slane %v12213_v3, 9  ;;  %v2994_v61 = vshrl.u32 %v2920_v11, 16 }
 0x23d   : > { %v2997_v46 = vshll.u32 %v2920_v11, 16  ;;  %v4710_v45 = vsel %vm1125_vm1, %v10738_v10, %v12081_v47  ;;  %4640 = vrot.lane.b32.xlu2 %v4624_v36, %s10850_s18  ;;  %v2678_v63 = vpop.permute.xlu0 %2677  ;;  %v5779_v42 = vunpack.c.l.b16 %v12226_v38  ;;  %v3003_v41 = vshll.u32 %v12229_v24, 16  ;;  %v2834_v0 = vld [vmem:[#allocation2 + $0x3c] sm:$0xf] }
 0x23e   : > { %v3007_v44 = vshrl.u32 %v12229_v24, 16  ;;  %2830 = vst.msk [vmem:[#allocation2 + $0x34] sm:$0xf] %vm2801_vm2, %v2678_v63  ;;  %v4559_v17 = vpack.c.b16 %v12220_v27, %v4542_v4  ;;  %v5530_v47 = vsel %vm11507_vm7, %v10294_v53, %v5529_v20  ;;  %v3676_v58 = vunpack.c.l.b16 %v12233_v57 }
 0x23f   : > { %2689 = vrot.lane.b32.xlu1 %v12030_v26, %s10849_s29  ;;  %v1012_v37 = vld [vmem:[#allocation2 + $0x44] sm:$0x1]  ;;  %v4445_v26 = vrot.slane %v4443_v25, 4  ;;  %v3426_v29 = vsel %vm11507_vm7, %v3424_v30, %v3425_v35  ;;  %v4446_v43 = vrot.slane %v12140_v7, 5  ;;  %v5097_v18 = vshrl.u32 %v5026_v60, 16 }
 0x240   : > { %v1013_v28 = vsel %vm11325_vm10, %v741_v23, %v1012_v37  ;;  %4588 = vrot.lane.b32.xlu0 %v4558_v51, %s10851_s19  ;;  %v2996_v20 = vrot.slane %v2994_v61, 4  ;;  %v2999_v48 = vrot.slane %v2997_v46, 5  ;;  %v5100_v3 = vshll.u32 %v5026_v60, 16  ;;  %v633_v23 = vld [vmem:[%s11283_s17 + $0x28] sm:$0xf] }
 0x241   : > { %1014 = vst [vmem:[#allocation2 + $0x44] sm:$0x1] %v1013_v28  ;;  %v5106_v50 = vshll.u32 %v12176_v15, 16  ;;  %v2682_v62 = vpop.permute.xlu1 %2681  ;;  %v12261_v40 = vrot.slane %v3003_v41, 5  ;;  %v3009_v16 = vrot.slane %v3007_v44, 4  ;;  %v5099_v27 = vrot.slane %v5097_v18, 4 }
 0x242   : > { %v5110_v11 = vshrl.u32 %v12176_v15, 16  ;;  %v2835_v7 = vsel %vm11447_vm3, %v2682_v62, %v2834_v0  ;;  %v4447_v51 = vsel %vm11507_vm7, %v4445_v26, %v4446_v43  ;;  %v5102_v19 = vrot.slane %v5100_v3, 5  ;;  %v3842_v61 = vld [vmem:[#allocation2 + $0x18] sm:$0xf]  ;;  %v3873_v62 = vld [vmem:[#allocation2 + $0x20] sm:$0x1] }
 0x243   : > { %v12269_v53 = vrot.slane %v5106_v50, 5  ;;  %2836 = vst [vmem:[#allocation2 + $0x3c] sm:$0xf] %v2835_v7  ;;  %v5778_v38 = vunpack.c.l.b16 %v5530_v47  ;;  %v3013_v10 = vshll.u32 %v12252_v12, 16  ;;  %v412_v57 = vsel %vm11364_vm11, 0, %v411_v9 }
 0x244   : > { %v5112_v36 = vrot.slane %v5110_v11, 4  ;;  %v4444_v15 = vsel %vm11507_vm7, %v10185_v6, %v4443_v25  ;;  %v5103_v30 = vor.u32 %v5102_v19, %v5099_v27  ;;  %413 = vst [vmem:[#allocation2 + $0x48] sm:$0x1] %v412_v57  ;;  %v743_v35 = vshrl.u32 %v633_v23, 16 }
 0x245   : > { %v746_v4 = vshll.u32 %v633_v23, 16  ;;  %4590 = vrot.lane.b32.xlu2 %v4559_v17, %s10851_s19  ;;  %v4665_v46 = vpop.permute.xlu0 %4664  ;;  %v3677_v60 = vunpack.c.l.b16 %v3426_v29  ;;  %v4623_v63 = vunpack.c.l.b16 %v4447_v51  ;;  %v3000_v41 = vor.u32 %v2999_v48, %v2996_v20 }
 0x246   : > { %v3010_v44 = vor.u32 %v3009_v16, %v12261_v40  ;;  %v4745_v47 = vsel %vm3804_vm6, %v4710_v45, %v4665_v46  ;;  %v5113_v25 = vor.u32 %v5112_v36, %v12269_v53  ;;  %v5116_v6 = vshll.u32 %v12195_v13, 16  ;;  %v3843_v13 = vld [vmem:[#allocation2 + $0x1c] sm:$0xf] }
 0x247   : > { %4668 = vrot.lane.b32.xlu1 %v12210_v33, %s10850_s18  ;;  %v12283_v37 = vrot.slane %v743_v35, 7  ;;  %v4622_v26 = vunpack.c.l.b16 %v4444_v15  ;;  %v3015_v0 = vrot.slane %v3013_v10, 5  ;;  %v15394_v17 = vshll.u32 %v11889_v52, 16  ;;  %v4273_v52 = vld [vmem:[#allocation2 + $0x18] sm:$0xe] }
 0x248   : > { %v3913_v28 = vshrl.u32 %v3842_v61, 16  ;;  %v15395_v29 = vrot.slane %v11875_v55, 4  ;;  %10269 = vmatmul.msk.bf16.gmra.mxu2 %vm4765_vm9, %v4745_v47  ;;  %v5809_v45 = vpack.c.b16 %v5779_v42, %v5778_v38  ;;  %v5104_v43 = vrot.slane %v5103_v30, 4  ;;  %v2838_v16 = vld [vmem:[#allocation2 + $0x44] sm:$0x1] }
 0x249   : > { %v2501_v33 = vor.u32 %v15394_v17, %v11960_v32  ;;  %v748_v18 = vor.u32 %v746_v4, %v12283_v37  ;;  %v3916_v9 = vshll.u32 %v3842_v61, 16  ;;  %v3708_v20 = vpack.c.b16 %v3677_v60, %v3676_v58  ;;  %v12300_v15 = vld [vmem:[#allocation2 + $0x34] sm:$0xf] }
 0x24a   : > { %2691 = vrot.lane.b32.xlu0 %v15395_v29, %s10849_s29  ;;  %v4639_v48 = vpack.c.b16 %v4623_v63, %v4622_v26  ;;  %v3001_v3 = vrot.slane %v3000_v41, 4  ;;  %v3011_v50 = vrot.slane %v3010_v44, 4  ;;  %v5114_v27 = vrot.slane %v5113_v25, 4 }
 0x24b   : > { %v5118_v11 = vrot.slane %v5116_v6, 5  ;;  %v3915_v23 = vrot.slane %v3913_v28, 4  ;;  %v3918_v55 = vrot.slane %v3916_v9, 5  ;;  %v1015_v42 = vld [vmem:[#allocation2 + $0x48] sm:$0xf]  ;;  %v4345_v51 = vrot.slane %v3843_v13, 5 }
 0x24c   : > { %v3016_v7 = vsel %vm11523_vm4, %v3011_v50, %v3015_v0  ;;  %v3922_v19 = vshll.u32 %v3843_v13, 16  ;;  %v3926_v38 = vshrl.u32 %v3843_v13, 16  ;;  %v5109_v58 = vsel %vm11523_vm4, %v5104_v43, %v12269_v53  ;;  %v12323_v43 = vld [vmem:[#allocation2 + $0x38] sm:$0x1] }
 0x24d   : > { %v1016_v10 = vsel %vm11408_vm13, %v748_v18, %v1015_v42  ;;  %v10171_v36 = vrot.slane %v4273_v52, 9  ;;  %v3932_v57 = vshll.u32 %v3873_v62, 16  ;;  %5826 = vrot.lane.b32.xlu2 %v5809_v45, %s10850_s18  ;;  %v2686_v30 = vpop.permute.xlu0 %2685  ;;  %v3006_v35 = vsel %vm11523_vm4, %v3001_v3, %v12261_v40  ;;  %v5458_v18 = vld [vmem:[#allocation2 + $0x30] sm:$0xe]  ;;  %v12334_v52 = vld [vmem:[#allocation2 + $0x1c] sm:$0xf] }
 0x24e   : > { %1017 = vst [vmem:[#allocation2 + $0x48] sm:$0xf] %v1016_v10  ;;  %v4348_v4 = vrot.slane %v3873_v62, 5  ;;  %v12307_v61 = vrot.slane %v3922_v19, 5  ;;  %v3928_v53 = vrot.slane %v3926_v38, 4  ;;  %v2839_v46 = vsel %vm11428_vm15, %v2686_v30, %v2838_v16 }
 0x24f   : > { %3724 = vrot.lane.b32.xlu1 %v3708_v20, %s10850_s18  ;;  %v3599_v60 = vunpack.c.l.b16 %v3016_v7  ;;  %v5119_v63 = vsel %vm11523_vm4, %v5114_v27, %v5118_v11  ;;  %v3919_v41 = vor.u32 %v3918_v55, %v3915_v23  ;;  %2840 = vst [vmem:[#allocation2 + $0x44] sm:$0x1] %v2839_v46  ;;  %v5698_v44 = vunpack.c.l.b16 %v5109_v58  ;;  %v2922_v62 = vld [vmem:[#allocation2 + $0x18] sm:$0xf]  ;;  %v3354_v23 = vld [vmem:[#allocation2 + $0xc] sm:$0xe] }
 0x250   : > { %v4347_v47 = vrot.slane %v4345_v51, 4  ;;  %v3929_v25 = vor.u32 %v3928_v53, %v12307_v61  ;;  %v5536_v40 = vrot.slane %v12300_v15, 5  ;;  %v3598_v6 = vunpack.c.l.b16 %v3006_v35  ;;  %v5028_v10 = vld [vmem:[#allocation2 + $0x30] sm:$0xf] }
 0x251   : > { %v15396_v26 = vshll.u32 %v11880_v8, 16  ;;  %v4346_v17 = vsel %vm11507_vm7, %v10171_v36, %v4345_v51  ;;  %v3934_v28 = vrot.slane %v3932_v57, 5  ;;  %v5699_v29 = vunpack.c.l.b16 %v5119_v63  ;;  %v12358_v63 = vld [vmem:[#allocation2 + $0x20] sm:$0x1] }
 0x252   : > { %4670 = vrot.lane.b32.xlu0 %v4639_v48, %s10850_s18  ;;  %v4349_v45 = vsel %vm11507_vm7, %v4347_v47, %v4348_v4  ;;  %v15397_v13 = vshrl.u32 %v11899_v5, 16  ;;  %v2513_v20 = vshrl.u32 %v12051_v49, 16  ;;  %v3629_v48 = vpack.c.b16 %v3599_v60, %v3598_v6  ;;  %v10375_v60 = vld [vmem:[%s15344_s4 + $0x20] sm:$0xf] }
 0x253   : > { %v2493_v0 = vor.u32 %v15396_v26, %v11943_v22  ;;  %v2502_v8 = vsel %vm11150_vm5, %v2494_v2, %v2501_v33  ;;  %v3920_v3 = vrot.slane %v3919_v41, 4  ;;  %v3930_v50 = vrot.slane %v3929_v25, 4 }
 0x254   : > { %v12327_v9 = vrot.slane %v15397_v13, 7  ;;  %v5729_v16 = vpack.c.b16 %v5699_v29, %v5698_v44  ;;  %v4594_v27 = vunpack.c.l.b16 %v4346_v17  ;;  %v5538_v11 = vrot.slane %v5536_v40, 4 }
 0x255   : > { %v3429_v55 = vrot.slane %v12229_v24, 5  ;;  %v2841_v7 = vld [vmem:[#allocation2 + $0x48] sm:$0xf]  ;;  %v4595_v42 = vunpack.c.l.b16 %v4349_v45  ;;  %v3935_v51 = vsel %vm11523_vm4, %v3930_v50, %v3934_v28  ;;  %v10295_v22 = vrot.slane %v5458_v18, 9  ;;  %3646 = vrot.lane.b32.xlu2 %v3629_v48, %s10851_s19  ;;  %v2688_v2 = vpop.permute.xlu0 %2687 }
 0x256   : > { %v5539_v19 = vrot.slane %v12323_v43, 5  ;;  %v3432_v33 = vrot.slane %v12252_v12, 5  ;;  %v3018_v38 = vshrl.u32 %v2922_v62, 16  ;;  %v3027_v58 = vshll.u32 %v12334_v52, 16 }
 0x257   : > { %5746 = vrot.lane.b32.xlu1 %v5729_v16, %s10851_s19  ;;  %v3031_v24 = vshrl.u32 %v12334_v52, 16  ;;  %v2842_v36 = vsel %vm11447_vm3, %v2688_v2, %v2841_v7  ;;  %v3925_v57 = vsel %vm11523_vm4, %v3920_v3, %v12307_v61  ;;  %v10091_v30 = vrot.slane %v3354_v23, 9  ;;  %v3845_v16 = vld [vmem:[#allocation2 + $0x28] sm:$0xf] }
 0x258   : > { %v3021_v35 = vshll.u32 %v2922_v62, 16  ;;  %2843 = vst [vmem:[#allocation2 + $0x48] sm:$0xf] %v2842_v36  ;;  %v4515_v4 = vunpack.c.l.b16 %v3935_v51  ;;  %v5537_v12 = vsel %vm11507_vm7, %v10295_v22, %v5536_v40  ;;  %v5540_v53 = vsel %vm11507_vm7, %v5538_v11, %v5539_v19  ;;  %v3844_v11 = vld [vmem:[#allocation2 + $0x24] sm:$0xf] }
 0x259   : > { %v3431_v46 = vrot.slane %v3429_v55, 4  ;;  %v5121_v61 = vshrl.u32 %v5028_v10, 16  ;;  %v5124_v41 = vshll.u32 %v5028_v10, 16  ;;  %v5130_v44 = vshll.u32 %v12300_v15, 16 }
 0x25a   : > { %2693 = vrot.lane.b32.xlu0 %v2493_v0, %s10849_s29  ;;  %v5134_v47 = vshrl.u32 %v12300_v15, 16  ;;  %v3020_v40 = vrot.slane %v3018_v38, 4  ;;  %v12364_v6 = vrot.slane %v3027_v58, 5  ;;  %v3033_v26 = vrot.slane %v3031_v24, 4 }
 0x25b   : > { %v3433_v25 = vsel %vm11507_vm7, %v3431_v46, %v3432_v33  ;;  %v3023_v17 = vrot.slane %v3021_v35, 5  ;;  %v12366_v28 = vrot.slane %v5130_v44, 5  ;;  %v5945_v0 = vunpack.c.l.b16 %v10375_v60  ;;  %v4274_v33 = vld [vmem:[#allocation2 + $0x24] sm:$0xe]  ;;  %v3874_v60 = vld [vmem:[#allocation2 + $0x2c] sm:$0x1] }
 0x25c   : > { %v5136_v29 = vrot.slane %v5134_v47, 4  ;;  %v4625_v45 = vpack.c.b16 %v4595_v42, %v4594_v27  ;;  %v4514_v18 = vunpack.c.l.b16 %v3925_v57  ;;  %v5780_v13 = vunpack.c.l.b16 %v5537_v12 }
 0x25d   : > { %v3037_v48 = vshll.u32 %v12358_v63, 16  ;;  %v5123_v3 = vrot.slane %v5121_v61, 4  ;;  %v5126_v50 = vrot.slane %v5124_v41, 5  ;;  %v5947_v62 = vpack.c.b16 %v5945_v0, %v5945_v0 }
 0x25e   : > { %v5137_v15 = vor.u32 %v5136_v29, %v12366_v28  ;;  %4642 = vrot.lane.b32.xlu2 %v4625_v45, %s10850_s18  ;;  %v5781_v23 = vunpack.c.l.b16 %v5540_v53  ;;  %v3430_v7 = vsel %vm11507_vm7, %v10091_v30, %v3429_v55  ;;  %v3679_v27 = vunpack.c.l.b16 %v3433_v25 }
 0x25f   : > { %2695 = vrot.lane.b32.xlu1 %v2502_v8, %s10849_s29  ;;  %v3034_v42 = vor.u32 %v3033_v26, %v12364_v6  ;;  %v4545_v51 = vpack.c.b16 %v4515_v4, %v4514_v18  ;;  %v3024_v22 = vor.u32 %v3023_v17, %v3020_v40  ;;  %v5140_v19 = vshll.u32 %v12323_v43, 16 }
 0x260   : > { %v5982_v2 = vsel %vm15398_vm14, %v5947_v62, 0  ;;  %v3039_v38 = vrot.slane %v3037_v48, 5  ;;  %v4352_v58 = vrot.slane %v3845_v16, 5  ;;  %v3937_v24 = vshrl.u32 %v3844_v11, 16 }
 0x261   : > { %5990 = vmatpush.bf16.msra.mxu2 %v5982_v2  ;;  %v3940_v10 = vshll.u32 %v3844_v11, 16  ;;  %v3678_v8 = vunpack.c.l.b16 %v3430_v7  ;;  %v5127_v36 = vor.u32 %v5126_v50, %v5123_v3  ;;  %v5138_v55 = vrot.slane %v5137_v15, 4  ;;  %v5459_v50 = vld [vmem:[#allocation2 + $0x3c] sm:$0xe]  ;;  %v5031_v11 = vld [vmem:[#allocation2 + $0x40] sm:$0xf] }
 0x262   : > { %4562 = vrot.lane.b32.xlu0 %v4545_v51, %s10851_s19  ;;  %v12380_v57 = vrot.slane %v2513_v20, 7  ;;  %v5810_v30 = vpack.c.b16 %v5781_v23, %v5780_v13  ;;  %v3035_v35 = vrot.slane %v3034_v42, 4  ;;  %v10172_v43 = vrot.slane %v4274_v33, 9  ;;  %v12407_v42 = vld [vmem:[#allocation2 + $0x44] sm:$0x1] }
 0x263   : > { %v3946_v4 = vshll.u32 %v3845_v16, 16  ;;  %v3709_v12 = vpack.c.b16 %v3679_v27, %v3678_v8  ;;  %v3025_v53 = vrot.slane %v3024_v22, 4  ;;  %v5142_v46 = vrot.slane %v5140_v19, 5 }
 0x264   : > { %v3950_v61 = vshrl.u32 %v3845_v16, 16  ;;  %v3040_v41 = vsel %vm11523_vm4, %v3035_v35, %v3039_v38  ;;  %v4354_v44 = vrot.slane %v4352_v58, 4  ;;  %v3939_v47 = vrot.slane %v3937_v24, 4  ;;  %v5030_v24 = vld [vmem:[#allocation2 + $0x3c] sm:$0xf] }
 0x265   : > { %v3942_v25 = vrot.slane %v3940_v10, 5  ;;  %v5128_v40 = vrot.slane %v5127_v36, 4  ;;  %v5143_v20 = vsel %vm11523_vm4, %v5138_v55, %v5142_v46  ;;  %v12386_v26 = vrot.slane %v3946_v4, 5  ;;  %v2924_v35 = vld [vmem:[#allocation2 + $0x24] sm:$0xf] }
 0x266   : > { %v3952_v17 = vrot.slane %v3950_v61, 4  ;;  %5828 = vrot.lane.b32.xlu2 %v5810_v30, %s10850_s18  ;;  %v2503_v29 = vrot.slane %v11960_v32, 4  ;;  %v4353_v0 = vsel %vm11507_vm7, %v10172_v43, %v4352_v58  ;;  %v4355_v45 = vrot.slane %v3874_v60, 5  ;;  %v3355_v30 = vld [vmem:[#allocation2 + $0x18] sm:$0xe] }
 0x267   : > { %3726 = vrot.lane.b32.xlu1 %v3709_v12, %s10850_s18  ;;  %v3030_v18 = vsel %vm11523_vm4, %v3025_v53, %v12364_v6  ;;  %v5133_v13 = vsel %vm11523_vm4, %v5128_v40, %v12366_v28  ;;  %v2508_v48 = vshll.u32 %v11899_v5, 16  ;;  %v2516_v3 = vshll.u32 %v12051_v49, 16 }
 0x268   : > { %v3601_v15 = vunpack.c.l.b16 %v3040_v41  ;;  %v5701_v62 = vunpack.c.l.b16 %v5143_v20  ;;  %v4356_v32 = vsel %vm11507_vm7, %v4354_v44, %v4355_v45  ;;  %v3943_v16 = vor.u32 %v3942_v25, %v3939_v47 }
 0x269   : > { %v4596_v23 = vunpack.c.l.b16 %v4353_v0  ;;  %v2511_v6 = vrot.slane %v12327_v9, 4  ;;  %v2518_v7 = vor.u32 %v2516_v3, %v12380_v57  ;;  %v3953_v28 = vor.u32 %v3952_v17, %v12386_v26 }
 0x26a   : > { %2697 = vrot.lane.b32.xlu0 %v2503_v29, %s10849_s29  ;;  %v3600_v5 = vunpack.c.l.b16 %v3030_v18  ;;  %v5700_v27 = vunpack.c.l.b16 %v5133_v13  ;;  %v3956_v49 = vshll.u32 %v3874_v60, 16  ;;  %v10296_v51 = vrot.slane %v5459_v50, 9 }
 0x26b   : > { %v4597_v22 = vunpack.c.l.b16 %v4356_v32  ;;  %v5543_v19 = vrot.slane %v5031_v11, 5  ;;  %v2510_v38 = vor.u32 %v2508_v48, %v12327_v9  ;;  %v3944_v58 = vrot.slane %v3943_v16, 4  ;;  %v2925_v9 = vld [vmem:[#allocation2 + $0x28] sm:$0xf] }
 0x26c   : > { %v3630_v2 = vpack.c.b16 %v3601_v15, %v3600_v5  ;;  %v5730_v33 = vpack.c.b16 %v5701_v62, %v5700_v27  ;;  %v2519_v8 = vsel %vm11150_vm5, %v2511_v6, %v2518_v7  ;;  %v3954_v36 = vrot.slane %v3953_v28, 4  ;;  %v12431_v62 = vld [vmem:[#allocation2 + $0x34] sm:$0xf]  ;;  %v2953_v5 = vld [vmem:[#allocation2 + $0x2c] sm:$0x1] }
 0x26d   : > { %v4626_v10 = vpack.c.b16 %v4597_v22, %v4596_v23  ;;  %v5546_v55 = vrot.slane %v12407_v42, 5  ;;  %v3958_v43 = vrot.slane %v3956_v49, 5  ;;  %v12417_v4 = vsel %vm11507_vm7, %v10296_v51, %v5543_v19 }
 0x26e   : > { %3648 = vrot.lane.b32.xlu2 %v3630_v2, %s10851_s19  ;;  %v5154_v12 = vshll.u32 %v5031_v11, 16  ;;  %v5158_v53 = vshrl.u32 %v5031_v11, 16  ;;  %v5545_v46 = vrot.slane %v5543_v19, 4  ;;  %v3436_v60 = vrot.slane %v12334_v52, 5  ;;  %v3356_v52 = vld [vmem:[#allocation2 + $0x24] sm:$0xe] }
 0x26f   : > { %5748 = vrot.lane.b32.xlu1 %v5730_v33, %s10851_s19  ;;  %v5145_v61 = vshrl.u32 %v5030_v24, 16  ;;  %v5148_v41 = vshll.u32 %v5030_v24, 16  ;;  %v3949_v44 = vsel %vm11523_vm4, %v3944_v58, %v12386_v26  ;;  %v10092_v47 = vrot.slane %v3355_v30, 9 }
 0x270   : > { %v3042_v25 = vshrl.u32 %v2924_v35, 16  ;;  %v3045_v40 = vshll.u32 %v2924_v35, 16  ;;  %v3959_v20 = vsel %vm11523_vm4, %v3954_v36, %v3958_v43  ;;  %v5547_v17 = vsel %vm11507_vm7, %v5545_v46, %v5546_v55 }
 0x271   : > { %v3439_v29 = vrot.slane %v12358_v63, 5  ;;  %v3443_v0 = vrot.slane %v2925_v9, 5  ;;  %v12429_v45 = vrot.slane %v5154_v12, 5  ;;  %v5160_v18 = vrot.slane %v5158_v53, 4 }
 0x272   : > { %2699 = vrot.lane.b32.xlu0 %v2510_v38, %s10849_s29  ;;  %v3051_v13 = vshll.u32 %v2925_v9, 16  ;;  %v3055_v26 = vshrl.u32 %v2925_v9, 16  ;;  %v4516_v48 = vunpack.c.l.b16 %v3949_v44  ;;  %v3438_v3 = vrot.slane %v3436_v60, 4 }
 0x273   : > { %v5147_v50 = vrot.slane %v5145_v61, 4  ;;  %v5150_v15 = vrot.slane %v5148_v41, 5  ;;  %v10093_v32 = vrot.slane %v3356_v52, 9  ;;  %v5164_v16 = vshll.u32 %v12407_v42, 16  ;;  %v3846_v42 = vld [vmem:[#allocation2 + $0x30] sm:$0xf] }
 0x274   : > { %v3044_v11 = vrot.slane %v3042_v25, 4  ;;  %v3047_v23 = vrot.slane %v3045_v40, 5  ;;  %v4517_v6 = vunpack.c.l.b16 %v3959_v20  ;;  %v5783_v63 = vunpack.c.l.b16 %v5547_v17  ;;  %v3875_v20 = vld [vmem:[#allocation2 + $0x38] sm:$0x1]  ;;  %v12454_v52 = vld [vmem:[#allocation2 + $0x34] sm:$0xf] }
 0x275   : > { %v3437_v7 = vsel %vm11507_vm7, %v10092_v47, %v3436_v60  ;;  %v3440_v28 = vsel %vm11507_vm7, %v3438_v3, %v3439_v29  ;;  %v5161_v27 = vor.u32 %v5160_v18, %v12429_v45  ;;  %v3053_v49 = vrot.slane %v3051_v13, 5 }
 0x276   : > { %4644 = vrot.lane.b32.xlu2 %v4626_v10, %s10850_s18  ;;  %v3057_v51 = vrot.slane %v3055_v26, 4  ;;  %v3970_v22 = vshll.u32 %v12431_v62, 16  ;;  %v4546_v19 = vpack.c.b16 %v4517_v6, %v4516_v48  ;;  %v3445_v2 = vrot.slane %v3443_v0, 4 }
 0x277   : > { %2701 = vrot.lane.b32.xlu1 %v2519_v8, %s10849_s29  ;;  %v5151_v33 = vor.u32 %v5150_v15, %v5147_v50  ;;  %v3974_v38 = vshrl.u32 %v12431_v62, 16  ;;  %v3681_v58 = vunpack.c.l.b16 %v3440_v28  ;;  %v3446_v24 = vrot.slane %v2953_v5, 5 }
 0x278   : > { %v5166_v36 = vrot.slane %v5164_v16, 5  ;;  %v3048_v55 = vor.u32 %v3047_v23, %v3044_v11  ;;  %v3961_v10 = vshrl.u32 %v3846_v42, 16  ;;  %v3964_v8 = vshll.u32 %v3846_v42, 16  ;;  %v2926_v11 = vld [vmem:[#allocation2 + $0x30] sm:$0xf] }
 0x279   : > { %v12444_v30 = vrot.slane %v3970_v22, 5  ;;  %v3976_v35 = vrot.slane %v3974_v38, 4  ;;  %v5782_v43 = vunpack.c.l.b16 %v12417_v4  ;;  %v3680_v9 = vunpack.c.l.b16 %v3437_v7 }
 0x27a   : > { %4564 = vrot.lane.b32.xlu0 %v4546_v19, %s10851_s19  ;;  %v5162_v12 = vrot.slane %v5161_v27, 4  ;;  %v3058_v53 = vor.u32 %v3057_v51, %v3053_v49  ;;  %v3444_v46 = vsel %vm11507_vm7, %v10093_v32, %v3443_v0  ;;  %v3447_v60 = vsel %vm11507_vm7, %v3445_v2, %v3446_v24 }
 0x27b   : > { %v5152_v61 = vrot.slane %v5151_v33, 4  ;;  %v3061_v41 = vshll.u32 %v2953_v5, 16  ;;  %v5811_v44 = vpack.c.b16 %v5783_v63, %v5782_v43  ;;  %v3710_v47 = vpack.c.b16 %v3681_v58, %v3680_v9  ;;  %v4275_v58 = vld [vmem:[#allocation2 + $0x30] sm:$0xe] }
 0x27c   : > { %v5167_v25 = vsel %vm11523_vm4, %v5162_v12, %v5166_v36  ;;  %v3049_v40 = vrot.slane %v3048_v55, 4  ;;  %v3963_v17 = vrot.slane %v3961_v10, 4  ;;  %v3966_v4 = vrot.slane %v3964_v8, 5  ;;  %v12477_v10 = vld [vmem:[#allocation2 + $0x38] sm:$0x1] }
 0x27d   : > { %v3977_v29 = vor.u32 %v3976_v35, %v12444_v30  ;;  %v2520_v0 = vrot.slane %v12380_v57, 4  ;;  %v3682_v18 = vunpack.c.l.b16 %v3444_v46  ;;  %v3683_v13 = vunpack.c.l.b16 %v3447_v60  ;;  %v12482_v46 = vpop.permute.xlu2 %4666 }
 0x27e   : > { %5830 = vrot.lane.b32.xlu2 %v5811_v44, %s10850_s18  ;;  %v3059_v26 = vrot.slane %v3058_v53, 4  ;;  %v5157_v48 = vsel %vm11523_vm4, %v5152_v61, %v12429_v45  ;;  %v5703_v3 = vunpack.c.l.b16 %v5167_v25  ;;  %v3063_v50 = vrot.slane %v3061_v41, 5 }
 0x27f   : > { %3728 = vrot.lane.b32.xlu1 %v3710_v47, %s10850_s18  ;;  %v3980_v15 = vshll.u32 %v3875_v20, 16  ;;  %v3054_v32 = vsel %vm11523_vm4, %v3049_v40, %v3053_v49  ;;  %v4359_v16 = vrot.slane %v12431_v62, 5  ;;  %v3075_v23 = vshll.u32 %v12454_v52, 16  ;;  %v12487_v40 = vld [vmem:[#allocation2 + $0x40] sm:$0xf] }
 0x280   : > { %v3079_v57 = vshrl.u32 %v12454_v52, 16  ;;  %v3967_v6 = vor.u32 %v3966_v4, %v3963_v17  ;;  %v3978_v63 = vrot.slane %v3977_v29, 4  ;;  %v3711_v7 = vpack.c.b16 %v3683_v13, %v3682_v18  ;;  %v12489_v17 = vld [vmem:[#allocation2 + $0x40] sm:$0xf]  ;;  %v2928_v29 = vld [vmem:[#allocation2 + $0x3c] sm:$0xf] }
 0x281   : > { %v5702_v28 = vunpack.c.l.b16 %v5157_v48  ;;  %v3064_v45 = vsel %vm11523_vm4, %v3059_v26, %v3063_v50  ;;  %v3602_v5 = vunpack.c.l.b16 %v3054_v32  ;;  %v3982_v27 = vrot.slane %v3980_v15, 5  ;;  %v12495_v48 = vld [vmem:[#allocation2 + $0x44] sm:$0x1] }
 0x282   : > { %2703 = vrot.lane.b32.xlu0 %v2520_v0, %s10849_s29  ;;  %v3066_v51 = vshrl.u32 %v2926_v11, 16  ;;  %v3069_v49 = vshll.u32 %v2926_v11, 16  ;;  %v4361_v62 = vrot.slane %v4359_v16, 4  ;;  %v3077_v22 = vrot.slane %v3075_v23, 5  ;;  %v634_v11 = vld [vmem:[%s11283_s17 + $0x2c] sm:$0xf] }
 0x283   : > { %v5731_v42 = vpack.c.b16 %v5703_v3, %v5702_v28  ;;  %v3081_v19 = vrot.slane %v3079_v57, 4  ;;  %v3603_v2 = vunpack.c.l.b16 %v3064_v45  ;;  %v3968_v33 = vrot.slane %v3967_v6, 4  ;;  %v3839_v23 = vld [vmem:[%s15344_s4 + $0x8] sm:$0xf]  ;;  %v4276_v6 = vld [vmem:[#allocation2 + $0x3c] sm:$0xe] }
 0x284   : > { %v3983_v38 = vsel %vm11523_vm4, %v3978_v63, %v3982_v27  ;;  %v4362_v24 = vrot.slane %v3875_v20, 5  ;;  %v3068_v8 = vrot.slane %v3066_v51, 4  ;;  %v3071_v35 = vrot.slane %v3069_v49, 5 }
 0x285   : > { %v3631_v36 = vpack.c.b16 %v3603_v2, %v3602_v5  ;;  %v3973_v55 = vsel %vm11523_vm4, %v3968_v33, %v12444_v30  ;;  %v4519_v43 = vunpack.c.l.b16 %v3983_v38  ;;  %v10173_v9 = vrot.slane %v4275_v58, 9  ;;  %v12509_v57 = vpop.permute.xlu2 %5824  ;;  %v2955_v2 = vld [vmem:[#allocation2 + $0x44] sm:$0x1] }
 0x286   : > { %3730 = vrot.lane.b32.xlu2 %v3711_v7, %s10850_s18  ;;  %v4363_v12 = vsel %vm11507_vm7, %v4361_v62, %v4362_v24  ;;  %v3082_v53 = vor.u32 %v3081_v19, %v3077_v22  ;;  %v4518_v60 = vunpack.c.l.b16 %v3973_v55  ;;  %v3085_v30 = vshll.u32 %v12477_v10, 16 }
 0x287   : > { %5750 = vrot.lane.b32.xlu1 %v5731_v42, %s10851_s19  ;;  %v4360_v61 = vsel %vm11507_vm7, %v10173_v9, %v4359_v16  ;;  %v4599_v41 = vunpack.c.l.b16 %v4363_v12  ;;  %v3072_v44 = vor.u32 %v3071_v35, %v3068_v8  ;;  %v4366_v13 = vrot.slane %v12487_v40, 5  ;;  %v10759_v16 = vld [vmem:[%s15344_s4 + $0x18] sm:$0xff]  ;;  %v5038_v9 = vld [vmem:[#allocation2 + $0x6c] sm:$0xf]  ;;  %v3358_v12 = vld [vmem:[#allocation2 + $0x3c] sm:$0xe] }
 0x288   : > { %v4547_v47 = vpack.c.b16 %v4519_v43, %v4518_v60  ;;  %v3083_v25 = vrot.slane %v3082_v53, 4  ;;  %v4598_v20 = vunpack.c.l.b16 %v4360_v61  ;;  %v3087_v4 = vrot.slane %v3085_v30, 5  ;;  %5991 = vmatpush.bf16.msra.mxu2 %v10759_v16  ;;  %v12528_v30 = vld [vmem:[#allocation2 + $0x70] sm:$0xf] }
 0x289   : > { %v3073_v18 = vrot.slane %v3072_v44, 4  ;;  %v3099_v3 = vshll.u32 %v12489_v17, 16  ;;  %v3103_v50 = vshrl.u32 %v12489_v17, 16  ;;  %v3090_v32 = vshrl.u32 %v2928_v29, 16 }
 0x28a   : > { %3650 = vrot.lane.b32.xlu0 %v3631_v36, %s10851_s19  ;;  %v4627_v0 = vpack.c.b16 %v4599_v41, %v4598_v20  ;;  %v3088_v26 = vsel %vm11523_vm4, %v3083_v25, %v3087_v4  ;;  %v3093_v63 = vshll.u32 %v2928_v29, 16  ;;  %v751_v7 = vshrl.u32 %v634_v11, 16  ;;  %v2936_v41 = vld [vmem:[#allocation2 + $0x6c] sm:$0xf]  ;;  %v12530_v4 = vld [vmem:[#allocation2 + $0x70] sm:$0xf] }
 0x28b   : > { %v3078_v15 = vsel %vm11523_vm4, %v3073_v18, %v3077_v22  ;;  %v754_v28 = vshll.u32 %v634_v11, 16  ;;  %v4895_v45 = vunpack.c.l.b16 %v3839_v23  ;;  %v3605_v5 = vunpack.c.l.b16 %v3088_v26 }
 0x28c   : > { %v4368_v27 = vrot.slane %v4366_v13, 4  ;;  %v4369_v51 = vrot.slane %v12495_v48, 5  ;;  %v749_v49 = vrot.slane %v12283_v37, 4  ;;  %v12513_v42 = vrot.slane %v751_v7, 7 }
 0x28d   : > { %v4897_v62 = vpack.c.b16 %v4895_v45, %v4895_v45  ;;  %v3604_v22 = vunpack.c.l.b16 %v3078_v15  ;;  %v10174_v19 = vrot.slane %v4276_v6, 9  ;;  %v12515_v33 = vrot.slane %v3099_v3, 5 }
 0x28e   : > { %v3105_v38 = vrot.slane %v3103_v50, 4  ;;  %v3092_v58 = vrot.slane %v3090_v32, 4  ;;  %v3095_v24 = vrot.slane %v3093_v63, 5  ;;  %v756_v36 = vor.u32 %v754_v28, %v12513_v42 }
 0x28f   : > { %4566 = vrot.lane.b32.xlu1 %v4547_v47, %s10851_s19  ;;  %v4932_v55 = vsel %vm15399_vm0, %v4897_v62, 0  ;;  %v3632_v8 = vpack.c.b16 %v3605_v5, %v3604_v22  ;;  %v4370_v37 = vsel %vm11507_vm7, %v4368_v27, %v4369_v51  ;;  %v3109_v35 = vshll.u32 %v2955_v2, 16  ;;  %v467_v47 = vld [vmem:[#allocation2 + $0x50] sm:$0x1]  ;;  %v12532_v29 = vpop.permute.xlu2 %3644  ;;  %v10725_v27 = vld [vmem:[%s15344_s4] sm:$0xff] }
 0x290   : > { %4940 = vmatpush.bf16.msrb.mxu1 %v4932_v55  ;;  %10813 = vmatpush.bf16.msrb.mxu3 %v4932_v55  ;;  %v757_v43 = vsel %vm11150_vm5, %v749_v49, %v756_v36  ;;  %v4367_v53 = vsel %vm11507_vm7, %v10174_v19, %v4366_v13  ;;  %v3096_v60 = vor.u32 %v3095_v24, %v3092_v58  ;;  %v4601_v44 = vunpack.c.l.b16 %v4370_v37  ;;  %v12552_v19 = vld [vmem:[#allocation2 + $0x74] sm:$0x1] }
 0x291   : > { %1018 = vst.msk [vmem:[#allocation2 + $0x4c] sm:$0xf] %vm503_vm12, %v757_v43  ;;  %v3106_v61 = vor.u32 %v3105_v38, %v12515_v33  ;;  %v5241_v25 = vshrl.u32 %v5038_v9, 16  ;;  %v5244_v20 = vshll.u32 %v5038_v9, 16  ;;  %v468_v18 = vsel %vm11306_vm8, 0, %v467_v47 }
 0x292   : > { %4646 = vrot.lane.b32.xlu0 %v4627_v0, %s10850_s18  ;;  %v3111_v0 = vrot.slane %v3109_v35, 5  ;;  %v10095_v26 = vrot.slane %v3358_v12, 9  ;;  %v3457_v13 = vrot.slane %v12489_v17, 5  ;;  %v4600_v3 = vunpack.c.l.b16 %v4367_v53  ;;  %469 = vst [vmem:[#allocation2 + $0x50] sm:$0x1] %v468_v18 }
 0x293   : > { %v5250_v50 = vshll.u32 %v12528_v30, 16  ;;  %v3186_v15 = vshrl.u32 %v2936_v41, 16  ;;  %v3189_v32 = vshll.u32 %v2936_v41, 16  ;;  %v3097_v16 = vrot.slane %v3096_v60, 4  ;;  %v2959_v41 = vld [vmem:[#allocation2 + $0x74] sm:$0x1] }
 0x294   : > { %v3107_v11 = vrot.slane %v3106_v61, 4  ;;  %v5254_v23 = vshrl.u32 %v12528_v30, 16  ;;  %v3195_v6 = vshll.u32 %v12530_v4, 16  ;;  %v4628_v63 = vpack.c.b16 %v4601_v44, %v4600_v3  ;;  %4941 = vmatpush.bf16.msrb.mxu1 %v10725_v27  ;;  %10814 = vmatpush.bf16.msrb.mxu3 %v10725_v27  ;;  %v3362_v3 = vld [vmem:[#allocation2 + $0x6c] sm:$0xe] }
 0x295   : > { %v5243_v7 = vrot.slane %v5241_v25, 4  ;;  %v5246_v28 = vrot.slane %v5244_v20, 5  ;;  %v3199_v45 = vshrl.u32 %v12530_v4, 16  ;;  %v3458_v51 = vsel %vm11507_vm7, %v10095_v26, %v3457_v13  ;;  %v5463_v20 = vld [vmem:[#allocation2 + $0x6c] sm:$0xe] }
 0x296   : > { %v3112_v17 = vsel %vm11523_vm4, %v3107_v11, %v3111_v0  ;;  %v3459_v49 = vrot.slane %v3457_v13, 4  ;;  %v3460_v62 = vrot.slane %v2955_v2, 5  ;;  %v758_v22 = vrot.slane %v12513_v42, 4  ;;  %v10739_v0 = vld [vmem:[#allocation2 + $0xa8] sm:$0xff]  ;;  %v5040_v27 = vld [vmem:[#allocation2 + $0x78] sm:$0xf] }
 0x297   : > { %v12554_v38 = vrot.slane %v5250_v50, 5  ;;  %v3188_v58 = vrot.slane %v3186_v15, 4  ;;  %v3191_v24 = vrot.slane %v3189_v32, 5  ;;  %v3102_v36 = vsel %vm11523_vm4, %v3097_v16, %v12515_v33  ;;  %v4641_v47 = vpop.permute.xlu2 %4640 }
 0x298   : > { %v3461_v55 = vsel %vm11507_vm7, %v3459_v49, %v3460_v62  ;;  %v12561_v2 = vrot.slane %v3195_v6, 5  ;;  %v3607_v37 = vunpack.c.l.b16 %v3112_v17  ;;  %v3686_v42 = vunpack.c.l.b16 %v3458_v51  ;;  %v635_v49 = vld [vmem:[%s11283_s17 + $0x30] sm:$0xf] }
 0x299   : > { %v3687_v35 = vunpack.c.l.b16 %v3461_v55  ;;  %v3201_v43 = vrot.slane %v3199_v45, 4  ;;  %v1019_v9 = vld [vmem:[#allocation2 + $0x50] sm:$0x1]  ;;  %v5247_v12 = vor.u32 %v5246_v28, %v5243_v7  ;;  %v5260_v53 = vshll.u32 %v12552_v19, 16 }
 0x29a   : > { %3652 = vrot.lane.b32.xlu0 %v3632_v8, %s10851_s19  ;;  %v5256_v8 = vrot.slane %v5254_v23, 4  ;;  %v3606_v60 = vunpack.c.l.b16 %v3102_v36  ;;  %v1020_v33 = vsel %vm11325_vm10, %v758_v22, %v1019_v9  ;;  %v5571_v44 = vrot.slane %v12528_v30, 5  ;;  %v10726_v7 = vld [vmem:[#allocation2 + $0xc] sm:$0xff] }
 0x29b   : > { %v12566_v61 = vpack.c.b16 %v3687_v35, %v3686_v42  ;;  %1021 = vst [vmem:[#allocation2 + $0x50] sm:$0x1] %v1020_v33  ;;  %v3192_v25 = vor.u32 %v3191_v24, %v3188_v58  ;;  %v3202_v13 = vor.u32 %v3201_v43, %v12561_v2  ;;  %v5262_v15 = vrot.slane %v5260_v53, 5 }
 0x29c   : > { %v3633_v18 = vpack.c.b16 %v3607_v37, %v3606_v60  ;;  %v5257_v26 = vor.u32 %v5256_v8, %v12554_v38  ;;  %v3205_v32 = vshll.u32 %v2959_v41, 16  ;;  %v3485_v16 = vrot.slane %v12530_v4, 5  ;;  %v414_v4 = vld [vmem:[#allocation2 + $0x54] sm:$0x1] }
 0x29d   : > { %v5248_v30 = vrot.slane %v5247_v12, 4  ;;  %v10300_v23 = vrot.slane %v5463_v20, 9  ;;  %v5573_v6 = vrot.slane %v5571_v44, 4  ;;  %v3193_v28 = vrot.slane %v3192_v25, 4 }
 0x29e   : > { %v12541_v5 = vpop.permute.xlu1 %5744  ;;  %v5574_v45 = vrot.slane %v12552_v19, 5  ;;  %v10099_v17 = vrot.slane %v3362_v3, 9  ;;  %v5258_v22 = vrot.slane %v5257_v26, 4  ;;  %v3203_v58 = vrot.slane %v3202_v13, 4 }
 0x29f   : > { %v5253_v62 = vsel %vm11523_vm4, %v5248_v30, %v12554_v38  ;;  %v415_v19 = vsel %vm11364_vm11, 0, %v414_v4  ;;  %v760_v36 = vshrl.u32 %v635_v49, 16  ;;  %v3487_v55 = vrot.slane %v3485_v16, 4  ;;  %v12606_v25 = vpop.permute.xlu2 %4590 }
 0x2a0   : > { %416 = vst [vmem:[#allocation2 + $0x54] sm:$0x1] %v415_v19  ;;  %v763_v37 = vshll.u32 %v635_v49, 16  ;;  %v3198_v38 = vsel %vm11523_vm4, %v3193_v28, %v12561_v2  ;;  %v5575_v42 = vsel %vm11507_vm7, %v5573_v6, %v5574_v45  ;;  %v3207_v43 = vrot.slane %v3205_v32, 5  ;;  %v12602_v2 = vld [vmem:[#allocation2 + $0x7c] sm:$0xf] }
 0x2a1   : > { %v762_v35 = vrot.slane %v760_v36, 7  ;;  %v3488_v9 = vrot.slane %v2959_v41, 5  ;;  %v5265_v12 = vshrl.u32 %v5040_v27, 16  ;;  %v5263_v53 = vsel %vm11523_vm4, %v5258_v22, %v5262_v15  ;;  %v12634_v22 = vld [vmem:[#allocation2 + $0x78] sm:$0xe] }
 0x2a2   : > { %4648 = vrot.lane.b32.xlu0 %v4628_v63, %s10850_s18  ;;  %v12596_v60 = vunpack.c.l.b16 %v5253_v62  ;;  %v3208_v41 = vsel %vm11523_vm4, %v3203_v58, %v3207_v43  ;;  %v5791_v26 = vunpack.c.l.b16 %v5575_v42  ;;  %v5268_v32 = vshll.u32 %v5040_v27, 16 }
 0x2a3   : > { %v12615_v13 = vsel %vm11507_vm7, %v3487_v55, %v3488_v9  ;;  %v765_v3 = vor.u32 %v763_v37, %v762_v35  ;;  %v5278_v30 = vshrl.u32 %v12602_v2, 16  ;;  %v3994_v28 = vshll.u32 %v12487_v40, 16  ;;  %v12642_v55 = vld [vmem:[#allocation2 + $0x78] sm:$0xf] }
 0x2a4   : > { %v3998_v27 = vshrl.u32 %v12487_v40, 16  ;;  %v12628_v4 = vunpack.c.l.b16 %v3208_v41  ;;  %v12632_v62 = vrot.slane %v5265_v12, 4  ;;  %v3695_v19 = vunpack.c.l.b16 %v12615_v13  ;;  %v10740_v40 = vld [vmem:[#allocation2 + $0xb4] sm:$0xff]  ;;  %v12654_v12 = vld [vmem:[#allocation2 + $0x30] sm:$0xe] }
 0x2a5   : > { %v12640_v36 = vrot.slane %v5268_v32, 5  ;;  %vm8509_vm14 = vcmask 97280  }
 0x2a6   : > { %v4000_v41 = vrot.slane %v3998_v27, 4 }
 0x2a9   : > { %v4587_v50 = vpop.permute.xlu1 %4586 }
 0x2aa   : > { %v4713_v11 = vsel %vm1125_vm1, %v10739_v0, %v4587_v50  ;;  %3654 = vrot.lane.b32.xlu0 %v3633_v18, %s10851_s19  ;;  %v4561_v51 = vpop.permute.xlu0 %4560  ;;  %v636_v0 = vld [vmem:[%s11283_s17 + $0x34] sm:$0xf]  ;;  %v12611_v18 = vunpack.c.l.b16 %v3198_v38  ;;  %v12648_v38 = vrot.slane %v5278_v30, 4  ;;  %v12666_v30 = vpop.permute.xlu2 %5826 }
 0x2ab   : > { %v4747_v63 = vsel %vm3804_vm6, %v4713_v11, %v12482_v46  ;;  %v5572_v46 = vsel %vm11507_vm7, %v10300_v23, %v5571_v44  ;;  %v4674_v24 = vsel %vm1125_vm1, %v10726_v7, %v4561_v51  ;;  %v12600_v44 = vsel %vm11507_vm7, %v10099_v17, %v3485_v16  ;;  %v1022_v17 = vld [vmem:[#allocation2 + $0x54] sm:$0xf]  ;;  %v5032_v51 = vld [vmem:[#allocation2 + $0x48] sm:$0xf] }
 0x2ac   : > { %10270 = vmatmul.msk.bf16.gmra.mxu2 %vm4765_vm9, %v4747_v63  ;;  %v4721_v8 = vsel %vm3804_vm6, %v4674_v24, %v4641_v47  ;;  %v5790_v33 = vunpack.c.l.b16 %v5572_v46  ;;  %v12604_v47 = vld [vmem:[#allocation2 + $0x80] sm:$0x1]  ;;  %15400 = vst [vmem:[#allocation9_spill] sm:$0xff] %v12611_v18  ;;  %v768_v50 = vshrl.u32 %v636_v0, 16  ;;  %v771_v15 = vshll.u32 %v636_v0, 16 }
 0x2ad   : > { %10257 = vmatmul.msk.bf16.vlgmr.msrb.gmra.mxu0 %vm4765_vm9, %v4721_v8  ;;  %v12618_v16 = vunpack.c.l.b16 %v5263_v53  ;;  %v5274_v11 = vshll.u32 %v12602_v2, 16  ;;  %v5284_v23 = vshll.u32 %v12604_v47, 16  ;;  %v766_v63 = vrot.slane %v762_v35, 4  ;;  %v3848_v24 = vld [vmem:[#allocation2 + $0x3c] sm:$0xf] }
 0x2ae   : > { %v12623_v7 = vrot.slane %v768_v50, 7  ;;  %v3694_v45 = vunpack.c.l.b16 %v12600_v44  ;;  %v12630_v49 = vpack.c.b16 %v5791_v26, %v5790_v33  ;;  %v1023_v58 = vsel %vm11408_vm13, %v765_v3, %v1022_v17  ;;  %v2845_v3 = vld [vmem:[#allocation2 + $0x50] sm:$0x1] }
 0x2af   : > { %1024 = vst [vmem:[#allocation2 + $0x54] sm:$0xf] %v1023_v58  ;;  %v12646_v37 = vrot.slane %v5274_v11, 5  ;;  %v12650_v42 = vrot.slane %v5284_v23, 5  ;;  %v5169_v35 = vshrl.u32 %v5032_v51, 16  ;;  %v5172_v43 = vshll.u32 %v5032_v51, 16 }
 0x2b0   : > { %15401 = vst [vmem:[#allocation10_spill] sm:$0xff] %v12630_v49  ;;  %v773_v46 = vor.u32 %v771_v15, %v12623_v7  ;;  %v12656_v53 = vrot.slane %v3994_v28, 5  ;;  %v3985_v0 = vshrl.u32 %v3848_v24, 16  ;;  %v10709_v11 = vld [vmem:[#allocation2] sm:$0xff] }
 0x2b1   : > { %v2690_v20 = vpop.permute.xlu1 %2689  ;;  %v5171_v51 = vrot.slane %v5169_v35, 4  ;;  %v5174_v27 = vrot.slane %v5172_v43, 5  ;;  %v12682_v43 = vpack.c.b16 %v3695_v19, %v3694_v45  ;;  %v4004_v45 = vshll.u32 %v12495_v48, 16  ;;  %v417_v48 = vld [vmem:[#allocation2 + $0x60] sm:$0x1] }
 0x2b2   : > { %2844 = vst.msk [vmem:[#allocation2 + $0x4c] sm:$0xf] %vm2801_vm2, %v2690_v20  ;;  %v4589_v6 = vpop.permute.xlu0 %4588  ;;  %v774_v9 = vsel %vm11150_vm5, %v766_v63, %v773_v46  ;;  %v3988_v46 = vshll.u32 %v3848_v24, 16  ;;  %v12675_v26 = vrot.slane %v3985_v0, 4  ;;  %v4001_v8 = vor.u32 %v4000_v41, %v12656_v53 }
 0x2b3   : > { %v4716_v33 = vsel %vm1125_vm1, %v10740_v40, %v4589_v6  ;;  %1025 = vst.msk [vmem:[#allocation2 + $0x58] sm:$0xf] %vm503_vm12, %v774_v9  ;;  %v470_v40 = vld [vmem:[#allocation2 + $0x5c] sm:$0x1]  ;;  %v418_v50 = vsel %vm11364_vm11, 0, %v417_v48 }
 0x2b4   : > { %v471_v35 = vsel %vm11306_vm8, 0, %v470_v40  ;;  %15402 = vst [vmem:[#allocation11_spill] sm:$0xff] %v12682_v43  ;;  %v12690_v63 = vrot.slane %v3988_v46, 5  ;;  %v775_v46 = vrot.slane %v12623_v7, 4 }
 0x2b5   : > { %472 = vst [vmem:[#allocation2 + $0x5c] sm:$0x1] %v471_v35  ;;  %v10741_v35 = vld [vmem:[#allocation2 + $0xc0] sm:$0xff] }
 0x2b6   : > { %419 = vst [vmem:[#allocation2 + $0x60] sm:$0x1] %v418_v50  ;;  %v4719_v7 = vsel %vm1125_vm1, %v10741_v35, %v12606_v25 }
 0x2b9   : > { %v4669_v44 = vpop.permute.xlu1 %4668  ;;  %v5033_v20 = vld [vmem:[#allocation2 + $0x4c] sm:$0xf] }
 0x2ba   : > { %v4749_v13 = vsel %vm3804_vm6, %v4716_v33, %v4669_v44  ;;  %v5178_v23 = vshll.u32 %v5033_v20, 16  ;;  %v5182_v6 = vshrl.u32 %v5033_v20, 16  ;;  %v5460_v33 = vld [vmem:[#allocation2 + $0x48] sm:$0xe]  ;;  %v15355_v44 = vrot.slane %v12454_v52, 5 }
 0x2bb   : > { %v5550_v32 = vrot.slane %v5033_v20, 5  ;;  %v10297_v41 = vrot.slane %v5460_v33, 9  ;;  %v637_v33 = vld [vmem:[%s11283_s17 + $0x38] sm:$0xf]  ;;  %s14747_s17 = scalar_lea.vmem %s15350_s10, %s10704_s15 }
 0x2bc   : > { %10271 = vmatmul.msk.bf16.gmra.mxu2 %vm4765_vm9, %v4749_v13  ;;  %v2692_v17 = vpop.permute.xlu0 %2691  ;;  %v12678_v13 = vld [vmem:[#allocation2 + $0x4c] sm:$0xf]  ;;  %v5180_v0 = vrot.slane %v5178_v23, 5  ;;  %v5184_v28 = vrot.slane %v5182_v6, 4  ;;  %v12699_v23 = vrot.slane %v4001_v8, 4  ;;  %v780_v8 = vshll.u32 %v637_v33, 16 }
 0x2bd   : > { %v2846_v9 = vsel %vm11428_vm15, %v2692_v17, %v2845_v3  ;;  %v3758_v3 = vsel %vm1125_vm1, %v10709_v11, %v12532_v29  ;;  %v4277_v17 = vld [vmem:[#allocation2 + $0x48] sm:$0xe]  ;;  %v4373_v40 = vrot.slane %v12678_v13, 5  ;;  %v12696_v29 = vrot.slane %v15355_v44, 4  ;;  %v1026_v50 = vld [vmem:[#allocation2 + $0x5c] sm:$0x1] }
 0x2be   : > { %2847 = vst [vmem:[#allocation2 + $0x50] sm:$0x1] %v2846_v9  ;;  %v5175_v9 = vor.u32 %v5174_v27, %v5171_v51  ;;  %v3453_v11 = vrot.slane %v12477_v10, 5  ;;  %v5551_v51 = vsel %vm11507_vm7, %v10297_v41, %v5550_v32  ;;  %v10175_v27 = vrot.slane %v4277_v17, 9 }
 0x2bf   : > { %v5185_v20 = vor.u32 %v5184_v28, %v5180_v0  ;;  %v777_v10 = vshrl.u32 %v637_v33, 16  ;;  %v5552_v24 = vrot.slane %v5550_v32, 4  ;;  %v3991_v41 = vor.u32 %v12690_v63, %v12675_v26 }
 0x2c0   : > { %v12711_v17 = vrot.slane %v4004_v45, 5  ;;  %v4374_v48 = vsel %vm11507_vm7, %v10175_v27, %v4373_v40  ;;  %v4375_v32 = vrot.slane %v4373_v40, 4  ;;  %v5784_v58 = vunpack.c.l.b16 %v5551_v51 }
 0x2c1   : > { %v3725_v19 = vpop.permute.xlu1 %3724  ;;  %v5186_v45 = vrot.slane %v5185_v20, 4  ;;  %v1027_v35 = vsel %vm11325_vm10, %v775_v46, %v1026_v50  ;;  %v4602_v49 = vunpack.c.l.b16 %v4374_v48  ;;  %v788_v20 = vshll.u32 %v638_v14, 16  ;;  %v2848_v46 = vld [vmem:[#allocation2 + $0x54] sm:$0xf] }
 0x2c2   : > { %v3806_v6 = vsel %vm3804_vm6, %v3758_v3, %v3725_v19  ;;  %v5176_v3 = vrot.slane %v5175_v9, 4  ;;  %v12715_v19 = vpop.permute.xlu2 %3646  ;;  %v779_v9 = vrot.slane %v777_v10, 7  ;;  %1028 = vst [vmem:[#allocation2 + $0x5c] sm:$0x1] %v1027_v35  ;;  %v785_v10 = vshrl.u32 %v638_v14, 16 }
 0x2c3   : > { %10277 = vmatmul.msk.bf16.vlgmr.msrb.gmra.mxu1 %vm4765_vm9, %v3806_v6  ;;  %v3454_v48 = vsel %vm11507_vm7, %v12696_v29, %v3453_v11  ;;  %v15405_v11 = vrot.slane %v12654_v12, 9  ;;  %v15406_v12 = vor.u32 %v12640_v36, %v12632_v62  ;;  %v15409_v62 = vshrl.u32 %v12642_v55, 16 }
 0x2c4   : > { %v4671_v15 = vpop.permute.xlu0 %4670  ;;  %v5181_v25 = vsel %vm11523_vm4, %v5176_v3, %v5180_v0  ;;  %v782_v44 = vor.u32 %v780_v8, %v779_v9  ;;  %v12733_v3 = vld [vmem:[#allocation2 + $0x7c] sm:$0xf] }
 0x2c5   : > { %v5060_v28 = vld [vmem:[#allocation2 + $0x50] sm:$0x1]  ;;  %v5704_v50 = vunpack.c.l.b16 %v5181_v25  ;;  %v3219_v29 = vshll.u32 %v12733_v3, 16  ;;  %v3212_v36 = vrot.slane %v15409_v62, 4 }
 0x2c6   : > { %v12717_v6 = vld [vmem:[#allocation2 + $0x50] sm:$0x1]  ;;  %v5553_v33 = vrot.slane %v5060_v28, 5  ;;  %v5188_v63 = vshll.u32 %v5060_v28, 16 }
 0x2c7   : > { %v4376_v26 = vrot.slane %v12717_v6, 5 }
 0x2c8   : > { %v5554_v27 = vsel %vm11507_vm7, %v5552_v24, %v5553_v33  ;;  %v5190_v51 = vrot.slane %v5188_v63, 5  ;;  %v783_v24 = vrot.slane %v779_v9, 4  ;;  %v12737_v33 = vrot.slane %v785_v10, 7  ;;  %v5042_v10 = vld [vmem:[#allocation2 + $0x84] sm:$0xf] }
 0x2c9   : > { %v4377_v40 = vsel %vm11507_vm7, %v4375_v32, %v4376_v26  ;;  %v12731_v28 = vpop.permute.xlu1 %5746  ;;  %v5785_v43 = vunpack.c.l.b16 %v5554_v27  ;;  %v3363_v32 = vld [vmem:[#allocation2 + $0x78] sm:$0xe]  ;;  %v4751_v26 = vsel %vm3804_vm6, %v4719_v7, %v4671_v15  ;;  %v1029_v27 = vld [vmem:[#allocation2 + $0x60] sm:$0xf]  ;;  %v12749_v15 = vpop.f32.mrf.mxu2  ;;  %v4007_v7 = vsel %vm11523_vm4, %v12699_v23, %v12711_v17 }
 0x2ca   : > { %v4603_v0 = vunpack.c.l.b16 %v4377_v40  ;;  %v5191_v8 = vsel %vm11523_vm4, %v5186_v45, %v5190_v51  ;;  %v3992_v40 = vrot.slane %v3991_v41, 4  ;;  %v1030_v9 = vsel %vm11408_vm13, %v782_v44, %v1029_v27  ;;  %v12747_v45 = vld [vmem:[#allocation2 + $0x80] sm:$0x1]  ;;  %15403 = vst [vmem:[#allocation12_spill] sm:$0xff] %v12749_v15 }
 0x2cb   : > { %v5812_v63 = vpack.c.b16 %v5785_v43, %v5784_v58  ;;  %v5705_v18 = vunpack.c.l.b16 %v5191_v8  ;;  %v790_v25 = vor.u32 %v788_v20, %v12737_v33  ;;  %1031 = vst [vmem:[#allocation2 + $0x60] sm:$0xf] %v1030_v9  ;;  %v10100_v43 = vrot.slane %v3363_v32, 9 }
 0x2cc   : > { %v4629_v35 = vpack.c.b16 %v4603_v0, %v4602_v49  ;;  %10272 = vmatmul.msk.bf16.gmra.mxu2 %vm4765_vm9, %v4751_v26  ;;  %v2694_v14 = vpop.permute.xlu0 %2693  ;;  %v15404_v44 = vrot.slane %v12454_v52, 5  ;;  %v3223_v51 = vshrl.u32 %v12733_v3, 16  ;;  %v4643_v0 = vpop.permute.xlu2 %4642  ;;  %v3685_v52 = vunpack.c.l.b16 %v3454_v48  ;;  %v12800_v48 = vld [vmem:[#allocation2 + $0x88] sm:$0xf] }
 0x2cd   : > { %v2849_v49 = vsel %vm11447_vm3, %v2694_v14, %v2848_v46  ;;  %5832 = vrot.lane.b32.xlu2 %v5812_v63, %s10850_s18  ;;  %v5732_v58 = vpack.c.b16 %v5705_v18, %v5704_v50  ;;  %v791_v18 = vsel %vm11150_vm5, %v783_v24, %v790_v25  ;;  %v12774_v20 = vrot.slane %v15406_v12, 4 }
 0x2ce   : > { %4650 = vrot.lane.b32.xlu0 %v4629_v35, %s10850_s18  ;;  %2850 = vst [vmem:[#allocation2 + $0x54] sm:$0xf] %v2849_v49  ;;  %v3451_v41 = vsel %vm11507_vm7, %v15405_v11, %v15404_v44  ;;  %v3492_v46 = vrot.slane %v12733_v3, 5  ;;  %v3495_v23 = vrot.slane %v12747_v45, 5  ;;  %v3997_v17 = vsel %vm11523_vm4, %v3992_v40, %v12656_v53  ;;  %v10727_v49 = vld [vmem:[#allocation2 + $0x18] sm:$0xff] }
 0x2cf   : > { %5752 = vrot.lane.b32.xlu1 %v5732_v58, %s10851_s19  ;;  %1032 = vst.msk [vmem:[#allocation2 + $0x64] sm:$0xf] %vm503_vm12, %v791_v18  ;;  %v15407_v8 = vrot.slane %v12602_v2, 5  ;;  %v15408_v50 = vrot.slane %v12634_v22, 9  ;;  %v15410_v32 = vshll.u32 %v12642_v55, 16  ;;  %v3684_v63 = vunpack.c.l.b16 %v3451_v41 }
 0x2d0   : > { %v4521_v35 = vunpack.c.l.b16 %v4007_v7  ;;  %v15411_v53 = vor.u32 %v12648_v38, %v12646_v37  ;;  %v12803_v40 = vrot.slane %v3219_v29, 5  ;;  %v3225_v9 = vrot.slane %v3223_v51, 4  ;;  %v473_v11 = vld [vmem:[#allocation2 + $0x68] sm:$0x1] }
 0x2d1   : > { %v12787_v24 = vsel %vm11507_vm7, %v15408_v50, %v15407_v8  ;;  %v3215_v3 = vrot.slane %v15410_v32, 5  ;;  %v2696_v26 = vpop.permute.xlu1 %2695  ;;  %v15412_v22 = vmov %v15407_v8  ;;  %v5289_v55 = vshrl.u32 %v5042_v10, 16  ;;  %v10743_v8 = vld [vmem:[#allocation2 + $0x18] sm:$0xff]  ;;  %v12819_v32 = vpop.f32.mrf.mxu2 }
 0x2d2   : > { %v12796_v27 = vrot.slane %v15411_v53, 4  ;;  %v5580_v14 = vrot.slane %v15412_v22, 4  ;;  %2851 = vst.msk [vmem:[#allocation2 + $0x58] sm:$0xf] %vm2801_vm2, %v2696_v26  ;;  %v5292_v25 = vshll.u32 %v5042_v10, 16  ;;  %v3712_v58 = vpack.c.b16 %v3685_v52, %v3684_v63 }
 0x2d3   : > { %v4520_v44 = vunpack.c.l.b16 %v3997_v17  ;;  %v5792_v38 = vunpack.c.l.b16 %v12787_v24  ;;  %v12808_v41 = vsel %vm11507_vm7, %v10100_v43, %v3492_v46  ;;  %v474_v7 = vsel %vm11306_vm8, 0, %v473_v11  ;;  %15413 = vst [vmem:[#allocation13_spill] sm:$0xff] %v12819_v32 }
 0x2d4   : > { %v4563_v2 = vpop.permute.xlu0 %4562  ;;  %v3494_v18 = vrot.slane %v3492_v46, 4  ;;  %v3216_v29 = vor.u32 %v3215_v3, %v3212_v36  ;;  %v3229_v51 = vshll.u32 %v12747_v45, 16  ;;  %475 = vst [vmem:[#allocation2 + $0x68] sm:$0x1] %v474_v7  ;;  %v5298_v17 = vshll.u32 %v12800_v48, 16  ;;  %v10710_v3 = vld [vmem:[#allocation2 + $0xc] sm:$0xff] }
 0x2d5   : > { %v4677_v10 = vsel %vm1125_vm1, %v10727_v49, %v4563_v2  ;;  %3732 = vrot.lane.b32.xlu2 %v3712_v58, %s10850_s18  ;;  %v4548_v52 = vpack.c.b16 %v4521_v35, %v4520_v44  ;;  %v5034_v12 = vld [vmem:[#allocation2 + $0x54] sm:$0xf]  ;;  %v5302_v43 = vshrl.u32 %v12800_v48, 16  ;;  %v3226_v62 = vor.u32 %v3225_v9, %v12803_v40  ;;  %v2852_v44 = vld [vmem:[#allocation2 + $0x5c] sm:$0x1] }
 0x2d6   : > { %v4723_v50 = vsel %vm3804_vm6, %v4677_v10, %v4643_v0  ;;  %v5291_v46 = vrot.slane %v5289_v55, 4  ;;  %v5294_v36 = vrot.slane %v5292_v25, 5  ;;  %v5277_v26 = vsel %vm11523_vm4, %v12774_v20, %v12646_v37  ;;  %v12840_v20 = vpop.permute.xlu2 %5828 }
 0x2d7   : > { %4568 = vrot.lane.b32.xlu1 %v4548_v52, %s10851_s19  ;;  %10258 = vmatmul.msk.bf16.gmra.mxu0 %vm4765_vm9, %v4723_v50  ;;  %v5287_v0 = vsel %vm11523_vm4, %v12796_v27, %v12650_v42  ;;  %v15414_v63 = vrot.slane %v12604_v47, 5  ;;  %v5858_v22 = vsel %vm1125_vm1, %v10743_v8, %v12541_v5  ;;  %v5193_v9 = vshrl.u32 %v5034_v12, 16  ;;  %v12859_v52 = vld [vmem:[#allocation2 + $0x8c] sm:$0x1] }
 0x2d8   : > { %v5196_v55 = vshll.u32 %v5034_v12, 16  ;;  %v3217_v25 = vrot.slane %v3216_v29, 4  ;;  %v3761_v37 = vsel %vm1125_vm1, %v10710_v3, %v12715_v19  ;;  %v792_v42 = vrot.slane %v12737_v33, 4  ;;  %v3850_v19 = vld [vmem:[#allocation2 + $0x48] sm:$0xf] }
 0x2d9   : > { %v5582_v35 = vsel %vm11507_vm7, %v5580_v14, %v15414_v63  ;;  %v3727_v49 = vpop.permute.xlu1 %3726  ;;  %v12843_v47 = vld [vmem:[#allocation2 + $0x58] sm:$0xf]  ;;  %v12845_v27 = vrot.slane %v5298_v17, 5  ;;  %v5304_v14 = vrot.slane %v5302_v43, 4  ;;  %v3227_v5 = vrot.slane %v3226_v62, 4 }
 0x2da   : > { %v3808_v58 = vsel %vm3804_vm6, %v3761_v37, %v3727_v49  ;;  %v3231_v11 = vrot.slane %v3229_v51, 5  ;;  %v5295_v2 = vor.u32 %v5294_v36, %v5291_v46  ;;  %v5905_v7 = vsel %vm3804_vm6, %v5858_v22, %v12509_v57  ;;  %v5461_v49 = vld [vmem:[#allocation2 + $0x54] sm:$0xe] }
 0x2db   : > { %10278 = vmatmul.msk.bf16.gmra.mxu1 %vm4765_vm9, %v3808_v58  ;;  %v12851_v29 = vunpack.c.l.b16 %v5277_v26  ;;  %v5793_v33 = vunpack.c.l.b16 %v5582_v35  ;;  %v12857_v10 = vsel %vm11507_vm7, %v3494_v18, %v3495_v23  ;;  %v5195_v12 = vrot.slane %v5193_v9, 4  ;;  %v1033_v8 = vld [vmem:[#allocation2 + $0x68] sm:$0x1] }
 0x2dc   : > { %10380 = vmatmul.msk.bf16.vlgmr.msra.gmra.mxu2 %vm4765_vm9, %v5905_v7  ;;  %v2698_v51 = vpop.permute.xlu0 %2697  ;;  %v5198_v17 = vrot.slane %v5196_v55, 5  ;;  %v5202_v57 = vshll.u32 %v12843_v47, 16  ;;  %v5206_v43 = vshrl.u32 %v12843_v47, 16  ;;  %v1034_v45 = vsel %vm11325_vm10, %v792_v42, %v1033_v8 }
 0x2dd   : > { %v2853_v50 = vsel %vm11428_vm15, %v2698_v51, %v2852_v44  ;;  %v12868_v23 = vunpack.c.l.b16 %v5287_v0  ;;  %v5305_v18 = vor.u32 %v5304_v14, %v12845_v27  ;;  %v3222_v62 = vsel %vm11523_vm4, %v3217_v25, %v12803_v40  ;;  %1035 = vst [vmem:[#allocation2 + $0x68] sm:$0x1] %v1034_v45  ;;  %v12882_v40 = vpop.f32.mrf.mxu2  ;;  %v12894_v44 = vld [vmem:[#allocation2 + $0x84] sm:$0xf] }
 0x2de   : > { %2854 = vst [vmem:[#allocation2 + $0x5c] sm:$0x1] %v2853_v50  ;;  %v3232_v46 = vsel %vm11523_vm4, %v3227_v5, %v3231_v11  ;;  %v12876_v36 = vrot.slane %v5295_v2, 4  ;;  %v5308_v3 = vshll.u32 %v12859_v52, 16  ;;  %v4009_v26 = vshrl.u32 %v3850_v19, 16  ;;  %v12903_v24 = vpop.permute.xlu2 %3648  ;;  %v10744_v45 = vld [vmem:[#allocation2 + $0x24] sm:$0xff] }
 0x2df   : > { %v4012_v63 = vshll.u32 %v3850_v19, 16  ;;  %v4018_v0 = vshll.u32 %v12678_v13, 16  ;;  %v4022_v35 = vshrl.u32 %v12678_v13, 16  ;;  %v5199_v22 = vor.u32 %v5198_v17, %v5195_v12  ;;  %15415 = vst [vmem:[#allocation14_spill] sm:$0xff] %v12882_v40  ;;  %v2855_v5 = vld [vmem:[#allocation2 + $0x60] sm:$0xf] }
 0x2e0   : > { %v5204_v9 = vrot.slane %v5202_v57, 5  ;;  %v5208_v55 = vrot.slane %v5206_v43, 4  ;;  %v12890_v14 = vpack.c.b16 %v5793_v33, %v5792_v38  ;;  %v12892_v58 = vunpack.c.l.b16 %v3222_v62  ;;  %v2930_v2 = vld [vmem:[#allocation2 + $0x48] sm:$0xf] }
 0x2e1   : > { %v12884_v25 = vpop.permute.xlu1 %5748  ;;  %v5306_v13 = vrot.slane %v5305_v18, 4  ;;  %v5557_v11 = vrot.slane %v12843_v47, 5  ;;  %v12897_v7 = vunpack.c.l.b16 %v3232_v46  ;;  %v5301_v19 = vsel %vm11523_vm4, %v12876_v36, %v12845_v27 }
 0x2e2   : > { %15416 = vst [vmem:[#allocation15_spill] sm:$0xff] %v12890_v14  ;;  %v5310_v51 = vrot.slane %v5308_v3, 5  ;;  %v4011_v38 = vrot.slane %v4009_v26, 4  ;;  %v4014_v33 = vrot.slane %v4012_v63, 5  ;;  %v12905_v12 = vrot.slane %v4018_v0, 5  ;;  %v10746_v14 = vld [vmem:[#allocation2 + $0x3c] sm:$0xff] }
 0x2e3   : > { %v4024_v17 = vrot.slane %v4022_v35, 4  ;;  %v10298_v43 = vrot.slane %v5461_v49, 9  ;;  %v5200_v8 = vrot.slane %v5199_v22, 4  ;;  %v5209_v47 = vor.u32 %v5208_v55, %v5204_v9 }
 0x2e4   : > { %v2700_v57 = vpop.permute.xlu0 %2699  ;;  %v3234_v50 = vshrl.u32 %v12894_v44, 16  ;;  %v4028_v27 = vshll.u32 %v12717_v6, 16  ;;  %v3114_v46 = vshrl.u32 %v2930_v2, 16  ;;  %v5311_v36 = vsel %vm11523_vm4, %v5306_v13, %v5310_v51 }
 0x2e5   : > { %v2856_v18 = vsel %vm11447_vm3, %v2700_v57, %v2855_v5  ;;  %v5061_v62 = vld [vmem:[#allocation2 + $0x5c] sm:$0x1]  ;;  %v5558_v3 = vsel %vm11507_vm7, %v10298_v43, %v5557_v11  ;;  %v5559_v26 = vrot.slane %v5557_v11, 4  ;;  %v5861_v35 = vsel %vm1125_vm1, %v10744_v45, %v12731_v28 }
 0x2e6   : > { %2857 = vst [vmem:[#allocation2 + $0x60] sm:$0xf] %v2856_v18  ;;  %v5560_v63 = vrot.slane %v5061_v62, 5  ;;  %v5212_v0 = vshll.u32 %v5061_v62, 16  ;;  %v4015_v22 = vor.u32 %v4014_v33, %v4011_v38  ;;  %v4025_v54 = vor.u32 %v4024_v17, %v12905_v12  ;;  %v10728_v17 = vld [vmem:[#allocation2 + $0x24] sm:$0xff] }
 0x2e7   : > { %v3117_v55 = vshll.u32 %v2930_v2, 16  ;;  %v5205_v49 = vsel %vm11523_vm4, %v5200_v8, %v5204_v9  ;;  %v5210_v13 = vrot.slane %v5209_v47, 4  ;;  %v5786_v57 = vunpack.c.l.b16 %v5558_v3  ;;  %v12932_v9 = vpop.f32.mrf.mxu2  ;;  %v3878_v21 = vld [vmem:[#allocation2 + $0x5c] sm:$0x1] }
 0x2e8   : > { %v5561_v6 = vsel %vm11507_vm7, %v5559_v26, %v5560_v63  ;;  %v5214_v5 = vrot.slane %v5212_v0, 5  ;;  %v4030_v43 = vrot.slane %v4028_v27, 5  ;;  %v3237_v18 = vshll.u32 %v12894_v44, 16  ;;  %15417 = vst [vmem:[#allocation16_spill] sm:$0xff] %v12932_v9  ;;  %v12939_v26 = vld [vmem:[#allocation2 + $0x88] sm:$0xf] }
 0x2e9   : > { %v2702_v51 = vpop.permute.xlu1 %2701  ;;  %v5787_v11 = vunpack.c.l.b16 %v5561_v6  ;;  %v5907_v28 = vsel %vm3804_vm6, %v5861_v35, %v12666_v30  ;;  %v12928_v38 = vunpack.c.l.b16 %v5301_v19  ;;  %v12930_v33 = vunpack.c.l.b16 %v5311_v36  ;;  %v4645_v36 = vpop.permute.xlu2 %4644 }
 0x2ea   : > { %2858 = vst.msk [vmem:[#allocation2 + $0x64] sm:$0xf] %vm2801_vm2, %v2702_v51  ;;  %v5215_v2 = vsel %vm11523_vm4, %v5210_v13, %v5214_v5  ;;  %v5706_v47 = vunpack.c.l.b16 %v5205_v49  ;;  %v4026_v62 = vrot.slane %v4025_v54, 4  ;;  %v4016_v27 = vrot.slane %v4015_v22, 4  ;;  %v10711_v13 = vld [vmem:[#allocation2 + $0x18] sm:$0xff] }
 0x2eb   : > { %v5813_v8 = vpack.c.b16 %v5787_v11, %v5786_v57  ;;  %v5707_v45 = vunpack.c.l.b16 %v5215_v2  ;;  %v12935_v3 = vrot.slane %v3114_v46, 4  ;;  %v12937_v30 = vrot.slane %v3117_v55, 5 }
 0x2ec   : > { %10381 = vmatmul.msk.bf16.gmra.mxu2 %vm4765_vm9, %v5907_v28  ;;  %v4565_v44 = vpop.permute.xlu0 %4564  ;;  %v12941_v19 = vrot.slane %v3234_v50, 4  ;;  %v4031_v35 = vsel %vm11523_vm4, %v4026_v62, %v4030_v43  ;;  %v12947_v22 = vrot.slane %v3237_v18, 5  ;;  %v4021_v50 = vsel %vm11523_vm4, %v4016_v27, %v12905_v12 }
 0x2ed   : > { %v4680_v63 = vsel %vm1125_vm1, %v10728_v17, %v4565_v44  ;;  %5834 = vrot.lane.b32.xlu2 %v5813_v8, %s10850_s18  ;;  %v5733_v0 = vpack.c.b16 %v5707_v45, %v5706_v47  ;;  %v5036_v54 = vld [vmem:[#allocation2 + $0x60] sm:$0xf]  ;;  %v3243_v57 = vshll.u32 %v12939_v26, 16  ;;  %v3247_v11 = vshrl.u32 %v12939_v26, 16 }
 0x2ee   : > { %v2934_v6 = vld [vmem:[#allocation2 + $0x60] sm:$0xf]  ;;  %v4725_v46 = vsel %vm3804_vm6, %v4680_v63, %v4645_v36  ;;  %v5217_v55 = vshrl.u32 %v5036_v54, 16  ;;  %v5220_v49 = vshll.u32 %v5036_v54, 16  ;;  %v4523_v43 = vunpack.c.l.b16 %v4031_v35  ;;  %v2859_v63 = vld [vmem:[#allocation2 + $0x68] sm:$0x1] }
 0x2ef   : > { %5754 = vrot.lane.b32.xlu1 %v5733_v0, %s10851_s19  ;;  %10259 = vmatmul.msk.bf16.gmra.mxu0 %vm4765_vm9, %v4725_v46  ;;  %v3162_v5 = vshrl.u32 %v2934_v6, 16  ;;  %v3165_v51 = vshll.u32 %v2934_v6, 16  ;;  %v5462_v18 = vld [vmem:[#allocation2 + $0x60] sm:$0xe]  ;;  %v3120_v12 = vor.u32 %v12937_v30, %v12935_v3  ;;  %v3764_v17 = vsel %vm1125_vm1, %v10711_v13, %v12903_v24  ;;  %v12964_v6 = vld [vmem:[#allocation2 + $0x4c] sm:$0xf] }
 0x2f0   : > { %v5219_v28 = vrot.slane %v5217_v55, 4  ;;  %v5222_v2 = vrot.slane %v5220_v49, 5  ;;  %v4522_v47 = vunpack.c.l.b16 %v4021_v50  ;;  %v10745_v50 = vld [vmem:[#allocation2 + $0x30] sm:$0xff]  ;;  %v10299_v13 = vrot.slane %v5462_v18, 9 }
 0x2f1   : > { %v3729_v8 = vpop.permute.xlu1 %3728  ;;  %v5037_v45 = vld [vmem:[#allocation2 + $0x64] sm:$0xf]  ;;  %v3164_v44 = vrot.slane %v3162_v5, 4  ;;  %v3167_v27 = vrot.slane %v3165_v51, 5  ;;  %vm15432_vm2 = vcmask 24576  }
 0x2f2   : > { %v12961_v62 = vld [vmem:[#allocation2 + $0x64] sm:$0xf]  ;;  %v3810_v36 = vsel %vm3804_vm6, %v3764_v17, %v3729_v8  ;;  %v5564_v0 = vrot.slane %v5037_v45, 5  ;;  %v5223_v35 = vor.u32 %v5222_v2, %v5219_v28  ;;  %v5226_v54 = vshll.u32 %v5037_v45, 16  ;;  %v12969_v17 = vpop.f32.mrf.mxu2  ;;  %v3361_v8 = vld [vmem:[#allocation2 + $0x60] sm:$0xe] }
 0x2f3   : > { %10279 = vmatmul.msk.bf16.gmra.mxu1 %vm4765_vm9, %v3810_v36  ;;  %v5230_v3 = vshrl.u32 %v5037_v45, 16  ;;  %v3168_v30 = vor.u32 %v3167_v27, %v3164_v44  ;;  %v3171_v24 = vshll.u32 %v12961_v62, 16  ;;  %v3175_v46 = vshrl.u32 %v12961_v62, 16  ;;  %15418 = vst [vmem:[#allocation17_spill] sm:$0xff] %v12969_v17  ;;  %v12981_v36 = vpop.permute.xlu2 %5830 }
 0x2f4   : > { %v2704_v55 = vpop.permute.xlu0 %2703  ;;  %v4549_v49 = vpack.c.b16 %v4523_v43, %v4522_v47  ;;  %v5224_v5 = vrot.slane %v5223_v35, 4  ;;  %v5228_v51 = vrot.slane %v5226_v54, 5  ;;  %v3123_v45 = vshll.u32 %v12964_v6, 16 }
 0x2f5   : > { %v2860_v28 = vsel %vm11428_vm15, %v2704_v55, %v2859_v63  ;;  %3734 = vrot.lane.b32.xlu2 %v12566_v61, %s10850_s18  ;;  %v5232_v2 = vrot.slane %v5230_v3, 4  ;;  %v3127_v44 = vshrl.u32 %v12964_v6, 16  ;;  %v5864_v43 = vsel %vm1125_vm1, %v10745_v50, %v12884_v25  ;;  %v12997_v55 = vld [vmem:[#allocation2 + $0x50] sm:$0x1] }
 0x2f6   : > { %2861 = vst [vmem:[#allocation2 + $0x68] sm:$0x1] %v2860_v28  ;;  %v3169_v18 = vrot.slane %v3168_v30, 4  ;;  %v3173_v47 = vrot.slane %v3171_v24, 5  ;;  %v12979_v27 = vrot.slane %v3243_v57, 5  ;;  %v12986_v31 = vsel %vm11507_vm7, %v10299_v13, %v5564_v0 }
 0x2f7   : > { %4570 = vrot.lane.b32.xlu1 %v4549_v49, %s10851_s19  ;;  %v5229_v61 = vsel %vm11523_vm4, %v5224_v5, %v5228_v51  ;;  %v3177_v63 = vrot.slane %v3175_v46, 4  ;;  %v3478_v35 = vrot.slane %v12961_v62, 5  ;;  %v5233_v25 = vor.u32 %v5232_v2, %v5228_v51  ;;  %v3852_v57 = vld [vmem:[#allocation2 + $0x54] sm:$0xf]  ;;  %v13001_v5 = vld [vmem:[#allocation2 + $0x58] sm:$0xf] }
 0x2f8   : > { %v10098_v54 = vrot.slane %v3361_v8, 9  ;;  %v12991_v3 = vrot.slane %v3120_v12, 4  ;;  %v12993_v30 = vrot.slane %v3247_v11, 4  ;;  %v5909_v50 = vsel %vm3804_vm6, %v5864_v43, %v12840_v20 }
 0x2f9   : > { %v5751_v24 = vpop.permute.xlu1 %5750  ;;  %v12999_v49 = vrot.slane %v3123_v45, 5  ;;  %v3129_v13 = vrot.slane %v3127_v44, 4  ;;  %v5566_v46 = vrot.slane %v5564_v0, 4  ;;  %v5788_v12 = vunpack.c.l.b16 %v12986_v31  ;;  %v10712_v45 = vld [vmem:[#allocation2 + $0x24] sm:$0xff] }
 0x2fa   : > { %v13006_v51 = vunpack.c.l.b16 %v5229_v61  ;;  %v3174_v11 = vsel %vm11523_vm4, %v3169_v18, %v3173_v47  ;;  %v3178_v28 = vor.u32 %v3177_v63, %v3173_v47  ;;  %v3480_v20 = vrot.slane %v3478_v35, 4  ;;  %v13019_v17 = vpop.f32.mrf.mxu2 }
 0x2fb   : > { %v4033_v2 = vshrl.u32 %v3852_v57, 16  ;;  %v4036_v8 = vshll.u32 %v3852_v57, 16  ;;  %v5234_v43 = vrot.slane %v5233_v25, 4  ;;  %v3133_v42 = vshll.u32 %v12997_v55, 16  ;;  %15419 = vst [vmem:[#allocation18_spill] sm:$0xff] %v13019_v17  ;;  %v10729_v17 = vld [vmem:[#allocation2 + $0x30] sm:$0xff] }
 0x2fc   : > { %10382 = vmatmul.msk.bf16.gmra.mxu2 %vm4765_vm9, %v5909_v50  ;;  %v3651_v44 = vpop.permute.xlu0 %3650  ;;  %v4042_v0 = vshll.u32 %v13001_v5, 16  ;;  %v4046_v31 = vshrl.u32 %v13001_v5, 16  ;;  %v13016_v18 = vsel %vm11507_vm7, %v10098_v54, %v3478_v35  ;;  %v3130_v47 = vor.u32 %v3129_v13, %v12999_v49  ;;  %v3731_v13 = vpop.permute.xlu2 %3730 }
 0x2fd   : > { %v5062_v61 = vld [vmem:[#allocation2 + $0x68] sm:$0x1]  ;;  %v4035_v63 = vrot.slane %v4033_v2, 4  ;;  %v4038_v57 = vrot.slane %v4036_v8, 5  ;;  %v3612_v25 = vunpack.c.l.b16 %v3174_v11  ;;  %v3767_v9 = vsel %vm1125_vm1, %v10712_v45, %v3651_v44 }
 0x2fe   : > { %v2958_v37 = vld [vmem:[#allocation2 + $0x68] sm:$0x1]  ;;  %v5567_v50 = vrot.slane %v5062_v61, 5  ;;  %v5236_v53 = vshll.u32 %v5062_v61, 16  ;;  %v3179_v40 = vrot.slane %v3178_v28, 4  ;;  %v4044_v59 = vrot.slane %v4042_v0, 5 }
 0x2ff   : > { %v3181_v62 = vshll.u32 %v2958_v37, 16  ;;  %v3481_v32 = vrot.slane %v2958_v37, 5  ;;  %v4039_v15 = vor.u32 %v4038_v57, %v4035_v63  ;;  %v3131_v39 = vrot.slane %v3130_v47, 4  ;;  %v3359_v63 = vld [vmem:[#allocation2 + $0x48] sm:$0xe] }
 0x300   : > { %v5568_v1 = vsel %vm11507_vm7, %v5566_v46, %v5567_v50  ;;  %v5238_v35 = vrot.slane %v5236_v53, 5  ;;  %v3135_v61 = vrot.slane %v3133_v42, 5  ;;  %v4048_v11 = vrot.slane %v4046_v31, 4  ;;  %v4278_v50 = vld [vmem:[#allocation2 + $0x54] sm:$0xe] }
 0x301   : > { %v3183_v54 = vrot.slane %v3181_v62, 5  ;;  %v4567_v2 = vpop.permute.xlu1 %4566  ;;  %v5789_v8 = vunpack.c.l.b16 %v5568_v1  ;;  %v3812_v45 = vsel %vm3804_vm6, %v3767_v9, %v3731_v13  ;;  %v3482_v53 = vsel %vm11507_vm7, %v3480_v20, %v3481_v32  ;;  %v2932_v20 = vld [vmem:[#allocation2 + $0x54] sm:$0xf] }
 0x302   : > { %v5239_v37 = vsel %vm11523_vm4, %v5234_v43, %v5238_v35  ;;  %v4040_v28 = vrot.slane %v4039_v15, 4  ;;  %v5867_v44 = vsel %vm1125_vm1, %v10746_v14, %v5751_v24  ;;  %v4683_v0 = vsel %vm1125_vm1, %v10729_v17, %v4567_v2 }
 0x303   : > { %v3184_v46 = vsel %vm11523_vm4, %v3179_v40, %v3183_v54  ;;  %10280 = vmatmul.msk.bf16.gmra.mxu1 %vm4765_vm9, %v3812_v45  ;;  %v5814_v1 = vpack.c.b16 %v5789_v8, %v5788_v12  ;;  %v5709_v62 = vunpack.c.l.b16 %v5239_v37  ;;  %v4049_v31 = vor.u32 %v4048_v11, %v4044_v59  ;;  %v13053_v54 = vld [vmem:[#allocation2 + $0x58] sm:$0xf]  ;;  %v13060_v37 = vld [vmem:[#allocation2 + $0x5c] sm:$0x1] }
 0x304   : > { %v3613_v42 = vunpack.c.l.b16 %v3184_v46  ;;  %v4647_v9 = vpop.permute.xlu0 %4646  ;;  %v4052_v47 = vshll.u32 %v3878_v21, 16  ;;  %v3136_v12 = vsel %vm11523_vm4, %v3131_v39, %v3135_v61  ;;  %v3693_v15 = vunpack.c.l.b16 %v3482_v53 }
 0x305   : > { %5836 = vrot.lane.b32.xlu2 %v5814_v1, %s10850_s18  ;;  %v4727_v40 = vsel %vm3804_vm6, %v4683_v0, %v4647_v9  ;;  %v5734_v43 = vpack.c.b16 %v5709_v62, %v13006_v51  ;;  %v4050_v14 = vrot.slane %v4049_v31, 4  ;;  %v4380_v17 = vrot.slane %v13001_v5, 5  ;;  %v3854_v62 = vld [vmem:[#allocation2 + $0x60] sm:$0xf]  ;;  %v13067_v0 = vld [vmem:[#allocation2 + $0x64] sm:$0xf] }
 0x306   : > { %v3636_v32 = vpack.c.b16 %v3613_v42, %v3612_v25  ;;  %10260 = vmatmul.msk.bf16.gmra.mxu0 %vm4765_vm9, %v4727_v40  ;;  %v4054_v24 = vrot.slane %v4052_v47, 5  ;;  %v3692_v57 = vunpack.c.l.b16 %v13016_v18  ;;  %v3126_v39 = vsel %vm11523_vm4, %v12991_v3, %v12999_v49  ;;  %v13055_v18 = vpop.f32.mrf.mxu2 }
 0x307   : > { %5756 = vrot.lane.b32.xlu1 %v5734_v43, %s10851_s19  ;;  %v4045_v51 = vsel %vm11523_vm4, %v4040_v28, %v4044_v59  ;;  %v3464_v25 = vrot.slane %v12964_v6, 5  ;;  %v4383_v35 = vrot.slane %v3878_v21, 5  ;;  %v3138_v13 = vshrl.u32 %v2932_v20, 16 }
 0x308   : > { %3660 = vrot.lane.b32.xlu0 %v3636_v32, %s10851_s19  ;;  %v4055_v5 = vsel %vm11523_vm4, %v4050_v14, %v4054_v24  ;;  %v3141_v2 = vshll.u32 %v2932_v20, 16  ;;  %v5911_v8 = vsel %vm3804_vm6, %v5867_v44, %v12981_v36  ;;  %v3609_v3 = vunpack.c.l.b16 %v3136_v12  ;;  %v13077_v20 = vld [vmem:[#allocation2 + $0x8c] sm:$0x1] }
 0x309   : > { %v4525_v49 = vunpack.c.l.b16 %v4055_v5  ;;  %v10096_v61 = vrot.slane %v3359_v63, 9  ;;  %v3716_v59 = vpack.c.b16 %v3693_v15, %v3692_v57  ;;  %v3608_v11 = vunpack.c.l.b16 %v3126_v39 }
 0x30a   : > { %v4382_v45 = vrot.slane %v4380_v17, 4  ;;  %v3467_v6 = vrot.slane %v12997_v55, 5  ;;  %v4524_v21 = vunpack.c.l.b16 %v4045_v51  ;;  %v10176_v46 = vrot.slane %v4278_v50, 9 }
 0x30b   : > { %v3466_v53 = vrot.slane %v3464_v25, 4  ;;  %v3147_v1 = vshll.u32 %v13053_v54, 16  ;;  %v3140_v42 = vrot.slane %v3138_v13, 4  ;;  %v3143_v28 = vrot.slane %v3141_v2, 5  ;;  %v13089_v2 = vld [vmem:[#allocation2 + $0x68] sm:$0x1] }
 0x30c   : > { %10383 = vmatmul.msk.bf16.gmra.mxu2 %vm4765_vm9, %v5911_v8  ;;  %v4384_v36 = vsel %vm11507_vm7, %v4382_v45, %v4383_v35  ;;  %v3151_v44 = vshrl.u32 %v13053_v54, 16  ;;  %v3634_v55 = vpack.c.b16 %v3609_v3, %v3608_v11  ;;  %v4550_v9 = vpack.c.b16 %v4525_v49, %v4524_v21 }
 0x30d   : > { %3740 = vrot.lane.b32.xlu2 %v3716_v59, %s10850_s18  ;;  %v13070_v31 = vrot.slane %v3147_v1, 5  ;;  %v3157_v47 = vshll.u32 %v13060_v37, 16  ;;  %v4381_v40 = vsel %vm11507_vm7, %v10176_v46, %v4380_v17  ;;  %v3468_v43 = vsel %vm11507_vm7, %v3466_v53, %v3467_v6 }
 0x30e   : > { %v3153_v32 = vrot.slane %v3151_v44, 4  ;;  %v4057_v12 = vshrl.u32 %v3854_v62, 16  ;;  %v4605_v15 = vunpack.c.l.b16 %v4384_v36  ;;  %v4060_v14 = vshll.u32 %v3854_v62, 16 }
 0x30f   : > { %3656 = vrot.lane.b32.xlu1 %v3634_v55, %s10851_s19  ;;  %v4066_v24 = vshll.u32 %v13067_v0, 16  ;;  %v4070_v63 = vshrl.u32 %v13067_v0, 16  ;;  %v3465_v17 = vsel %vm11507_vm7, %v10096_v61, %v3464_v25  ;;  %v3144_v57 = vor.u32 %v3143_v28, %v3140_v42  ;;  %v5465_v25 = vld [vmem:[#allocation2 + $0x84] sm:$0xe]  ;;  %v13094_v61 = vpop.f32.mrf.mxu2  ;;  %v5044_v42 = vld [vmem:[#allocation2 + $0x90] sm:$0xf] }
 0x310   : > { %4572 = vrot.lane.b32.xlu0 %v4550_v9, %s10851_s19  ;;  %v3154_v39 = vor.u32 %v3153_v32, %v13070_v31  ;;  %v15420_v51 = vor.u32 %v12947_v22, %v12941_v19  ;;  %v4604_v5 = vunpack.c.l.b16 %v4381_v40  ;;  %v3689_v35 = vunpack.c.l.b16 %v3468_v43  ;;  %v13116_v40 = vld [vmem:[#allocation2 + $0x94] sm:$0xf] }
 0x311   : > { %v3159_v13 = vrot.slane %v3157_v47, 5  ;;  %v3253_v8 = vshll.u32 %v13077_v20, 16  ;;  %v4059_v3 = vrot.slane %v4057_v12, 4  ;;  %v4062_v49 = vrot.slane %v4060_v14, 5  ;;  %v13125_v14 = vld [vmem:[#allocation2 + $0x84] sm:$0xe] }
 0x312   : > { %v3241_v50 = vrot.slane %v15420_v51, 4  ;;  %v13092_v59 = vrot.slane %v4066_v24, 5  ;;  %v4072_v11 = vrot.slane %v4070_v63, 4  ;;  %v4630_v45 = vpack.c.b16 %v4605_v15, %v4604_v5 }
 0x313   : > { %v3688_v6 = vunpack.c.l.b16 %v3465_v17  ;;  %v15421_v19 = vunpack.c.l.b16 %v12808_v41  ;;  %v15422_v22 = vunpack.c.l.b16 %v12857_v10  ;;  %v3250_v46 = vor.u32 %v12993_v30, %v12979_v27 }
 0x314   : > { %v3145_v53 = vrot.slane %v3144_v57, 4  ;;  %v3155_v1 = vrot.slane %v3154_v39, 4  ;;  %v4076_v62 = vshll.u32 %v13089_v2, 16  ;;  %v3638_v36 = vpack.c.b16 %v12897_v7, %v12892_v58 }
 0x315   : > { %v13100_v21 = vpack.c.b16 %v15422_v22, %v15421_v19  ;;  %4652 = vrot.lane.b32.xlu2 %v4630_v45, %s10850_s18  ;;  %v3714_v28 = vpack.c.b16 %v3689_v35, %v3688_v6  ;;  %v5737_v41 = vpack.c.b16 %v12930_v33, %v12928_v38  ;;  %v3255_v10 = vrot.slane %v3253_v8, 5  ;;  %v3360_v8 = vld [vmem:[#allocation2 + $0x54] sm:$0xe]  ;;  %v15424_v6 = vld [vmem:[#allocation9_spill] sm:$0xff] }
 0x316   : > { %v10302_v44 = vrot.slane %v5465_v25, 9  ;;  %v3160_v55 = vsel %vm11523_vm4, %v3155_v1, %v3159_v13  ;;  %v4063_v30 = vor.u32 %v4062_v49, %v4059_v3  ;;  %v4073_v9 = vor.u32 %v4072_v11, %v13092_v59 }
 0x317   : > { %v3246_v47 = vsel %vm11523_vm4, %v3241_v50, %v12979_v27  ;;  %3736 = vrot.lane.b32.xlu1 %v3714_v28, %s10850_s18  ;;  %v15423_v43 = vpack.c.b16 %v12618_v16, %v12596_v60  ;;  %v3251_v32 = vrot.slane %v3250_v46, 4  ;;  %v5585_v12 = vrot.slane %v12800_v48, 5 }
 0x318   : > { %v5588_v15 = vrot.slane %v12859_v52, 5  ;;  %v5313_v24 = vshrl.u32 %v5044_v42, 16  ;;  %v3150_v27 = vsel %vm11523_vm4, %v3145_v53, %v13070_v31  ;;  %v4078_v63 = vrot.slane %v4076_v62, 5  ;;  %v2942_v62 = vld [vmem:[#allocation2 + $0x90] sm:$0xf] }
 0x319   : > { %5758 = vrot.lane.b32.xlu0 %v15423_v43, %s10851_s19  ;;  %v3471_v17 = vrot.slane %v13053_v54, 5  ;;  %v5316_v57 = vshll.u32 %v5044_v42, 16  ;;  %v3611_v39 = vunpack.c.l.b16 %v3160_v55  ;;  %v13131_v51 = vunpack.c.l.b16 %v3246_v47  ;;  %v13166_v47 = vld [vmem:[#allocation2 + $0x94] sm:$0xf] }
 0x31a   : > { %v5322_v60 = vshll.u32 %v13116_v40, 16  ;;  %v5326_v16 = vshrl.u32 %v13116_v40, 16  ;;  %v4064_v48 = vrot.slane %v4063_v30, 4  ;;  %v4074_v50 = vrot.slane %v4073_v9, 4 }
 0x31b   : > { %v3474_v5 = vrot.slane %v13060_v37, 5  ;;  %v10101_v35 = vrot.slane %v13125_v14, 9  ;;  %v3610_v13 = vunpack.c.l.b16 %v3150_v27  ;;  %v3256_v31 = vsel %vm11523_vm4, %v3251_v32, %v3255_v10  ;;  %v13146_v37 = vpop.f32.mrf.mxu2  ;;  %v5066_v32 = vld [vmem:[#allocation2 + $0x98] sm:$0x1] }
 0x31c   : > { %v13141_v54 = vsel %vm11507_vm7, %v10302_v44, %v5585_v12  ;;  %v3499_v3 = vrot.slane %v12939_v26, 5  ;;  %v4079_v49 = vsel %vm11523_vm4, %v4074_v50, %v4078_v63  ;;  %v3473_v11 = vrot.slane %v3471_v17, 4  ;;  %v15426_v44 = vld [vmem:[#allocation10_spill] sm:$0xff] }
 0x31d   : > { %v5315_v25 = vrot.slane %v5313_v24, 4  ;;  %v5318_v45 = vrot.slane %v5316_v57, 5  ;;  %v15425_v19 = vpack.c.b16 %v12628_v4, %v15424_v6  ;;  %v3635_v22 = vpack.c.b16 %v3611_v39, %v3610_v13 }
 0x31e   : > { %v5587_v46 = vrot.slane %v5585_v12, 4  ;;  %v13152_v53 = vrot.slane %v5322_v60, 5  ;;  %v5328_v1 = vrot.slane %v5326_v16, 4  ;;  %v4069_v26 = vsel %vm11523_vm4, %v4064_v48, %v13092_v59  ;;  %v5466_v12 = vld [vmem:[#allocation2 + $0x90] sm:$0xe] }
 0x31f   : > { %3662 = vrot.lane.b32.xlu2 %v15425_v19, %s10851_s19  ;;  %v10097_v42 = vrot.slane %v3360_v8, 9  ;;  %v3475_v28 = vsel %vm11507_vm7, %v3473_v11, %v3474_v5  ;;  %v5794_v10 = vunpack.c.l.b16 %v13141_v54  ;;  %5838 = vrot.lane.b32.xlu1 %v15426_v44, %s10850_s18  ;;  %v4527_v4 = vunpack.c.l.b16 %v4079_v49 }
 0x320   : > { %v13163_v55 = vunpack.c.l.b16 %v3256_v31  ;;  %v3501_v30 = vrot.slane %v3499_v3, 4  ;;  %v5592_v9 = vrot.slane %v13116_v40, 5  ;;  %v4387_v43 = vrot.slane %v13067_v0, 5  ;;  %v4279_v0 = vld [vmem:[#allocation2 + $0x60] sm:$0xe] }
 0x321   : > { %3658 = vrot.lane.b32.xlu0 %v3635_v22, %s10851_s19  ;;  %v3472_v59 = vsel %vm11507_vm7, %v10097_v42, %v3471_v17  ;;  %v5319_v24 = vor.u32 %v5318_v45, %v5315_v25  ;;  %v3258_v27 = vshrl.u32 %v2942_v62, 16  ;;  %v4526_v63 = vunpack.c.l.b16 %v4069_v26  ;;  %v15427_v42 = vld [vmem:[#allocation11_spill] sm:$0xff] }
 0x322   : > { %v3691_v57 = vunpack.c.l.b16 %v3475_v28  ;;  %v5329_v39 = vor.u32 %v5328_v1, %v13152_v53  ;;  %v3261_v60 = vshll.u32 %v2942_v62, 16  ;;  %v4390_v16 = vrot.slane %v13089_v2, 5 }
 0x323   : > { %v3502_v40 = vrot.slane %v13077_v20, 5  ;;  %v3267_v48 = vshll.u32 %v13166_v47, 16  ;;  %v3271_v50 = vshrl.u32 %v13166_v47, 16  ;;  %v4551_v17 = vpack.c.b16 %v4527_v4, %v4526_v63  ;;  %v13181_v26 = vpop.f32.mrf.mxu2 }
 0x324   : > { %v3690_v5 = vunpack.c.l.b16 %v3472_v59  ;;  %v10303_v13 = vrot.slane %v5466_v12, 9  ;;  %v5332_v8 = vshll.u32 %v5066_v32, 16  ;;  %v4389_v31 = vrot.slane %v4387_v43, 4 }
 0x325   : > { %v5594_v49 = vrot.slane %v5592_v9, 4  ;;  %v5595_v11 = vrot.slane %v5066_v32, 5  ;;  %v5320_v25 = vrot.slane %v5319_v24, 4  ;;  %v5330_v6 = vrot.slane %v5329_v39, 4 }
 0x326   : > { %v3715_v45 = vpack.c.b16 %v3691_v57, %v3690_v5  ;;  %v3260_v2 = vrot.slane %v3258_v27, 4  ;;  %v3263_v19 = vrot.slane %v3261_v60, 5  ;;  %v10177_v20 = vrot.slane %v4279_v0, 9  ;;  %v13219_v5 = vld [vmem:[#allocation2 + $0xa0] sm:$0xf] }
 0x327   : > { %4574 = vrot.lane.b32.xlu2 %v4551_v17, %s10851_s19  ;;  %v4391_v22 = vsel %vm11507_vm7, %v4389_v31, %v4390_v16  ;;  %v13179_v1 = vrot.slane %v3267_v48, 5  ;;  %v3273_v62 = vrot.slane %v3271_v50, 4  ;;  %3742 = vrot.lane.b32.xlu1 %v15427_v42, %s10850_s18  ;;  %v13186_v28 = vpop.permute.xlu2 %5832  ;;  %v5589_v44 = vsel %vm11507_vm7, %v5587_v46, %v5588_v15  ;;  %v13211_v46 = vld [vmem:[#allocation2 + $0x98] sm:$0x1]  ;;  %v3653_v48 = vpop.permute.xlu0 %3652 }
 0x328   : > { %v3500_v4 = vsel %vm11507_vm7, %v10101_v35, %v3499_v3  ;;  %v3503_v59 = vsel %vm11507_vm7, %v3501_v30, %v3502_v40  ;;  %v5334_v32 = vrot.slane %v5332_v8, 5  ;;  %v4388_v12 = vsel %vm11507_vm7, %v10177_v20, %v4387_v43  ;;  %v5046_v43 = vld [vmem:[#allocation2 + $0x9c] sm:$0xf]  ;;  %v3365_v40 = vld [vmem:[#allocation2 + $0x90] sm:$0xe] }
 0x329   : > { %3738 = vrot.lane.b32.xlu0 %v3715_v45, %s10850_s18  ;;  %v5593_v24 = vsel %vm11507_vm7, %v10303_v13, %v5592_v9  ;;  %v5596_v52 = vsel %vm11507_vm7, %v5594_v49, %v5595_v11  ;;  %v5325_v15 = vsel %vm11523_vm4, %v5320_v25, %v13152_v53  ;;  %v4607_v14 = vunpack.c.l.b16 %v4391_v22  ;;  %v10713_v8 = vld [vmem:[#allocation2 + $0x30] sm:$0xff] }
 0x32a   : > { %v3639_v35 = vpack.c.b16 %v13163_v55, %v13131_v51  ;;  %v5335_v3 = vsel %vm11523_vm4, %v5330_v6, %v5334_v32  ;;  %v3264_v30 = vor.u32 %v3263_v19, %v3260_v2  ;;  %v5795_v27 = vunpack.c.l.b16 %v5589_v44  ;;  %v9212_v51 = vld [vmem:[#allocation3 + $0xcc] sm:$0xe] }
 0x32b   : > { %v3698_v9 = vunpack.c.l.b16 %v3500_v4  ;;  %v3699_v63 = vunpack.c.l.b16 %v3503_v59  ;;  %v3274_v57 = vor.u32 %v3273_v62, %v13179_v1  ;;  %v4606_v39 = vunpack.c.l.b16 %v4388_v12 }
 0x32c   : > { %v5796_v60 = vunpack.c.l.b16 %v5593_v24  ;;  %v5797_v16 = vunpack.c.l.b16 %v5596_v52  ;;  %v13214_v53 = vunpack.c.l.b16 %v5325_v15  ;;  %v13216_v50 = vunpack.c.l.b16 %v5335_v3  ;;  %v5048_v15 = vld [vmem:[#allocation2 + $0xa8] sm:$0xf] }
 0x32d   : > { %v3277_v17 = vshll.u32 %v13211_v46, 16  ;;  %v5337_v0 = vshrl.u32 %v5046_v43, 16  ;;  %v5340_v13 = vshll.u32 %v5046_v43, 16  ;;  %v15428_v31 = vpack.c.b16 %v12868_v23, %v12851_v29  ;;  %v15429_v29 = vld [vmem:[#allocation15_spill] sm:$0xff] }
 0x32e   : > { %v4631_v49 = vpack.c.b16 %v4607_v14, %v4606_v39  ;;  %v3265_v11 = vrot.slane %v3264_v30, 4  ;;  %v5346_v25 = vshll.u32 %v13219_v5, 16  ;;  %v5350_v45 = vshrl.u32 %v13219_v5, 16  ;;  %v13251_v14 = vld [vmem:[#allocation2 + $0xac] sm:$0xf] }
 0x32f   : > { %5760 = vrot.lane.b32.xlu2 %v15428_v31, %s10851_s19  ;;  %v13229_v6 = vpack.c.b16 %v5795_v27, %v5794_v10  ;;  %v3275_v2 = vrot.slane %v3274_v57, 4  ;;  %v10102_v19 = vrot.slane %v3365_v40, 9  ;;  %v3506_v20 = vrot.slane %v13166_v47, 5  ;;  %v13233_v62 = vpop.f32.mrf.mxu2  ;;  %v3733_v23 = vpop.permute.xlu2 %3732  ;;  %v2944_v47 = vld [vmem:[#allocation2 + $0x9c] sm:$0xf] }
 0x330   : > { %v3770_v22 = vsel %vm1125_vm1, %v10713_v8, %v3653_v48  ;;  %4654 = vrot.lane.b32.xlu1 %v4631_v49, %s10850_s18  ;;  %v13238_v42 = vpack.c.b16 %v3699_v63, %v3698_v9  ;;  %v13240_v44 = vpack.c.b16 %v5797_v16, %v5796_v60  ;;  %v3279_v10 = vrot.slane %v3277_v17, 5  ;;  %v13260_v9 = vld [vmem:[#allocation2 + $0xa0] sm:$0xf]  ;;  %v13264_v60 = vld [vmem:[#allocation2 + $0xa4] sm:$0x1] }
 0x331   : > { %5840 = vrot.lane.b32.xlu0 %v15429_v29, %s10850_s18  ;;  %v3814_v54 = vsel %vm3804_vm6, %v3770_v22, %v3733_v23  ;;  %v5339_v4 = vrot.slane %v5337_v0, 4  ;;  %v5342_v59 = vrot.slane %v5340_v13, 5  ;;  %v5738_v32 = vpack.c.b16 %v13216_v50, %v13214_v53  ;;  %v13294_v29 = vld [vmem:[#allocation2 + $0xb0] sm:$0x1] }
 0x332   : > { %10281 = vmatmul.msk.bf16.gmra.mxu1 %vm4765_vm9, %v3814_v54  ;;  %v3270_v12 = vsel %vm11523_vm4, %v3265_v11, %v13179_v1  ;;  %v13249_v24 = vrot.slane %v5346_v25, 5  ;;  %v5352_v52 = vrot.slane %v5350_v45, 4  ;;  %v3280_v3 = vsel %vm11523_vm4, %v3275_v2, %v3279_v10  ;;  %v5467_v25 = vld [vmem:[#allocation2 + $0x9c] sm:$0xe] }
 0x333   : > { %v13257_v30 = vsel %vm11507_vm7, %v10102_v19, %v3506_v20  ;;  %v3508_v43 = vrot.slane %v3506_v20, 4  ;;  %v3509_v27 = vrot.slane %v13211_v46, 5  ;;  %v3282_v63 = vshrl.u32 %v2944_v47, 16 }
 0x334   : > { %v3285_v1 = vshll.u32 %v2944_v47, 16  ;;  %v3291_v57 = vshll.u32 %v13260_v9, 16  ;;  %v3295_v39 = vshrl.u32 %v13260_v9, 16  ;;  %v5361_v16 = vshrl.u32 %v5048_v15, 16  ;;  %v2963_v47 = vld [vmem:[#allocation2 + $0xa4] sm:$0x1] }
 0x335   : > { %v5364_v40 = vshll.u32 %v5048_v15, 16  ;;  %v5370_v48 = vshll.u32 %v13251_v14, 16  ;;  %v5374_v17 = vshrl.u32 %v13251_v14, 16  ;;  %v13270_v46 = vunpack.c.l.b16 %v3270_v12 }
 0x336   : > { %v5343_v0 = vor.u32 %v5342_v59, %v5339_v4  ;;  %v5353_v13 = vor.u32 %v5352_v52, %v13249_v24  ;;  %v5356_v8 = vshll.u32 %v13264_v60, 16  ;;  %v13274_v31 = vunpack.c.l.b16 %v3280_v3  ;;  %v2946_v59 = vld [vmem:[#allocation2 + $0xa8] sm:$0xf]  ;;  %v3366_v52 = vld [vmem:[#allocation2 + $0x9c] sm:$0xe] }
 0x337   : > { %3744 = vrot.lane.b32.xlu2 %v13100_v21, %s10850_s18  ;;  %v13278_v49 = vsel %vm11507_vm7, %v3508_v43, %v3509_v27  ;;  %v3700_v11 = vunpack.c.l.b16 %v13257_v30  ;;  %v5599_v45 = vrot.slane %v13219_v5, 5  ;;  %v13282_v2 = vpop.f32.mrf.mxu2  ;;  %v3284_v21 = vrot.slane %v3282_v63, 4  ;;  %v13304_v63 = vpop.permute.xlu0 %4648 }
 0x338   : > { %3664 = vrot.lane.b32.xlu1 %v3638_v36, %s10851_s19  ;;  %v3287_v19 = vrot.slane %v3285_v1, 5  ;;  %v13292_v20 = vrot.slane %v3291_v57, 5  ;;  %v3297_v22 = vrot.slane %v3295_v39, 4  ;;  %v5363_v5 = vrot.slane %v5361_v16, 4 }
 0x339   : > { %5762 = vrot.lane.b32.xlu0 %v5737_v41, %s10851_s19  ;;  %v5366_v23 = vrot.slane %v5364_v40, 5  ;;  %v13296_v54 = vrot.slane %v5370_v48, 5  ;;  %v5376_v10 = vrot.slane %v5374_v17, 4  ;;  %v5344_v4 = vrot.slane %v5343_v0, 4  ;;  %v517_v0 = vld [vmem:[#allocation3 + $0xc] sm:$0x1] }
 0x33a   : > { %v5354_v58 = vrot.slane %v5353_v13, 4  ;;  %v5358_v7 = vrot.slane %v5356_v8, 5  ;;  %v10304_v36 = vrot.slane %v5467_v25, 9  ;;  %v3640_v38 = vpack.c.b16 %v13274_v31, %v13270_v46 }
 0x33b   : > { %v3701_v33 = vunpack.c.l.b16 %v13278_v49  ;;  %v5601_v41 = vrot.slane %v5599_v45, 4  ;;  %v3513_v12 = vrot.slane %v13260_v9, 5  ;;  %v3288_v15 = vor.u32 %v3287_v19, %v3284_v21  ;;  %v13319_v21 = vld [vmem:[#allocation2 + $0xac] sm:$0xf] }
 0x33c   : > { %v3298_v3 = vor.u32 %v3297_v22, %v13292_v20  ;;  %v3301_v43 = vshll.u32 %v2963_v47, 16  ;;  %v5380_v27 = vshll.u32 %v13294_v29, 16  ;;  %v5367_v1 = vor.u32 %v5366_v23, %v5363_v5  ;;  %v10747_v22 = vld [vmem:[#allocation2 + $0x48] sm:$0xff] }
 0x33d   : > { %v5377_v57 = vor.u32 %v5376_v10, %v13296_v54  ;;  %v3306_v39 = vshrl.u32 %v2946_v59, 16  ;;  %v3309_v16 = vshll.u32 %v2946_v59, 16  ;;  %v5349_v9 = vsel %vm11523_vm4, %v5344_v4, %v13249_v24 }
 0x33e   : > { %v5359_v40 = vsel %vm11523_vm4, %v5354_v58, %v5358_v7  ;;  %v5600_v48 = vsel %vm11507_vm7, %v10304_v36, %v5599_v45  ;;  %v5602_v17 = vrot.slane %v13264_v60, 5  ;;  %v10103_v13 = vrot.slane %v3366_v52, 9 }
 0x33f   : > { %3666 = vrot.lane.b32.xlu2 %v3639_v35, %s10851_s19  ;;  %v3515_v8 = vrot.slane %v3513_v12, 4  ;;  %v3516_v25 = vrot.slane %v2963_v47, 5  ;;  %v518_v55 = vsel %vm11325_vm10, 0, %v517_v0  ;;  %v13323_v35 = vpop.f32.mrf.mxu2  ;;  %v3289_v24 = vrot.slane %v3288_v15, 4 }
 0x340   : > { %5842 = vrot.lane.b32.xlu1 %v13229_v6, %s10850_s18  ;;  %v3299_v45 = vrot.slane %v3298_v3, 4  ;;  %v3303_v60 = vrot.slane %v3301_v43, 5  ;;  %v5382_v19 = vrot.slane %v5380_v27, 5  ;;  %519 = vst [vmem:[#allocation3 + $0xc] sm:$0x1] %v518_v55  ;;  %v5368_v5 = vrot.slane %v5367_v1, 4 }
 0x341   : > { %3746 = vrot.lane.b32.xlu0 %v13238_v42, %s10850_s18  ;;  %v5378_v23 = vrot.slane %v5377_v57, 4  ;;  %v3308_v10 = vrot.slane %v3306_v39, 4  ;;  %v3311_v4 = vrot.slane %v3309_v16, 5  ;;  %v5753_v58 = vpop.permute.xlu1 %5752  ;;  %v5603_v7 = vsel %vm11507_vm7, %v5601_v41, %v5602_v17  ;;  %v13345_v1 = vld [vmem:[#allocation2 + $0xb0] sm:$0x1] }
 0x342   : > { %v5798_v36 = vunpack.c.l.b16 %v5600_v48  ;;  %v3315_v6 = vshll.u32 %v13319_v21, 16  ;;  %v3319_v59 = vshrl.u32 %v13319_v21, 16  ;;  %v5870_v42 = vsel %vm1125_vm1, %v10747_v22, %v5753_v58  ;;  %v3655_v48 = vpop.permute.xlu0 %3654 }
 0x343   : > { %v5718_v47 = vunpack.c.l.b16 %v5349_v9  ;;  %v3514_v52 = vsel %vm11507_vm7, %v10103_v13, %v3513_v12  ;;  %v3517_v15 = vsel %vm11507_vm7, %v3515_v8, %v3516_v25  ;;  %v5913_v3 = vsel %vm3804_vm6, %v5870_v42, %v13186_v28  ;;  %v5468_v8 = vld [vmem:[#allocation2 + $0xa8] sm:$0xe]  ;;  %v13398_v42 = vpop.f32.mrf.mxu0 }
 0x344   : > { %v5719_v43 = vunpack.c.l.b16 %v5359_v40  ;;  %v3294_v41 = vsel %vm11523_vm4, %v3289_v24, %v13292_v20  ;;  %v3304_v27 = vsel %vm11523_vm4, %v3299_v45, %v3303_v60  ;;  %10384 = vmatmul.msk.bf16.gmra.mxu2 %vm4765_vm9, %v5913_v3  ;;  %v5799_v57 = vunpack.c.l.b16 %v5603_v7  ;;  %v10730_v45 = vld [vmem:[#allocation2 + $0x3c] sm:$0xff] }
 0x345   : > { %v5373_v12 = vsel %vm11523_vm4, %v5368_v5, %v13296_v54  ;;  %v5383_v28 = vsel %vm11523_vm4, %v5378_v23, %v5382_v19  ;;  %v3312_v39 = vor.u32 %v3311_v4, %v3308_v10  ;;  %v3702_v20 = vunpack.c.l.b16 %v3514_v52  ;;  %v10714_v54 = vld [vmem:[#allocation2 + $0x3c] sm:$0xff]  ;;  %v5050_v23 = vld [vmem:[#allocation2 + $0xb4] sm:$0xf] }
 0x346   : > { %v3703_v16 = vunpack.c.l.b16 %v3517_v15  ;;  %v3317_v9 = vrot.slane %v3315_v6, 5  ;;  %v3321_v40 = vrot.slane %v3319_v59, 4  ;;  %v13355_v17 = vunpack.c.l.b16 %v3294_v41  ;;  %v13396_v59 = vld [vmem:[#allocation2 + $0xb8] sm:$0xf] }
 0x347   : > { %5844 = vrot.lane.b32.xlu2 %v13240_v44, %s10850_s18  ;;  %v13357_v0 = vunpack.c.l.b16 %v3304_v27  ;;  %v3325_v13 = vshll.u32 %v13345_v1, 16  ;;  %v13360_v25 = vpop.f32.mrf.mxu2  ;;  %v13370_v44 = vpop.permute.xlu2 %5834  ;;  %v13372_v55 = vunpack.c.l.b16 %v5373_v12  ;;  %v13374_v24 = vunpack.c.l.b16 %v5383_v28 }
 0x348   : > { %5764 = vrot.lane.b32.xlu1 %v5738_v32, %s10851_s19  ;;  %v5739_v60 = vpack.c.b16 %v5719_v43, %v5718_v47  ;;  %v3720_v19 = vpack.c.b16 %v3701_v33, %v3700_v11  ;;  %v5819_v53 = vpack.c.b16 %v5799_v57, %v5798_v36  ;;  %v3313_v50 = vrot.slane %v3312_v39, 4  ;;  %v3367_v32 = vld [vmem:[#allocation2 + $0xa8] sm:$0xe]  ;;  %v13389_v11 = vld [vmem:[#allocation2 + $0xb8] sm:$0xf]  ;;  %v13400_v47 = vpop.f32.mrf.mxu1 }
 0x349   : > { %3668 = vrot.lane.b32.xlu0 %v3640_v38, %s10851_s19  ;;  %v3773_v22 = vsel %vm1125_vm1, %v10714_v54, %v3655_v48  ;;  %v4569_v46 = vpop.permute.xlu1 %4568  ;;  %v13381_v31 = vpack.c.b16 %v3703_v16, %v3702_v20  ;;  %v3322_v38 = vor.u32 %v3321_v40, %v3317_v9  ;;  %v10305_v5 = vrot.slane %v5468_v8, 9  ;;  %v2948_v33 = vld [vmem:[#allocation2 + $0xb4] sm:$0xf]  ;;  %v5069_v8 = vld [vmem:[#allocation2 + $0xbc] sm:$0x1] }
 0x34a   : > { %v4686_v10 = vsel %vm1125_vm1, %v10730_v45, %v4569_v46  ;;  %v3641_v4 = vpack.c.b16 %v13357_v0, %v13355_v17  ;;  %v13386_v30 = vrot.slane %v3325_v13, 5  ;;  %v5606_v49 = vrot.slane %v13251_v14, 5  ;;  %v5469_v40 = vld [vmem:[#allocation2 + $0xb4] sm:$0xe] }
 0x34b   : > { %v4729_v58 = vsel %vm3804_vm6, %v4686_v10, %v13304_v63  ;;  %v5740_v7 = vpack.c.b16 %v13374_v24, %v13372_v55  ;;  %v5609_v36 = vrot.slane %v13294_v29, 5  ;;  %v10104_v6 = vrot.slane %v3367_v32, 9 }
 0x34c   : > { %10261 = vmatmul.msk.bf16.gmra.mxu0 %vm4765_vm9, %v4729_v58  ;;  %v3318_v14 = vsel %vm11523_vm4, %v3313_v50, %v3317_v9  ;;  %v3520_v52 = vrot.slane %v13319_v21, 5  ;;  %v5385_v63 = vshrl.u32 %v5050_v23, 16  ;;  %v5388_v15 = vshll.u32 %v5050_v23, 16  ;;  %v572_v50 = vld [vmem:[#allocation3 + $0x14] sm:$0x1] }
 0x34d   : > { %v3323_v3 = vrot.slane %v3322_v38, 4  ;;  %v5394_v29 = vshll.u32 %v13389_v11, 16  ;;  %v5398_v43 = vshrl.u32 %v13389_v11, 16  ;;  %v3330_v41 = vshrl.u32 %v2948_v33, 16 }
 0x34e   : > { %v3523_v27 = vrot.slane %v13345_v1, 5  ;;  %v3333_v57 = vshll.u32 %v2948_v33, 16  ;;  %v3339_v12 = vshll.u32 %v13396_v59, 16  ;;  %v3343_v28 = vshrl.u32 %v13396_v59, 16 }
 0x34f   : > { %5766 = vrot.lane.b32.xlu2 %v5739_v60, %s10851_s19  ;;  %v13412_v39 = vpop.f32.mrf.mxu2  ;;  %v3735_v21 = vpop.permute.xlu2 %3734  ;;  %v13416_v20 = vunpack.c.l.b16 %v3318_v14  ;;  %v13420_v16 = vsel %vm11507_vm7, %v10305_v5, %v5606_v49  ;;  %v5608_v9 = vrot.slane %v5606_v49, 4  ;;  %v13424_v1 = vsel %vm11507_vm7, %v10104_v6, %v3520_v52  ;;  %v13427_v60 = vld [vmem:[#allocation2 + $0xbc] sm:$0x1]  ;;  %v13445_v49 = vld [vmem:[#allocation2 + $0xc4] sm:$0xf] }
 0x350   : > { %3748 = vrot.lane.b32.xlu1 %v3720_v19, %s10850_s18  ;;  %v3816_v48 = vsel %vm3804_vm6, %v3773_v22, %v3735_v21  ;;  %v3522_v13 = vrot.slane %v3520_v52, 4  ;;  %v5387_v54 = vrot.slane %v5385_v63, 4  ;;  %v5390_v45 = vrot.slane %v5388_v15, 5  ;;  %v5052_v63 = vld [vmem:[#allocation2 + $0xc0] sm:$0xf] }
 0x351   : > { %5846 = vrot.lane.b32.xlu0 %v5819_v53, %s10850_s18  ;;  %10282 = vmatmul.msk.bf16.gmra.mxu1 %vm4765_vm9, %v3816_v48  ;;  %v3328_v19 = vsel %vm11523_vm4, %v3323_v3, %v13386_v30  ;;  %vm15431_vm15 = vsmask.f32 7938  ;;  %v13439_v32 = vrot.slane %v5394_v29, 5  ;;  %v5400_v22 = vrot.slane %v5398_v43, 4 }
 0x352   : > { %vm13435_vm3 = vmand %vm15432_vm2, %vm15431_vm15  ;;  %v3332_v46 = vrot.slane %v3330_v41, 4  ;;  %v3335_v5 = vrot.slane %v3333_v57, 5  ;;  %v13443_v23 = vrot.slane %v3339_v12, 5  ;;  %v3345_v10 = vrot.slane %v3343_v28, 4  ;;  %v13458_v57 = vpop.f32.mrf.mxu0 }
 0x353   : > { %v573_v38 = vsel %vm13435_vm3, 0, %v572_v50  ;;  %v5610_v30 = vsel %vm11507_vm7, %v5608_v9, %v5609_v36  ;;  %v5800_v33 = vunpack.c.l.b16 %v13420_v16  ;;  %v10306_v58 = vrot.slane %v5469_v40, 9 }
 0x354   : > { %v5613_v6 = vrot.slane %v13389_v11, 5  ;;  %574 = vst [vmem:[#allocation3 + $0x14] sm:$0x1] %v573_v38  ;;  %v3704_v14 = vunpack.c.l.b16 %v13424_v1  ;;  %v5391_v52 = vor.u32 %v5390_v45, %v5387_v54  ;;  %v5418_v15 = vshll.u32 %v13445_v49, 16  ;;  %v13460_v11 = vpop.f32.mrf.mxu1 }
 0x355   : > { %v5422_v3 = vshrl.u32 %v13445_v49, 16  ;;  %v3625_v29 = vunpack.c.l.b16 %v3328_v19  ;;  %v5401_v36 = vor.u32 %v5400_v22, %v13439_v32  ;;  %v5404_v43 = vshll.u32 %v5069_v8, 16  ;;  %v520_v22 = vld [vmem:[#allocation3 + $0x18] sm:$0x1] }
 0x356   : > { %v3349_v41 = vshll.u32 %v13427_v60, 16  ;;  %v5801_v12 = vunpack.c.l.b16 %v5610_v30  ;;  %v3524_v28 = vsel %vm11507_vm7, %v3522_v13, %v3523_v27  ;;  %v3336_v21 = vor.u32 %v3335_v5, %v3332_v46 }
 0x357   : > { %3750 = vrot.lane.b32.xlu2 %v13381_v31, %s10850_s18  ;;  %v3346_v16 = vor.u32 %v3345_v10, %v13443_v23  ;;  %v13465_v9 = vpop.f32.mrf.mxu2  ;;  %v13477_v31 = vsel %vm11507_vm7, %v10306_v58, %v5613_v6  ;;  %v5615_v27 = vrot.slane %v5613_v6, 4  ;;  %v5616_v1 = vrot.slane %v5069_v8, 5  ;;  %v3368_v6 = vld [vmem:[#allocation2 + $0xb4] sm:$0xe] }
 0x358   : > { %3670 = vrot.lane.b32.xlu1 %v3641_v4, %s10851_s19  ;;  %v5409_v40 = vshrl.u32 %v5052_v63, 16  ;;  %v5392_v48 = vrot.slane %v5391_v52, 4  ;;  %v5412_v13 = vshll.u32 %v5052_v63, 16  ;;  %v13479_v54 = vrot.slane %v5418_v15, 5 }
 0x359   : > { %5768 = vrot.lane.b32.xlu0 %v5740_v7, %s10851_s19  ;;  %v5424_v45 = vrot.slane %v5422_v3, 4  ;;  %v3705_v19 = vunpack.c.l.b16 %v3524_v28  ;;  %v5402_v17 = vrot.slane %v5401_v36, 4  ;;  %v5406_v0 = vrot.slane %v5404_v43, 5  ;;  %v13482_v7 = vld [vmem:[#allocation2 + $0xc8] sm:$0x1] }
 0x35a   : > { %v3351_v4 = vrot.slane %v3349_v41, 5  ;;  %v3642_v50 = vpack.c.b16 %v3625_v29, %v13416_v20  ;;  %v3337_v55 = vrot.slane %v3336_v21, 4  ;;  %v3347_v24 = vrot.slane %v3346_v16, 4  ;;  %v13507_v36 = vld [vmem:[%s15345_s5] ss:$0 sm:$0xff] }
 0x35b   : > { %v5820_v46 = vpack.c.b16 %v5801_v12, %v5800_v33  ;;  %v5617_v8 = vsel %vm11507_vm7, %v5615_v27, %v5616_v1  ;;  %v5802_v38 = vunpack.c.l.b16 %v13477_v31  ;;  %v521_v5 = vsel %vm11325_vm10, 0, %v520_v22  ;;  %v10748_v31 = vld [vmem:[#allocation2 + $0x54] sm:$0xff] }
 0x35c   : > { %v5397_v10 = vsel %vm11523_vm4, %v5392_v48, %v13439_v32  ;;  %v5411_v30 = vrot.slane %v5409_v40, 4  ;;  %v5414_v20 = vrot.slane %v5412_v13, 5  ;;  %v5425_v58 = vor.u32 %v5424_v45, %v13479_v54  ;;  %522 = vst [vmem:[#allocation3 + $0x18] sm:$0x1] %v521_v5  ;;  %v13500_v32 = vpop.f32.mrf.mxu0  ;;  %v13502_v29 = vpop.f32.mrf.mxu1 }
 0x35d   : > { %v3722_v33 = vpack.c.b16 %v3705_v19, %v3704_v14  ;;  %v5407_v52 = vsel %vm11523_vm4, %v5402_v17, %v5406_v0  ;;  %v5428_v63 = vshll.u32 %v13482_v7, 16  ;;  %v3527_v15 = vrot.slane %v13396_v59, 5  ;;  %v575_v17 = vld [vmem:[#allocation3 + $0x20] sm:$0x1] }
 0x35e   : > { %v4944_v3 = vadd.f32 %v13400_v47, %v13398_v42  ;;  %v3342_v14 = vsel %vm11523_vm4, %v3337_v55, %v13443_v23  ;;  %v3352_v43 = vsel %vm11523_vm4, %v3347_v24, %v3351_v4  ;;  %v5620_v59 = vrot.slane %v13445_v49, 5  ;;  %v13523_v23 = vld [vmem:[%s15346_s6] ss:$0 sm:$0xff]  ;;  %v5470_v4 = vld [vmem:[#allocation2 + $0xc0] sm:$0xe] }
 0x35f   : > { %3672 = vrot.lane.b32.xlu2 %v3642_v50, %s10851_s19  ;;  %v5993_v41 = vpop.f32.mrf.mxu2  ;;  %v13517_v42 = vpop.permute.xlu2 %5836  ;;  %v5803_v47 = vunpack.c.l.b16 %v5617_v8  ;;  %v5722_v12 = vunpack.c.l.b16 %v5397_v10  ;;  %v10105_v28 = vrot.slane %v3368_v6, 9  ;;  %v3530_v21 = vrot.slane %v13427_v60, 5 }
 0x360   : > { %5848 = vrot.lane.b32.xlu1 %v5820_v46, %s10850_s18  ;;  %v6073_v16 = vadd.f32 %v5993_v41, %v4944_v3  ;;  %v5723_v49 = vunpack.c.l.b16 %v5407_v52  ;;  %v5415_v27 = vor.u32 %v5414_v20, %v5411_v30  ;;  %v5426_v1 = vrot.slane %v5425_v58, 4 }
 0x361   : > { %3752 = vrot.lane.b32.xlu0 %v3722_v33, %s10850_s18  ;;  %v5755_v40 = vpop.permute.xlu1 %5754  ;;  %v3626_v48 = vunpack.c.l.b16 %v3342_v14  ;;  %v3627_v13 = vunpack.c.l.b16 %v3352_v43  ;;  %v5430_v45 = vrot.slane %v5428_v63, 5  ;;  %v3529_v19 = vrot.slane %v3527_v15, 4 }
 0x362   : > { %v6109_v0 = vmul.f32 %v13507_v36, %v6073_v16  ;;  %v5873_v60 = vsel %vm1125_vm1, %v10748_v31, %v5755_v40  ;;  %v5622_v50 = vrot.slane %v5620_v59, 4  ;;  %v576_v55 = vsel %vm13435_vm3, 0, %v575_v17  ;;  %v4651_v31 = vpop.permute.xlu0 %4650 }
 0x363   : > { %v5915_v24 = vsel %vm3804_vm6, %v5873_v60, %v13370_v44  ;;  %v5821_v22 = vpack.c.b16 %v5803_v47, %v5802_v38  ;;  %v3528_v46 = vsel %vm11507_vm7, %v10105_v28, %v3527_v15  ;;  %577 = vst [vmem:[#allocation3 + $0x20] sm:$0x1] %v576_v55  ;;  %v5416_v5 = vrot.slane %v5415_v27, 4  ;;  %v6562_v60 = vld [vmem:[#allocation3 + $0xc] sm:$0xf] }
 0x364   : > { %v6145_v8 = vadd.f32 %v13523_v23, %v6109_v0  ;;  %10385 = vmatmul.msk.bf16.gmra.mxu2 %vm4765_vm9, %v5915_v24  ;;  %v5431_v10 = vsel %vm11523_vm4, %v5426_v1, %v5430_v45  ;;  %v5623_v30 = vrot.slane %v13482_v7, 5  ;;  %v5741_v20 = vpack.c.b16 %v5723_v49, %v5722_v12  ;;  %v4950_v43 = vpop.f32.mrf.mxu1  ;;  %v4817_v47 = vpop.f32.mrf.mxu0  ;;  %v523_v45 = vld [vmem:[#allocation3 + $0x24] sm:$0x1] }
 0x365   : > { %v3643_v58 = vpack.c.b16 %v3627_v13, %v3626_v48  ;;  %v3531_v44 = vsel %vm11507_vm7, %v3529_v19, %v3530_v21  ;;  %v10307_v38 = vrot.slane %v5470_v4, 9  ;;  %v4946_v6 = vadd.f32 %v13460_v11, %v13458_v57  ;;  %v10731_v57 = vld [vmem:[#allocation2 + $0x48] sm:$0xff] }
 0x366   : > { %v6177_v33 = vmax.f32 %v6145_v8, 0.0  ;;  %v5421_v52 = vsel %vm11523_vm4, %v5416_v5, %v13479_v54  ;;  %v5624_v63 = vsel %vm11507_vm7, %v5622_v50, %v5623_v30  ;;  %v5725_v3 = vunpack.c.l.b16 %v5431_v10 }
 0x367   : > { %5850 = vrot.lane.b32.xlu2 %v5821_v22, %s10850_s18  ;;  %v5995_v7 = vpop.f32.mrf.mxu2  ;;  %v13550_v15 = vpop.permute.xlu2 %3740  ;;  %v5621_v11 = vsel %vm11507_vm7, %v10307_v38, %v5620_v59  ;;  %v5724_v12 = vunpack.c.l.b16 %v5421_v52  ;;  %v3706_v28 = vunpack.c.l.b16 %v3528_v46  ;;  %v3707_v21 = vunpack.c.l.b16 %v3531_v44  ;;  %v7106_v52 = vld [vmem:[#allocation3] sm:$0xe] }
 0x368   : > { %5770 = vrot.lane.b32.xlu1 %v5741_v20, %s10851_s19  ;;  %v6209_v14 = vpack.c.bf16 %v6177_v33, %v6177_v33  ;;  %v6074_v41 = vadd.f32 %v5995_v7, %v4946_v6  ;;  %v5805_v16 = vunpack.c.l.b16 %v5624_v63  ;;  %v5804_v13 = vunpack.c.l.b16 %v5621_v11  ;;  %v13571_v6 = vld [vmem:[#allocation3 + $0x4] sm:$0xf]  ;;  %v578_v63 = vld [vmem:[#allocation3 + $0x2c] sm:$0x1]  ;;  %v6566_v11 = vld [vmem:[#allocation3 + $0x14] sm:$0x1] }
 0x369   : > { %3674 = vrot.lane.b32.xlu0 %v3643_v58, %s10851_s19  ;;  %v4571_v54 = vpop.permute.xlu1 %4570  ;;  %v5742_v48 = vpack.c.b16 %v5725_v3, %v5724_v12  ;;  %v524_v0 = vsel %vm11325_vm10, 0, %v523_v45  ;;  %v3723_v4 = vpack.c.b16 %v3707_v21, %v3706_v28  ;;  %v4949_v55 = vadd.f32 %v13502_v29, %v13500_v32  ;;  %v569_v29 = vld [vmem:[#allocation3 + $0x8] sm:$0x1] }
 0x36a   : > { %v6242_v49 = vshrl.u32 %v6209_v14, 16  ;;  %v6110_v27 = vmul.f32 %v13507_v36, %v6074_v41  ;;  %v4689_v1 = vsel %vm1125_vm1, %v10731_v57, %v4571_v54  ;;  %v6245_v17 = vshll.u32 %v6209_v14, 16  ;;  %525 = vst [vmem:[#allocation3 + $0x24] sm:$0x1] %v524_v0  ;;  %v10717_v0 = vld [vmem:[#allocation2 + $0x60] sm:$0xff] }
 0x36b   : > { %v4731_v40 = vsel %vm3804_vm6, %v4689_v1, %v4651_v31  ;;  %v5822_v50 = vpack.c.b16 %v5805_v16, %v5804_v13  ;;  %v570_v33 = vsel %vm13435_vm3, 0, %v569_v29  ;;  %v10396_v41 = vrot.slane %v7106_v52, 9 }
 0x36c   : > { %v6244_v19 = vrot.slane %v6242_v49, 7  ;;  %v6146_v59 = vadd.f32 %v13523_v23, %v6110_v27  ;;  %10262 = vmatmul.msk.bf16.gmra.mxu0 %vm4765_vm9, %v4731_v40  ;;  %v4820_v44 = vpop.f32.mrf.mxu0  ;;  %571 = vst [vmem:[#allocation3 + $0x8] sm:$0x1] %v570_v33  ;;  %v4951_v57 = vadd.f32 %v4950_v43, %v4817_v47  ;;  %v7172_v54 = vrot.slane %v13571_v6, 5 }
 0x36d   : > { %v579_v12 = vsel %vm13435_vm3, 0, %v578_v63 }
 0x36e   : > { %v6247_v24 = vor.u32 %v6245_v17, %v6244_v19  ;;  %v6178_v22 = vmax.f32 %v6146_v59, 0.0  ;;  %v6248_v28 = vrot.slane %v6244_v19, 4  ;;  %580 = vst [vmem:[#allocation3 + $0x2c] sm:$0x1] %v579_v12  ;;  %v7173_v1 = vsel %vm11507_vm7, %v10396_v41, %v7172_v54  ;;  %v10749_v17 = vld [vmem:[#allocation2 + $0x60] sm:$0xff] }
 0x36f   : > { %5772 = vrot.lane.b32.xlu2 %v5742_v48, %s10851_s19  ;;  %v5998_v46 = vpop.f32.mrf.mxu2  ;;  %v13566_v8 = vpop.permute.xlu2 %4652 }
 0x370   : > { %3754 = vrot.lane.b32.xlu1 %v3723_v4, %s10850_s18  ;;  %v6563_v10 = vsel %vm11408_vm13, %v6247_v24, %v6562_v60  ;;  %v6210_v30 = vpack.c.bf16 %v6178_v22, %v6178_v22  ;;  %v6075_v20 = vadd.f32 %v5998_v46, %v4949_v55  ;;  %v4953_v58 = vpop.f32.mrf.mxu1  ;;  %v7174_v24 = vrot.slane %v7172_v54, 4 }
 0x371   : > { %5852 = vrot.lane.b32.xlu0 %v5822_v50, %s10850_s18  ;;  %6564 = vst [vmem:[#allocation3 + $0xc] sm:$0xf] %v6563_v10  ;;  %v4954_v19 = vadd.f32 %v4953_v58, %v4820_v44  ;;  %v10718_v10 = vld [vmem:[#allocation2 + $0x6c] sm:$0xff]  ;;  %v7426_v58 = vunpack.c.l.b16 %v7173_v1 }
 0x372   : > { %v6250_v38 = vshrl.u32 %v6210_v30, 16  ;;  %v6111_v32 = vmul.f32 %v13507_v36, %v6075_v20  ;;  %v6253_v3 = vshll.u32 %v6210_v30, 16 }
 0x374   : > { %v6252_v7 = vrot.slane %v6250_v38, 7  ;;  %v6147_v14 = vadd.f32 %v13523_v23, %v6111_v32  ;;  %v4822_v46 = vpop.f32.mrf.mxu0  ;;  %v13591_v38 = vld [vmem:[#allocation3 + $0x8] sm:$0x1] }
 0x375   : > { %v7175_v52 = vrot.slane %v13591_v38, 5 }
 0x376   : > { %v6255_v21 = vor.u32 %v6253_v3, %v6252_v7  ;;  %v6257_v16 = vrot.slane %v6252_v7, 4  ;;  %v6179_v31 = vmax.f32 %v6147_v14, 0.0  ;;  %v526_v7 = vld [vmem:[#allocation3 + $0x30] sm:$0x1]  ;;  %v6569_v3 = vld [vmem:[#allocation3 + $0x18] sm:$0xf] }
 0x377   : > { %v6000_v49 = vpop.f32.mrf.mxu2  ;;  %v7176_v12 = vsel %vm11507_vm7, %v7174_v24, %v7175_v52 }
 0x378   : > { %v6256_v48 = vsel %vm11150_vm5, %v6248_v28, %v6255_v21  ;;  %v6567_v43 = vsel %vm11325_vm10, %v6257_v16, %v6566_v11  ;;  %v6211_v47 = vpack.c.bf16 %v6179_v31, %v6179_v31  ;;  %v6076_v13 = vadd.f32 %v6000_v49, %v4951_v57  ;;  %v4955_v45 = vpop.f32.mrf.mxu1  ;;  %v7589_v44 = vld [vmem:[#allocation3 + $0xc] sm:$0xf] }
 0x379   : > { %v3663_v27 = vpop.permute.xlu2 %3662  ;;  %6565 = vst.msk [vmem:[#allocation3 + $0x10] sm:$0xf] %vm503_vm12, %v6256_v48  ;;  %v5757_v59 = vpop.permute.xlu1 %5756  ;;  %v8021_v63 = vld [vmem:[#allocation3 + $0xc] sm:$0xe]  ;;  %v13600_v14 = vadd.f32 %v4955_v45, %v4822_v46  ;;  %v7641_v41 = vshll.u32 %v7589_v44, 16  ;;  %v527_v57 = vsel %vm11325_vm10, 0, %v526_v7  ;;  %v7427_v31 = vunpack.c.l.b16 %v7176_v12 }
 0x37a   : > { %v3661_v60 = vpop.permute.xlu0 %3660  ;;  %6568 = vst [vmem:[#allocation3 + $0x14] sm:$0x1] %v6567_v43  ;;  %v6259_v4 = vshrl.u32 %v6211_v47, 16  ;;  %v6112_v50 = vmul.f32 %v13507_v36, %v6076_v13  ;;  %v5876_v55 = vsel %vm1125_vm1, %v10749_v17, %v5757_v59  ;;  %v6262_v22 = vshll.u32 %v6211_v47, 16  ;;  %v10733_v21 = vld [vmem:[#allocation2 + $0x60] sm:$0xff] }
 0x37b   : > { %v3782_v30 = vsel %vm1125_vm1, %v10717_v0, %v3661_v60  ;;  %v5917_v20 = vsel %vm3804_vm6, %v5876_v55, %v13517_v42  ;;  %v7638_v42 = vshrl.u32 %v7589_v44, 16  ;;  %528 = vst [vmem:[#allocation3 + $0x30] sm:$0x1] %v527_v57  ;;  %v10476_v49 = vrot.slane %v8021_v63, 9 }
 0x37c   : > { %v13593_v32 = vrot.slane %v6259_v4, 7  ;;  %v6148_v29 = vadd.f32 %v13523_v23, %v6112_v50  ;;  %v3822_v33 = vsel %vm3804_vm6, %v3782_v30, %v13550_v15  ;;  %10386 = vmatmul.msk.bf16.gmra.mxu2 %vm4765_vm9, %v5917_v20  ;;  %v13607_v15 = vsel %vm1125_vm1, %v10718_v10, %v3663_v27  ;;  %v10732_v27 = vld [vmem:[#allocation2 + $0x54] sm:$0xff]  ;;  %v10715_v30 = vld [vmem:[#allocation2 + $0x48] sm:$0xff] }
 0x37d   : > { %10285 = vmatmul.msk.bf16.vlgmr.msrb.gmra.mxu3 %vm4765_vm9, %v3822_v33  ;;  %v7640_v1 = vrot.slane %v7638_v42, 4  ;;  %v7643_v48 = vrot.slane %v7641_v41, 5  ;;  %v7458_v4 = vpack.c.b16 %v7427_v31, %v7426_v58  ;;  %v514_v42 = vld [vmem:[#allocation3] sm:$0x1] }
 0x37e   : > { %v6264_v11 = vor.u32 %v6262_v22, %v13593_v32  ;;  %v6180_v54 = vmax.f32 %v6148_v29, 0.0  ;;  %v6265_v43 = vrot.slane %v13593_v32, 4  ;;  %v6573_v41 = vld [vmem:[#allocation3 + $0x20] sm:$0x1] }
 0x37f   : > { %v6003_v28 = vpop.f32.mrf.mxu2  ;;  %v7644_v20 = vor.u32 %v7643_v48, %v7640_v1  ;;  %7474 = vrot.lane.b32.xlu1 %v7458_v4, %s10851_s19  ;;  %v10751_v1 = vld [vmem:[#allocation2 + $0x78] sm:$0xff] }
 0x380   : > { %v6570_v47 = vsel %vm11408_vm13, %v6264_v11, %v6569_v3  ;;  %v6212_v13 = vpack.c.bf16 %v6180_v54, %v6180_v54  ;;  %v6077_v45 = vadd.f32 %v6003_v28, %v4954_v19  ;;  %v7590_v17 = vld [vmem:[#allocation3 + $0x10] sm:$0xf]  ;;  %v4958_v44 = vpop.f32.mrf.mxu1 }
 0x381   : > { %v4575_v16 = vpop.permute.xlu2 %4574  ;;  %6571 = vst [vmem:[#allocation3 + $0x18] sm:$0xf] %v6570_v47  ;;  %v3657_v0 = vpop.permute.xlu1 %3656  ;;  %v7621_v50 = vld [vmem:[#allocation3 + $0x14] sm:$0x1]  ;;  %v8087_v55 = vrot.slane %v7590_v17, 5  ;;  %v7647_v24 = vshll.u32 %v7590_v17, 16 }
 0x382   : > { %v13615_v59 = vsel %vm1125_vm1, %v10733_v21, %v4575_v16  ;;  %v4573_v60 = vpop.permute.xlu0 %4572  ;;  %v6267_v22 = vshrl.u32 %v6212_v13, 16  ;;  %v6270_v46 = vshll.u32 %v6212_v13, 16  ;;  %v6113_v10 = vmul.f32 %v13507_v36, %v6077_v45 }
 0x383   : > { %v4692_v19 = vsel %vm1125_vm1, %v10732_v27, %v4573_v60  ;;  %v4825_v32 = vpop.f32.mrf.mxu0  ;;  %v8088_v29 = vsel %vm11507_vm7, %v10476_v49, %v8087_v55  ;;  %v8089_v33 = vrot.slane %v8087_v55, 4  ;;  %v8090_v58 = vrot.slane %v7621_v50, 5 }
 0x384   : > { %v6269_v52 = vrot.slane %v6267_v22, 7  ;;  %v6149_v63 = vadd.f32 %v13523_v23, %v6113_v10  ;;  %v3776_v7 = vsel %vm1125_vm1, %v10715_v30, %v3657_v0  ;;  %v4733_v3 = vsel %vm3804_vm6, %v4692_v19, %v13566_v8  ;;  %v444_v10 = vld [vmem:[#allocation2 + $0xcc] sm:$0x1] }
 0x385   : > { %v13626_v57 = vadd.f32 %v4958_v44, %v4825_v32  ;;  %10263 = vmatmul.msk.bf16.gmra.mxu0 %vm4765_vm9, %v4733_v3  ;;  %v8091_v11 = vsel %vm11507_vm7, %v8089_v33, %v8090_v58  ;;  %v8341_v54 = vunpack.c.l.b16 %v8088_v29  ;;  %v7649_v12 = vrot.slane %v7647_v24, 5 }
 0x386   : > { %v6272_v28 = vor.u32 %v6270_v46, %v6269_v52  ;;  %v6274_v21 = vrot.slane %v6269_v52, 4  ;;  %v6181_v16 = vmax.f32 %v6149_v63, 0.0  ;;  %v8342_v31 = vunpack.c.l.b16 %v8091_v11  ;;  %v13654_v11 = vld [vmem:[#allocation2 + $0xd0] sm:$0xf] }
 0x387   : > { %v6005_v49 = vpop.f32.mrf.mxu2  ;;  %v7645_v47 = vrot.slane %v7644_v20, 4  ;;  %v7651_v8 = vshrl.u32 %v7590_v17, 16  ;;  %v7657_v13 = vshll.u32 %v7621_v50, 16  ;;  %v515_v45 = vsel %vm11325_vm10, 0, %v514_v42  ;;  %v10750_v50 = vld [vmem:[#allocation2 + $0x6c] sm:$0xff] }
 0x388   : > { %v6273_v27 = vsel %vm11150_vm5, %v6265_v43, %v6272_v28  ;;  %v6574_v0 = vsel %vm11325_vm10, %v6274_v21, %v6573_v41  ;;  %v6213_v60 = vpack.c.bf16 %v6181_v16, %v6181_v16  ;;  %v6078_v4 = vadd.f32 %v6005_v49, %v13600_v14  ;;  %516 = vst [vmem:[#allocation3] sm:$0x1] %v515_v45  ;;  %v500_v41 = vld [vmem:[#allocation2 + $0xd4] sm:$0x1]  ;;  %v4960_v28 = vpop.f32.mrf.mxu1 }
 0x389   : > { %v5761_v48 = vpop.permute.xlu2 %5760  ;;  %6572 = vst.msk [vmem:[#allocation3 + $0x1c] sm:$0xf] %vm503_vm12, %v6273_v27  ;;  %v3737_v17 = vpop.permute.xlu1 %3736  ;;  %v8373_v22 = vpack.c.b16 %v8342_v31, %v8341_v54  ;;  %v7650_v46 = vsel %vm11523_vm4, %v7645_v47, %v7649_v12  ;;  %v7653_v43 = vrot.slane %v7651_v8, 4  ;;  %v7659_v44 = vrot.slane %v7657_v13, 5  ;;  %v6576_v54 = vld [vmem:[#allocation3 + $0x24] sm:$0xf] }
 0x38a   : > { %v13640_v55 = vsel %vm1125_vm1, %v10751_v1, %v5761_v48  ;;  %6575 = vst [vmem:[#allocation3 + $0x20] sm:$0x1] %v6574_v0  ;;  %v6276_v30 = vshrl.u32 %v6213_v60, 16  ;;  %v6279_v20 = vshll.u32 %v6213_v60, 16  ;;  %v6114_v14 = vmul.f32 %v13507_v36, %v6078_v4 }
 0x38b   : > { %v5759_v24 = vpop.permute.xlu0 %5758  ;;  %8389 = vrot.lane.b32.xlu2 %v8373_v22, %s10851_s19  ;;  %v4827_v32 = vpop.f32.mrf.mxu0  ;;  %v3818_v29 = vsel %vm3804_vm6, %v3776_v7, %v3737_v17  ;;  %v7654_v33 = vor.u32 %v7653_v43, %v7649_v12  ;;  %v6732_v58 = vshll.u32 %v13571_v6, 16  ;;  %v8261_v3 = vunpack.c.l.b16 %v7650_v46 }
 0x38c   : > { %v5879_v19 = vsel %vm1125_vm1, %v10750_v50, %v5759_v24  ;;  %v13649_v52 = vrot.slane %v6276_v30, 7  ;;  %v6150_v63 = vadd.f32 %v13523_v23, %v6114_v14  ;;  %10283 = vmatmul.msk.bf16.gmra.mxu1 %vm4765_vm9, %v3818_v29  ;;  %v6736_v42 = vshrl.u32 %v13571_v6, 16  ;;  %v581_v29 = vld [vmem:[#allocation3 + $0x38] sm:$0x1] }
 0x38d   : > { %v7655_v21 = vrot.slane %v7654_v33, 4  ;;  %v13656_v16 = vrot.slane %v6732_v58, 5  ;;  %v6742_v7 = vshll.u32 %v13591_v38, 16  ;;  %v445_v31 = vsel %vm11364_vm11, 0, %v444_v10 }
 0x38e   : > { %v6281_v49 = vor.u32 %v6279_v20, %v13649_v52  ;;  %v6182_v1 = vmax.f32 %v6150_v63, 0.0  ;;  %v13662_v48 = vadd.f32 %v4960_v28, %v4827_v32  ;;  %v6738_v47 = vrot.slane %v6736_v42, 4  ;;  %446 = vst [vmem:[#allocation2 + $0xcc] sm:$0x1] %v445_v31  ;;  %v10716_v63 = vld [vmem:[#allocation2 + $0x54] sm:$0xff] }
 0x38f   : > { %v6282_v6 = vrot.slane %v13649_v52, 4  ;;  %v7660_v8 = vsel %vm11523_vm4, %v7655_v21, %v7659_v44  ;;  %v6008_v13 = vpop.f32.mrf.mxu2  ;;  %v6674_v45 = vld [vmem:[#allocation3] sm:$0xf]  ;;  %v501_v38 = vsel %vm11306_vm8, 0, %v500_v41  ;;  %v5442_v0 = vshll.u32 %v13654_v11, 16 }
 0x390   : > { %v6577_v60 = vsel %vm11408_vm13, %v6281_v49, %v6576_v54  ;;  %v6214_v4 = vpack.c.bf16 %v6182_v1, %v6182_v1  ;;  %v8262_v17 = vunpack.c.l.b16 %v7660_v8  ;;  %v6079_v50 = vadd.f32 %v6008_v13, %v13626_v57  ;;  %502 = vst [vmem:[#allocation2 + $0xd4] sm:$0x1] %v501_v38  ;;  %v6580_v28 = vld [vmem:[#allocation3 + $0x2c] sm:$0x1]  ;;  %v9197_v13 = vld [vmem:[#allocation3 + $0x18] sm:$0xe] }
 0x391   : > { %6578 = vst [vmem:[#allocation3 + $0x24] sm:$0xf] %v6577_v60  ;;  %v5839_v24 = vpop.permute.xlu1 %5838  ;;  %v6723_v22 = vshrl.u32 %v6674_v45, 16  ;;  %v6726_v46 = vshll.u32 %v6674_v45, 16  ;;  %v6739_v43 = vor.u32 %v6738_v47, %v13656_v16  ;;  %v6744_v10 = vrot.slane %v6742_v7, 5 }
 0x392   : > { %v6284_v20 = vshrl.u32 %v6214_v4, 16  ;;  %v8293_v14 = vpack.c.b16 %v8262_v17, %v8261_v3  ;;  %v6115_v44 = vmul.f32 %v13507_v36, %v6079_v50  ;;  %v13675_v32 = vrot.slane %v5442_v0, 5 }
 0x393   : > { %v3659_v30 = vpop.permute.xlu0 %3658  ;;  %v5919_v33 = vsel %vm3804_vm6, %v5879_v19, %v5839_v24  ;;  %v6725_v58 = vrot.slane %v6723_v22, 4  ;;  %v6728_v57 = vrot.slane %v6726_v46, 5  ;;  %v6740_v52 = vrot.slane %v6739_v43, 4  ;;  %v8766_v46 = vld [vmem:[#allocation3 + $0x1c] sm:$0xf] }
 0x394   : > { %v6286_v42 = vrot.slane %v6284_v20, 7  ;;  %v6287_v41 = vshll.u32 %v6214_v4, 16  ;;  %8309 = vrot.lane.b32.xlu1 %v8293_v14, %s10849_s29  ;;  %v6151_v54 = vadd.f32 %v13523_v23, %v6115_v44  ;;  %10387 = vmatmul.msk.bf16.gmra.mxu2 %vm4765_vm9, %v5919_v33  ;;  %v5446_v3 = vshrl.u32 %v13654_v11, 16 }
 0x395   : > { %v6729_v21 = vor.u32 %v6728_v57, %v6725_v58  ;;  %v6745_v7 = vsel %vm11523_vm4, %v6740_v52, %v6744_v10  ;;  %v3779_v19 = vsel %vm1125_vm1, %v10716_v63, %v3659_v30  ;;  %v5054_v12 = vld [vmem:[#allocation2 + $0xcc] sm:$0xf]  ;;  %v582_v31 = vsel %vm13435_vm3, 0, %v581_v29 }
 0x396   : > { %v6289_v49 = vor.u32 %v6287_v41, %v6286_v42  ;;  %v6291_v1 = vrot.slane %v6286_v42, 4  ;;  %v6183_v47 = vmax.f32 %v6151_v54, 0.0  ;;  %v7347_v8 = vunpack.c.l.b16 %v6745_v7  ;;  %583 = vst [vmem:[#allocation3 + $0x38] sm:$0x1] %v582_v31 }
 0x397   : > { %v6730_v45 = vrot.slane %v6729_v21, 4  ;;  %v13687_v27 = vld [vmem:[#allocation2 + $0xd4] sm:$0x1]  ;;  %v5433_v38 = vshrl.u32 %v5054_v12, 16  ;;  %v5436_v0 = vshll.u32 %v5054_v12, 16  ;;  %v5448_v60 = vrot.slane %v5446_v3, 4  ;;  %v6010_v22 = vpop.f32.mrf.mxu2 }
 0x398   : > { %v6290_v4 = vsel %vm11150_vm5, %v6282_v6, %v6289_v49  ;;  %v6581_v17 = vsel %vm11325_vm10, %v6291_v1, %v6580_v28  ;;  %v6215_v50 = vpack.c.bf16 %v6183_v47, %v6183_v47  ;;  %v5452_v24 = vshll.u32 %v13687_v27, 16  ;;  %v8797_v6 = vld [vmem:[#allocation3 + $0x20] sm:$0x1]  ;;  %v6583_v21 = vld [vmem:[#allocation3 + $0x30] sm:$0xf] }
 0x399   : > { %6579 = vst.msk [vmem:[#allocation3 + $0x28] sm:$0xf] %vm503_vm12, %v6290_v4  ;;  %v6735_v43 = vsel %vm11523_vm4, %v6730_v45, %v13656_v16  ;;  %v5435_v10 = vrot.slane %v5433_v38, 4  ;;  %v5438_v30 = vrot.slane %v5436_v0, 5  ;;  %v5449_v20 = vor.u32 %v5448_v60, %v13675_v32  ;;  %v3743_v14 = vpop.permute.xlu1 %3742  ;;  %v8765_v1 = vld [vmem:[#allocation3 + $0x18] sm:$0xf] }
 0x39a   : > { %6582 = vst [vmem:[#allocation3 + $0x2c] sm:$0x1] %v6581_v17  ;;  %v6293_v44 = vshrl.u32 %v6215_v50, 16  ;;  %v7346_v29 = vunpack.c.l.b16 %v6735_v43  ;;  %v5454_v33 = vrot.slane %v5452_v24, 5  ;;  %v10598_v57 = vrot.slane %v9197_v13, 9 }
 0x39b   : > { %v3739_v58 = vpop.permute.xlu0 %3738  ;;  %v6296_v52 = vshll.u32 %v6215_v50, 16  ;;  %v5439_v63 = vor.u32 %v5438_v30, %v5435_v10  ;;  %v5450_v42 = vrot.slane %v5449_v20, 4  ;;  %v6080_v41 = vadd.f32 %v6010_v22, %v13662_v48  ;;  %v13720_v50 = vld [vmem:[#allocation3 + $0x1c] sm:$0xf]  ;;  %v8022_v24 = vld [vmem:[#allocation3 + $0x18] sm:$0xe] }
 0x39c   : > { %v13700_v54 = vrot.slane %v6293_v44, 7  ;;  %v7378_v16 = vpack.c.b16 %v7347_v8, %v7346_v29  ;;  %v9263_v3 = vrot.slane %v8766_v46, 5  ;;  %v9266_v28 = vrot.slane %v8797_v6, 5 }
 0x39d   : > { %v5440_v7 = vrot.slane %v5439_v63, 4  ;;  %v5455_v12 = vsel %vm11523_vm4, %v5450_v42, %v5454_v33  ;;  %v6116_v31 = vmul.f32 %v13507_v36, %v6080_v41  ;;  %v3820_v49 = vsel %vm3804_vm6, %v3779_v19, %v3739_v58  ;;  %v13725_v58 = vld [vmem:[#allocation3 + $0x20] sm:$0x1] }
 0x39e   : > { %v6298_v47 = vor.u32 %v6296_v52, %v13700_v54  ;;  %v6299_v13 = vrot.slane %v13700_v54, 4  ;;  %7394 = vrot.lane.b32.xlu0 %v7378_v16, %s10849_s29  ;;  %v5727_v48 = vunpack.c.l.b16 %v5455_v12  ;;  %v9264_v8 = vsel %vm11507_vm7, %v10598_v57, %v9263_v3  ;;  %10284 = vmatmul.msk.bf16.gmra.mxu1 %vm4765_vm9, %v3820_v49 }
 0x39f   : > { %v5445_v45 = vsel %vm11523_vm4, %v5440_v7, %v13675_v32  ;;  %v6152_v36 = vadd.f32 %v13523_v23, %v6116_v31  ;;  %v9265_v19 = vrot.slane %v9263_v3, 4  ;;  %v9517_v38 = vunpack.c.l.b16 %v9264_v8 }
 0x3a0   : > { %v6584_v0 = vsel %vm11408_vm13, %v6298_v47, %v6583_v21  ;;  %v5726_v60 = vunpack.c.l.b16 %v5445_v45  ;;  %v3824_v4 = vsel %vm3804_vm6, %v13607_v15, %v3743_v14  ;;  %v8814_v17 = vshrl.u32 %v8765_v1, 16  ;;  %v6587_v45 = vld [vmem:[#allocation3 + $0x38] sm:$0x1] }
 0x3a1   : > { %6585 = vst [vmem:[#allocation3 + $0x30] sm:$0xf] %v6584_v0  ;;  %v6184_v22 = vmax.f32 %v6152_v36, 0.0  ;;  %v9267_v32 = vsel %vm11507_vm7, %v9265_v19, %v9266_v28  ;;  %10286 = vmatmul.msk.bf16.gmra.mxu3 %vm4765_vm9, %v3824_v4  ;;  %v8817_v23 = vshll.u32 %v8765_v1, 16  ;;  %v8823_v43 = vshll.u32 %v8766_v46, 16 }
 0x3a2   : > { %v5743_v10 = vpack.c.b16 %v5727_v48, %v5726_v60  ;;  %v9518_v30 = vunpack.c.l.b16 %v9267_v32  ;;  %v8816_v20 = vrot.slane %v8814_v17, 4  ;;  %v8827_v44 = vshrl.u32 %v8766_v46, 16  ;;  %v4655_v57 = vpop.permute.xlu1 %4654  ;;  %v7591_v46 = vld [vmem:[#allocation3 + $0x18] sm:$0xf] }
 0x3a3   : > { %v6216_v29 = vpack.c.bf16 %v6184_v22, %v6184_v22  ;;  %v8819_v33 = vrot.slane %v8817_v23, 5  ;;  %v8825_v15 = vrot.slane %v8823_v43, 5  ;;  %v8833_v14 = vshll.u32 %v8797_v6, 16  ;;  %v5841_v16 = vpop.permute.xlu0 %5840  ;;  %v5471_v43 = vld [vmem:[#allocation2 + $0xcc] sm:$0xe] }
 0x3a4   : > { %5774 = vrot.lane.b32.xlu1 %v5743_v10, %s10851_s19  ;;  %v9549_v52 = vpack.c.b16 %v9518_v30, %v9517_v38  ;;  %v8829_v63 = vrot.slane %v8827_v44, 4  ;;  %v10477_v42 = vrot.slane %v8022_v24, 9  ;;  %v8094_v41 = vrot.slane %v13720_v50, 5 }
 0x3a5   : > { %v6301_v3 = vshrl.u32 %v6216_v29, 16  ;;  %v6304_v28 = vshll.u32 %v6216_v29, 16  ;;  %v8820_v21 = vor.u32 %v8819_v33, %v8816_v20  ;;  %v8835_v7 = vrot.slane %v8833_v14, 5 }
 0x3a6   : > { %9565 = vrot.lane.b32.xlu0 %v9549_v52, %s10851_s19  ;;  %v8830_v12 = vor.u32 %v8829_v63, %v8825_v15  ;;  %v8095_v6 = vsel %vm11507_vm7, %v10477_v42, %v8094_v41  ;;  %v8096_v31 = vrot.slane %v8094_v41, 4  ;;  %v8097_v49 = vrot.slane %v13725_v58, 5  ;;  %v6677_v41 = vld [vmem:[#allocation3 + $0x10] sm:$0xf] }
 0x3a7   : > { %v6303_v1 = vrot.slane %v6301_v3, 7  ;;  %v8821_v47 = vrot.slane %v8820_v21, 4  ;;  %v8343_v48 = vunpack.c.l.b16 %v8095_v6  ;;  %v5921_v8 = vsel %vm3804_vm6, %v13640_v55, %v5841_v16  ;;  %v3745_v16 = vpop.permute.xlu2 %3744  ;;  %v6707_v6 = vld [vmem:[#allocation3 + $0x14] sm:$0x1] }
 0x3a8   : > { %v8831_v36 = vrot.slane %v8830_v12, 4  ;;  %v8098_v19 = vsel %vm11507_vm7, %v8096_v31, %v8097_v49  ;;  %v7662_v38 = vshrl.u32 %v7591_v46, 16  ;;  %v7665_v0 = vshll.u32 %v7591_v46, 16  ;;  %10388 = vmatmul.msk.bf16.gmra.mxu2 %vm4765_vm9, %v5921_v8  ;;  %v10752_v12 = vld [vmem:[#allocation2 + $0x84] sm:$0xff] }
 0x3a9   : > { %v6306_v60 = vor.u32 %v6304_v28, %v6303_v1  ;;  %v6308_v4 = vrot.slane %v6303_v1, 4  ;;  %v8826_v17 = vsel %vm11523_vm4, %v8821_v47, %v8825_v15  ;;  %v8344_v24 = vunpack.c.l.b16 %v8098_v19 }
 0x3aa   : > { %v8836_v22 = vsel %vm11523_vm4, %v8831_v36, %v8835_v7  ;;  %v9437_v32 = vunpack.c.l.b16 %v8826_v17  ;;  %v7664_v55 = vrot.slane %v7662_v38, 4  ;;  %v7667_v23 = vrot.slane %v7665_v0, 5  ;;  %v3665_v42 = vpop.permute.xlu1 %3664  ;;  %v7107_v7 = vld [vmem:[#allocation3 + $0xc] sm:$0xe] }
 0x3ab   : > { %v6307_v10 = vsel %vm11150_vm5, %v6299_v13, %v6306_v60  ;;  %v6588_v30 = vsel %vm11325_vm10, %v6308_v4, %v6587_v45  ;;  %v9438_v20 = vunpack.c.l.b16 %v8836_v22  ;;  %v8374_v44 = vpack.c.b16 %v8344_v24, %v8343_v48  ;;  %v6676_v48 = vld [vmem:[#allocation3 + $0xc] sm:$0xf] }
 0x3ac   : > { %6586 = vst.msk [vmem:[#allocation3 + $0x34] sm:$0xf] %vm503_vm12, %v6307_v10  ;;  %v7668_v29 = vor.u32 %v7667_v23, %v7664_v55  ;;  %v7671_v33 = vshll.u32 %v13720_v50, 16  ;;  %v7675_v15 = vshrl.u32 %v13720_v50, 16  ;;  %v7681_v14 = vshll.u32 %v13725_v58, 16  ;;  %v10719_v50 = vld [vmem:[#allocation2 + $0x78] sm:$0xff]  ;;  %v5763_v58 = vpop.permute.xlu0 %5762 }
 0x3ad   : > { %6589 = vst [vmem:[#allocation3 + $0x38] sm:$0x1] %v6588_v30  ;;  %v9469_v52 = vpack.c.b16 %v9438_v20, %v9437_v32  ;;  %8391 = vrot.lane.b32.xlu1 %v8374_v44, %s10851_s19  ;;  %v4735_v54 = vsel %vm3804_vm6, %v13615_v59, %v4655_v57  ;;  %v10308_v13 = vrot.slane %v5471_v43, 9  ;;  %v5627_v63 = vrot.slane %v13654_v11, 5  ;;  %v8767_v10 = vld [vmem:[#allocation3 + $0x24] sm:$0xf] }
 0x3ae   : > { %v7669_v3 = vrot.slane %v7668_v29, 4  ;;  %v7673_v28 = vrot.slane %v7671_v33, 5  ;;  %v7677_v21 = vrot.slane %v7675_v15, 4  ;;  %10264 = vmatmul.msk.bf16.gmra.mxu0 %vm4765_vm9, %v4735_v54  ;;  %v7683_v46 = vrot.slane %v7681_v14, 5  ;;  %v13773_v33 = vld [vmem:[#allocation3 + $0x28] sm:$0xf] }
 0x3af   : > { %9485 = vrot.lane.b32.xlu2 %v9469_v52, %s10849_s29  ;;  %v5628_v59 = vsel %vm11507_vm7, %v10308_v13, %v5627_v63  ;;  %v5629_v57 = vrot.slane %v5627_v63, 4  ;;  %v5630_v11 = vrot.slane %v13687_v27, 5  ;;  %v3788_v47 = vsel %vm1125_vm1, %v10719_v50, %v3665_v42 }
 0x3b0   : > { %v7674_v31 = vsel %vm11523_vm4, %v7669_v3, %v7673_v28  ;;  %v7678_v49 = vor.u32 %v7677_v21, %v7673_v28  ;;  %v5806_v1 = vunpack.c.l.b16 %v5628_v59  ;;  %v5885_v36 = vsel %vm1125_vm1, %v10752_v12, %v5763_v58  ;;  %v13780_v28 = vpop.permute.xlu2 %3666  ;;  %v7593_v59 = vld [vmem:[#allocation3 + $0x24] sm:$0xf] }
 0x3b1   : > { %v8263_v8 = vunpack.c.l.b16 %v7674_v31  ;;  %v5631_v45 = vsel %vm11507_vm7, %v5629_v57, %v5630_v11  ;;  %v10397_v19 = vrot.slane %v7107_v7, 9  ;;  %v7179_v27 = vrot.slane %v6677_v41, 5 }
 0x3b2   : > { %v7679_v38 = vrot.slane %v7678_v49, 4  ;;  %v5807_v0 = vunpack.c.l.b16 %v5631_v45  ;;  %v7182_v60 = vrot.slane %v6707_v6, 5  ;;  %v3826_v4 = vsel %vm3804_vm6, %v3788_v47, %v3745_v16  ;;  %v13778_v16 = vld [vmem:[#allocation3 + $0x2c] sm:$0x1]  ;;  %v7594_v47 = vld [vmem:[#allocation3 + $0x28] sm:$0xf] }
 0x3b3   : > { %v6747_v17 = vshrl.u32 %v6676_v48, 16  ;;  %v6750_v24 = vshll.u32 %v6676_v48, 16  ;;  %v6756_v22 = vshll.u32 %v6677_v41, 16  ;;  %v7180_v23 = vsel %vm11507_vm7, %v10397_v19, %v7179_v27  ;;  %10287 = vmatmul.msk.bf16.gmra.mxu3 %vm4765_vm9, %v3826_v4  ;;  %v7623_v19 = vld [vmem:[#allocation3 + $0x2c] sm:$0x1] }
 0x3b4   : > { %v7684_v32 = vsel %vm11523_vm4, %v7679_v38, %v7683_v46  ;;  %v5823_v55 = vpack.c.b16 %v5807_v0, %v5806_v1  ;;  %v7181_v43 = vrot.slane %v7179_v27, 4  ;;  %v7428_v20 = vunpack.c.l.b16 %v7180_v23  ;;  %v5843_v46 = vpop.permute.xlu1 %5842 }
 0x3b5   : > { %v8264_v30 = vunpack.c.l.b16 %v7684_v32  ;;  %v6749_v44 = vrot.slane %v6747_v17, 4  ;;  %v6752_v29 = vrot.slane %v6750_v24, 5  ;;  %v6758_v14 = vrot.slane %v6756_v22, 5 }
 0x3b6   : > { %v7183_v15 = vsel %vm11507_vm7, %v7181_v43, %v7182_v60  ;;  %v6760_v52 = vshrl.u32 %v6677_v41, 16  ;;  %v6766_v54 = vshll.u32 %v6707_v6, 16  ;;  %v8838_v3 = vshrl.u32 %v8767_v10, 16 }
 0x3b7   : > { %v8294_v13 = vpack.c.b16 %v8264_v30, %v8263_v8  ;;  %5854 = vrot.lane.b32.xlu2 %v5823_v55, %s10850_s18  ;;  %v7429_v63 = vunpack.c.l.b16 %v7183_v15  ;;  %v6753_v42 = vor.u32 %v6752_v29, %v6749_v44  ;;  %v8841_v58 = vshll.u32 %v8767_v10, 16  ;;  %v9198_v30 = vld [vmem:[#allocation3 + $0x24] sm:$0xe] }
 0x3b8   : > { %v6762_v21 = vrot.slane %v6760_v52, 4  ;;  %v6768_v50 = vrot.slane %v6766_v54, 5  ;;  %v8847_v7 = vshll.u32 %v13773_v33, 16  ;;  %v8840_v11 = vrot.slane %v8838_v3, 4  ;;  %v8023_v54 = vld [vmem:[#allocation3 + $0x24] sm:$0xe] }
 0x3b9   : > { %8311 = vrot.lane.b32.xlu0 %v8294_v13, %s10849_s29  ;;  %v7459_v41 = vpack.c.b16 %v7429_v63, %v7428_v20  ;;  %v6754_v57 = vrot.slane %v6753_v42, 4  ;;  %v8851_v12 = vshrl.u32 %v13773_v33, 16  ;;  %v8843_v31 = vrot.slane %v8841_v58, 5 }
 0x3ba   : > { %v6763_v6 = vor.u32 %v6762_v21, %v6758_v14  ;;  %v8849_v49 = vrot.slane %v8847_v7, 5  ;;  %v8857_v1 = vshll.u32 %v13778_v16, 16  ;;  %v5923_v45 = vsel %vm3804_vm6, %v5885_v36, %v5843_v46  ;;  %v13797_v21 = vpop.permute.xlu2 %5844 }
 0x3bb   : > { %v6759_v48 = vsel %vm11523_vm4, %v6754_v57, %v6758_v14  ;;  %v8853_v8 = vrot.slane %v8851_v12, 4  ;;  %v7686_v38 = vshrl.u32 %v7593_v59, 16  ;;  %v8844_v60 = vor.u32 %v8843_v31, %v8840_v11  ;;  %10389 = vmatmul.msk.bf16.gmra.mxu2 %vm4765_vm9, %v5923_v45 }
 0x3bc   : > { %v6764_v0 = vrot.slane %v6763_v6, 4  ;;  %v7348_v27 = vunpack.c.l.b16 %v6759_v48  ;;  %v8859_v4 = vrot.slane %v8857_v1, 5  ;;  %v7689_v22 = vshll.u32 %v7593_v59, 16  ;;  %v3747_v6 = vpop.permute.xlu0 %3746 }
 0x3bd   : > { %v8854_v17 = vor.u32 %v8853_v8, %v8849_v49  ;;  %v7688_v24 = vrot.slane %v7686_v38, 4  ;;  %v7695_v32 = vshll.u32 %v7594_v47, 16  ;;  %v8845_v23 = vrot.slane %v8844_v60, 4  ;;  %v10720_v38 = vld [vmem:[#allocation2 + $0x84] sm:$0xff]  ;;  %v7108_v60 = vld [vmem:[#allocation3 + $0x18] sm:$0xe] }
 0x3be   : > { %v6769_v55 = vsel %vm11523_vm4, %v6764_v0, %v6768_v50  ;;  %v7699_v43 = vshrl.u32 %v7594_v47, 16  ;;  %v7705_v10 = vshll.u32 %v7623_v19, 16  ;;  %v7691_v44 = vrot.slane %v7689_v22, 5 }
 0x3bf   : > { %v7349_v36 = vunpack.c.l.b16 %v6769_v55  ;;  %v8855_v20 = vrot.slane %v8854_v17, 4  ;;  %v7697_v29 = vrot.slane %v7695_v32, 5  ;;  %v8850_v15 = vsel %vm11523_vm4, %v8845_v23, %v8849_v49  ;;  %v6708_v32 = vld [vmem:[#allocation3 + $0x20] sm:$0x1] }
 0x3c0   : > { %v7701_v14 = vrot.slane %v7699_v43, 4  ;;  %v7707_v52 = vrot.slane %v7705_v10, 5  ;;  %v7692_v42 = vor.u32 %v7691_v44, %v7688_v24  ;;  %v10599_v3 = vrot.slane %v9198_v30, 9 }
 0x3c1   : > { %7476 = vrot.lane.b32.xlu0 %v7459_v41, %s10851_s19  ;;  %v7379_v13 = vpack.c.b16 %v7349_v36, %v7348_v27  ;;  %v8860_v63 = vsel %vm11523_vm4, %v8855_v20, %v8859_v4  ;;  %v9439_v50 = vunpack.c.l.b16 %v8850_v15  ;;  %v9270_v46 = vrot.slane %v13773_v33, 5  ;;  %v6679_v27 = vld [vmem:[#allocation3 + $0x1c] sm:$0xf] }
 0x3c2   : > { %v9440_v58 = vunpack.c.l.b16 %v8860_v63  ;;  %v7702_v7 = vor.u32 %v7701_v14, %v7697_v29  ;;  %v7693_v59 = vrot.slane %v7692_v42, 4  ;;  %v9273_v57 = vrot.slane %v13778_v16, 5  ;;  %v13822_v42 = vpop.permute.xlu2 %5766 }
 0x3c3   : > { %7396 = vrot.lane.b32.xlu2 %v7379_v13, %s10849_s29  ;;  %v10478_v11 = vrot.slane %v8023_v54, 9  ;;  %v8101_v41 = vrot.slane %v7594_v47, 5  ;;  %v9271_v49 = vsel %vm11507_vm7, %v10599_v3, %v9270_v46  ;;  %v9272_v1 = vrot.slane %v9270_v46, 4  ;;  %v13825_v46 = vld [vmem:[#allocation3 + $0x34] sm:$0xf] }
 0x3c4   : > { %v9470_v12 = vpack.c.b16 %v9440_v58, %v9439_v50  ;;  %v7703_v31 = vrot.slane %v7702_v7, 4  ;;  %v7698_v48 = vsel %vm11523_vm4, %v7693_v59, %v7697_v29  ;;  %v8104_v45 = vrot.slane %v7623_v19, 5  ;;  %v6678_v19 = vld [vmem:[#allocation3 + $0x18] sm:$0xf] }
 0x3c5   : > { %v8102_v33 = vsel %vm11507_vm7, %v10478_v11, %v8101_v41  ;;  %v8103_v8 = vrot.slane %v8101_v41, 4  ;;  %v9274_v47 = vsel %vm11507_vm7, %v9272_v1, %v9273_v57  ;;  %v9519_v0 = vunpack.c.l.b16 %v9271_v49 }
 0x3c6   : > { %9487 = vrot.lane.b32.xlu1 %v9470_v12, %s10849_s29  ;;  %v7708_v16 = vsel %vm11523_vm4, %v7703_v31, %v7707_v52  ;;  %v8265_v4 = vunpack.c.l.b16 %v7698_v48  ;;  %v9520_v24 = vunpack.c.l.b16 %v9274_v47  ;;  %v3791_v55 = vsel %vm1125_vm1, %v10720_v38, %v13780_v28  ;;  %v8769_v52 = vld [vmem:[#allocation3 + $0x30] sm:$0xf]  ;;  %v5765_v12 = vpop.permute.xlu1 %5764  ;;  %v13832_v48 = vld [vmem:[#allocation3 + $0x38] sm:$0x1] }
 0x3c7   : > { %v8266_v17 = vunpack.c.l.b16 %v7708_v16  ;;  %v8105_v22 = vsel %vm11507_vm7, %v8103_v8, %v8104_v45  ;;  %v8345_v23 = vunpack.c.l.b16 %v8102_v33  ;;  %v10398_v36 = vrot.slane %v7108_v60, 9  ;;  %v7595_v47 = vld [vmem:[#allocation3 + $0x30] sm:$0xf] }
 0x3c8   : > { %v8346_v43 = vunpack.c.l.b16 %v8105_v22  ;;  %v9550_v30 = vpack.c.b16 %v9520_v24, %v9519_v0  ;;  %v7186_v20 = vrot.slane %v6679_v27, 5  ;;  %v7189_v44 = vrot.slane %v6708_v32, 5  ;;  %v10753_v0 = vld [vmem:[#allocation2 + $0x90] sm:$0xff] }
 0x3c9   : > { %v8295_v10 = vpack.c.b16 %v8266_v17, %v8265_v4  ;;  %v3828_v29 = vsel %vm3804_vm6, %v3791_v55, %v3747_v6  ;;  %v6771_v15 = vshrl.u32 %v6678_v19, 16  ;;  %v6774_v14 = vshll.u32 %v6678_v19, 16  ;;  %v13830_v6 = vpop.permute.xlu0 %3668  ;;  %v13837_v55 = vld [vmem:[#allocation3 + $0x34] sm:$0xf] }
 0x3ca   : > { %v7187_v54 = vsel %vm11507_vm7, %v10398_v36, %v7186_v20  ;;  %v7188_v28 = vrot.slane %v7186_v20, 4  ;;  %v6780_v13 = vshll.u32 %v6679_v27, 16  ;;  %v6784_v63 = vshrl.u32 %v6679_v27, 16  ;;  %10288 = vmatmul.msk.bf16.gmra.mxu3 %vm4765_vm9, %v3828_v29 }
 0x3cb   : > { %8313 = vrot.lane.b32.xlu0 %v8295_v10, %s10849_s29  ;;  %9567 = vrot.lane.b32.xlu2 %v9550_v30, %s10851_s19  ;;  %v8375_v3 = vpack.c.b16 %v8346_v43, %v8345_v23  ;;  %v6773_v50 = vrot.slane %v6771_v15, 4  ;;  %v6776_v58 = vrot.slane %v6774_v14, 5  ;;  %v6790_v7 = vshll.u32 %v6708_v32, 16 }
 0x3cc   : > { %v7190_v59 = vsel %vm11507_vm7, %v7188_v28, %v7189_v44  ;;  %v6782_v57 = vrot.slane %v6780_v13, 5  ;;  %v6786_v11 = vrot.slane %v6784_v63, 4  ;;  %v8862_v41 = vshrl.u32 %v8769_v52, 16  ;;  %v4963_v13 = vpop.f32.mrf.mxu1 }
 0x3cd   : > { %v7430_v31 = vunpack.c.l.b16 %v7187_v54  ;;  %v7431_v49 = vunpack.c.l.b16 %v7190_v59  ;;  %v6777_v1 = vor.u32 %v6776_v58, %v6773_v50  ;;  %v8865_v33 = vshll.u32 %v8769_v52, 16  ;;  %v7624_v52 = vld [vmem:[#allocation3 + $0x38] sm:$0x1]  ;;  %v13847_v59 = vpop.permute.xlu2 %3750 }
 0x3ce   : > { %8393 = vrot.lane.b32.xlu1 %v8375_v3, %s10851_s19  ;;  %v6787_v8 = vor.u32 %v6786_v11, %v6782_v57  ;;  %v8864_v45 = vrot.slane %v8862_v41, 4  ;;  %v8871_v38 = vshll.u32 %v13825_v46, 16  ;;  %v8875_v16 = vshrl.u32 %v13825_v46, 16 }
 0x3cf   : > { %v7460_v27 = vpack.c.b16 %v7431_v49, %v7430_v31  ;;  %v6778_v60 = vrot.slane %v6777_v1, 4  ;;  %v6792_v4 = vrot.slane %v6790_v7, 5  ;;  %v8867_v17 = vrot.slane %v8865_v33, 5  ;;  %v9199_v7 = vld [vmem:[#allocation3 + $0x30] sm:$0xe] }
 0x3d0   : > { %v6788_v24 = vrot.slane %v6787_v8, 4  ;;  %v8873_v22 = vrot.slane %v8871_v38, 5  ;;  %v8877_v32 = vrot.slane %v8875_v16, 4  ;;  %v8881_v19 = vshll.u32 %v13832_v48, 16  ;;  %v6013_v8 = vpop.f32.mrf.mxu2 }
 0x3d1   : > { %v5888_v23 = vsel %vm1125_vm1, %v10753_v0, %v5765_v12  ;;  %v6783_v43 = vsel %vm11523_vm4, %v6778_v60, %v6782_v57  ;;  %v8868_v10 = vor.u32 %v8867_v17, %v8864_v45  ;;  %v7710_v30 = vshrl.u32 %v7595_v47, 16  ;;  %v4830_v45 = vpop.f32.mrf.mxu0  ;;  %v13857_v0 = vpop.permute.xlu0 %5846  ;;  %v8024_v60 = vld [vmem:[#allocation3 + $0x30] sm:$0xe] }
 0x3d2   : > { %v6793_v36 = vsel %vm11523_vm4, %v6788_v24, %v6792_v4  ;;  %v7350_v20 = vunpack.c.l.b16 %v6783_v43  ;;  %v8878_v44 = vor.u32 %v8877_v32, %v8873_v22  ;;  %v7713_v29 = vshll.u32 %v7595_v47, 16  ;;  %v3749_v47 = vpop.permute.xlu1 %3748 }
 0x3d3   : > { %7478 = vrot.lane.b32.xlu0 %v7460_v27, %s10851_s19  ;;  %v7351_v15 = vunpack.c.l.b16 %v6793_v36  ;;  %v8869_v14 = vrot.slane %v8868_v10, 4  ;;  %v7712_v54 = vrot.slane %v7710_v30, 4  ;;  %v7719_v28 = vshll.u32 %v13837_v55, 16 }
 0x3d4   : > { %v8879_v63 = vrot.slane %v8878_v44, 4  ;;  %v8883_v3 = vrot.slane %v8881_v19, 5  ;;  %v7715_v50 = vrot.slane %v7713_v29, 5  ;;  %v7723_v58 = vshrl.u32 %v13837_v55, 16  ;;  %v10721_v44 = vld [vmem:[#allocation2 + $0x90] sm:$0xff] }
 0x3d5   : > { %v7380_v57 = vpack.c.b16 %v7351_v15, %v7350_v20  ;;  %v8874_v11 = vsel %vm11523_vm4, %v8869_v14, %v8873_v22  ;;  %v7721_v41 = vrot.slane %v7719_v28, 5  ;;  %v5925_v12 = vsel %vm3804_vm6, %v5888_v23, %v13797_v21  ;;  %v10754_v22 = vld [vmem:[#allocation2 + $0x9c] sm:$0xff]  ;;  %v529_v14 = vld [vmem:[#allocation3 + $0x3c] sm:$0x1] }
 0x3d6   : > { %v8884_v31 = vsel %vm11523_vm4, %v8879_v63, %v8883_v3  ;;  %v7716_v49 = vor.u32 %v7715_v50, %v7712_v54  ;;  %v7725_v1 = vrot.slane %v7723_v58, 4  ;;  %v7729_v33 = vshll.u32 %v7624_v52, 16  ;;  %10390 = vmatmul.msk.bf16.gmra.mxu2 %vm4765_vm9, %v5925_v12  ;;  %v6681_v3 = vld [vmem:[#allocation3 + $0x28] sm:$0xf]  ;;  %v7109_v50 = vld [vmem:[#allocation3 + $0x24] sm:$0xe] }
 0x3d7   : > { %7398 = vrot.lane.b32.xlu2 %v7380_v57, %s10849_s29  ;;  %v9441_v38 = vunpack.c.l.b16 %v8874_v11  ;;  %v9442_v16 = vunpack.c.l.b16 %v8884_v31  ;;  %v10600_v27 = vrot.slane %v9199_v7, 9  ;;  %v9277_v21 = vrot.slane %v13825_v46, 5  ;;  %v6680_v11 = vld [vmem:[#allocation3 + $0x24] sm:$0xf] }
 0x3d8   : > { %v7717_v4 = vrot.slane %v7716_v49, 4  ;;  %v7726_v17 = vor.u32 %v7725_v1, %v7721_v41  ;;  %v9280_v24 = vrot.slane %v13832_v48, 5  ;;  %v8108_v43 = vrot.slane %v13837_v55, 5 }
 0x3d9   : > { %v9471_v32 = vpack.c.b16 %v9442_v16, %v9441_v38  ;;  %v9278_v19 = vsel %vm11507_vm7, %v10600_v27, %v9277_v21  ;;  %v9279_v23 = vrot.slane %v9277_v21, 4  ;;  %v7731_v36 = vrot.slane %v7729_v33, 5  ;;  %v13881_v33 = vpop.permute.xlu2 %3672 }
 0x3da   : > { %v7722_v10 = vsel %vm11523_vm4, %v7717_v4, %v7721_v41  ;;  %v7727_v30 = vrot.slane %v7726_v17, 4  ;;  %v10479_v20 = vrot.slane %v8024_v60, 9  ;;  %v5891_v46 = vsel %vm1125_vm1, %v10754_v22, %v13822_v42  ;;  %v4965_v41 = vpop.f32.mrf.mxu1  ;;  %v4832_v22 = vpop.f32.mrf.mxu0 }
 0x3db   : > { %9489 = vrot.lane.b32.xlu1 %v9471_v32, %s10849_s29  ;;  %v9281_v48 = vsel %vm11507_vm7, %v9279_v23, %v9280_v24  ;;  %v8110_v29 = vrot.slane %v8108_v43, 4  ;;  %v8111_v15 = vrot.slane %v7624_v52, 5  ;;  %v9521_v54 = vunpack.c.l.b16 %v9278_v19  ;;  %v6709_v52 = vld [vmem:[#allocation3 + $0x2c] sm:$0x1]  ;;  %v6015_v24 = vpop.f32.mrf.mxu2 }
 0x3dc   : > { %v7732_v55 = vsel %vm11523_vm4, %v7727_v30, %v7731_v36  ;;  %v9522_v28 = vunpack.c.l.b16 %v9281_v48  ;;  %v8109_v63 = vsel %vm11507_vm7, %v10479_v20, %v8108_v43  ;;  %v3794_v42 = vsel %vm1125_vm1, %v10721_v44, %v13830_v6  ;;  %v584_v20 = vld [vmem:[#allocation3 + $0x44] sm:$0x1] }
 0x3dd   : > { %v8267_v58 = vunpack.c.l.b16 %v7722_v10  ;;  %v8268_v7 = vunpack.c.l.b16 %v7732_v55  ;;  %v8112_v57 = vsel %vm11507_vm7, %v8110_v29, %v8111_v15  ;;  %v530_v49 = vsel %vm11325_vm10, 0, %v529_v14  ;;  %v13907_v55 = vld [vmem:[%s15346_s6] ss:$0 sm:$0xff] }
 0x3de   : > { %v9551_v12 = vpack.c.b16 %v9522_v28, %v9521_v54  ;;  %v8348_v31 = vunpack.c.l.b16 %v8112_v57  ;;  %v4964_v1 = vadd.f32 %v4963_v13, %v4830_v45  ;;  %v8347_v16 = vunpack.c.l.b16 %v8109_v63  ;;  %531 = vst [vmem:[#allocation3 + $0x3c] sm:$0x1] %v530_v49  ;;  %v13886_v13 = vpop.permute.xlu1 %3670  ;;  %v13888_v45 = vpop.permute.xlu0 %5768 }
 0x3df   : > { %v8296_v38 = vpack.c.b16 %v8268_v7, %v8267_v58  ;;  %v10399_v6 = vrot.slane %v7109_v50, 9  ;;  %v7193_v27 = vrot.slane %v6681_v3, 5  ;;  %v7196_v60 = vrot.slane %v6709_v52, 5 }
 0x3e0   : > { %9569 = vrot.lane.b32.xlu2 %v9551_v12, %s10851_s19  ;;  %v6081_v21 = vadd.f32 %v6013_v8, %v4964_v1  ;;  %v3830_v4 = vsel %vm3804_vm6, %v3794_v42, %v3749_v47  ;;  %v6795_v17 = vshrl.u32 %v6680_v11, 16  ;;  %v8376_v32 = vpack.c.b16 %v8348_v31, %v8347_v16  ;;  %v13894_v8 = vld [vmem:[%s15345_s5] ss:$0 sm:$0xff]  ;;  %v10776_v12 = vld [vmem:[%s15347_s7] sm:$0x30] }
 0x3e1   : > { %8315 = vrot.lane.b32.xlu0 %v8296_v38, %s10849_s29  ;;  %v7195_v19 = vrot.slane %v7193_v27, 4  ;;  %10289 = vmatmul.msk.bf16.gmra.mxu3 %vm4765_vm9, %v3830_v4  ;;  %v6798_v23 = vshll.u32 %v6680_v11, 16  ;;  %v6804_v43 = vshll.u32 %v6681_v3, 16  ;;  %v7194_v10 = vsel %vm11507_vm7, %v10399_v6, %v7193_v27 }
 0x3e2   : > { %v6117_v47 = vmul.f32 %v13894_v8, %v6081_v21  ;;  %v6797_v30 = vrot.slane %v6795_v17, 4  ;;  %v6808_v36 = vshrl.u32 %v6681_v3, 16  ;;  %v6814_v15 = vshll.u32 %v6709_v52, 16  ;;  %v10560_v3 = vld [vmem:[%s15347_s7 + $0x8] sm:$0xf]  ;;  %v4968_v11 = vpop.f32.mrf.mxu1 }
 0x3e3   : > { %8395 = vrot.lane.b32.xlu1 %v8376_v32, %s10851_s19  ;;  %v7197_v44 = vsel %vm11507_vm7, %v7195_v19, %v7196_v60  ;;  %v6800_v48 = vrot.slane %v6798_v23, 5  ;;  %v6806_v29 = vrot.slane %v6804_v43, 5  ;;  %v5927_v14 = vsel %vm3804_vm6, %v5891_v46, %v13857_v0  ;;  %v10793_v0 = vld [vmem:[%s15347_s7 + $0x8] sm:$0x30]  ;;  %v10580_v46 = vld [vmem:[%s15347_s7] sm:$0xf]  ;;  %v13935_v19 = vpop.permute.xlu2 %5850 }
 0x3e4   : > { %v6153_v54 = vadd.f32 %v13907_v55, %v6117_v47  ;;  %v7433_v28 = vunpack.c.l.b16 %v7197_v44  ;;  %v6810_v63 = vrot.slane %v6808_v36, 4  ;;  %v7432_v50 = vunpack.c.l.b16 %v7194_v10  ;;  %v532_v32 = vld [vmem:[#allocation3 + $0x48] sm:$0x1] }
 0x3e5   : > { %v6801_v42 = vor.u32 %v6800_v48, %v6797_v30  ;;  %v585_v58 = vsel %vm13435_vm3, 0, %v584_v20  ;;  %v4966_v7 = vadd.f32 %v4965_v41, %v4832_v22  ;;  %v6816_v49 = vrot.slane %v6814_v15, 5  ;;  %v10682_v22 = vld [vmem:[%s15347_s7 + $0x10] sm:$0xf]  ;;  %v10722_v36 = vld [vmem:[#allocation2 + $0x9c] sm:$0xff] }
 0x3e6   : > { %v6185_v57 = vmax.f32 %v6153_v54, 0.0  ;;  %v6811_v52 = vor.u32 %v6810_v63, %v6806_v29  ;;  %586 = vst [vmem:[#allocation3 + $0x44] sm:$0x1] %v585_v58  ;;  %10391 = vmatmul.msk.bf16.gmra.mxu2 %vm4765_vm9, %v5927_v14  ;;  %v7461_v31 = vpack.c.b16 %v7433_v28, %v7432_v50  ;;  %v10561_v6 = vor.u32 %v10793_v0, %v10560_v3  ;;  %v587_v30 = vld [vmem:[#allocation3 + $0x50] sm:$0x1]  ;;  %v5849_v44 = vpop.permute.xlu1 %5848  ;;  %v13939_v48 = vpop.permute.xlu0 %3752 }
 0x3e7   : > { %v6802_v41 = vrot.slane %v6801_v42, 4  ;;  %v6082_v1 = vadd.f32 %v6015_v24, %v4966_v7  ;;  %vm8542_vm8 = vcmask 1045504   ;;  %v6018_v27 = vpop.f32.mrf.mxu2  ;;  %v10581_v17 = vor.u32 %v10776_v12, %v10580_v46  ;;  %v10810_v24 = vld [vmem:[%s15347_s7 + $0x10] sm:$0x30]  ;;  %v6590_v42 = vld [vmem:[#allocation3 + $0x3c] sm:$0xf] }
 0x3e8   : > { %v6217_v38 = vpack.c.bf16 %v6185_v57, %v6185_v57  ;;  %v6812_v16 = vrot.slane %v6811_v52, 4  ;;  %v8544_v15 = vsel %vm8542_vm8, %v10561_v6, 0  ;;  %v10683_v28 = vor.u32 %v10810_v24, %v10682_v22  ;;  %v10755_v12 = vld [vmem:[#allocation2 + $0xa8] sm:$0xff] }
 0x3e9   : > { %v4835_v21 = vpop.f32.mrf.mxu0  ;;  %7480 = vrot.lane.b32.xlu0 %v7461_v31, %s10851_s19  ;;  %v6807_v60 = vsel %vm11523_vm4, %v6802_v41, %v6806_v29  ;;  %v6118_v4 = vmul.f32 %v13894_v8, %v6082_v1  ;;  %v8673_v14 = vsel %vm8542_vm8, %v10581_v17, 0  ;;  %8553 = vmatpush.bf16.msra.mxu3 %v8544_v15  ;;  %v533_v63 = vsel %vm11325_vm10, 0, %v532_v32  ;;  %v10723_v31 = vld [vmem:[#allocation2 + $0xa8] sm:$0xff] }
 0x3ea   : > { %v6310_v23 = vshrl.u32 %v6217_v38, 16  ;;  %v6313_v43 = vshll.u32 %v6217_v38, 16  ;;  %v6817_v47 = vsel %vm11523_vm4, %v6812_v16, %v6816_v49  ;;  %v7352_v10 = vunpack.c.l.b16 %v6807_v60  ;;  %8682 = vmatpush.bf16.msra.mxu0 %v8673_v14  ;;  %534 = vst [vmem:[#allocation3 + $0x48] sm:$0x1] %v533_v63  ;;  %v4970_v41 = vpop.f32.mrf.mxu1  ;;  %v6682_v22 = vld [vmem:[#allocation3 + $0x30] sm:$0xf] }
 0x3eb   : > { %v7353_v20 = vunpack.c.l.b16 %v6817_v47  ;;  %v6154_v29 = vadd.f32 %v13907_v55, %v6118_v4  ;;  %v4969_v3 = vadd.f32 %v4968_v11, %v4835_v21  ;;  %v3797_v50 = vsel %vm1125_vm1, %v10722_v36, %v13886_v13  ;;  %v13967_v24 = vld [vmem:[#allocation3 + $0x34] sm:$0xf]  ;;  %v5773_v47 = vpop.permute.xlu2 %5772  ;;  %v10756_v14 = vld [vmem:[#allocation2 + $0xb4] sm:$0xff] }
 0x3ec   : > { %v13944_v54 = vrot.slane %v6310_v23, 7  ;;  %v588_v0 = vsel %vm13435_vm3, 0, %v587_v30  ;;  %v9718_v57 = vsel %vm8542_vm8, %v10683_v28, 0  ;;  %v3832_v49 = vsel %vm3804_vm6, %v3797_v50, %v13847_v59 }
 0x3ed   : > { %v7381_v58 = vpack.c.b16 %v7353_v20, %v7352_v10  ;;  %v6186_v7 = vmax.f32 %v6154_v29, 0.0  ;;  %v6083_v52 = vadd.f32 %v6018_v27, %v4969_v3  ;;  %589 = vst [vmem:[#allocation3 + $0x50] sm:$0x1] %v588_v0  ;;  %9727 = vmatpush.bf16.msra.mxu1 %v9718_v57  ;;  %v5894_v16 = vsel %vm1125_vm1, %v10755_v12, %v13888_v45  ;;  %v6594_v30 = vld [vmem:[#allocation3 + $0x44] sm:$0x1] }
 0x3ee   : > { %v6315_v46 = vor.u32 %v6313_v43, %v13944_v54  ;;  %v3800_v21 = vsel %vm1125_vm1, %v10723_v31, %v13881_v33  ;;  %v5929_v60 = vsel %vm3804_vm6, %v5894_v16, %v5849_v44  ;;  %v6819_v45 = vshrl.u32 %v6682_v22, 16  ;;  %v10757_v44 = vld [vmem:[#allocation2 + $0xc0] sm:$0xff]  ;;  %v5771_v28 = vpop.permute.xlu1 %5770  ;;  %v3675_v63 = vpop.permute.xlu0 %3674 }
 0x3ef   : > { %7400 = vrot.lane.b32.xlu2 %v7381_v58, %s10849_s29  ;;  %v6218_v11 = vpack.c.bf16 %v6186_v7, %v6186_v7  ;;  %v6119_v1 = vmul.f32 %v13894_v8, %v6083_v52  ;;  %v6020_v59 = vpop.f32.mrf.mxu2  ;;  %v6822_v43 = vshll.u32 %v6682_v22, 16  ;;  %v6316_v10 = vrot.slane %v13944_v54, 4  ;;  %v13974_v54 = vld [vmem:[#allocation3 + $0x38] sm:$0x1] }
 0x3f0   : > { %v6591_v13 = vsel %vm11408_vm13, %v6315_v46, %v6590_v42  ;;  %v6828_v33 = vshll.u32 %v13967_v24, 16  ;;  %v6832_v20 = vshrl.u32 %v13967_v24, 16  ;;  %v6821_v50 = vrot.slane %v6819_v45, 4  ;;  %v10724_v42 = vld [vmem:[#allocation2 + $0xb4] sm:$0xff] }
 0x3f1   : > { %v4837_v38 = vpop.f32.mrf.mxu0  ;;  %6592 = vst [vmem:[#allocation3 + $0x3c] sm:$0xf] %v6591_v13  ;;  %v6318_v6 = vshrl.u32 %v6218_v11, 16  ;;  %10290 = vmatmul.msk.bf16.gmra.mxu3 %vm4765_vm9, %v3832_v49  ;;  %v6321_v4 = vshll.u32 %v6218_v11, 16  ;;  %v6155_v17 = vadd.f32 %v13907_v55, %v6119_v1  ;;  %v6824_v7 = vrot.slane %v6822_v43, 5 }
 0x3f2   : > { %v4971_v27 = vadd.f32 %v4970_v41, %v4837_v38  ;;  %v13976_v0 = vrot.slane %v6828_v33, 5  ;;  %v6834_v46 = vrot.slane %v6832_v20, 4  ;;  %v13979_v57 = vsel %vm1125_vm1, %v10757_v44, %v5773_v47 }
 0x3f3   : > { %v6320_v32 = vrot.slane %v6318_v6, 7  ;;  %v6187_v36 = vmax.f32 %v6155_v17, 0.0  ;;  %v5897_v31 = vsel %vm1125_vm1, %v10756_v14, %v5771_v28  ;;  %v13989_v13 = vsel %vm1125_vm1, %v10724_v42, %v3675_v63 }
 0x3f4   : > { %v6084_v23 = vadd.f32 %v6020_v59, %v4971_v27  ;;  %v6835_v1 = vor.u32 %v6834_v46, %v13976_v0  ;;  %v3834_v38 = vsel %vm3804_vm6, %v3800_v21, %v13939_v48  ;;  %v6825_v27 = vor.u32 %v6824_v7, %v6821_v50  ;;  %v6601_v63 = vld [vmem:[#allocation3 + $0x50] sm:$0x1] }
 0x3f5   : > { %v6323_v29 = vor.u32 %v6321_v4, %v6320_v32  ;;  %v6325_v15 = vrot.slane %v6320_v32, 4  ;;  %v6219_v58 = vpack.c.bf16 %v6187_v36, %v6187_v36  ;;  %v5931_v43 = vsel %vm3804_vm6, %v5897_v31, %v13935_v19 }
 0x3f6   : > { %v6120_v3 = vmul.f32 %v13894_v8, %v6084_v23  ;;  %10392 = vmatmul.msk.bf16.gmra.mxu2 %vm4765_vm9, %v5929_v60  ;;  %v6838_v60 = vshll.u32 %v13974_v54, 16  ;;  %v6597_v23 = vld [vmem:[#allocation3 + $0x48] sm:$0xf]  ;;  %v6836_v21 = vrot.slane %v6835_v1, 4  ;;  %v6826_v44 = vrot.slane %v6825_v27, 4  ;;  %v3755_v50 = vpop.permute.xlu1 %3754 }
 0x3f7   : > { %v6324_v52 = vsel %vm11150_vm5, %v6316_v10, %v6323_v29  ;;  %v6595_v12 = vsel %vm11325_vm10, %v6325_v15, %v6594_v30  ;;  %v6327_v41 = vshrl.u32 %v6219_v58, 16  ;;  %v6330_v17 = vshll.u32 %v6219_v58, 16 }
 0x3f8   : > { %v6156_v11 = vadd.f32 %v13907_v55, %v6120_v3  ;;  %6593 = vst.msk [vmem:[#allocation3 + $0x40] sm:$0xf] %vm503_vm12, %v6324_v52  ;;  %v9200_v49 = vld [vmem:[#allocation3 + $0x3c] sm:$0xe]  ;;  %v6840_v29 = vrot.slane %v6838_v60, 5  ;;  %vm7506_vm11 = vcmask 31744   ;;  %v6831_v46 = vsel %vm11523_vm4, %v6826_v44, %v13976_v0  ;;  %v14002_v52 = vpop.permute.xlu2 %8389 }
 0x3f9   : > { %6596 = vst [vmem:[#allocation3 + $0x44] sm:$0x1] %v6595_v12  ;;  %v8771_v6 = vld [vmem:[#allocation3 + $0x3c] sm:$0xf]  ;;  %v6329_v4 = vrot.slane %v6327_v41, 7  ;;  %v10601_v20 = vrot.slane %v9200_v49, 9 }
 0x3fa   : > { %v6188_v16 = vmax.f32 %v6156_v11, 0.0  ;;  %v8886_v59 = vshrl.u32 %v8771_v6, 16  ;;  %v8889_v22 = vshll.u32 %v8771_v6, 16  ;;  %v7597_v32 = vld [vmem:[#allocation3 + $0x3c] sm:$0xf]  ;;  %v6841_v49 = vsel %vm11523_vm4, %v6836_v21, %v6840_v29 }
 0x3fb   : > { %v7734_v47 = vshrl.u32 %v7597_v32, 16  ;;  %v7737_v10 = vshll.u32 %v7597_v32, 16  ;;  %v6332_v30 = vor.u32 %v6330_v17, %v6329_v4  ;;  %v6333_v15 = vrot.slane %v6329_v4, 4 }
 0x3fc   : > { %v6220_v45 = vpack.c.bf16 %v6188_v16, %v6188_v16  ;;  %v8888_v36 = vrot.slane %v8886_v59, 4  ;;  %v8891_v48 = vrot.slane %v8889_v22, 5 }
 0x3fd   : > { %v6598_v14 = vsel %vm11408_vm13, %v6332_v30, %v6597_v23  ;;  %v7736_v3 = vrot.slane %v7734_v47, 4  ;;  %v7739_v7 = vrot.slane %v7737_v10, 5 }
 0x3fe   : > { %v6335_v33 = vshrl.u32 %v6220_v45, 16  ;;  %v6338_v28 = vshll.u32 %v6220_v45, 16  ;;  %6599 = vst [vmem:[#allocation3 + $0x48] sm:$0xf] %v6598_v14  ;;  %v8892_v58 = vor.u32 %v8891_v48, %v8888_v36  ;;  %v14016_v36 = vunpack.c.l.b16 %v6841_v49  ;;  %v5853_v48 = vpop.permute.xlu0 %5852 }
 0x3ff   : > { %v8772_v42 = vld [vmem:[#allocation3 + $0x40] sm:$0xf]  ;;  %v14020_v29 = vpop.f32.mrf.mxu2 }
 0x400   : > { %v6337_v19 = vrot.slane %v6335_v33, 7  ;;  %v8800_v12 = vld [vmem:[#allocation3 + $0x44] sm:$0x1]  ;;  %v9284_v11 = vrot.slane %v8772_v42, 5  ;;  %v8895_v31 = vshll.u32 %v8772_v42, 16  ;;  %v8899_v41 = vshrl.u32 %v8772_v42, 16 }
 0x401   : > { %10291 = vmatmul.msk.bf16.gmra.mxu3 %vm4765_vm9, %v3834_v38  ;;  %v9287_v6 = vrot.slane %v8800_v12, 5  ;;  %v8905_v27 = vshll.u32 %v8800_v12, 16  ;;  %v7598_v59 = vld [vmem:[#allocation3 + $0x40] sm:$0xf]  ;;  %v8893_v23 = vrot.slane %v8892_v58, 4  ;;  %v7740_v38 = vor.u32 %v7739_v7, %v7736_v3 }
 0x402   : > { %v6340_v1 = vor.u32 %v6338_v28, %v6337_v19  ;;  %v6342_v16 = vrot.slane %v6337_v19, 4  ;;  %v9285_v60 = vsel %vm11507_vm7, %v10601_v20, %v9284_v11  ;;  %v9286_v4 = vrot.slane %v9284_v11, 4  ;;  %v7625_v45 = vld [vmem:[#allocation3 + $0x44] sm:$0x1]  ;;  %v7475_v19 = vpop.permute.xlu1 %7474  ;;  %v4840_v12 = vpop.f32.mrf.mxu0  ;;  %v8025_v11 = vld [vmem:[#allocation3 + $0x3c] sm:$0xe] }
 0x403   : > { %v8897_v0 = vrot.slane %v8895_v31, 5  ;;  %v8901_v17 = vrot.slane %v8899_v41, 4  ;;  %v9523_v10 = vunpack.c.l.b16 %v9285_v60  ;;  %v7743_v20 = vshll.u32 %v7598_v59, 16  ;;  %v10794_v41 = vld [vmem:[#allocation3 + $0x18] sm:$0xff] }
 0x404   : > { %v6341_v22 = vsel %vm11150_vm5, %v6333_v15, %v6340_v1  ;;  %v6602_v32 = vsel %vm11325_vm10, %v6342_v16, %v6601_v63  ;;  %v9288_v47 = vsel %vm11507_vm7, %v9286_v4, %v9287_v6  ;;  %v7747_v44 = vshrl.u32 %v7598_v59, 16  ;;  %v7110_v4 = vld [vmem:[#allocation3 + $0x30] sm:$0xe] }
 0x405   : > { %6600 = vst.msk [vmem:[#allocation3 + $0x4c] sm:$0xf] %vm503_vm12, %v6341_v22  ;;  %v8902_v30 = vor.u32 %v8901_v17, %v8897_v0  ;;  %v9524_v21 = vunpack.c.l.b16 %v9288_v47  ;;  %v8898_v33 = vsel %vm11523_vm4, %v8893_v23, %v8897_v0  ;;  %v8907_v14 = vrot.slane %v8905_v27, 5  ;;  %v535_v47 = vld [vmem:[#allocation3 + $0x54] sm:$0x1] }
 0x406   : > { %6603 = vst [vmem:[#allocation3 + $0x50] sm:$0x1] %v6602_v32  ;;  %10393 = vmatmul.msk.bf16.gmra.mxu2 %vm4765_vm9, %v5931_v43  ;;  %v7753_v28 = vshll.u32 %v7625_v45, 16  ;;  %v7354_v63 = vunpack.c.l.b16 %v6831_v46  ;;  %v7741_v42 = vrot.slane %v7740_v38, 4  ;;  %v7745_v58 = vrot.slane %v7743_v20, 5 }
 0x407   : > { %v8903_v15 = vrot.slane %v8902_v30, 4  ;;  %v9552_v3 = vpack.c.b16 %v9524_v21, %v9523_v10  ;;  %v7749_v7 = vrot.slane %v7747_v44, 4  ;;  %v14025_v31 = vsel %vm3804_vm6, %v13979_v57, %v5853_v48 }
 0x408   : > { %v9443_v1 = vunpack.c.l.b16 %v8898_v33  ;;  %v3836_v46 = vsel %vm3804_vm6, %v13989_v13, %v3755_v50  ;;  %v7746_v27 = vsel %vm11523_vm4, %v7741_v42, %v7745_v58  ;;  %v7382_v57 = vpack.c.b16 %v14016_v36, %v7354_v63  ;;  %v10760_v36 = vld [vmem:[#allocation3] sm:$0xff]  ;;  %v590_v33 = vld [vmem:[#allocation3 + $0x5c] sm:$0x1]  ;;  %v9201_v63 = vld [vmem:[#allocation3 + $0x48] sm:$0xe] }
 0x409   : > { %v9486_v49 = vpop.permute.xlu2 %9485  ;;  %v8908_v43 = vsel %vm11523_vm4, %v8903_v15, %v8907_v14  ;;  %v4973_v16 = vpop.f32.mrf.mxu1  ;;  %9571 = vrot.lane.b32.xlu2 %v9552_v3, %s10851_s19  ;;  %v7750_v60 = vor.u32 %v7749_v7, %v7745_v58  ;;  %v7755_v17 = vrot.slane %v7753_v28, 5  ;;  %v10480_v22 = vrot.slane %v8025_v11, 9 }
 0x40a   : > { %v9444_v6 = vunpack.c.l.b16 %v8908_v43  ;;  %v14036_v0 = vsel %vm7506_vm11, %v10794_v41, %v9486_v49  ;;  %v8115_v32 = vrot.slane %v7598_v59, 5  ;;  %v8269_v13 = vunpack.c.l.b16 %v7746_v27  ;;  %v6025_v7 = vpop.f32.mrf.mxu2 }
 0x40b   : > { %v7751_v38 = vrot.slane %v7750_v60, 4  ;;  %v7200_v50 = vrot.slane %v13967_v24, 5  ;;  %v8118_v48 = vrot.slane %v7625_v45, 5  ;;  %v10400_v21 = vrot.slane %v7110_v4, 9  ;;  %v4842_v60 = vpop.f32.mrf.mxu0 }
 0x40c   : > { %v9472_v23 = vpack.c.b16 %v9444_v6, %v9443_v1  ;;  %v8116_v10 = vsel %vm11507_vm7, %v10480_v22, %v8115_v32  ;;  %v8117_v30 = vrot.slane %v8115_v32, 4  ;;  %v7203_v44 = vrot.slane %v13974_v54, 5  ;;  %v8774_v28 = vld [vmem:[#allocation3 + $0x4c] sm:$0xf]  ;;  %v8310_v22 = vpop.permute.xlu1 %8309  ;;  %v14063_v32 = vpop.f32.mrf.mxu3 }
 0x40d   : > { %v7756_v20 = vsel %vm11523_vm4, %v7751_v38, %v7755_v17  ;;  %v7202_v59 = vrot.slane %v7200_v50, 4  ;;  %v8349_v14 = vunpack.c.l.b16 %v8116_v10  ;;  %v536_v45 = vsel %vm11325_vm10, 0, %v535_v47  ;;  %v14053_v41 = vld [vmem:[#allocation3 + $0x50] sm:$0x1] }
 0x40e   : > { %9491 = vrot.lane.b32.xlu1 %v9472_v23, %s10849_s29  ;;  %v8270_v15 = vunpack.c.l.b16 %v7756_v20  ;;  %v8119_v24 = vsel %vm11507_vm7, %v8117_v30, %v8118_v48  ;;  %537 = vst [vmem:[#allocation3 + $0x54] sm:$0x1] %v536_v45  ;;  %v4974_v11 = vadd.f32 %v4973_v16, %v4840_v12  ;;  %v591_v54 = vsel %vm13435_vm3, 0, %v590_v33 }
 0x40f   : > { %v8350_v3 = vunpack.c.l.b16 %v8119_v24  ;;  %v7204_v42 = vsel %vm11507_vm7, %v7202_v59, %v7203_v44  ;;  %v7201_v43 = vsel %vm11507_vm7, %v10400_v21, %v7200_v50  ;;  %592 = vst [vmem:[#allocation3 + $0x5c] sm:$0x1] %v591_v54  ;;  %v10602_v4 = vrot.slane %v9201_v63, 9  ;;  %v7599_v63 = vld [vmem:[#allocation3 + $0x48] sm:$0xf] }
 0x410   : > { %v7395_v58 = vpop.permute.xlu0 %7394  ;;  %v8297_v49 = vpack.c.b16 %v8270_v15, %v8269_v13  ;;  %v7435_v1 = vunpack.c.l.b16 %v7204_v42  ;;  %v6085_v16 = vadd.f32 %v14020_v29, %v4974_v11  ;;  %v9291_v17 = vrot.slane %v8774_v28, 5  ;;  %v8773_v13 = vld [vmem:[#allocation3 + $0x48] sm:$0xf] }
 0x411   : > { %v7509_v6 = vsel %vm7506_vm11, %v10760_v36, %v7395_v58  ;;  %v4975_v27 = vpop.f32.mrf.mxu1  ;;  %10292 = vmatmul.msk.bf16.gmra.mxu3 %vm4765_vm9, %v3836_v46  ;;  %7402 = vrot.lane.b32.xlu2 %v7382_v57, %s10849_s29  ;;  %v8377_v23 = vpack.c.b16 %v8350_v3, %v8349_v14  ;;  %v9294_v46 = vrot.slane %v14053_v41, 5  ;;  %v8919_v57 = vshll.u32 %v8774_v28, 16  ;;  %v14070_v36 = vpop.permute.xlu2 %5854  ;;  %v10777_v3 = vld [vmem:[#allocation3 + $0xc] sm:$0xff] }
 0x412   : > { %v7556_v12 = vsel %vm1125_vm1, %v7509_v6, %v7475_v19  ;;  %8317 = vrot.lane.b32.xlu0 %v8297_v49, %s10849_s29  ;;  %v4976_v38 = vadd.f32 %v4975_v27, %v4842_v60  ;;  %v6121_v19 = vmul.f32 %v13894_v8, %v6085_v16  ;;  %v9292_v29 = vsel %vm11507_vm7, %v10602_v4, %v9291_v17  ;;  %v10758_v16 = vld [vmem:[#allocation2 + $0xcc] sm:$0xff] }
 0x413   : > { %10582 = vmatmul.msk.bf16.vlgmr.msra.gmra.mxu0 %vm8509_vm14, %v7556_v12  ;;  %v9293_v50 = vrot.slane %v9291_v17, 4  ;;  %v8910_v47 = vshrl.u32 %v8773_v13, 16  ;;  %v7434_v10 = vunpack.c.l.b16 %v7201_v43  ;;  %v8913_v48 = vshll.u32 %v8773_v13, 16  ;;  %v14082_v43 = vld [vmem:[#allocation3 + $0x4c] sm:$0xf] }
 0x414   : > { %v6086_v30 = vadd.f32 %v6025_v7, %v4976_v38  ;;  %v8921_v21 = vrot.slane %v8919_v57, 5  ;;  %v6157_v33 = vadd.f32 %v13907_v55, %v6121_v19  ;;  %v8923_v44 = vshrl.u32 %v8774_v28, 16 }
 0x415   : > { %v9295_v20 = vsel %vm11507_vm7, %v9293_v50, %v9294_v46  ;;  %v8912_v59 = vrot.slane %v8910_v47, 4  ;;  %v9525_v24 = vunpack.c.l.b16 %v9292_v29  ;;  %v8915_v45 = vrot.slane %v8913_v48, 5  ;;  %v14094_v29 = vpop.f32.mrf.mxu3 }
 0x416   : > { %8397 = vrot.lane.b32.xlu1 %v8377_v23, %s10851_s19  ;;  %10394 = vmatmul.msk.bf16.gmra.mxu2 %vm4765_vm9, %v14025_v31  ;;  %v6122_v15 = vmul.f32 %v13894_v8, %v6086_v30  ;;  %v9526_v14 = vunpack.c.l.b16 %v9295_v20  ;;  %v7462_v42 = vpack.c.b16 %v7435_v1, %v7434_v10  ;;  %v6189_v58 = vmax.f32 %v6157_v33, 0.0  ;;  %v5775_v19 = vpop.permute.xlu1 %5774 }
 0x417   : > { %v14079_v11 = vpop.f32.mrf.mxu2  ;;  %v8925_v54 = vrot.slane %v8923_v44, 4  ;;  %v8929_v49 = vshll.u32 %v14053_v41, 16  ;;  %v8916_v27 = vor.u32 %v8915_v45, %v8912_v59  ;;  %v8423_v12 = vsel %vm7506_vm11, %v10777_v3, %v8310_v22  ;;  %v14101_v59 = vld [vmem:[#allocation3 + $0x50] sm:$0x1]  ;;  %v6684_v44 = vld [vmem:[#allocation3 + $0x3c] sm:$0xf] }
 0x418   : > { %v9566_v7 = vpop.permute.xlu0 %9565  ;;  %v6158_v28 = vadd.f32 %v13907_v55, %v6122_v15  ;;  %v9553_v6 = vpack.c.b16 %v9526_v14, %v9525_v24  ;;  %v6221_v1 = vpack.c.bf16 %v6189_v58, %v6189_v58  ;;  %v7758_v4 = vshrl.u32 %v7599_v63, 16  ;;  %v6604_v15 = vld [vmem:[#allocation3 + $0x54] sm:$0xf] }
 0x419   : > { %v9646_v31 = vsel %vm1125_vm1, %v14036_v0, %v9566_v7  ;;  %v8926_v60 = vor.u32 %v8925_v54, %v8921_v21  ;;  %v8917_v17 = vrot.slane %v8916_v27, 4  ;;  %v7761_v23 = vshll.u32 %v7599_v63, 16  ;;  %v6608_v27 = vld [vmem:[#allocation3 + $0x5c] sm:$0x1] }
 0x41a   : > { %10684 = vmatmul.msk.bf16.vlgmr.msra.gmra.mxu1 %vm8509_vm14, %v9646_v31  ;;  %7482 = vrot.lane.b32.xlu0 %v7462_v42, %s10851_s19  ;;  %v6190_v41 = vmax.f32 %v6158_v28, 0.0  ;;  %v7767_v0 = vshll.u32 %v14082_v43, 16  ;;  %v6344_v38 = vshrl.u32 %v6221_v1, 16  ;;  %v8931_v13 = vrot.slane %v8929_v49, 5  ;;  %v14107_v31 = vld [vmem:[#allocation3 + $0x40] sm:$0xf] }
 0x41b   : > { %9573 = vrot.lane.b32.xlu2 %v9553_v6, %s10851_s19  ;;  %v8927_v46 = vrot.slane %v8926_v60, 4  ;;  %v7760_v57 = vrot.slane %v7758_v4, 4  ;;  %v8470_v22 = vsel %vm1125_vm1, %v8423_v12, %v14002_v52  ;;  %v8922_v47 = vsel %vm11523_vm4, %v8917_v17, %v8921_v21 }
 0x41c   : > { %v6222_v50 = vpack.c.bf16 %v6190_v41, %v6190_v41  ;;  %v7763_v10 = vrot.slane %v7761_v23, 5  ;;  %v5903_v30 = vsel %vm1125_vm1, %v10758_v16, %v5775_v19  ;;  %v6346_v48 = vrot.slane %v6344_v38, 7 }
 0x41d   : > { %v6347_v33 = vshll.u32 %v6221_v1, 16  ;;  %v8932_v20 = vsel %vm11523_vm4, %v8927_v46, %v8931_v13  ;;  %v9445_v24 = vunpack.c.l.b16 %v8922_v47  ;;  %v7769_v45 = vrot.slane %v7767_v0, 5  ;;  %v14103_v63 = vpop.permute.xlu2 %7396  ;;  %v14114_v1 = vld [vmem:[#allocation3 + $0x44] sm:$0x1] }
 0x41e   : > { %v6352_v52 = vshrl.u32 %v6222_v50, 16  ;;  %v9446_v14 = vunpack.c.l.b16 %v8932_v20  ;;  %v6355_v21 = vshll.u32 %v6222_v50, 16  ;;  %v7764_v42 = vor.u32 %v7763_v10, %v7760_v57 }
 0x41f   : > { %v6349_v3 = vor.u32 %v6347_v33, %v6346_v48  ;;  %v7771_v58 = vshrl.u32 %v14082_v43, 16  ;;  %v7777_v49 = vshll.u32 %v14101_v59, 16  ;;  %v6843_v28 = vshrl.u32 %v6684_v44, 16  ;;  %v14116_v4 = vpop.f32.mrf.mxu2 }
 0x420   : > { %v6354_v7 = vrot.slane %v6352_v52, 7  ;;  %v9473_v54 = vpack.c.b16 %v9446_v14, %v9445_v24  ;;  %v5935_v12 = vsel %vm3804_vm6, %v5903_v30, %v14070_v36  ;;  %v6846_v60 = vshll.u32 %v6684_v44, 16  ;;  %v8026_v30 = vld [vmem:[#allocation3 + $0x48] sm:$0xe]  ;;  %v15439_v52 = vld [vmem:[#allocation12_spill] sm:$0xff] }
 0x421   : > { %v6605_v6 = vsel %vm11408_vm13, %v6349_v3, %v6604_v15  ;;  %10562 = vmatmul.msk.bf16.vlgmr.msra.gmra.mxu3 %vm8509_vm14, %v8470_v22  ;;  %v7773_v16 = vrot.slane %v7771_v58, 4  ;;  %v6350_v41 = vrot.slane %v6346_v48, 4  ;;  %v6845_v0 = vrot.slane %v6843_v28, 4  ;;  %v538_v22 = vld [vmem:[#allocation3 + $0x60] sm:$0x1] }
 0x422   : > { %6606 = vst [vmem:[#allocation3 + $0x54] sm:$0xf] %v6605_v6  ;;  %v6357_v17 = vor.u32 %v6355_v21, %v6354_v7  ;;  %v6359_v23 = vrot.slane %v6354_v7, 4  ;;  %9493 = vrot.lane.b32.xlu1 %v9473_v54, %s10849_s29  ;;  %v7765_v38 = vrot.slane %v7764_v42, 4  ;;  %v6848_v13 = vrot.slane %v6846_v60, 5  ;;  %v4978_v42 = vpop.f32.mrf.mxu1 }
 0x423   : > { %v7774_v46 = vor.u32 %v7773_v16, %v7769_v45  ;;  %v6852_v57 = vshll.u32 %v14107_v31, 16  ;;  %v7779_v50 = vrot.slane %v7777_v49, 5  ;;  %v6856_v47 = vshrl.u32 %v14107_v31, 16  ;;  %v7111_v15 = vld [vmem:[#allocation3 + $0x3c] sm:$0xe] }
 0x424   : > { %v6358_v36 = vsel %vm11150_vm5, %v6350_v41, %v6357_v17  ;;  %v6609_v19 = vsel %vm11325_vm10, %v6359_v23, %v6608_v27  ;;  %v14125_v10 = vpop.f32.mrf.mxu3  ;;  %v7770_v48 = vsel %vm11523_vm4, %v7765_v38, %v7769_v45  ;;  %v6849_v20 = vor.u32 %v6848_v13, %v6845_v0  ;;  %v10778_v13 = vld [vmem:[#allocation3 + $0x18] sm:$0xff] }
 0x425   : > { %6607 = vst.msk [vmem:[#allocation3 + $0x58] sm:$0xf] %vm503_vm12, %v6358_v36  ;;  %v7775_v33 = vrot.slane %v7774_v46, 4  ;;  %v6854_v44 = vrot.slane %v6852_v57, 5  ;;  %v4984_v24 = vadd.f32 %v14063_v32, %v15439_v52  ;;  %v6858_v14 = vrot.slane %v6856_v47, 4  ;;  %v14140_v27 = vpop.permute.xlu2 %9567 }
 0x426   : > { %6610 = vst [vmem:[#allocation3 + $0x5c] sm:$0x1] %v6609_v19  ;;  %10395 = vmatmul.msk.bf16.gmra.mxu2 %vm4765_vm9, %v5935_v12  ;;  %v6862_v3 = vshll.u32 %v14114_v1, 16  ;;  %v539_v21 = vsel %vm11325_vm10, 0, %v538_v22  ;;  %v6850_v58 = vrot.slane %v6849_v20, 4  ;;  %v10481_v7 = vrot.slane %v8026_v30, 9 }
 0x427   : > { %v7780_v45 = vsel %vm11523_vm4, %v7775_v33, %v7779_v50  ;;  %540 = vst [vmem:[#allocation3 + $0x60] sm:$0x1] %v539_v21  ;;  %v8122_v54 = vrot.slane %v14082_v43, 5  ;;  %v8271_v49 = vunpack.c.l.b16 %v7770_v48  ;;  %v6859_v28 = vor.u32 %v6858_v14, %v6854_v44  ;;  %v541_v19 = vld [vmem:[#allocation3 + $0x6c] sm:$0x1] }
 0x428   : > { %v8272_v32 = vunpack.c.l.b16 %v7780_v45  ;;  %v7207_v6 = vrot.slane %v14107_v31, 5  ;;  %v6855_v12 = vsel %vm11523_vm4, %v6850_v58, %v6854_v44  ;;  %v8125_v41 = vrot.slane %v14101_v59, 5  ;;  %v593_v33 = vld [vmem:[#allocation3 + $0x68] sm:$0x1]  ;;  %v8392_v58 = vpop.permute.xlu1 %8391 }
 0x429   : > { %v8123_v16 = vsel %vm11507_vm7, %v10481_v7, %v8122_v54  ;;  %v8124_v60 = vrot.slane %v8122_v54, 4  ;;  %v6860_v0 = vrot.slane %v6859_v28, 4  ;;  %v6864_v43 = vrot.slane %v6862_v3, 5 }
 0x42a   : > { %v8298_v23 = vpack.c.b16 %v8272_v32, %v8271_v49  ;;  %v10401_v46 = vrot.slane %v7111_v15, 9  ;;  %v7356_v57 = vunpack.c.l.b16 %v6855_v12  ;;  %v7210_v36 = vrot.slane %v14114_v1, 5  ;;  %v596_v1 = vld [vmem:[#allocation3 + $0x74] sm:$0x1]  ;;  %v10761_v32 = vld [vmem:[#allocation3 + $0xc] sm:$0xff] }
 0x42b   : > { %v8312_v17 = vpop.permute.xlu0 %8311  ;;  %v4845_v38 = vpop.f32.mrf.mxu0  ;;  %v8126_v22 = vsel %vm11507_vm7, %v8124_v60, %v8125_v41  ;;  %v6865_v59 = vsel %vm11523_vm4, %v6860_v0, %v6864_v43  ;;  %v8351_v47 = vunpack.c.l.b16 %v8123_v16  ;;  %v7209_v48 = vrot.slane %v7207_v6, 4  ;;  %v15440_v41 = vld [vmem:[#allocation13_spill] sm:$0xff] }
 0x42c   : > { %v4979_v31 = vadd.f32 %v4978_v42, %v4845_v38  ;;  %v6033_v50 = vpop.f32.mrf.mxu2  ;;  %8319 = vrot.lane.b32.xlu0 %v8298_v23, %s10849_s29  ;;  %v8352_v30 = vunpack.c.l.b16 %v8126_v22  ;;  %v8426_v20 = vsel %vm7506_vm11, %v10778_v13, %v8312_v17  ;;  %v7357_v44 = vunpack.c.l.b16 %v6865_v59  ;;  %v4990_v21 = vpop.f32.mrf.mxu3 }
 0x42d   : > { %v7208_v52 = vsel %vm11507_vm7, %v10401_v46, %v7207_v6  ;;  %v7211_v3 = vsel %vm11507_vm7, %v7209_v48, %v7210_v36  ;;  %v542_v42 = vsel %vm11325_vm10, 0, %v541_v19  ;;  %v6089_v45 = vadd.f32 %v6033_v50, %v4984_v24  ;;  %v4980_v60 = vpop.f32.mrf.mxu1  ;;  %v10762_v19 = vld [vmem:[#allocation3 + $0x18] sm:$0xff]  ;;  %v15441_v50 = vld [vmem:[#allocation14_spill] sm:$0xff] }
 0x42e   : > { %v6087_v15 = vadd.f32 %v14079_v11, %v4979_v31  ;;  %v8378_v14 = vpack.c.b16 %v8352_v30, %v8351_v47  ;;  %v7383_v7 = vpack.c.b16 %v7357_v44, %v7356_v57  ;;  %v7437_v49 = vunpack.c.l.b16 %v7211_v3  ;;  %543 = vst [vmem:[#allocation3 + $0x6c] sm:$0x1] %v542_v42  ;;  %v14184_v47 = vld [vmem:[#allocation3 + $0x58] sm:$0xf]  ;;  %v14186_v30 = vld [vmem:[#allocation3 + $0x5c] sm:$0x1] }
 0x42f   : > { %v594_v11 = vsel %vm13435_vm3, 0, %v593_v33  ;;  %v8472_v28 = vsel %vm1125_vm1, %v8426_v20, %v8392_v58  ;;  %v7436_v6 = vunpack.c.l.b16 %v7208_v52  ;;  %v6125_v12 = vmul.f32 %v13894_v8, %v6089_v45  ;;  %v15442_v33 = vld [vmem:[#allocation16_spill] sm:$0xff] }
 0x430   : > { %v6123_v54 = vmul.f32 %v13894_v8, %v6087_v15  ;;  %8399 = vrot.lane.b32.xlu1 %v8378_v14, %s10851_s19  ;;  %595 = vst [vmem:[#allocation3 + $0x68] sm:$0x1] %v594_v11  ;;  %v597_v24 = vsel %vm13435_vm3, 0, %v596_v1  ;;  %7404 = vrot.lane.b32.xlu2 %v7383_v7, %s10849_s29  ;;  %v4986_v17 = vadd.f32 %v14094_v29, %v15440_v41  ;;  %v9202_v15 = vld [vmem:[#allocation3 + $0x54] sm:$0xe]  ;;  %v9298_v52 = vrot.slane %v14184_v47, 5 }
 0x431   : > { %10563 = vmatmul.msk.bf16.gmra.mxu3 %vm8509_vm14, %v8472_v28  ;;  %598 = vst [vmem:[#allocation3 + $0x74] sm:$0x1] %v597_v24  ;;  %v7512_v23 = vsel %vm7506_vm11, %v10761_v32, %v14103_v63  ;;  %v7463_v43 = vpack.c.b16 %v7437_v49, %v7436_v6  ;;  %v6161_v38 = vadd.f32 %v13907_v55, %v6125_v12  ;;  %v7399_v13 = vpop.permute.xlu2 %7398  ;;  %v544_v1 = vld [vmem:[#allocation3 + $0x78] sm:$0x1]  ;;  %v10795_v14 = vld [vmem:[#allocation3 + $0x24] sm:$0xff] }
 0x432   : > { %v6159_v16 = vadd.f32 %v13907_v55, %v6123_v54  ;;  %v14181_v29 = vadd.f32 %v14125_v10, %v15441_v50  ;;  %v14189_v20 = vadd.f32 %v4990_v21, %v15442_v33  ;;  %v14194_v10 = vsel %vm7506_vm11, %v10762_v19, %v7399_v13  ;;  %v6611_v41 = vld [vmem:[#allocation3 + $0x60] sm:$0xf] }
 0x433   : > { %v7477_v0 = vpop.permute.xlu0 %7476  ;;  %v4847_v46 = vpop.f32.mrf.mxu0  ;;  %v6193_v63 = vmax.f32 %v6161_v38, 0.0  ;;  %v545_v45 = vsel %vm11325_vm10, 0, %v544_v1  ;;  %v10603_v54 = vrot.slane %v9202_v15, 9 }
 0x434   : > { %v7558_v57 = vsel %vm1125_vm1, %v7512_v23, %v7477_v0  ;;  %v6191_v31 = vmax.f32 %v6159_v16, 0.0  ;;  %v4981_v22 = vadd.f32 %v4980_v60, %v4847_v46  ;;  %v6035_v36 = vpop.f32.mrf.mxu2  ;;  %7484 = vrot.lane.b32.xlu0 %v7463_v43, %s10851_s19  ;;  %546 = vst [vmem:[#allocation3 + $0x78] sm:$0x1] %v545_v45  ;;  %v8775_v60 = vld [vmem:[#allocation3 + $0x54] sm:$0xf]  ;;  %v9300_v43 = vrot.slane %v9298_v52, 4 }
 0x435   : > { %10583 = vmatmul.msk.bf16.gmra.mxu0 %vm8509_vm14, %v7558_v57  ;;  %v6090_v59 = vadd.f32 %v6035_v36, %v4986_v17  ;;  %v6225_v3 = vpack.c.bf16 %v6193_v63, %v6193_v63  ;;  %v6618_v46 = vld [vmem:[#allocation3 + $0x6c] sm:$0xf]  ;;  %v15443_v57 = vld [vmem:[#allocation17_spill] sm:$0xff]  ;;  %v8934_v63 = vshrl.u32 %v8775_v60, 16 }
 0x436   : > { %v6223_v48 = vpack.c.bf16 %v6191_v31, %v6191_v31  ;;  %v6088_v44 = vadd.f32 %v14116_v4, %v4981_v22  ;;  %v9301_v4 = vrot.slane %v14186_v30, 5  ;;  %v4993_v6 = vpop.f32.mrf.mxu3 }
 0x437   : > { %v6126_v42 = vmul.f32 %v13894_v8, %v6090_v59  ;;  %v6378_v32 = vshrl.u32 %v6225_v3, 16  ;;  %v6381_v23 = vshll.u32 %v6225_v3, 16  ;;  %v14213_v31 = vadd.f32 %v4993_v6, %v15443_v57 }
 0x438   : > { %v9488_v58 = vpop.permute.xlu1 %9487  ;;  %v6361_v7 = vshrl.u32 %v6223_v48, 16  ;;  %v6124_v21 = vmul.f32 %v13894_v8, %v6088_v44  ;;  %v6364_v11 = vshll.u32 %v6223_v48, 16  ;;  %v9299_v8 = vsel %vm11507_vm7, %v10603_v54, %v9298_v52  ;;  %v6622_v6 = vld [vmem:[#allocation3 + $0x74] sm:$0x1] }
 0x439   : > { %v9602_v49 = vsel %vm7506_vm11, %v10795_v14, %v9488_v58  ;;  %v6162_v28 = vadd.f32 %v13907_v55, %v6126_v42  ;;  %v6380_v17 = vrot.slane %v6378_v32, 7  ;;  %v9302_v50 = vsel %vm11507_vm7, %v9300_v43, %v9301_v4 }
 0x43a   : > { %v14203_v12 = vrot.slane %v6361_v7, 7  ;;  %v9648_v24 = vsel %vm1125_vm1, %v9602_v49, %v14140_v27  ;;  %v6160_v16 = vadd.f32 %v13907_v55, %v6124_v21  ;;  %v9527_v27 = vunpack.c.l.b16 %v9299_v8  ;;  %v10779_v55 = vld [vmem:[#allocation3 + $0x24] sm:$0xff]  ;;  %v14223_v42 = vpop.permute.xlu2 %9569 }
 0x43b   : > { %10685 = vmatmul.msk.bf16.gmra.mxu1 %vm8509_vm14, %v9648_v24  ;;  %v6194_v0 = vmax.f32 %v6162_v28, 0.0  ;;  %v6383_v36 = vor.u32 %v6381_v23, %v6380_v17  ;;  %v9528_v44 = vunpack.c.l.b16 %v9302_v50  ;;  %v6384_v52 = vrot.slane %v6380_v17, 4  ;;  %v6615_v8 = vld [vmem:[#allocation3 + $0x68] sm:$0x1] }
 0x43c   : > { %v6366_v38 = vor.u32 %v6364_v11, %v14203_v12  ;;  %v6192_v13 = vmax.f32 %v6160_v16, 0.0  ;;  %v6367_v59 = vrot.slane %v14203_v12, 4  ;;  %v8936_v32 = vrot.slane %v8934_v63, 4  ;;  %v14232_v12 = vld [vmem:[%s15345_s5] ss:$0 sm:$0xff] }
 0x43d   : > { %v8314_v22 = vpop.permute.xlu0 %8313  ;;  %v6226_v19 = vpack.c.bf16 %v6194_v0, %v6194_v0  ;;  %v6619_v1 = vsel %vm11408_vm13, %v6383_v36, %v6618_v46  ;;  %v9554_v21 = vpack.c.b16 %v9528_v44, %v9527_v27  ;;  %v8937_v16 = vshll.u32 %v8775_v60, 16  ;;  %v14241_v46 = vld [vmem:[%s15346_s6] ss:$0 sm:$0xff]  ;;  %v7601_v27 = vld [vmem:[#allocation3 + $0x54] sm:$0xf]  ;;  %v15444_v44 = vld [vmem:[#allocation18_spill] sm:$0xff] }
 0x43e   : > { %v6612_v48 = vsel %vm11408_vm13, %v6366_v38, %v6611_v41  ;;  %v6224_v33 = vpack.c.bf16 %v6192_v13, %v6192_v13  ;;  %v8429_v15 = vsel %vm7506_vm11, %v10779_v55, %v8314_v22  ;;  %v6038_v3 = vpop.f32.mrf.mxu2  ;;  %6620 = vst [vmem:[#allocation3 + $0x6c] sm:$0xf] %v6619_v1  ;;  %v8947_v23 = vshrl.u32 %v14184_v47, 16  ;;  %v4995_v57 = vpop.f32.mrf.mxu3 }
 0x43f   : > { %6613 = vst [vmem:[#allocation3 + $0x60] sm:$0xf] %v6612_v48  ;;  %v6386_v14 = vshrl.u32 %v6226_v19, 16  ;;  %v6389_v7 = vshll.u32 %v6226_v19, 16  ;;  %v6091_v54 = vadd.f32 %v6038_v3, %v14181_v29  ;;  %9575 = vrot.lane.b32.xlu2 %v9554_v21, %s10851_s19  ;;  %v8943_v29 = vshll.u32 %v14184_v47, 16 }
 0x440   : > { %v8394_v45 = vpop.permute.xlu1 %8393  ;;  %v6369_v58 = vshrl.u32 %v6224_v33, 16  ;;  %v6372_v49 = vshll.u32 %v6224_v33, 16  ;;  %v8953_v0 = vshll.u32 %v14186_v30, 16  ;;  %v8939_v60 = vrot.slane %v8937_v16, 5  ;;  %v14248_v19 = vld [vmem:[#allocation3 + $0x58] sm:$0xf] }
 0x441   : > { %v8474_v4 = vsel %vm1125_vm1, %v8429_v15, %v8394_v45  ;;  %v6388_v11 = vrot.slane %v6386_v14, 7  ;;  %v6127_v24 = vmul.f32 %v14232_v12, %v6091_v54  ;;  %v8945_v30 = vrot.slane %v8943_v29, 5  ;;  %v14262_v14 = vld [vmem:[#allocation3 + $0x5c] sm:$0x1]  ;;  %v10763_v16 = vld [vmem:[#allocation3 + $0x24] sm:$0xff] }
 0x442   : > { %v6371_v28 = vrot.slane %v6369_v58, 7  ;;  %10564 = vmatmul.msk.bf16.gmra.mxu3 %vm8509_vm14, %v8474_v4  ;;  %v8949_v36 = vrot.slane %v8947_v23, 4  ;;  %v14260_v15 = vadd.f32 %v4995_v57, %v15444_v44  ;;  %v7785_v45 = vshll.u32 %v7601_v27, 16  ;;  %v10796_v23 = vld [vmem:[#allocation3 + $0x30] sm:$0xff] }
 0x443   : > { %v6391_v41 = vor.u32 %v6389_v7, %v6388_v11  ;;  %v6393_v17 = vrot.slane %v6388_v11, 4  ;;  %v6163_v13 = vadd.f32 %v14241_v46, %v6127_v24  ;;  %v7795_v58 = vshrl.u32 %v14248_v19, 16  ;;  %v6686_v24 = vld [vmem:[#allocation3 + $0x48] sm:$0xf] }
 0x444   : > { %v6374_v43 = vor.u32 %v6372_v49, %v6371_v28  ;;  %v6376_v38 = vrot.slane %v6371_v28, 4  ;;  %v8950_v1 = vor.u32 %v8949_v36, %v8945_v30  ;;  %v8955_v54 = vrot.slane %v8953_v0, 5 }
 0x445   : > { %v7479_v55 = vpop.permute.xlu0 %7478  ;;  %v6392_v22 = vsel %vm11150_vm5, %v6384_v52, %v6391_v41  ;;  %v6623_v47 = vsel %vm11325_vm10, %v6393_v17, %v6622_v6  ;;  %v6195_v33 = vmax.f32 %v6163_v13, 0.0  ;;  %v8940_v52 = vor.u32 %v8939_v60, %v8936_v32  ;;  %v6625_v60 = vld [vmem:[#allocation3 + $0x78] sm:$0xf] }
 0x446   : > { %v6375_v50 = vsel %vm11150_vm5, %v6367_v59, %v6374_v43  ;;  %v6616_v63 = vsel %vm11325_vm10, %v6376_v38, %v6615_v8  ;;  %v7560_v48 = vsel %vm1125_vm1, %v14194_v10, %v7479_v55  ;;  %6621 = vst.msk [vmem:[#allocation3 + $0x70] sm:$0xf] %vm503_vm12, %v6392_v22  ;;  %v7782_v59 = vshrl.u32 %v7601_v27, 16  ;;  %v14276_v55 = vld [vmem:[#allocation3 + $0x4c] sm:$0xf] }
 0x447   : > { %6614 = vst.msk [vmem:[#allocation3 + $0x64] sm:$0xf] %vm503_vm12, %v6375_v50  ;;  %10584 = vmatmul.msk.bf16.gmra.mxu0 %vm8509_vm14, %v7560_v48  ;;  %v6227_v3 = vpack.c.bf16 %v6195_v33, %v6195_v33  ;;  %v7791_v10 = vshll.u32 %v14248_v19, 16  ;;  %v8941_v7 = vrot.slane %v8940_v52, 4  ;;  %v8951_v21 = vrot.slane %v8950_v1, 4 }
 0x448   : > { %6617 = vst [vmem:[#allocation3 + $0x68] sm:$0x1] %v6616_v63  ;;  %v7784_v4 = vrot.slane %v7782_v59, 4  ;;  %v7787_v28 = vrot.slane %v7785_v45, 5  ;;  %v7801_v6 = vshll.u32 %v14262_v14, 16  ;;  %v7797_v17 = vrot.slane %v7795_v58, 4 }
 0x449   : > { %6624 = vst [vmem:[#allocation3 + $0x74] sm:$0x1] %v6623_v47  ;;  %v7401_v49 = vpop.permute.xlu2 %7400  ;;  %v6395_v11 = vshrl.u32 %v6227_v3, 16  ;;  %v7793_v32 = vrot.slane %v7791_v10, 5  ;;  %v6398_v29 = vshll.u32 %v6227_v3, 16  ;;  %v8946_v8 = vsel %vm11523_vm4, %v8941_v7, %v8945_v30 }
 0x44a   : > { %v8956_v41 = vsel %vm11523_vm4, %v8951_v21, %v8955_v54  ;;  %v9447_v0 = vunpack.c.l.b16 %v8946_v8  ;;  %v7788_v13 = vor.u32 %v7787_v28, %v7784_v4  ;;  %v14274_v57 = vsel %vm7506_vm11, %v10763_v16, %v7401_v49  ;;  %v14279_v33 = vld [vmem:[#allocation3 + $0x50] sm:$0x1]  ;;  %v599_v3 = vld [vmem:[#allocation3 + $0x80] sm:$0x1]  ;;  %v6040_v21 = vpop.f32.mrf.mxu2  ;;  %v8027_v28 = vld [vmem:[#allocation3 + $0x54] sm:$0xe] }
 0x44b   : > { %v14271_v43 = vrot.slane %v6395_v11, 7  ;;  %v9448_v38 = vunpack.c.l.b16 %v8956_v41  ;;  %v7798_v27 = vor.u32 %v7797_v17, %v7793_v32  ;;  %v6867_v22 = vshrl.u32 %v6686_v24, 16 }
 0x44c   : > { %v6870_v47 = vshll.u32 %v6686_v24, 16  ;;  %v7789_v63 = vrot.slane %v7788_v13, 4  ;;  %v7803_v48 = vrot.slane %v7801_v6, 5  ;;  %v6876_v7 = vshll.u32 %v14276_v55, 16 }
 0x44d   : > { %v9490_v30 = vpop.permute.xlu1 %9489  ;;  %v6400_v36 = vor.u32 %v6398_v29, %v14271_v43  ;;  %v9474_v50 = vpack.c.b16 %v9448_v38, %v9447_v0  ;;  %v7799_v52 = vrot.slane %v7798_v27, 4  ;;  %v6869_v1 = vrot.slane %v6867_v22, 4  ;;  %v4998_v11 = vpop.f32.mrf.mxu3 }
 0x44e   : > { %v9605_v44 = vsel %vm7506_vm11, %v10796_v23, %v9490_v30  ;;  %v6872_v59 = vrot.slane %v6870_v47, 5  ;;  %v7794_v58 = vsel %vm11523_vm4, %v7789_v63, %v7793_v32  ;;  %v6878_v24 = vrot.slane %v6876_v7, 5  ;;  %v10780_v23 = vld [vmem:[#allocation3 + $0x30] sm:$0xff] }
 0x44f   : > { %v9650_v45 = vsel %vm1125_vm1, %v9605_v44, %v14223_v42  ;;  %v6626_v10 = vsel %vm11408_vm13, %v6400_v36, %v6625_v60  ;;  %9495 = vrot.lane.b32.xlu1 %v9474_v50, %s10849_s29  ;;  %v7804_v54 = vsel %vm11523_vm4, %v7799_v52, %v7803_v48  ;;  %v8273_v4 = vunpack.c.l.b16 %v7794_v58  ;;  %v7112_v50 = vld [vmem:[#allocation3 + $0x48] sm:$0xe] }
 0x450   : > { %10686 = vmatmul.msk.bf16.gmra.mxu1 %vm8509_vm14, %v9650_v45  ;;  %6627 = vst [vmem:[#allocation3 + $0x78] sm:$0xf] %v6626_v10  ;;  %v6873_v49 = vor.u32 %v6872_v59, %v6869_v1  ;;  %v6880_v42 = vshrl.u32 %v14276_v55, 16  ;;  %v8274_v6 = vunpack.c.l.b16 %v7804_v54  ;;  %v6886_v16 = vshll.u32 %v14279_v33, 16 }
 0x451   : > { %v600_v32 = vsel %vm13435_vm3, 0, %v599_v3  ;;  %v6401_v29 = vrot.slane %v14271_v43, 4  ;;  %v6092_v17 = vadd.f32 %v6040_v21, %v14189_v20  ;;  %v14300_v13 = vadd.f32 %v4998_v11, %v13055_v18 }
 0x452   : > { %v6874_v8 = vrot.slane %v6873_v49, 4  ;;  %v6882_v41 = vrot.slane %v6880_v42, 4  ;;  %601 = vst [vmem:[#allocation3 + $0x80] sm:$0x1] %v600_v32  ;;  %v8299_v38 = vpack.c.b16 %v8274_v6, %v8273_v4  ;;  %v10482_v60 = vrot.slane %v8027_v28, 9 }
 0x453   : > { %v8316_v0 = vpop.permute.xlu0 %8315  ;;  %v8129_v27 = vrot.slane %v14248_v19, 5  ;;  %v6888_v30 = vrot.slane %v6886_v16, 5  ;;  %v6128_v36 = vmul.f32 %v14232_v12, %v6092_v17  ;;  %v8132_v44 = vrot.slane %v14262_v14, 5  ;;  %v547_v19 = vld [vmem:[#allocation3 + $0x84] sm:$0x1] }
 0x454   : > { %v6879_v22 = vsel %vm11523_vm4, %v6874_v8, %v6878_v24  ;;  %v6883_v47 = vor.u32 %v6882_v41, %v6878_v24  ;;  %v8432_v63 = vsel %vm7506_vm11, %v10780_v23, %v8316_v0  ;;  %8321 = vrot.lane.b32.xlu0 %v8299_v38, %s10849_s29  ;;  %v10402_v58 = vrot.slane %v7112_v50, 9  ;;  %v8778_v49 = vld [vmem:[#allocation3 + $0x64] sm:$0xf]  ;;  %v9203_v42 = vld [vmem:[#allocation3 + $0x60] sm:$0xe] }
 0x455   : > { %v8396_v20 = vpop.permute.xlu1 %8395  ;;  %v8130_v18 = vsel %vm11507_vm7, %v10482_v60, %v8129_v27  ;;  %v8131_v48 = vrot.slane %v8129_v27, 4  ;;  %v7358_v59 = vunpack.c.l.b16 %v6879_v22  ;;  %v6164_v3 = vadd.f32 %v14241_v46, %v6128_v36  ;;  %v5000_v17 = vpop.f32.mrf.mxu3  ;;  %v14325_v23 = vld [vmem:[#allocation3 + $0x68] sm:$0x1] }
 0x456   : > { %v8476_v52 = vsel %vm1125_vm1, %v8432_v63, %v8396_v20  ;;  %v6884_v1 = vrot.slane %v6883_v47, 4  ;;  %v8353_v10 = vunpack.c.l.b16 %v8130_v18  ;;  %v7214_v7 = vrot.slane %v14276_v55, 5  ;;  %v602_v47 = vld [vmem:[#allocation3 + $0x8c] sm:$0x1] }
 0x457   : > { %10565 = vmatmul.msk.bf16.gmra.mxu3 %vm8509_vm14, %v8476_v52  ;;  %v8133_v45 = vsel %vm11507_vm7, %v8131_v48, %v8132_v44  ;;  %v6196_v14 = vmax.f32 %v6164_v3, 0.0  ;;  %v548_v4 = vsel %vm11325_vm10, 0, %v547_v19  ;;  %v7217_v24 = vrot.slane %v14279_v33, 5 }
 0x458   : > { %v6889_v21 = vsel %vm11523_vm4, %v6884_v1, %v6888_v30  ;;  %v8354_v54 = vunpack.c.l.b16 %v8133_v45  ;;  %v7215_v28 = vsel %vm11507_vm7, %v10402_v58, %v7214_v7  ;;  %v7216_v6 = vrot.slane %v7214_v7, 4  ;;  %549 = vst [vmem:[#allocation3 + $0x84] sm:$0x1] %v548_v4 }
 0x459   : > { %v7359_v11 = vunpack.c.l.b16 %v6889_v21  ;;  %v6043_v16 = vpop.f32.mrf.mxu2  ;;  %v6228_v55 = vpack.c.bf16 %v6196_v14, %v6196_v14  ;;  %v7438_v8 = vunpack.c.l.b16 %v7215_v28  ;;  %v10604_v27 = vrot.slane %v9203_v42, 9  ;;  %v6629_v1 = vld [vmem:[#allocation3 + $0x80] sm:$0x1] }
 0x45a   : > { %v8379_v32 = vpack.c.b16 %v8354_v54, %v8353_v10  ;;  %v6093_v41 = vadd.f32 %v6043_v16, %v14213_v31  ;;  %v7218_v60 = vsel %vm11507_vm7, %v7216_v6, %v7217_v24  ;;  %v9305_v22 = vrot.slane %v8778_v49, 5  ;;  %v8777_v31 = vld [vmem:[#allocation3 + $0x60] sm:$0xf] }
 0x45b   : > { %v7481_v0 = vpop.permute.xlu0 %7480  ;;  %v7384_v38 = vpack.c.b16 %v7359_v11, %v7358_v59  ;;  %v6403_v30 = vshrl.u32 %v6228_v55, 16  ;;  %v6406_v36 = vshll.u32 %v6228_v55, 16  ;;  %v7439_v50 = vunpack.c.l.b16 %v7218_v60  ;;  %v7603_v6 = vld [vmem:[#allocation3 + $0x60] sm:$0xf]  ;;  %v14352_v60 = vld [vmem:[#allocation3 + $0x64] sm:$0xf] }
 0x45c   : > { %v7562_v33 = vsel %vm1125_vm1, %v14274_v57, %v7481_v0  ;;  %8401 = vrot.lane.b32.xlu1 %v8379_v32, %s10851_s19  ;;  %v6129_v63 = vmul.f32 %v14232_v12, %v6093_v41  ;;  %v9306_v20 = vsel %vm11507_vm7, %v10604_v27, %v9305_v22  ;;  %v9307_v18 = vrot.slane %v9305_v22, 4 }
 0x45d   : > { %7406 = vrot.lane.b32.xlu2 %v7384_v38, %s10849_s29  ;;  %10585 = vmatmul.msk.bf16.gmra.mxu0 %vm8509_vm14, %v7562_v33  ;;  %v9308_v48 = vrot.slane %v14325_v23, 5  ;;  %v6405_v44 = vrot.slane %v6403_v30, 7  ;;  %v7464_v57 = vpack.c.b16 %v7439_v50, %v7438_v8  ;;  %v9529_v19 = vunpack.c.l.b16 %v9306_v20 }
 0x45e   : > { %v603_v52 = vsel %vm13435_vm3, 0, %v602_v47  ;;  %v6165_v59 = vadd.f32 %v14241_v46, %v6129_v63  ;;  %v8958_v45 = vshrl.u32 %v8777_v31, 16  ;;  %v8961_v10 = vshll.u32 %v8777_v31, 16  ;;  %v14364_v63 = vld [vmem:[#allocation3 + $0x68] sm:$0x1] }
 0x45f   : > { %v9309_v3 = vsel %vm11507_vm7, %v9307_v18, %v9308_v48  ;;  %604 = vst [vmem:[#allocation3 + $0x8c] sm:$0x1] %v603_v52  ;;  %v6408_v58 = vor.u32 %v6406_v36, %v6405_v44  ;;  %v6410_v7 = vrot.slane %v6405_v44, 4  ;;  %7486 = vrot.lane.b32.xlu0 %v7464_v57, %s10851_s19  ;;  %v8967_v14 = vshll.u32 %v8778_v49, 16  ;;  %v6632_v44 = vld [vmem:[#allocation3 + $0x84] sm:$0xf] }
 0x460   : > { %v9530_v21 = vunpack.c.l.b16 %v9309_v3  ;;  %v6197_v54 = vmax.f32 %v6165_v59, 0.0  ;;  %v8960_v42 = vrot.slane %v8958_v45, 4  ;;  %v8963_v11 = vrot.slane %v8961_v10, 5 }
 0x461   : > { %v6045_v4 = vpop.f32.mrf.mxu2  ;;  %v8971_v28 = vshrl.u32 %v8778_v49, 16  ;;  %v6409_v24 = vsel %vm11150_vm5, %v6401_v29, %v6408_v58  ;;  %v6630_v16 = vsel %vm11325_vm10, %v6410_v7, %v6629_v1  ;;  %v8969_v0 = vrot.slane %v8967_v14, 5  ;;  %v14373_v14 = vld [vmem:[#allocation3 + $0x58] sm:$0xf] }
 0x462   : > { %v9555_v55 = vpack.c.b16 %v9530_v21, %v9529_v19  ;;  %v6094_v32 = vadd.f32 %v6045_v4, %v14260_v15  ;;  %6628 = vst.msk [vmem:[#allocation3 + $0x7c] sm:$0xf] %vm503_vm12, %v6409_v24  ;;  %v6229_v8 = vpack.c.bf16 %v6197_v54, %v6197_v54  ;;  %v8964_v41 = vor.u32 %v8963_v11, %v8960_v42  ;;  %v14377_v11 = vld [vmem:[#allocation3 + $0x5c] sm:$0x1] }
 0x463   : > { %v8973_v38 = vrot.slane %v8971_v28, 4  ;;  %6631 = vst [vmem:[#allocation3 + $0x80] sm:$0x1] %v6630_v16  ;;  %v8977_v29 = vshll.u32 %v14325_v23, 16  ;;  %v7806_v27 = vshrl.u32 %v7603_v6, 16  ;;  %v7809_v22 = vshll.u32 %v7603_v6, 16 }
 0x464   : > { %v6130_v43 = vmul.f32 %v14232_v12, %v6094_v32  ;;  %v5003_v49 = vpop.f32.mrf.mxu3  ;;  %v6412_v47 = vshrl.u32 %v6229_v8, 16  ;;  %v6415_v33 = vshll.u32 %v6229_v8, 16  ;;  %v14357_v15 = vadd.f32 %v5000_v17, %v13094_v61  ;;  %v6688_v17 = vld [vmem:[#allocation3 + $0x54] sm:$0xf]  ;;  %v550_v6 = vld [vmem:[#allocation3 + $0x90] sm:$0x1] }
 0x465   : > { %9577 = vrot.lane.b32.xlu2 %v9555_v55, %s10851_s19  ;;  %v8965_v30 = vrot.slane %v8964_v41, 4  ;;  %v14362_v50 = vadd.f32 %v5003_v49, %v13146_v37  ;;  %v8974_v31 = vor.u32 %v8973_v38, %v8969_v0  ;;  %v7808_v20 = vrot.slane %v7806_v27, 4 }
 0x466   : > { %v6166_v36 = vadd.f32 %v14241_v46, %v6130_v43  ;;  %v6414_v23 = vrot.slane %v6412_v47, 7  ;;  %v7811_v48 = vrot.slane %v7809_v22, 5  ;;  %v7815_v61 = vshll.u32 %v14352_v60, 16  ;;  %v6636_v22 = vld [vmem:[#allocation3 + $0x8c] sm:$0x1]  ;;  %v14382_v47 = vpop.permute.xlu2 %9571 }
 0x467   : > { %v8970_v18 = vsel %vm11523_vm4, %v8965_v30, %v8969_v0  ;;  %v8975_v19 = vrot.slane %v8974_v31, 4  ;;  %v8979_v52 = vrot.slane %v8977_v29, 5  ;;  %v7819_v1 = vshrl.u32 %v14352_v60, 16 }
 0x468   : > { %v6198_v57 = vmax.f32 %v6166_v36, 0.0  ;;  %v6417_v37 = vor.u32 %v6415_v33, %v6414_v23  ;;  %v9449_v59 = vunpack.c.l.b16 %v8970_v18  ;;  %v7812_v3 = vor.u32 %v7811_v48, %v7808_v20 }
 0x469   : > { %v7817_v45 = vrot.slane %v7815_v61, 5  ;;  %v8980_v58 = vsel %vm11523_vm4, %v8975_v19, %v8979_v52  ;;  %v7821_v7 = vrot.slane %v7819_v1, 4  ;;  %v7825_v21 = vshll.u32 %v14364_v63, 16  ;;  %v6048_v20 = vpop.f32.mrf.mxu2  ;;  %v8028_v1 = vld [vmem:[#allocation3 + $0x60] sm:$0xe] }
 0x46a   : > { %v6230_v10 = vpack.c.bf16 %v6198_v57, %v6198_v57  ;;  %v6418_v54 = vrot.slane %v6414_v23, 4  ;;  %v6633_v4 = vsel %vm11408_vm13, %v6417_v37, %v6632_v44  ;;  %v9450_v42 = vunpack.c.l.b16 %v8980_v58 }
 0x46b   : > { %v6891_v28 = vshrl.u32 %v6688_v17, 16  ;;  %6634 = vst [vmem:[#allocation3 + $0x84] sm:$0xf] %v6633_v4  ;;  %v7813_v55 = vrot.slane %v7812_v3, 4  ;;  %v7822_v32 = vor.u32 %v7821_v7, %v7817_v45  ;;  %v7827_v41 = vrot.slane %v7825_v21, 5 }
 0x46c   : > { %v6420_v24 = vshrl.u32 %v6230_v10, 16  ;;  %v6423_v16 = vshll.u32 %v6230_v10, 16  ;;  %v9475_v8 = vpack.c.b16 %v9450_v42, %v9449_v59  ;;  %v6894_v38 = vshll.u32 %v6688_v17, 16  ;;  %v5005_v17 = vpop.f32.mrf.mxu3  ;;  %v7113_v10 = vld [vmem:[#allocation3 + $0x54] sm:$0xe] }
 0x46d   : > { %v6893_v0 = vrot.slane %v6891_v28, 4  ;;  %v7818_v49 = vsel %vm11523_vm4, %v7813_v55, %v7817_v45  ;;  %v7823_v29 = vrot.slane %v7822_v32, 4  ;;  %v6900_v27 = vshll.u32 %v14373_v14, 16 }
 0x46e   : > { %v6422_v43 = vrot.slane %v6420_v24, 7  ;;  %9497 = vrot.lane.b32.xlu1 %v9475_v8, %s10849_s29  ;;  %v6896_v33 = vrot.slane %v6894_v38, 5  ;;  %v6904_v30 = vshrl.u32 %v14373_v14, 16  ;;  %v6910_v36 = vshll.u32 %v14377_v11, 16 }
 0x46f   : > { %v551_v31 = vsel %vm11325_vm10, 0, %v550_v6  ;;  %v7828_v48 = vsel %vm11523_vm4, %v7823_v29, %v7827_v41  ;;  %v6902_v61 = vrot.slane %v6900_v27, 5  ;;  %v8275_v44 = vunpack.c.l.b16 %v7818_v49  ;;  %v14414_v29 = vld [vmem:[#allocation3 + $0x74] sm:$0x1] }
 0x470   : > { %v6425_v23 = vor.u32 %v6423_v16, %v6422_v43  ;;  %v6427_v18 = vrot.slane %v6422_v43, 4  ;;  %552 = vst [vmem:[#allocation3 + $0x90] sm:$0x1] %v551_v31  ;;  %v8276_v57 = vunpack.c.l.b16 %v7828_v48  ;;  %v6897_v19 = vor.u32 %v6896_v33, %v6893_v0  ;;  %v8780_v0 = vld [vmem:[#allocation3 + $0x70] sm:$0xf] }
 0x471   : > { %v6906_v52 = vrot.slane %v6904_v30, 4  ;;  %v6912_v3 = vrot.slane %v6910_v36, 5  ;;  %v6095_v45 = vadd.f32 %v6048_v20, %v14300_v13  ;;  %v14398_v4 = vadd.f32 %v5005_v17, %v13181_v26  ;;  %v7403_v30 = vpop.permute.xlu2 %7402  ;;  %v10764_v17 = vld [vmem:[#allocation3 + $0x30] sm:$0xff] }
 0x472   : > { %v6426_v37 = vsel %vm11150_vm5, %v6418_v54, %v6425_v23  ;;  %v6637_v59 = vsel %vm11325_vm10, %v6427_v18, %v6636_v22  ;;  %v8300_v58 = vpack.c.b16 %v8276_v57, %v8275_v44  ;;  %v6898_v7 = vrot.slane %v6897_v19, 4  ;;  %v605_v18 = vld [vmem:[#allocation3 + $0x98] sm:$0x1]  ;;  %v6050_v19 = vpop.f32.mrf.mxu2 }
 0x473   : > { %6635 = vst.msk [vmem:[#allocation3 + $0x88] sm:$0xf] %vm503_vm12, %v6426_v37  ;;  %v6907_v21 = vor.u32 %v6906_v52, %v6902_v61  ;;  %v6131_v42 = vmul.f32 %v14232_v12, %v6095_v45  ;;  %v10483_v28 = vrot.slane %v8028_v1, 9  ;;  %v8136_v54 = vrot.slane %v14352_v60, 5  ;;  %v9204_v60 = vld [vmem:[#allocation3 + $0x6c] sm:$0xe] }
 0x474   : > { %6638 = vst [vmem:[#allocation3 + $0x8c] sm:$0x1] %v6637_v59  ;;  %v8139_v6 = vrot.slane %v14364_v63, 5  ;;  %8323 = vrot.lane.b32.xlu0 %v8300_v58, %s10849_s29  ;;  %v6903_v13 = vsel %vm11523_vm4, %v6898_v7, %v6902_v61  ;;  %v10403_v16 = vrot.slane %v7113_v10, 9  ;;  %v7221_v55 = vrot.slane %v14373_v14, 5 }
 0x475   : > { %v6908_v24 = vrot.slane %v6907_v21, 4  ;;  %v7360_v32 = vunpack.c.l.b16 %v6903_v13  ;;  %v6167_v26 = vadd.f32 %v14241_v46, %v6131_v42  ;;  %v8137_v8 = vsel %vm11507_vm7, %v10483_v28, %v8136_v54  ;;  %v8779_v52 = vld [vmem:[#allocation3 + $0x6c] sm:$0xf] }
 0x476   : > { %v8138_v41 = vrot.slane %v8136_v54, 4  ;;  %v8355_v38 = vunpack.c.l.b16 %v8137_v8  ;;  %v7222_v43 = vsel %vm11507_vm7, %v10403_v16, %v7221_v55  ;;  %v7223_v49 = vrot.slane %v7221_v55, 4  ;;  %v7605_v16 = vld [vmem:[#allocation3 + $0x6c] sm:$0xf] }
 0x477   : > { %v6913_v63 = vsel %vm11523_vm4, %v6908_v24, %v6912_v3  ;;  %v6199_v27 = vmax.f32 %v6167_v26, 0.0  ;;  %v7224_v33 = vrot.slane %v14377_v11, 5  ;;  %v7440_v31 = vunpack.c.l.b16 %v7222_v43  ;;  %v6639_v55 = vld [vmem:[#allocation3 + $0x90] sm:$0xf] }
 0x478   : > { %v7361_v14 = vunpack.c.l.b16 %v6913_v63  ;;  %v8140_v22 = vsel %vm11507_vm7, %v8138_v41, %v8139_v6  ;;  %v10605_v20 = vrot.slane %v9204_v60, 9  ;;  %v9312_v23 = vrot.slane %v8780_v0, 5  ;;  %v14440_v43 = vld [vmem:[#allocation3 + $0x70] sm:$0xf] }
 0x479   : > { %v8356_v36 = vunpack.c.l.b16 %v8140_v22  ;;  %v6231_v61 = vpack.c.bf16 %v6199_v27, %v6199_v27  ;;  %v7225_v44 = vsel %vm11507_vm7, %v7223_v49, %v7224_v33  ;;  %v9315_v57 = vrot.slane %v14414_v29, 5 }
 0x47a   : > { %v7385_v48 = vpack.c.b16 %v7361_v14, %v7360_v32  ;;  %v7441_v37 = vunpack.c.l.b16 %v7225_v44  ;;  %v9313_v11 = vsel %vm11507_vm7, %v10605_v20, %v9312_v23  ;;  %v9314_v59 = vrot.slane %v9312_v23, 4  ;;  %v6690_v23 = vld [vmem:[#allocation3 + $0x60] sm:$0xf] }
 0x47b   : > { %v8380_v1 = vpack.c.b16 %v8356_v36, %v8355_v38  ;;  %v6429_v3 = vshrl.u32 %v6231_v61, 16  ;;  %v6432_v45 = vshll.u32 %v6231_v61, 16  ;;  %v14426_v10 = vsel %vm7506_vm11, %v10764_v17, %v7403_v30  ;;  %v5008_v30 = vpop.f32.mrf.mxu3 }
 0x47c   : > { %7408 = vrot.lane.b32.xlu2 %v7385_v48, %s10849_s29  ;;  %v606_v58 = vsel %vm13435_vm3, 0, %v605_v18  ;;  %v7465_v7 = vpack.c.b16 %v7441_v37, %v7440_v31  ;;  %v9316_v21 = vsel %vm11507_vm7, %v9314_v59, %v9315_v57  ;;  %v6096_v42 = vadd.f32 %v6050_v19, %v14357_v15 }
 0x47d   : > { %8403 = vrot.lane.b32.xlu1 %v8380_v1, %s10851_s19  ;;  %607 = vst [vmem:[#allocation3 + $0x98] sm:$0x1] %v606_v58  ;;  %v8982_v28 = vshrl.u32 %v8779_v52, 16  ;;  %v14434_v54 = vrot.slane %v6429_v3, 7  ;;  %v9531_v6 = vunpack.c.l.b16 %v9313_v11  ;;  %v9532_v13 = vunpack.c.l.b16 %v9316_v21  ;;  %v14454_v58 = vld [vmem:[#allocation3 + $0x64] sm:$0xf] }
 0x47e   : > { %v8985_v24 = vshll.u32 %v8779_v52, 16  ;;  %7488 = vrot.lane.b32.xlu0 %v7465_v7, %s10851_s19  ;;  %v6132_v32 = vmul.f32 %v14232_v12, %v6096_v42  ;;  %v8991_v8 = vshll.u32 %v8780_v0, 16  ;;  %v8995_v41 = vshrl.u32 %v8780_v0, 16  ;;  %v14446_v0 = vld [vmem:[#allocation3 + $0x74] sm:$0x1] }
 0x47f   : > { %v8984_v26 = vrot.slane %v8982_v28, 4  ;;  %v6434_v60 = vor.u32 %v6432_v45, %v14434_v54  ;;  %v6435_v63 = vrot.slane %v14434_v54, 4  ;;  %v9556_v15 = vpack.c.b16 %v9532_v13, %v9531_v6 }
 0x480   : > { %v8987_v38 = vrot.slane %v8985_v24, 5  ;;  %v6168_v49 = vadd.f32 %v14241_v46, %v6132_v32  ;;  %v8993_v14 = vrot.slane %v8991_v8, 5  ;;  %v8997_v27 = vrot.slane %v8995_v41, 4 }
 0x481   : > { %v9001_v22 = vshll.u32 %v14414_v29, 16  ;;  %v6640_v33 = vsel %vm11408_vm13, %v6434_v60, %v6639_v55  ;;  %v7830_v31 = vshrl.u32 %v7605_v16, 16  ;;  %v7833_v20 = vshll.u32 %v7605_v16, 16 }
 0x482   : > { %v8988_v36 = vor.u32 %v8987_v38, %v8984_v26  ;;  %6641 = vst [vmem:[#allocation3 + $0x90] sm:$0xf] %v6640_v33  ;;  %v6200_v18 = vmax.f32 %v6168_v49, 0.0  ;;  %v8998_v48 = vor.u32 %v8997_v27, %v8993_v14  ;;  %v7839_v17 = vshll.u32 %v14440_v43, 16  ;;  %v14458_v26 = vld [vmem:[#allocation3 + $0x68] sm:$0x1] }
 0x483   : > { %v9003_v61 = vrot.slane %v9001_v22, 5  ;;  %v7832_v29 = vrot.slane %v7830_v31, 4  ;;  %v7835_v57 = vrot.slane %v7833_v20, 5  ;;  %v7843_v19 = vshrl.u32 %v14440_v43, 16  ;;  %v6053_v22 = vpop.f32.mrf.mxu2 }
 0x484   : > { %9579 = vrot.lane.b32.xlu2 %v9556_v15, %s10851_s19  ;;  %v8989_v44 = vrot.slane %v8988_v36, 4  ;;  %v6232_v52 = vpack.c.bf16 %v6200_v18, %v6200_v18  ;;  %v8999_v1 = vrot.slane %v8998_v48, 4  ;;  %v7841_v37 = vrot.slane %v7839_v17, 5  ;;  %v6643_v15 = vld [vmem:[#allocation3 + $0x98] sm:$0x1] }
 0x485   : > { %v7849_v11 = vshll.u32 %v14446_v0, 16  ;;  %v7836_v3 = vor.u32 %v7835_v57, %v7832_v29  ;;  %v7845_v45 = vrot.slane %v7843_v19, 4  ;;  %v6915_v7 = vshrl.u32 %v6690_v23, 16  ;;  %v553_v18 = vld [vmem:[#allocation3 + $0x9c] sm:$0x1] }
 0x486   : > { %v8994_v59 = vsel %vm11523_vm4, %v8989_v44, %v8993_v14  ;;  %v6437_v21 = vshrl.u32 %v6232_v52, 16  ;;  %v6440_v42 = vshll.u32 %v6232_v52, 16  ;;  %v9004_v28 = vsel %vm11523_vm4, %v8999_v1, %v9003_v61  ;;  %v5010_v44 = vpop.f32.mrf.mxu3  ;;  %v8029_v1 = vld [vmem:[#allocation3 + $0x6c] sm:$0xe] }
 0x487   : > { %v9451_v6 = vunpack.c.l.b16 %v8994_v59  ;;  %v9452_v13 = vunpack.c.l.b16 %v9004_v28  ;;  %v7837_v24 = vrot.slane %v7836_v3, 4  ;;  %v7846_v16 = vor.u32 %v7845_v45, %v7841_v37  ;;  %v7114_v3 = vld [vmem:[#allocation3 + $0x60] sm:$0xe] }
 0x488   : > { %v7851_v55 = vrot.slane %v7849_v11, 5  ;;  %v6439_v32 = vrot.slane %v6437_v21, 7  ;;  %v6917_v8 = vrot.slane %v6915_v7, 4  ;;  %v6918_v41 = vshll.u32 %v6690_v23, 16 }
 0x489   : > { %v6924_v60 = vshll.u32 %v14454_v58, 16  ;;  %v9476_v38 = vpack.c.b16 %v9452_v13, %v9451_v6  ;;  %v7842_v49 = vsel %vm11523_vm4, %v7837_v24, %v7841_v37  ;;  %v7847_v14 = vrot.slane %v7846_v16, 4  ;;  %v7118_v40 = vld [vmem:[#allocation3 + $0x90] sm:$0xe] }
 0x48a   : > { %v6928_v27 = vshrl.u32 %v14454_v58, 16  ;;  %v6442_v33 = vor.u32 %v6440_v42, %v6439_v32  ;;  %v6444_v36 = vrot.slane %v6439_v32, 4  ;;  %v8277_v31 = vunpack.c.l.b16 %v7842_v49  ;;  %v9492_v32 = vpop.permute.xlu1 %9491 }
 0x48b   : > { %v6920_v20 = vrot.slane %v6918_v41, 5  ;;  %9499 = vrot.lane.b32.xlu1 %v9476_v38, %s10849_s29  ;;  %v7852_v23 = vsel %vm11523_vm4, %v7847_v14, %v7851_v55  ;;  %v6926_v48 = vrot.slane %v6924_v60, 5  ;;  %v6934_v17 = vshll.u32 %v14458_v26, 16  ;;  %v10797_v38 = vld [vmem:[#allocation3 + $0x3c] sm:$0xff] }
 0x48c   : > { %v6930_v61 = vrot.slane %v6928_v27, 4  ;;  %v6443_v29 = vsel %vm11150_vm5, %v6435_v63, %v6442_v33  ;;  %v6644_v57 = vsel %vm11325_vm10, %v6444_v36, %v6643_v15  ;;  %v8278_v19 = vunpack.c.l.b16 %v7852_v23  ;;  %v8318_v33 = vpop.permute.xlu0 %8317  ;;  %v608_v36 = vld [vmem:[#allocation3 + $0xa4] sm:$0x1]  ;;  %v10781_v23 = vld [vmem:[#allocation3 + $0x3c] sm:$0xff] }
 0x48d   : > { %v6921_v52 = vor.u32 %v6920_v20, %v6917_v8  ;;  %6642 = vst.msk [vmem:[#allocation3 + $0x94] sm:$0xf] %vm503_vm12, %v6443_v29  ;;  %v14476_v37 = vadd.f32 %v5008_v30, %v13233_v62  ;;  %v554_v59 = vsel %vm11325_vm10, 0, %v553_v18  ;;  %v6097_v54 = vadd.f32 %v6053_v22, %v14362_v50  ;;  %v9205_v8 = vld [vmem:[#allocation3 + $0x78] sm:$0xe] }
 0x48e   : > { %v6931_v11 = vor.u32 %v6930_v61, %v6926_v48  ;;  %6645 = vst [vmem:[#allocation3 + $0x98] sm:$0x1] %v6644_v57  ;;  %v8301_v63 = vpack.c.b16 %v8278_v19, %v8277_v31  ;;  %v6936_v7 = vrot.slane %v6934_v17, 5  ;;  %v14482_v21 = vadd.f32 %v5010_v44, %v13282_v2  ;;  %v6055_v31 = vpop.f32.mrf.mxu2 }
 0x48f   : > { %v6922_v45 = vrot.slane %v6921_v52, 4  ;;  %555 = vst [vmem:[#allocation3 + $0x9c] sm:$0x1] %v554_v59  ;;  %v6133_v28 = vmul.f32 %v14232_v12, %v6097_v54  ;;  %v10484_v62 = vrot.slane %v8029_v1, 9  ;;  %v8143_v30 = vrot.slane %v14440_v43, 5 }
 0x490   : > { %v6932_v42 = vrot.slane %v6931_v11, 4  ;;  %8325 = vrot.lane.b32.xlu0 %v8301_v63, %s10849_s29  ;;  %v8146_v6 = vrot.slane %v14446_v0, 5  ;;  %v10404_v13 = vrot.slane %v7114_v3, 9  ;;  %v7228_v24 = vrot.slane %v14454_v58, 5  ;;  %v14499_v58 = vld [vmem:[#allocation3 + $0x7c] sm:$0xf] }
 0x491   : > { %v6927_v50 = vsel %vm11523_vm4, %v6922_v45, %v6926_v48  ;;  %v6169_v16 = vadd.f32 %v14241_v46, %v6133_v28  ;;  %v8144_v55 = vsel %vm11507_vm7, %v10484_v62, %v8143_v30  ;;  %v7231_v43 = vrot.slane %v14458_v26, 5  ;;  %v8805_v48 = vld [vmem:[#allocation3 + $0x80] sm:$0x1]  ;;  %v8781_v59 = vld [vmem:[#allocation3 + $0x78] sm:$0xf] }
 0x492   : > { %v6937_v2 = vsel %vm11523_vm4, %v6932_v42, %v6936_v7  ;;  %v7362_v41 = vunpack.c.l.b16 %v6927_v50  ;;  %v8145_v15 = vrot.slane %v8143_v30, 4  ;;  %v7229_v0 = vsel %vm11507_vm7, %v10404_v13, %v7228_v24 }
 0x493   : > { %v7363_v60 = vunpack.c.l.b16 %v6937_v2  ;;  %v6201_v49 = vmax.f32 %v6169_v16, 0.0  ;;  %v8357_v14 = vunpack.c.l.b16 %v8144_v55  ;;  %v7230_v27 = vrot.slane %v7228_v24, 4  ;;  %v7607_v55 = vld [vmem:[#allocation3 + $0x78] sm:$0xf] }
 0x494   : > { %v7442_v22 = vunpack.c.l.b16 %v7229_v0  ;;  %v8147_v26 = vsel %vm11507_vm7, %v8145_v15, %v8146_v6  ;;  %v9608_v18 = vsel %vm7506_vm11, %v10797_v38, %v9492_v32  ;;  %v10606_v61 = vrot.slane %v9205_v8, 9  ;;  %v14531_v38 = vld [vmem:[#allocation3 + $0x7c] sm:$0xf] }
 0x495   : > { %v7386_v20 = vpack.c.b16 %v7363_v60, %v7362_v41  ;;  %v6233_v17 = vpack.c.bf16 %v6201_v49, %v6201_v49  ;;  %v8358_v44 = vunpack.c.l.b16 %v8147_v26  ;;  %v7232_v29 = vsel %vm11507_vm7, %v7230_v27, %v7231_v43  ;;  %v14539_v26 = vld [vmem:[#allocation3 + $0x80] sm:$0x1] }
 0x496   : > { %v9319_v57 = vrot.slane %v14499_v58, 5  ;;  %v7443_v19 = vunpack.c.l.b16 %v7232_v29  ;;  %v14509_v52 = vsel %vm7506_vm11, %v10781_v23, %v8318_v33  ;;  %v609_v1 = vsel %vm13435_vm3, 0, %v608_v36  ;;  %v6646_v13 = vld [vmem:[#allocation3 + $0x9c] sm:$0xf]  ;;  %v14537_v36 = vpop.permute.xlu2 %9573 }
 0x497   : > { %7410 = vrot.lane.b32.xlu2 %v7386_v20, %s10849_s29  ;;  %v6098_v11 = vadd.f32 %v6055_v31, %v14398_v4  ;;  %v6446_v54 = vshrl.u32 %v6233_v17, 16  ;;  %v8381_v3 = vpack.c.b16 %v8358_v44, %v8357_v14  ;;  %v9322_v45 = vrot.slane %v8805_v48, 5  ;;  %610 = vst [vmem:[#allocation3 + $0xa4] sm:$0x1] %v609_v1  ;;  %v14535_v14 = vpop.f32.mrf.mxu3  ;;  %v8398_v44 = vpop.permute.xlu1 %8397 }
 0x498   : > { %v9320_v63 = vsel %vm11507_vm7, %v10606_v61, %v9319_v57  ;;  %v6449_v7 = vshll.u32 %v6233_v17, 16  ;;  %v7466_v42 = vpack.c.b16 %v7443_v19, %v7442_v22  ;;  %v9321_v28 = vrot.slane %v9319_v57, 4 }
 0x499   : > { %v6134_v62 = vmul.f32 %v14232_v12, %v6098_v11  ;;  %v14517_v30 = vrot.slane %v6446_v54, 7  ;;  %8405 = vrot.lane.b32.xlu1 %v8381_v3, %s10851_s19  ;;  %v9533_v50 = vunpack.c.l.b16 %v9320_v63  ;;  %v9652_v4 = vsel %vm1125_vm1, %v9608_v18, %v14382_v47  ;;  %v7483_v3 = vpop.permute.xlu0 %7482 }
 0x49a   : > { %v9006_v6 = vshrl.u32 %v8781_v59, 16  ;;  %7490 = vrot.lane.b32.xlu0 %v7466_v42, %s10851_s19  ;;  %v9323_v24 = vsel %vm11507_vm7, %v9321_v28, %v9322_v45  ;;  %10687 = vmatmul.msk.bf16.gmra.mxu1 %vm8509_vm14, %v9652_v4  ;;  %v9009_v12 = vshll.u32 %v8781_v59, 16  ;;  %v9015_v16 = vshll.u32 %v14499_v58, 16  ;;  %v6692_v28 = vld [vmem:[#allocation3 + $0x6c] sm:$0xf] }
 0x49b   : > { %v6170_v2 = vadd.f32 %v14241_v46, %v6134_v62  ;;  %v6451_v43 = vor.u32 %v6449_v7, %v14517_v30  ;;  %v6452_v32 = vrot.slane %v14517_v30, 4  ;;  %v9534_v47 = vunpack.c.l.b16 %v9323_v24 }
 0x49c   : > { %v9008_v8 = vrot.slane %v9006_v6, 4  ;;  %v9011_v60 = vrot.slane %v9009_v12, 5  ;;  %v9017_v15 = vrot.slane %v9015_v16, 5  ;;  %v9019_v0 = vshrl.u32 %v14499_v58, 16 }
 0x49d   : > { %v6202_v41 = vmax.f32 %v6170_v2, 0.0  ;;  %v6647_v46 = vsel %vm11408_vm13, %v6451_v43, %v6646_v13  ;;  %v9557_v49 = vpack.c.b16 %v9534_v47, %v9533_v50  ;;  %v9025_v27 = vshll.u32 %v8805_v48, 16  ;;  %v14549_v13 = vld [vmem:[#allocation3 + $0x70] sm:$0xf] }
 0x49e   : > { %v7854_v22 = vshrl.u32 %v7607_v55, 16  ;;  %6648 = vst [vmem:[#allocation3 + $0x9c] sm:$0xf] %v6647_v46  ;;  %v9012_v31 = vor.u32 %v9011_v60, %v9008_v8  ;;  %v9021_v20 = vrot.slane %v9019_v0, 4  ;;  %v7857_v18 = vshll.u32 %v7607_v55, 16 }
 0x49f   : > { %v6234_v33 = vpack.c.bf16 %v6202_v41, %v6202_v41  ;;  %9581 = vrot.lane.b32.xlu2 %v9557_v49, %s10851_s19  ;;  %v9027_v58 = vrot.slane %v9025_v27, 5  ;;  %v7863_v61 = vshll.u32 %v14531_v38, 16  ;;  %v7867_v17 = vshrl.u32 %v14531_v38, 16  ;;  %v6650_v62 = vld [vmem:[#allocation3 + $0xa4] sm:$0x1]  ;;  %v6058_v49 = vpop.f32.mrf.mxu2 }
 0x4a0   : > { %v7856_v23 = vrot.slane %v7854_v22, 4  ;;  %v9013_v57 = vrot.slane %v9012_v31, 4  ;;  %v9022_v19 = vor.u32 %v9021_v20, %v9017_v15  ;;  %v7859_v1 = vrot.slane %v7857_v18, 5  ;;  %v14561_v60 = vld [vmem:[#allocation3 + $0x74] sm:$0x1] }
 0x4a1   : > { %v6454_v48 = vshrl.u32 %v6234_v33, 16  ;;  %v6457_v29 = vshll.u32 %v6234_v33, 16  ;;  %v7865_v11 = vrot.slane %v7863_v61, 5  ;;  %v7869_v59 = vrot.slane %v7867_v17, 4  ;;  %v556_v46 = vld [vmem:[#allocation3 + $0xa8] sm:$0x1]  ;;  %v5015_v33 = vpop.f32.mrf.mxu3 }
 0x4a2   : > { %v7873_v54 = vshll.u32 %v14539_v26, 16  ;;  %v9018_v45 = vsel %vm11523_vm4, %v9013_v57, %v9017_v15  ;;  %v9023_v7 = vrot.slane %v9022_v19, 4  ;;  %v8478_v42 = vsel %vm1125_vm1, %v14509_v52, %v8398_v44  ;;  %v8030_v57 = vld [vmem:[#allocation3 + $0x78] sm:$0xe] }
 0x4a3   : > { %v6456_v63 = vrot.slane %v6454_v48, 7  ;;  %v9453_v30 = vunpack.c.l.b16 %v9018_v45  ;;  %v7860_v50 = vor.u32 %v7859_v1, %v7856_v23  ;;  %v7870_v4 = vor.u32 %v7869_v59, %v7865_v11  ;;  %10566 = vmatmul.msk.bf16.gmra.mxu3 %vm8509_vm14, %v8478_v42  ;;  %v7405_v23 = vpop.permute.xlu2 %7404  ;;  %v14585_v45 = vld [vmem:[%s15345_s5] ss:$0 sm:$0xff] }
 0x4a4   : > { %v7875_v6 = vrot.slane %v7873_v54, 5  ;;  %v9028_v12 = vsel %vm11523_vm4, %v9023_v7, %v9027_v58  ;;  %v7564_v16 = vsel %vm1125_vm1, %v14426_v10, %v7483_v3  ;;  %v6939_v47 = vshrl.u32 %v6692_v28, 16  ;;  %v7115_v54 = vld [vmem:[#allocation3 + $0x6c] sm:$0xe] }
 0x4a5   : > { %v6459_v24 = vor.u32 %v6457_v29, %v6456_v63  ;;  %v6461_v2 = vrot.slane %v6456_v63, 4  ;;  %v9454_v55 = vunpack.c.l.b16 %v9028_v12  ;;  %v7861_v52 = vrot.slane %v7860_v50, 4  ;;  %10586 = vmatmul.msk.bf16.gmra.mxu0 %vm8509_vm14, %v7564_v16  ;;  %v10765_v29 = vld [vmem:[#allocation3 + $0x3c] sm:$0xff] }
 0x4a6   : > { %v7871_v43 = vrot.slane %v7870_v4, 4  ;;  %v6942_v15 = vshll.u32 %v6692_v28, 16  ;;  %v6948_v0 = vshll.u32 %v14549_v13, 16  ;;  %v6952_v61 = vshrl.u32 %v14549_v13, 16  ;;  %v9206_v28 = vld [vmem:[#allocation3 + $0x84] sm:$0xe] }
 0x4a7   : > { %v6460_v8 = vsel %vm11150_vm5, %v6452_v32, %v6459_v24  ;;  %v6651_v41 = vsel %vm11325_vm10, %v6461_v2, %v6650_v62  ;;  %v9477_v10 = vpack.c.b16 %v9454_v55, %v9453_v30  ;;  %v7866_v27 = vsel %vm11523_vm4, %v7861_v52, %v7865_v11  ;;  %v14597_v30 = vld [vmem:[%s15346_s6] ss:$0 sm:$0xff]  ;;  %v14601_v24 = vld [vmem:[#allocation3 + $0x88] sm:$0xf] }
 0x4a8   : > { %6649 = vst.msk [vmem:[#allocation3 + $0xa0] sm:$0xf] %vm503_vm12, %v6460_v8  ;;  %v7876_v22 = vsel %vm11523_vm4, %v7871_v43, %v7875_v6  ;;  %v6941_v32 = vrot.slane %v6939_v47, 4  ;;  %v8279_v31 = vunpack.c.l.b16 %v7866_v27  ;;  %v6944_v18 = vrot.slane %v6942_v15, 5 }
 0x4a9   : > { %6652 = vst [vmem:[#allocation3 + $0xa4] sm:$0x1] %v6651_v41  ;;  %v8280_v20 = vunpack.c.l.b16 %v7876_v22  ;;  %v6950_v58 = vrot.slane %v6948_v0, 5  ;;  %9501 = vrot.lane.b32.xlu1 %v9477_v10, %s10849_s29  ;;  %v6958_v17 = vshll.u32 %v14561_v60, 16  ;;  %v557_v44 = vsel %vm11325_vm10, 0, %v556_v46 }
 0x4aa   : > { %v6099_v48 = vadd.f32 %v6058_v49, %v14476_v37  ;;  %v14577_v19 = vadd.f32 %v14535_v14, %v13323_v35  ;;  %v6945_v11 = vor.u32 %v6944_v18, %v6941_v32  ;;  %558 = vst [vmem:[#allocation3 + $0xa8] sm:$0x1] %v557_v44  ;;  %v14580_v59 = vadd.f32 %v5015_v33, %v13360_v25  ;;  %v611_v10 = vld [vmem:[#allocation3 + $0xb0] sm:$0x1] }
 0x4ab   : > { %v8302_v1 = vpack.c.b16 %v8280_v20, %v8279_v31  ;;  %v6954_v3 = vrot.slane %v6952_v61, 4  ;;  %v6960_v63 = vrot.slane %v6958_v17, 5  ;;  %v14589_v7 = vsel %vm7506_vm11, %v10765_v29, %v7405_v23  ;;  %v6060_v31 = vpop.f32.mrf.mxu2  ;;  %v8783_v61 = vld [vmem:[#allocation3 + $0x84] sm:$0xf] }
 0x4ac   : > { %v6135_v37 = vmul.f32 %v14585_v45, %v6099_v48  ;;  %v6946_v35 = vrot.slane %v6945_v11, 4  ;;  %v10485_v14 = vrot.slane %v8030_v57, 9  ;;  %v8150_v25 = vrot.slane %v14531_v38, 5 }
 0x4ad   : > { %8327 = vrot.lane.b32.xlu0 %v8302_v1, %s10849_s29  ;;  %v8153_v42 = vrot.slane %v14539_v26, 5  ;;  %v6955_v62 = vor.u32 %v6954_v3, %v6950_v58  ;;  %v10405_v4 = vrot.slane %v7115_v54, 9  ;;  %v7235_v6 = vrot.slane %v14549_v13, 5 }
 0x4ae   : > { %v6171_v50 = vadd.f32 %v14597_v30, %v6135_v37  ;;  %v6951_v2 = vsel %vm11523_vm4, %v6946_v35, %v6950_v58  ;;  %v8151_v38 = vsel %vm11507_vm7, %v10485_v14, %v8150_v25  ;;  %v8152_v26 = vrot.slane %v8150_v25, 4 }
 0x4af   : > { %v7238_v12 = vrot.slane %v14561_v60, 5  ;;  %v6956_v16 = vrot.slane %v6955_v62, 4  ;;  %v7364_v55 = vunpack.c.l.b16 %v6951_v2  ;;  %v10607_v43 = vrot.slane %v9206_v28, 9  ;;  %v8806_v60 = vld [vmem:[#allocation3 + $0x8c] sm:$0x1] }
 0x4b0   : > { %v6203_v52 = vmax.f32 %v6171_v50, 0.0  ;;  %v8154_v47 = vsel %vm11507_vm7, %v8152_v26, %v8153_v42  ;;  %v7236_v13 = vsel %vm11507_vm7, %v10405_v4, %v7235_v6  ;;  %v7237_v8 = vrot.slane %v7235_v6, 4 }
 0x4b1   : > { %v9326_v41 = vrot.slane %v14601_v24, 5  ;;  %v6961_v15 = vsel %vm11523_vm4, %v6956_v16, %v6960_v63  ;;  %v8359_v46 = vunpack.c.l.b16 %v8151_v38  ;;  %v8360_v49 = vunpack.c.l.b16 %v8154_v47  ;;  %v6653_v3 = vld [vmem:[#allocation3 + $0xa8] sm:$0xf] }
 0x4b2   : > { %v6235_v0 = vpack.c.bf16 %v6203_v52, %v6203_v52  ;;  %v7365_v27 = vunpack.c.l.b16 %v6961_v15  ;;  %v7239_v22 = vsel %vm11507_vm7, %v7237_v8, %v7238_v12  ;;  %v7444_v58 = vunpack.c.l.b16 %v7236_v13  ;;  %v14634_v38 = vld [vmem:[#allocation3 + $0x88] sm:$0xf] }
 0x4b3   : > { %v9327_v32 = vsel %vm11507_vm7, %v10607_v43, %v9326_v41  ;;  %v9328_v33 = vrot.slane %v9326_v41, 4  ;;  %v8382_v18 = vpack.c.b16 %v8360_v49, %v8359_v46  ;;  %v7445_v23 = vunpack.c.l.b16 %v7239_v22  ;;  %v14639_v43 = vld [vmem:[#allocation3 + $0x8c] sm:$0x1]  ;;  %v6694_v49 = vld [vmem:[#allocation3 + $0x78] sm:$0xf] }
 0x4b4   : > { %v6463_v20 = vshrl.u32 %v6235_v0, 16  ;;  %v7387_v17 = vpack.c.b16 %v7365_v27, %v7364_v55  ;;  %v6466_v44 = vshll.u32 %v6235_v0, 16  ;;  %v9329_v48 = vrot.slane %v8806_v60, 5  ;;  %v5018_v55 = vpop.f32.mrf.mxu3 }
 0x4b5   : > { %v612_v29 = vsel %vm13435_vm3, 0, %v611_v10  ;;  %8407 = vrot.lane.b32.xlu1 %v8382_v18, %s10851_s19  ;;  %v7467_v1 = vpack.c.b16 %v7445_v23, %v7444_v58  ;;  %v9535_v11 = vunpack.c.l.b16 %v9327_v32  ;;  %v6100_v54 = vadd.f32 %v6060_v31, %v14482_v21  ;;  %v7609_v21 = vld [vmem:[#allocation3 + $0x84] sm:$0xf] }
 0x4b6   : > { %v14621_v57 = vrot.slane %v6463_v20, 7  ;;  %613 = vst [vmem:[#allocation3 + $0xb0] sm:$0x1] %v612_v29  ;;  %7412 = vrot.lane.b32.xlu2 %v7387_v17, %s10849_s29  ;;  %v9330_v63 = vsel %vm11507_vm7, %v9328_v33, %v9329_v48  ;;  %v9030_v37 = vshrl.u32 %v8783_v61, 16  ;;  %v9033_v35 = vshll.u32 %v8783_v61, 16 }
 0x4b7   : > { %v9039_v14 = vshll.u32 %v14601_v24, 16  ;;  %7492 = vrot.lane.b32.xlu0 %v7467_v1, %s10851_s19  ;;  %v9536_v28 = vunpack.c.l.b16 %v9330_v63  ;;  %v6136_v62 = vmul.f32 %v14585_v45, %v6100_v54  ;;  %v9043_v2 = vshrl.u32 %v14601_v24, 16  ;;  %v14647_v1 = vld [vmem:[#allocation3 + $0x7c] sm:$0xf] }
 0x4b8   : > { %v6468_v25 = vor.u32 %v6466_v44, %v14621_v57  ;;  %v6469_v42 = vrot.slane %v14621_v57, 4  ;;  %v9032_v50 = vrot.slane %v9030_v37, 4  ;;  %v9035_v4 = vrot.slane %v9033_v35, 5 }
 0x4b9   : > { %v9041_v6 = vrot.slane %v9039_v14, 5  ;;  %v9558_v12 = vpack.c.b16 %v9536_v28, %v9535_v11  ;;  %v6172_v16 = vadd.f32 %v14597_v30, %v6136_v62  ;;  %v9049_v52 = vshll.u32 %v8806_v60, 16  ;;  %v14649_v11 = vld [vmem:[#allocation3 + $0x80] sm:$0x1] }
 0x4ba   : > { %v6654_v26 = vsel %vm11408_vm13, %v6468_v25, %v6653_v3  ;;  %v9036_v47 = vor.u32 %v9035_v4, %v9032_v50  ;;  %v9045_v13 = vrot.slane %v9043_v2, 4  ;;  %v7878_v8 = vshrl.u32 %v7609_v21, 16 }
 0x4bb   : > { %6655 = vst [vmem:[#allocation3 + $0xa8] sm:$0xf] %v6654_v26  ;;  %v7881_v41 = vshll.u32 %v7609_v21, 16  ;;  %v6204_v15 = vmax.f32 %v6172_v16, 0.0  ;;  %v9051_v0 = vrot.slane %v9049_v52, 5  ;;  %v7887_v24 = vshll.u32 %v14634_v38, 16 }
 0x4bc   : > { %v7891_v46 = vshrl.u32 %v14634_v38, 16  ;;  %v9037_v10 = vrot.slane %v9036_v47, 4  ;;  %v9046_v27 = vor.u32 %v9045_v13, %v9041_v6  ;;  %v7880_v22 = vrot.slane %v7878_v8, 4  ;;  %v559_v52 = vld [vmem:[#allocation3 + $0xb4] sm:$0x1]  ;;  %v6063_v47 = vpop.f32.mrf.mxu2  ;;  %v5020_v13 = vpop.f32.mrf.mxu3 }
 0x4bd   : > { %v7883_v32 = vrot.slane %v7881_v41, 5  ;;  %v6236_v33 = vpack.c.bf16 %v6204_v15, %v6204_v15  ;;  %v7889_v60 = vrot.slane %v7887_v24, 5  ;;  %v7897_v20 = vshll.u32 %v14639_v43, 16  ;;  %v6657_v62 = vld [vmem:[#allocation3 + $0xb0] sm:$0x1] }
 0x4be   : > { %v7893_v31 = vrot.slane %v7891_v46, 4  ;;  %9583 = vrot.lane.b32.xlu2 %v9558_v12, %s10851_s19  ;;  %v9042_v18 = vsel %vm11523_vm4, %v9037_v10, %v9041_v6  ;;  %v9047_v58 = vrot.slane %v9046_v27, 4  ;;  %v6963_v61 = vshrl.u32 %v6694_v49, 16  ;;  %v8031_v24 = vld [vmem:[#allocation3 + $0x84] sm:$0xe] }
 0x4bf   : > { %v7884_v23 = vor.u32 %v7883_v32, %v7880_v22  ;;  %v6471_v17 = vshrl.u32 %v6236_v33, 16  ;;  %v6474_v44 = vshll.u32 %v6236_v33, 16  ;;  %v9455_v48 = vunpack.c.l.b16 %v9042_v18  ;;  %v7116_v22 = vld [vmem:[#allocation3 + $0x78] sm:$0xe] }
 0x4c0   : > { %v7894_v29 = vor.u32 %v7893_v31, %v7889_v60  ;;  %v9052_v54 = vsel %vm11523_vm4, %v9047_v58, %v9051_v0  ;;  %v7899_v63 = vrot.slane %v7897_v20, 5  ;;  %v6965_v37 = vrot.slane %v6963_v61, 4 }
 0x4c1   : > { %v7885_v3 = vrot.slane %v7884_v23, 4  ;;  %v6473_v35 = vrot.slane %v6471_v17, 7  ;;  %v9456_v14 = vunpack.c.l.b16 %v9052_v54  ;;  %v6966_v28 = vshll.u32 %v6694_v49, 16 }
 0x4c2   : > { %v7895_v25 = vrot.slane %v7894_v29, 4  ;;  %v6972_v50 = vshll.u32 %v14647_v1, 16  ;;  %v6976_v4 = vshrl.u32 %v14647_v1, 16  ;;  %v6982_v6 = vshll.u32 %v14649_v11, 16 }
 0x4c3   : > { %v7890_v21 = vsel %vm11523_vm4, %v7885_v3, %v7889_v60  ;;  %v6476_v2 = vor.u32 %v6474_v44, %v6473_v35  ;;  %v6478_v26 = vrot.slane %v6473_v35, 4  ;;  %v9478_v12 = vpack.c.b16 %v9456_v14, %v9455_v48  ;;  %v9494_v3 = vpop.permute.xlu1 %9493  ;;  %v10798_v14 = vld [vmem:[#allocation3 + $0x48] sm:$0xff] }
 0x4c4   : > { %v7900_v16 = vsel %vm11523_vm4, %v7895_v25, %v7899_v63  ;;  %v8281_v8 = vunpack.c.l.b16 %v7890_v21  ;;  %v6968_v15 = vrot.slane %v6966_v28, 5  ;;  %v6974_v0 = vrot.slane %v6972_v50, 5  ;;  %v8320_v63 = vpop.permute.xlu0 %8319  ;;  %v10782_v25 = vld [vmem:[#allocation3 + $0x48] sm:$0xff]  ;;  %v14691_v28 = vld [vmem:[#allocation3 + $0x94] sm:$0xf] }
 0x4c5   : > { %v8282_v41 = vunpack.c.l.b16 %v7900_v16  ;;  %v6477_v46 = vsel %vm11150_vm5, %v6469_v42, %v6476_v2  ;;  %v6658_v49 = vsel %vm11325_vm10, %v6478_v26, %v6657_v62  ;;  %v14667_v10 = vadd.f32 %v5018_v55, %v13412_v39  ;;  %9503 = vrot.lane.b32.xlu1 %v9478_v12, %s10849_s29 }
 0x4c6   : > { %v6978_v27 = vrot.slane %v6976_v4, 4  ;;  %6656 = vst.msk [vmem:[#allocation3 + $0xac] sm:$0xf] %vm503_vm12, %v6477_v46  ;;  %v6969_v33 = vor.u32 %v6968_v15, %v6965_v37  ;;  %v560_v57 = vsel %vm11325_vm10, 0, %v559_v52  ;;  %v6101_v60 = vadd.f32 %v6063_v47, %v14577_v19  ;;  %v9207_v4 = vld [vmem:[#allocation3 + $0x90] sm:$0xe]  ;;  %v6065_v47 = vpop.f32.mrf.mxu2  ;;  %v8684_v46 = vpop.f32.mrf.mxu0 }
 0x4c7   : > { %v8303_v32 = vpack.c.b16 %v8282_v41, %v8281_v8  ;;  %6659 = vst [vmem:[#allocation3 + $0xb0] sm:$0x1] %v6658_v49  ;;  %v6984_v31 = vrot.slane %v6982_v6, 5  ;;  %v10486_v20 = vrot.slane %v8031_v24, 9  ;;  %v8157_v39 = vrot.slane %v14634_v38, 5  ;;  %v8555_v8 = vpop.f32.mrf.mxu3 }
 0x4c8   : > { %v6979_v42 = vor.u32 %v6978_v27, %v6974_v0  ;;  %v6970_v55 = vrot.slane %v6969_v33, 4  ;;  %561 = vst [vmem:[#allocation3 + $0xb4] sm:$0x1] %v560_v57  ;;  %v6137_v18 = vmul.f32 %v14585_v45, %v6101_v60  ;;  %v8160_v58 = vrot.slane %v14639_v43, 5  ;;  %v614_v6 = vld [vmem:[#allocation3 + $0xbc] sm:$0x1] }
 0x4c9   : > { %8329 = vrot.lane.b32.xlu0 %v8303_v32, %s10849_s29  ;;  %v10406_v23 = vrot.slane %v7116_v22, 9  ;;  %v8158_v17 = vsel %vm11507_vm7, %v10486_v20, %v8157_v39  ;;  %v8159_v19 = vrot.slane %v8157_v39, 4  ;;  %v7242_v44 = vrot.slane %v14647_v1, 5  ;;  %v14700_v52 = vld [vmem:[#allocation3 + $0x98] sm:$0x1] }
 0x4ca   : > { %v6980_v61 = vrot.slane %v6979_v42, 4  ;;  %v6975_v48 = vsel %vm11523_vm4, %v6970_v55, %v6974_v0  ;;  %v6173_v38 = vadd.f32 %v14597_v30, %v6137_v18  ;;  %v8361_v29 = vunpack.c.l.b16 %v8158_v17  ;;  %v8785_v60 = vld [vmem:[#allocation3 + $0x90] sm:$0xf]  ;;  %v14716_v55 = vld [vmem:[%s15348_s8] ss:$0 sm:$0xff] }
 0x4cb   : > { %v7245_v54 = vrot.slane %v14649_v11, 5  ;;  %v7366_v37 = vunpack.c.l.b16 %v6975_v48  ;;  %v8161_v35 = vsel %vm11507_vm7, %v8159_v19, %v8160_v58  ;;  %v7243_v1 = vsel %vm11507_vm7, %v10406_v23, %v7242_v44  ;;  %v14726_v17 = vld [vmem:[%s15349_s9] ss:$0 sm:$0xff] }
 0x4cc   : > { %v6985_v43 = vsel %vm11523_vm4, %v6980_v61, %v6984_v31  ;;  %v6205_v21 = vmax.f32 %v6173_v38, 0.0  ;;  %v8362_v50 = vunpack.c.l.b16 %v8161_v35  ;;  %v7244_v11 = vrot.slane %v7242_v44, 4  ;;  %v9729_v31 = vpop.f32.mrf.mxu1 }
 0x4cd   : > { %v7367_v62 = vunpack.c.l.b16 %v6985_v43  ;;  %v14694_v2 = vadd.f32 %v5020_v13, %v13465_v9  ;;  %v7446_v26 = vunpack.c.l.b16 %v7243_v1  ;;  %v9611_v12 = vsel %vm7506_vm11, %v10798_v14, %v9494_v3  ;;  %v7611_v43 = vld [vmem:[#allocation3 + $0x90] sm:$0xf] }
 0x4ce   : > { %v14698_v16 = vsel %vm7506_vm11, %v10782_v25, %v8320_v63  ;;  %v6237_v15 = vpack.c.bf16 %v6205_v21, %v6205_v21  ;;  %v8383_v0 = vpack.c.b16 %v8362_v50, %v8361_v29  ;;  %v7246_v24 = vsel %vm11507_vm7, %v7244_v11, %v7245_v54  ;;  %v14737_v25 = vld [vmem:[#allocation3 + $0x94] sm:$0xf] }
 0x4cf   : > { %v7388_v41 = vpack.c.b16 %v7367_v62, %v7366_v37  ;;  %v7447_v49 = vunpack.c.l.b16 %v7246_v24  ;;  %v10608_v9 = vrot.slane %v9207_v4, 9  ;;  %v9333_v13 = vrot.slane %v14691_v28, 5  ;;  %v6660_v19 = vld [vmem:[#allocation3 + $0xb4] sm:$0xf] }
 0x4d0   : > { %v615_v27 = vsel %vm13435_vm3, 0, %v614_v6  ;;  %v6480_v22 = vshrl.u32 %v6237_v15, 16  ;;  %8409 = vrot.lane.b32.xlu1 %v8383_v0, %s10851_s19  ;;  %v9336_v32 = vrot.slane %v14700_v52, 5  ;;  %v6102_v33 = vadd.f32 %v6065_v47, %v14580_v59 }
 0x4d1   : > { %7414 = vrot.lane.b32.xlu2 %v7388_v41, %s10849_s29  ;;  %616 = vst [vmem:[#allocation3 + $0xbc] sm:$0x1] %v615_v27  ;;  %v8685_v57 = vadd.f32 %v8684_v46, %v8555_v8  ;;  %v7468_v42 = vpack.c.b16 %v7447_v49, %v7446_v26  ;;  %v9334_v20 = vsel %vm11507_vm7, %v10608_v9, %v9333_v13  ;;  %v9335_v39 = vrot.slane %v9333_v13, 4  ;;  %v14752_v46 = vld [vmem:[#allocation3 + $0x98] sm:$0x1] }
 0x4d2   : > { %v9654_v18 = vsel %vm1125_vm1, %v9611_v12, %v14537_v36  ;;  %v14720_v58 = vrot.slane %v6480_v22, 7  ;;  %v6483_v23 = vshll.u32 %v6237_v15, 16  ;;  %v6138_v59 = vmul.f32 %v14585_v45, %v6102_v33  ;;  %v8400_v22 = vpop.permute.xlu1 %8399 }
 0x4d3   : > { %v9809_v61 = vadd.f32 %v9729_v31, %v8685_v57  ;;  %10688 = vmatmul.msk.bf16.gmra.mxu1 %vm8509_vm14, %v9654_v18  ;;  %7494 = vrot.lane.b32.xlu0 %v7468_v42, %s10851_s19  ;;  %v9337_v36 = vsel %vm11507_vm7, %v9335_v39, %v9336_v32  ;;  %v9054_v44 = vshrl.u32 %v8785_v60, 16  ;;  %v9057_v48 = vshll.u32 %v8785_v60, 16  ;;  %v7485_v32 = vpop.permute.xlu0 %7484 }
 0x4d4   : > { %v9063_v38 = vshll.u32 %v14691_v28, 16  ;;  %v6485_v29 = vor.u32 %v6483_v23, %v14720_v58  ;;  %v9537_v54 = vunpack.c.l.b16 %v9334_v20  ;;  %v9538_v3 = vunpack.c.l.b16 %v9337_v36 }
 0x4d5   : > { %v6174_v63 = vadd.f32 %v14597_v30, %v6138_v59  ;;  %v9845_v37 = vmul.f32 %v14716_v55, %v9809_v61  ;;  %v9056_v35 = vrot.slane %v9054_v44, 4  ;;  %v9059_v1 = vrot.slane %v9057_v48, 5  ;;  %v14764_v44 = vld [vmem:[#allocation3 + $0x88] sm:$0xf] }
 0x4d6   : > { %v9065_v14 = vrot.slane %v9063_v38, 5  ;;  %v6661_v62 = vsel %vm11408_vm13, %v6485_v29, %v6660_v19  ;;  %v9559_v21 = vpack.c.b16 %v9538_v3, %v9537_v54  ;;  %v9067_v11 = vshrl.u32 %v14691_v28, 16  ;;  %v14770_v3 = vpop.permute.xlu2 %9575 }
 0x4d7   : > { %v6206_v50 = vmax.f32 %v6174_v63, 0.0  ;;  %6662 = vst [vmem:[#allocation3 + $0xb4] sm:$0xf] %v6661_v62  ;;  %v9881_v4 = vadd.f32 %v14726_v17, %v9845_v37  ;;  %v9060_v6 = vor.u32 %v9059_v1, %v9056_v35  ;;  %v9073_v26 = vshll.u32 %v14700_v52, 16 }
 0x4d8   : > { %v7902_v12 = vshrl.u32 %v7611_v43, 16  ;;  %v9069_v8 = vrot.slane %v9067_v11, 4  ;;  %v7905_v41 = vshll.u32 %v7611_v43, 16  ;;  %v7911_v28 = vshll.u32 %v14737_v25, 16  ;;  %v6664_v23 = vld [vmem:[#allocation3 + $0xbc] sm:$0x1]  ;;  %v8557_v11 = vpop.f32.mrf.mxu3 }
 0x4d9   : > { %9585 = vrot.lane.b32.xlu2 %v9559_v21, %s10851_s19  ;;  %v6238_v47 = vpack.c.bf16 %v6206_v50, %v6206_v50  ;;  %v6486_v15 = vrot.slane %v14720_v58, 4  ;;  %v9913_v0 = vmax.f32 %v9881_v4, 0.0  ;;  %v9061_v24 = vrot.slane %v9060_v6, 4  ;;  %v6696_v58 = vld [vmem:[#allocation3 + $0x84] sm:$0xf]  ;;  %v6068_v50 = vpop.f32.mrf.mxu2 }
 0x4da   : > { %v7904_v52 = vrot.slane %v7902_v12, 4  ;;  %v9070_v9 = vor.u32 %v9069_v8, %v9065_v14  ;;  %v9075_v13 = vrot.slane %v9073_v26, 5  ;;  %v7907_v27 = vrot.slane %v7905_v41, 5  ;;  %v562_v21 = vld [vmem:[#allocation3 + $0xc0] sm:$0x1]  ;;  %v8686_v8 = vpop.f32.mrf.mxu0 }
 0x4db   : > { %v6488_v49 = vshrl.u32 %v6238_v47, 16  ;;  %v6491_v33 = vshll.u32 %v6238_v47, 16  ;;  %9945 = vst.msk [vmem:[%s14747_s17] sm:$0xff] %vm7506_vm11, %v9913_v0  ;;  %v9066_v57 = vsel %vm11523_vm4, %v9061_v24, %v9065_v14  ;;  %v7913_v60 = vrot.slane %v7911_v28, 5  ;;  %v8032_v47 = vld [vmem:[#allocation3 + $0x90] sm:$0xe] }
 0x4dc   : > { %v7915_v42 = vshrl.u32 %v14737_v25, 16  ;;  %v9071_v20 = vrot.slane %v9070_v9, 4  ;;  %v7908_v39 = vor.u32 %v7907_v27, %v7904_v52  ;;  %v7921_v18 = vshll.u32 %v14752_v46, 16 }
 0x4dd   : > { %v6490_v31 = vrot.slane %v6488_v49, 7  ;;  %v9457_v59 = vunpack.c.l.b16 %v9066_v57  ;;  %v8480_v19 = vsel %vm1125_vm1, %v14698_v16, %v8400_v22  ;;  %v7566_v36 = vsel %vm1125_vm1, %v14589_v7, %v7485_v32  ;;  %v14772_v16 = vld [vmem:[#allocation3 + $0x8c] sm:$0x1]  ;;  %v9731_v22 = vpop.f32.mrf.mxu1  ;;  %v7117_v57 = vld [vmem:[#allocation3 + $0x84] sm:$0xe] }
 0x4de   : > { %v7917_v61 = vrot.slane %v7915_v42, 4  ;;  %v9076_v29 = vsel %vm11523_vm4, %v9071_v20, %v9075_v13  ;;  %v7909_v54 = vrot.slane %v7908_v39, 4  ;;  %10567 = vmatmul.msk.bf16.gmra.mxu3 %vm8509_vm14, %v8480_v19  ;;  %10587 = vmatmul.msk.bf16.gmra.mxu0 %vm8509_vm14, %v7566_v36  ;;  %v6987_v37 = vshrl.u32 %v6696_v58, 16 }
 0x4df   : > { %v6493_v48 = vor.u32 %v6491_v33, %v6490_v31  ;;  %v6495_v38 = vrot.slane %v6490_v31, 4  ;;  %v9458_v63 = vunpack.c.l.b16 %v9076_v29  ;;  %v6990_v7 = vshll.u32 %v6696_v58, 16 }
 0x4e0   : > { %v7918_v43 = vor.u32 %v7917_v61, %v7913_v60  ;;  %v7923_v14 = vrot.slane %v7921_v18, 5  ;;  %v6996_v62 = vshll.u32 %v14764_v44, 16  ;;  %v7914_v6 = vsel %vm11523_vm4, %v7909_v54, %v7913_v60 }
 0x4e1   : > { %v6494_v35 = vsel %vm11150_vm5, %v6486_v15, %v6493_v48  ;;  %v6665_v1 = vsel %vm11325_vm10, %v6495_v38, %v6664_v23  ;;  %v9479_v4 = vpack.c.b16 %v9458_v63, %v9457_v59  ;;  %v6989_v12 = vrot.slane %v6987_v37, 4  ;;  %v14801_v37 = vld [vmem:[#allocation3 + $0xa0] sm:$0xf] }
 0x4e2   : > { %6663 = vst.msk [vmem:[#allocation3 + $0xb8] sm:$0xf] %vm503_vm12, %v6494_v35  ;;  %v7919_v26 = vrot.slane %v7918_v43, 4  ;;  %v6992_v41 = vrot.slane %v6990_v7, 5  ;;  %v6998_v28 = vrot.slane %v6996_v62, 5  ;;  %v7000_v15 = vshrl.u32 %v14764_v44, 16  ;;  %v7407_v35 = vpop.permute.xlu2 %7406 }
 0x4e3   : > { %6666 = vst [vmem:[#allocation3 + $0xbc] sm:$0x1] %v6665_v1  ;;  %v7006_v0 = vshll.u32 %v14772_v16, 16  ;;  %9505 = vrot.lane.b32.xlu1 %v9479_v4, %s10849_s29  ;;  %v563_v52 = vsel %vm11325_vm10, 0, %v562_v21  ;;  %v6103_v49 = vadd.f32 %v6068_v50, %v14667_v10  ;;  %v8687_v9 = vadd.f32 %v8686_v8, %v8557_v11  ;;  %v9208_v7 = vld [vmem:[#allocation3 + $0x9c] sm:$0xe] }
 0x4e4   : > { %v7924_v24 = vsel %vm11523_vm4, %v7919_v26, %v7923_v14  ;;  %v8283_v13 = vunpack.c.l.b16 %v7914_v6  ;;  %v6993_v32 = vor.u32 %v6992_v41, %v6989_v12  ;;  %v7002_v33 = vrot.slane %v7000_v15, 4  ;;  %564 = vst [vmem:[#allocation3 + $0xc0] sm:$0x1] %v563_v52  ;;  %v10766_v4 = vld [vmem:[#allocation3 + $0x48] sm:$0xff]  ;;  %v8560_v52 = vpop.f32.mrf.mxu3 }
 0x4e5   : > { %v8284_v27 = vunpack.c.l.b16 %v7924_v24  ;;  %v7008_v60 = vrot.slane %v7006_v0, 5  ;;  %v6139_v42 = vmul.f32 %v14585_v45, %v6103_v49  ;;  %v9810_v31 = vadd.f32 %v9731_v22, %v8687_v9  ;;  %v617_v0 = vld [vmem:[#allocation3 + $0xc8] sm:$0x1]  ;;  %v6070_v24 = vpop.f32.mrf.mxu2  ;;  %v8787_v49 = vld [vmem:[#allocation3 + $0x9c] sm:$0xf] }
 0x4e6   : > { %v10487_v20 = vrot.slane %v8032_v47, 9  ;;  %v6994_v18 = vrot.slane %v6993_v32, 4  ;;  %v7003_v58 = vor.u32 %v7002_v33, %v6998_v28  ;;  %v8164_v23 = vrot.slane %v14737_v25, 5  ;;  %v14811_v47 = vld [vmem:[#allocation3 + $0xa4] sm:$0x1] }
 0x4e7   : > { %v8304_v39 = vpack.c.b16 %v8284_v27, %v8283_v13  ;;  %v6175_v10 = vadd.f32 %v14597_v30, %v6139_v42  ;;  %v9846_v59 = vmul.f32 %v14716_v55, %v9810_v31  ;;  %v8167_v61 = vrot.slane %v14752_v46, 5 }
 0x4e8   : > { %v10407_v19 = vrot.slane %v7117_v57, 9  ;;  %v6999_v36 = vsel %vm11523_vm4, %v6994_v18, %v6998_v28  ;;  %v7004_v48 = vrot.slane %v7003_v58, 4  ;;  %v8165_v38 = vsel %vm11507_vm7, %v10487_v20, %v8164_v23 }
 0x4e9   : > { %8331 = vrot.lane.b32.xlu0 %v8304_v39, %s10849_s29  ;;  %v8166_v29 = vrot.slane %v8164_v23, 4  ;;  %v7368_v54 = vunpack.c.l.b16 %v6999_v36  ;;  %v6207_v63 = vmax.f32 %v6175_v10, 0.0  ;;  %v9882_v25 = vadd.f32 %v14726_v17, %v9846_v59 }
 0x4ea   : > { %v8363_v43 = vunpack.c.l.b16 %v8165_v38  ;;  %v7009_v46 = vsel %vm11523_vm4, %v7004_v48, %v7008_v60  ;;  %v7249_v14 = vrot.slane %v14764_v44, 5  ;;  %v7252_v62 = vrot.slane %v14772_v16, 5  ;;  %v8689_v60 = vpop.f32.mrf.mxu0 }
 0x4eb   : > { %v8168_v1 = vsel %vm11507_vm7, %v8166_v29, %v8167_v61  ;;  %v7369_v21 = vunpack.c.l.b16 %v7009_v46  ;;  %v6239_v50 = vpack.c.bf16 %v6207_v63, %v6207_v63  ;;  %v9914_v11 = vmax.f32 %v9882_v25, 0.0  ;;  %v6667_v31 = vld [vmem:[#allocation3 + $0xc0] sm:$0xf] }
 0x4ec   : > { %v8364_v6 = vunpack.c.l.b16 %v8168_v1  ;;  %v7250_v26 = vsel %vm11507_vm7, %v10407_v19, %v7249_v14  ;;  %v7251_v12 = vrot.slane %v7249_v14, 4  ;;  %v10609_v8 = vrot.slane %v9208_v7, 9  ;;  %v9734_v19 = vpop.f32.mrf.mxu1  ;;  %v14843_v1 = vld [vmem:[#allocation3 + $0xa0] sm:$0xf] }
 0x4ed   : > { %v9340_v41 = vrot.slane %v14801_v37, 5  ;;  %v7389_v28 = vpack.c.b16 %v7369_v21, %v7368_v54  ;;  %v6497_v15 = vshrl.u32 %v6239_v50, 16  ;;  %9946 = vst.msk [vmem:[%s14747_s17 + $0x8] sm:$0xff] %vm7506_vm11, %v9914_v11  ;;  %v14817_v44 = vsel %vm7506_vm11, %v10766_v4, %v7407_v35  ;;  %v7613_v54 = vld [vmem:[#allocation3 + $0x9c] sm:$0xf] }
 0x4ee   : > { %v8384_v16 = vpack.c.b16 %v8364_v6, %v8363_v43  ;;  %v6500_v9 = vshll.u32 %v6239_v50, 16  ;;  %v7253_v13 = vsel %vm11507_vm7, %v7251_v12, %v7252_v62  ;;  %v7448_v33 = vunpack.c.l.b16 %v7250_v26  ;;  %v14848_v26 = vld [vmem:[#allocation3 + $0xa4] sm:$0x1] }
 0x4ef   : > { %v9341_v27 = vsel %vm11507_vm7, %v10609_v8, %v9340_v41  ;;  %v9342_v22 = vrot.slane %v9340_v41, 4  ;;  %7416 = vrot.lane.b32.xlu2 %v7389_v28, %s10849_s29  ;;  %v14824_v32 = vrot.slane %v6497_v15, 7  ;;  %v7449_v57 = vunpack.c.l.b16 %v7253_v13 }
 0x4f0   : > { %8411 = vrot.lane.b32.xlu1 %v8384_v16, %s10851_s19  ;;  %v9343_v42 = vrot.slane %v14811_v47, 5  ;;  %v618_v20 = vsel %vm13435_vm3, 0, %v617_v0  ;;  %v6104_v39 = vadd.f32 %v6070_v24, %v14694_v2  ;;  %v8690_v18 = vadd.f32 %v8689_v60, %v8560_v52  ;;  %v6698_v16 = vld [vmem:[#allocation3 + $0x90] sm:$0xf] }
 0x4f1   : > { %v9078_v58 = vshrl.u32 %v8787_v49, 16  ;;  %v6502_v23 = vor.u32 %v6500_v9, %v14824_v32  ;;  %v7469_v10 = vpack.c.b16 %v7449_v57, %v7448_v33  ;;  %v9539_v61 = vunpack.c.l.b16 %v9341_v27  ;;  %619 = vst [vmem:[#allocation3 + $0xc8] sm:$0x1] %v618_v20 }
 0x4f2   : > { %v9344_v59 = vsel %vm11507_vm7, %v9342_v22, %v9343_v42  ;;  %v6140_v48 = vmul.f32 %v14585_v45, %v6104_v39  ;;  %v9811_v38 = vadd.f32 %v9734_v19, %v8690_v18  ;;  %v9081_v63 = vshll.u32 %v8787_v49, 16 }
 0x4f3   : > { %v9540_v36 = vunpack.c.l.b16 %v9344_v59  ;;  %v9080_v29 = vrot.slane %v9078_v58, 4  ;;  %v6668_v2 = vsel %vm11408_vm13, %v6502_v23, %v6667_v31  ;;  %7496 = vrot.lane.b32.xlu0 %v7469_v10, %s10851_s19  ;;  %v9087_v25 = vshll.u32 %v14801_v37, 16  ;;  %v14861_v58 = vld [vmem:[#allocation3 + $0x98] sm:$0x1] }
 0x4f4   : > { %v9091_v43 = vshrl.u32 %v14801_v37, 16  ;;  %6669 = vst [vmem:[#allocation3 + $0xc0] sm:$0xf] %v6668_v2  ;;  %v6176_v46 = vadd.f32 %v14597_v30, %v6140_v48  ;;  %v9847_v35 = vmul.f32 %v14716_v55, %v9811_v38  ;;  %v9097_v45 = vshll.u32 %v14811_v47, 16 }
 0x4f5   : > { %v9560_v7 = vpack.c.b16 %v9540_v36, %v9539_v61  ;;  %v9083_v14 = vrot.slane %v9081_v63, 5  ;;  %v9089_v5 = vrot.slane %v9087_v25, 5  ;;  %v7926_v21 = vshrl.u32 %v7613_v54, 16 }
 0x4f6   : > { %v9093_v62 = vrot.slane %v9091_v43, 4  ;;  %v6503_v50 = vrot.slane %v14824_v32, 4  ;;  %v6208_v11 = vmax.f32 %v6176_v46, 0.0  ;;  %v9883_v4 = vadd.f32 %v14726_v17, %v9847_v35  ;;  %v14855_v32 = vld [vmem:[#allocation3 + $0x94] sm:$0xf] }
 0x4f7   : > { %v7929_v37 = vshll.u32 %v7613_v54, 16  ;;  %9587 = vrot.lane.b32.xlu2 %v9560_v7, %s10851_s19  ;;  %v9084_v30 = vor.u32 %v9083_v14, %v9080_v29  ;;  %v7928_v12 = vrot.slane %v7926_v21, 4  ;;  %v7935_v47 = vshll.u32 %v14843_v1, 16  ;;  %v8562_v54 = vpop.f32.mrf.mxu3  ;;  %v8033_v7 = vld [vmem:[#allocation3 + $0x9c] sm:$0xe] }
 0x4f8   : > { %v9094_v6 = vor.u32 %v9093_v62, %v9089_v5  ;;  %v6240_v8 = vpack.c.bf16 %v6208_v11, %v6208_v11  ;;  %v9915_v41 = vmax.f32 %v9883_v4, 0.0  ;;  %v7939_v15 = vshrl.u32 %v14843_v1, 16  ;;  %v6671_v23 = vld [vmem:[#allocation3 + $0xc8] sm:$0x1] }
 0x4f9   : > { %v7931_v28 = vrot.slane %v7929_v37, 5  ;;  %v9085_v0 = vrot.slane %v9084_v30, 4  ;;  %v9099_v52 = vrot.slane %v9097_v45, 5  ;;  %v7937_v49 = vrot.slane %v7935_v47, 5  ;;  %v8691_v45 = vpop.f32.mrf.mxu0  ;;  %v9736_v30 = vpop.f32.mrf.mxu1 }
 0x4fa   : > { %v9095_v24 = vrot.slane %v9094_v6, 4  ;;  %v6505_v9 = vshrl.u32 %v6240_v8, 16  ;;  %9947 = vst.msk [vmem:[%s14747_s17 + $0x10] sm:$0xff] %vm7506_vm11, %v9915_v41  ;;  %v7941_v27 = vrot.slane %v7939_v15, 4  ;;  %v7945_v22 = vshll.u32 %v14848_v26, 16 }
 0x4fb   : > { %v7932_v13 = vor.u32 %v7931_v28, %v7928_v12  ;;  %v6508_v33 = vshll.u32 %v6240_v8, 16  ;;  %v9090_v57 = vsel %vm11523_vm4, %v9085_v0, %v9089_v5  ;;  %v7011_v42 = vshrl.u32 %v6698_v16, 16 }
 0x4fc   : > { %v9100_v60 = vsel %vm11523_vm4, %v9095_v24, %v9099_v52  ;;  %v6507_v31 = vrot.slane %v6505_v9, 7  ;;  %v9459_v20 = vunpack.c.l.b16 %v9090_v57  ;;  %v7942_v10 = vor.u32 %v7941_v27, %v7937_v49  ;;  %v10799_v57 = vld [vmem:[#allocation3 + $0x54] sm:$0xff] }
 0x4fd   : > { %v9460_v39 = vunpack.c.l.b16 %v9100_v60  ;;  %v7933_v18 = vrot.slane %v7932_v13, 4  ;;  %v7013_v59 = vrot.slane %v7011_v42, 4  ;;  %v7014_v61 = vshll.u32 %v6698_v16, 16 }
 0x4fe   : > { %v7020_v19 = vshll.u32 %v14855_v32, 16  ;;  %v6510_v36 = vor.u32 %v6508_v33, %v6507_v31  ;;  %v6512_v48 = vrot.slane %v6507_v31, 4  ;;  %v7943_v2 = vrot.slane %v7942_v10, 4 }
 0x4ff   : > { %v9480_v38 = vpack.c.b16 %v9460_v39, %v9459_v20  ;;  %v7938_v29 = vsel %vm11523_vm4, %v7933_v18, %v7937_v49  ;;  %v7947_v63 = vrot.slane %v7945_v22, 5  ;;  %v7016_v25 = vrot.slane %v7014_v61, 5  ;;  %v8322_v39 = vpop.permute.xlu0 %8321  ;;  %v9209_v18 = vld [vmem:[#allocation3 + $0xa8] sm:$0xe] }
 0x500   : > { %v7022_v43 = vrot.slane %v7020_v19, 5  ;;  %v6511_v46 = vsel %vm11150_vm5, %v6503_v50, %v6510_v36  ;;  %v6672_v35 = vsel %vm11325_vm10, %v6512_v48, %v6671_v23  ;;  %v7024_v14 = vshrl.u32 %v14855_v32, 16  ;;  %v8565_v19 = vpop.f32.mrf.mxu3  ;;  %v8789_v36 = vld [vmem:[#allocation3 + $0xa8] sm:$0xf] }
 0x501   : > { %9507 = vrot.lane.b32.xlu1 %v9480_v38, %s10849_s29  ;;  %v7030_v5 = vshll.u32 %v14861_v58, 16  ;;  %6670 = vst.msk [vmem:[#allocation3 + $0xc4] sm:$0xf] %vm503_vm12, %v6511_v46  ;;  %v7948_v62 = vsel %vm11523_vm4, %v7943_v2, %v7947_v63  ;;  %v8285_v21 = vunpack.c.l.b16 %v7938_v29  ;;  %v7017_v11 = vor.u32 %v7016_v25, %v7013_v59  ;;  %v8809_v2 = vld [vmem:[#allocation3 + $0xb0] sm:$0x1]  ;;  %v8694_v25 = vpop.f32.mrf.mxu0 }
 0x502   : > { %v8692_v4 = vadd.f32 %v8691_v45, %v8562_v54  ;;  %6673 = vst [vmem:[#allocation3 + $0xc8] sm:$0x1] %v6672_v35  ;;  %v8286_v50 = vunpack.c.l.b16 %v7948_v62  ;;  %v7026_v37 = vrot.slane %v7024_v14, 4  ;;  %v10488_v6 = vrot.slane %v8033_v7, 9 }
 0x503   : > { %v8171_v12 = vrot.slane %v14843_v1, 5  ;;  %v7018_v47 = vrot.slane %v7017_v11, 4  ;;  %v7032_v8 = vrot.slane %v7030_v5, 5  ;;  %v8174_v28 = vrot.slane %v14848_v26, 5  ;;  %v9496_v1 = vpop.permute.xlu1 %9495 }
 0x504   : > { %v9812_v41 = vadd.f32 %v9736_v30, %v8692_v4  ;;  %v8305_v15 = vpack.c.b16 %v8286_v50, %v8285_v21  ;;  %v7027_v16 = vor.u32 %v7026_v37, %v7022_v43  ;;  %v10408_v9 = vrot.slane %v7118_v40, 9  ;;  %v9739_v40 = vpop.f32.mrf.mxu1  ;;  %v7615_v50 = vld [vmem:[#allocation3 + $0xa8] sm:$0xf] }
 0x505   : > { %v8172_v0 = vsel %vm11507_vm7, %v10488_v6, %v8171_v12  ;;  %v8173_v24 = vrot.slane %v8171_v12, 4  ;;  %v7023_v52 = vsel %vm11523_vm4, %v7018_v47, %v7022_v43  ;;  %v7256_v13 = vrot.slane %v14855_v32, 5  ;;  %v8790_v32 = vld [vmem:[#allocation3 + $0xac] sm:$0xf] }
 0x506   : > { %v9848_v49 = vmul.f32 %v14716_v55, %v9812_v41  ;;  %8333 = vrot.lane.b32.xlu0 %v8305_v15, %s10849_s29  ;;  %v7028_v27 = vrot.slane %v7027_v16, 4  ;;  %v8365_v22 = vunpack.c.l.b16 %v8172_v0  ;;  %v7259_v33 = vrot.slane %v14861_v58, 5  ;;  %v10783_v58 = vld [vmem:[#allocation3 + $0x54] sm:$0xff]  ;;  %v14910_v0 = vld [vmem:[#allocation3 + $0xac] sm:$0xf] }
 0x507   : > { %v8175_v26 = vsel %vm11507_vm7, %v8173_v24, %v8174_v28  ;;  %v7257_v31 = vsel %vm11507_vm7, %v10408_v9, %v7256_v13  ;;  %v7258_v20 = vrot.slane %v7256_v13, 4  ;;  %v7370_v10 = vunpack.c.l.b16 %v7023_v52  ;;  %v14912_v13 = vld [vmem:[#allocation3 + $0xb0] sm:$0x1] }
 0x508   : > { %v9884_v60 = vadd.f32 %v14726_v17, %v9848_v49  ;;  %v8366_v42 = vunpack.c.l.b16 %v8175_v26  ;;  %v7033_v23 = vsel %vm11523_vm4, %v7028_v27, %v7032_v8  ;;  %v7450_v59 = vunpack.c.l.b16 %v7257_v31 }
 0x509   : > { %v9614_v61 = vsel %vm7506_vm11, %v10799_v57, %v9496_v1  ;;  %v7371_v48 = vunpack.c.l.b16 %v7033_v23  ;;  %v7260_v54 = vsel %vm11507_vm7, %v7258_v20, %v7259_v33  ;;  %v8441_v43 = vsel %vm7506_vm11, %v10783_v58, %v8322_v39  ;;  %v7487_v39 = vpop.permute.xlu0 %7486 }
 0x50a   : > { %v9916_v38 = vmax.f32 %v9884_v60, 0.0  ;;  %v8385_v29 = vpack.c.b16 %v8366_v42, %v8365_v22  ;;  %v7451_v63 = vunpack.c.l.b16 %v7260_v54  ;;  %v10610_v7 = vrot.slane %v9209_v18, 9 }
 0x50b   : > { %v9347_v46 = vrot.slane %v8790_v32, 5  ;;  %v7390_v35 = vpack.c.b16 %v7371_v48, %v7370_v10  ;;  %v9656_v45 = vsel %vm1125_vm1, %v9614_v61, %v14770_v3  ;;  %v8695_v14 = vadd.f32 %v8694_v25, %v8565_v19  ;;  %v8402_v27 = vpop.permute.xlu1 %8401  ;;  %v14919_v48 = vld [vmem:[#allocation3 + $0xa0] sm:$0xf]  ;;  %v14931_v25 = vpop.permute.xlu2 %9577 }
 0x50c   : > { %9948 = vst.msk [vmem:[%s14747_s17 + $0x18] sm:$0xff] %vm7506_vm11, %v9916_v38  ;;  %8413 = vrot.lane.b32.xlu1 %v8385_v29, %s10851_s19  ;;  %v9102_v5 = vshrl.u32 %v8789_v36, 16  ;;  %v7470_v62 = vpack.c.b16 %v7451_v63, %v7450_v59  ;;  %v9350_v4 = vrot.slane %v8809_v2, 5  ;;  %10689 = vmatmul.msk.bf16.gmra.mxu1 %vm8509_vm14, %v9656_v45  ;;  %v9105_v12 = vshll.u32 %v8789_v36, 16 }
 0x50d   : > { %v9348_v21 = vsel %vm11507_vm7, %v10610_v7, %v9347_v46  ;;  %v9349_v11 = vrot.slane %v9347_v46, 4  ;;  %7418 = vrot.lane.b32.xlu2 %v7390_v35, %s10849_s29  ;;  %v9813_v30 = vadd.f32 %v9739_v40, %v8695_v14  ;;  %v9111_v47 = vshll.u32 %v8790_v32, 16 }
 0x50e   : > { %v9541_v37 = vunpack.c.l.b16 %v9348_v21  ;;  %v9104_v6 = vrot.slane %v9102_v5, 4  ;;  %7498 = vrot.lane.b32.xlu0 %v7470_v62, %s10851_s19  ;;  %v9115_v8 = vshrl.u32 %v8790_v32, 16  ;;  %v9121_v41 = vshll.u32 %v8809_v2, 16  ;;  %v6700_v32 = vld [vmem:[#allocation3 + $0x9c] sm:$0xf]  ;;  %v8567_v21 = vpop.f32.mrf.mxu3 }
 0x50f   : > { %v9351_v3 = vsel %vm11507_vm7, %v9349_v11, %v9350_v4  ;;  %v9849_v15 = vmul.f32 %v14716_v55, %v9813_v30  ;;  %v9107_v16 = vrot.slane %v9105_v12, 5  ;;  %v7950_v24 = vshrl.u32 %v7615_v50, 16  ;;  %v14929_v2 = vld [vmem:[#allocation3 + $0xa4] sm:$0x1]  ;;  %v8696_v30 = vpop.f32.mrf.mxu0 }
 0x510   : > { %v9542_v28 = vunpack.c.l.b16 %v9351_v3  ;;  %v9113_v52 = vrot.slane %v9111_v47, 5  ;;  %v9117_v49 = vrot.slane %v9115_v8, 4  ;;  %v9123_v9 = vrot.slane %v9121_v41, 5 }
 0x511   : > { %v7953_v1 = vshll.u32 %v7615_v50, 16  ;;  %v9885_v22 = vadd.f32 %v14726_v17, %v9849_v15  ;;  %v9108_v33 = vor.u32 %v9107_v16, %v9104_v6  ;;  %v7952_v57 = vrot.slane %v7950_v24, 4  ;;  %v8034_v50 = vld [vmem:[#allocation3 + $0xa8] sm:$0xe]  ;;  %v9741_v16 = vpop.f32.mrf.mxu1 }
 0x512   : > { %v9561_v26 = vpack.c.b16 %v9542_v28, %v9541_v37  ;;  %v9118_v60 = vor.u32 %v9117_v49, %v9113_v52  ;;  %v7959_v31 = vshll.u32 %v14910_v0, 16  ;;  %v7963_v20 = vshrl.u32 %v14910_v0, 16  ;;  %v7119_v49 = vld [vmem:[#allocation3 + $0x9c] sm:$0xe] }
 0x513   : > { %v7955_v42 = vrot.slane %v7953_v1, 5  ;;  %v9917_v18 = vmax.f32 %v9885_v22, 0.0  ;;  %v9109_v23 = vrot.slane %v9108_v33, 4  ;;  %v7969_v10 = vshll.u32 %v14912_v13, 16 }
 0x514   : > { %v8482_v59 = vsel %vm1125_vm1, %v8441_v43, %v8402_v27  ;;  %v9119_v61 = vrot.slane %v9118_v60, 4  ;;  %v7961_v19 = vrot.slane %v7959_v31, 5  ;;  %v7965_v36 = vrot.slane %v7963_v20, 4  ;;  %v14950_v31 = vpop.permute.xlu0 %8323 }
 0x515   : > { %v7956_v58 = vor.u32 %v7955_v42, %v7952_v57  ;;  %10568 = vmatmul.msk.bf16.gmra.mxu3 %vm8509_vm14, %v8482_v59  ;;  %9589 = vrot.lane.b32.xlu2 %v9561_v26, %s10851_s19  ;;  %9949 = vst.msk [vmem:[%s14747_s17 + $0x20] sm:$0xff] %vm7506_vm11, %v9917_v18  ;;  %v9114_v38 = vsel %vm11523_vm4, %v9109_v23, %v9113_v52  ;;  %v7971_v29 = vrot.slane %v7969_v10, 5  ;;  %v7035_v63 = vshrl.u32 %v6700_v32, 16  ;;  %v14948_v42 = vpop.permute.xlu1 %9497  ;;  %v8792_v18 = vld [vmem:[#allocation3 + $0xb8] sm:$0xf] }
 0x516   : > { %v7568_v54 = vsel %vm1125_vm1, %v14817_v44, %v7487_v39  ;;  %v9124_v43 = vsel %vm11523_vm4, %v9119_v61, %v9123_v9  ;;  %v9461_v7 = vunpack.c.l.b16 %v9114_v38  ;;  %v7966_v35 = vor.u32 %v7965_v36, %v7961_v19  ;;  %v9210_v61 = vld [vmem:[#allocation3 + $0xb4] sm:$0xe]  ;;  %v8810_v38 = vld [vmem:[#allocation3 + $0xbc] sm:$0x1] }
 0x517   : > { %v7957_v46 = vrot.slane %v7956_v58, 4  ;;  %10588 = vmatmul.msk.bf16.gmra.mxu0 %vm8509_vm14, %v7568_v54  ;;  %v9462_v45 = vunpack.c.l.b16 %v9124_v43  ;;  %v7037_v14 = vrot.slane %v7035_v63, 4  ;;  %v7038_v5 = vshll.u32 %v6700_v32, 16  ;;  %v7409_v58 = vpop.permute.xlu2 %7408 }
 0x518   : > { %v7044_v62 = vshll.u32 %v14919_v48, 16  ;;  %v7967_v11 = vrot.slane %v7966_v35, 4  ;;  %v7048_v4 = vshrl.u32 %v14919_v48, 16  ;;  %v7054_v40 = vshll.u32 %v14929_v2, 16  ;;  %v8791_v35 = vld [vmem:[#allocation3 + $0xb4] sm:$0xf] }
 0x519   : > { %v7962_v44 = vsel %vm11523_vm4, %v7957_v46, %v7961_v19  ;;  %v9481_v37 = vpack.c.b16 %v9462_v45, %v9461_v7  ;;  %v7040_v6 = vrot.slane %v7038_v5, 5  ;;  %v8697_v41 = vadd.f32 %v8696_v30, %v8567_v21  ;;  %v10767_v30 = vld [vmem:[#allocation3 + $0x54] sm:$0xff] }
 0x51a   : > { %v7046_v12 = vrot.slane %v7044_v62, 5  ;;  %v7972_v3 = vsel %vm11523_vm4, %v7967_v11, %v7971_v29  ;;  %v8287_v47 = vunpack.c.l.b16 %v7962_v44  ;;  %v7050_v8 = vrot.slane %v7048_v4, 4  ;;  %v7617_v11 = vld [vmem:[#allocation3 + $0xb4] sm:$0xf] }
 0x51b   : > { %9509 = vrot.lane.b32.xlu1 %v9481_v37, %s10849_s29  ;;  %v8288_v28 = vunpack.c.l.b16 %v7972_v3  ;;  %v7041_v15 = vor.u32 %v7040_v6, %v7037_v14  ;;  %v10489_v24 = vrot.slane %v8034_v50, 9  ;;  %v8178_v52 = vrot.slane %v14910_v0, 5 }
 0x51c   : > { %v7051_v9 = vor.u32 %v7050_v8, %v7046_v12  ;;  %v7056_v1 = vrot.slane %v7054_v40, 5  ;;  %v9814_v27 = vadd.f32 %v9741_v16, %v8697_v41  ;;  %v8181_v26 = vrot.slane %v14912_v13, 5  ;;  %v14975_v8 = vld [vmem:[#allocation3 + $0xb8] sm:$0xf]  ;;  %v14977_v16 = vld [vmem:[#allocation3 + $0xbc] sm:$0x1] }
 0x51d   : > { %v8306_v22 = vpack.c.b16 %v8288_v28, %v8287_v47  ;;  %v7042_v33 = vrot.slane %v7041_v15, 4  ;;  %v8179_v57 = vsel %vm11507_vm7, %v10489_v24, %v8178_v52  ;;  %v8180_v60 = vrot.slane %v8178_v52, 4  ;;  %v14979_v52 = vpop.permute.xlu1 %8403 }
 0x51e   : > { %v7052_v20 = vrot.slane %v7051_v9, 4  ;;  %v9850_v39 = vmul.f32 %v14716_v55, %v9814_v27  ;;  %v10409_v0 = vrot.slane %v7119_v49, 9  ;;  %v7263_v32 = vrot.slane %v14919_v48, 5  ;;  %v14981_v49 = vpop.permute.xlu0 %7488 }
 0x51f   : > { %8335 = vrot.lane.b32.xlu0 %v8306_v22, %s10849_s29  ;;  %v7047_v13 = vsel %vm11523_vm4, %v7042_v33, %v7046_v12  ;;  %v8182_v23 = vsel %vm11507_vm7, %v8180_v60, %v8181_v26  ;;  %v8367_v10 = vunpack.c.l.b16 %v8179_v57  ;;  %v7266_v59 = vrot.slane %v14929_v2, 5 }
 0x520   : > { %v7057_v55 = vsel %vm11523_vm4, %v7052_v20, %v7056_v1  ;;  %v7372_v19 = vunpack.c.l.b16 %v7047_v13  ;;  %v9886_v36 = vadd.f32 %v14726_v17, %v9850_v39  ;;  %v8368_v48 = vunpack.c.l.b16 %v8182_v23  ;;  %v6702_v20 = vld [vmem:[#allocation3 + $0xa8] sm:$0xf]  ;;  %v14989_v39 = vpop.permute.xlu2 %9579  ;;  %v10800_v23 = vld [vmem:[#allocation3 + $0x60] sm:$0xff] }
 0x521   : > { %v7373_v29 = vunpack.c.l.b16 %v7057_v55  ;;  %v7264_v54 = vsel %vm11507_vm7, %v10409_v0, %v7263_v32  ;;  %v7265_v63 = vrot.slane %v7263_v32, 4  ;;  %v9354_v43 = vrot.slane %v8792_v18, 5 }
 0x522   : > { %v9918_v7 = vmax.f32 %v9886_v36, 0.0  ;;  %v8386_v46 = vpack.c.b16 %v8368_v48, %v8367_v10  ;;  %v10611_v2 = vrot.slane %v9210_v61, 9  ;;  %v9357_v62 = vrot.slane %v8810_v38, 5  ;;  %v14992_v10 = vld [vmem:[#allocation3 + $0xac] sm:$0xf] }
 0x523   : > { %v7391_v45 = vpack.c.b16 %v7373_v29, %v7372_v19  ;;  %v7267_v14 = vsel %vm11507_vm7, %v7265_v63, %v7266_v59  ;;  %v9356_v5 = vrot.slane %v9354_v43, 4  ;;  %v7452_v17 = vunpack.c.l.b16 %v7264_v54 }
 0x524   : > { %9950 = vst.msk [vmem:[%s14747_s17 + $0x28] sm:$0xff] %vm7506_vm11, %v9918_v7  ;;  %8415 = vrot.lane.b32.xlu1 %v8386_v46, %s10851_s19  ;;  %v7453_v21 = vunpack.c.l.b16 %v7267_v14  ;;  %v9355_v44 = vsel %vm11507_vm7, %v10611_v2, %v9354_v43  ;;  %v9126_v40 = vshrl.u32 %v8791_v35, 16  ;;  %v9129_v50 = vshll.u32 %v8791_v35, 16  ;;  %v8570_v7 = vpop.f32.mrf.mxu3 }
 0x525   : > { %7420 = vrot.lane.b32.xlu2 %v7391_v45, %s10849_s29  ;;  %v9358_v4 = vsel %vm11507_vm7, %v9356_v5, %v9357_v62  ;;  %v9135_v37 = vshll.u32 %v8792_v18, 16  ;;  %v9139_v3 = vshrl.u32 %v8792_v18, 16  ;;  %v9145_v47 = vshll.u32 %v8810_v38, 16  ;;  %v6720_v62 = vld [vmem:[#allocation3 + $0xb0] sm:$0x1] }
 0x526   : > { %v7471_v6 = vpack.c.b16 %v7453_v21, %v7452_v17  ;;  %v9544_v12 = vunpack.c.l.b16 %v9358_v4  ;;  %v9128_v41 = vrot.slane %v9126_v40, 4  ;;  %v9131_v28 = vrot.slane %v9129_v50, 5  ;;  %v8699_v21 = vpop.f32.mrf.mxu0  ;;  %v8035_v50 = vld [vmem:[#allocation3 + $0xb4] sm:$0xe] }
 0x527   : > { %v9137_v15 = vrot.slane %v9135_v37, 5  ;;  %v7974_v24 = vshrl.u32 %v7617_v11, 16  ;;  %v14984_v9 = vsel %vm7506_vm11, %v10767_v30, %v7409_v58  ;;  %v9543_v1 = vunpack.c.l.b16 %v9355_v44 }
 0x528   : > { %7500 = vrot.lane.b32.xlu0 %v7471_v6, %s10851_s19  ;;  %v9141_v27 = vrot.slane %v9139_v3, 4  ;;  %v7977_v26 = vshll.u32 %v7617_v11, 16  ;;  %v9132_v22 = vor.u32 %v9131_v28, %v9128_v41  ;;  %v7983_v57 = vshll.u32 %v14975_v8, 16  ;;  %v15012_v41 = vpop.permute.xlu1 %9499  ;;  %v15014_v28 = vpop.permute.xlu0 %8325 }
 0x529   : > { %v7976_v33 = vrot.slane %v7974_v24, 4  ;;  %v7987_v60 = vshrl.u32 %v14975_v8, 16  ;;  %v9562_v0 = vpack.c.b16 %v9544_v12, %v9543_v1  ;;  %v7993_v13 = vshll.u32 %v14977_v16, 16  ;;  %v10784_v12 = vld [vmem:[#allocation3 + $0x60] sm:$0xff] }
 0x52a   : > { %v9142_v32 = vor.u32 %v9141_v27, %v9137_v15  ;;  %v7979_v18 = vrot.slane %v7977_v26, 5  ;;  %v9133_v59 = vrot.slane %v9132_v22, 4  ;;  %v9147_v61 = vrot.slane %v9145_v47, 5  ;;  %v7120_v47 = vld [vmem:[#allocation3 + $0xa8] sm:$0xe] }
 0x52b   : > { %v7985_v58 = vrot.slane %v7983_v57, 5  ;;  %v7989_v55 = vrot.slane %v7987_v60, 4  ;;  %v9617_v48 = vsel %vm7506_vm11, %v10800_v23, %v14948_v42  ;;  %v7059_v38 = vshrl.u32 %v6702_v20, 16  ;;  %v15020_v57 = vpop.permute.xlu2 %7410 }
 0x52c   : > { %v9143_v19 = vrot.slane %v9142_v32, 4  ;;  %v7980_v36 = vor.u32 %v7979_v18, %v7976_v33  ;;  %v9138_v29 = vsel %vm11523_vm4, %v9133_v59, %v9137_v15  ;;  %v7062_v63 = vshll.u32 %v6702_v20, 16 }
 0x52d   : > { %9591 = vrot.lane.b32.xlu2 %v9562_v0, %s10851_s19  ;;  %v7990_v54 = vor.u32 %v7989_v55, %v7985_v58  ;;  %v7068_v43 = vshll.u32 %v14992_v10, 16  ;;  %v7995_v35 = vrot.slane %v7993_v13, 5  ;;  %v7061_v45 = vrot.slane %v7059_v38, 4  ;;  %v8794_v55 = vld [vmem:[#allocation3 + $0xc4] sm:$0xf] }
 0x52e   : > { %v9148_v46 = vsel %vm11523_vm4, %v9143_v19, %v9147_v61  ;;  %v7981_v2 = vrot.slane %v7980_v36, 4  ;;  %v9463_v14 = vunpack.c.l.b16 %v9138_v29  ;;  %v7064_v17 = vrot.slane %v7062_v63, 5  ;;  %v9211_v38 = vld [vmem:[#allocation3 + $0xc0] sm:$0xe] }
 0x52f   : > { %v9464_v5 = vunpack.c.l.b16 %v9148_v46  ;;  %v7991_v42 = vrot.slane %v7990_v54, 4  ;;  %v7070_v11 = vrot.slane %v7068_v43, 5  ;;  %v7072_v4 = vshrl.u32 %v14992_v10, 16  ;;  %v8793_v29 = vld [vmem:[#allocation3 + $0xc0] sm:$0xf] }
 0x530   : > { %v7986_v44 = vsel %vm11523_vm4, %v7981_v2, %v7985_v58  ;;  %v9658_v40 = vsel %vm1125_vm1, %v9617_v48, %v14931_v25  ;;  %v15007_v37 = vadd.f32 %v8699_v21, %v8570_v7  ;;  %v7065_v3 = vor.u32 %v7064_v17, %v7061_v45  ;;  %v8811_v7 = vld [vmem:[#allocation3 + $0xc8] sm:$0x1] }
 0x531   : > { %v9482_v30 = vpack.c.b16 %v9464_v5, %v9463_v14  ;;  %v7996_v6 = vsel %vm11523_vm4, %v7991_v42, %v7995_v35  ;;  %10690 = vmatmul.msk.bf16.gmra.mxu1 %vm8509_vm14, %v9658_v40  ;;  %v8289_v15 = vunpack.c.l.b16 %v7986_v44  ;;  %v7074_v1 = vrot.slane %v7072_v4, 4 }
 0x532   : > { %v8290_v24 = vunpack.c.l.b16 %v7996_v6  ;;  %v7078_v25 = vshll.u32 %v6720_v62, 16  ;;  %v8444_v27 = vsel %vm7506_vm11, %v10784_v12, %v14950_v31  ;;  %v7066_v26 = vrot.slane %v7065_v3, 4  ;;  %v15051_v6 = vld [vmem:[#allocation3 + $0xc4] sm:$0xf] }
 0x533   : > { %9511 = vrot.lane.b32.xlu1 %v9482_v30, %s10849_s29  ;;  %v10490_v22 = vrot.slane %v8035_v50, 9  ;;  %v8185_v33 = vrot.slane %v14975_v8, 5  ;;  %v7075_v20 = vor.u32 %v7074_v1, %v7070_v11  ;;  %v10410_v0 = vrot.slane %v7120_v47, 9 }
 0x534   : > { %v8307_v60 = vpack.c.b16 %v8290_v24, %v8289_v15  ;;  %v7270_v32 = vrot.slane %v14992_v10, 5  ;;  %v7071_v18 = vsel %vm11523_vm4, %v7066_v26, %v7070_v11  ;;  %v8188_v31 = vrot.slane %v14977_v16, 5  ;;  %v15046_v11 = vpop.permute.xlu0 %7490  ;;  %v15056_v24 = vpop.permute.xlu2 %9581 }
 0x535   : > { %v8186_v13 = vsel %vm11507_vm7, %v10490_v22, %v8185_v33  ;;  %v8187_v23 = vrot.slane %v8185_v33, 4  ;;  %v7076_v59 = vrot.slane %v7075_v20, 4  ;;  %v7080_v8 = vrot.slane %v7078_v25, 5 }
 0x536   : > { %8337 = vrot.lane.b32.xlu0 %v8307_v60, %s10849_s29  ;;  %v7271_v61 = vsel %vm11507_vm7, %v10410_v0, %v7270_v32  ;;  %v7273_v58 = vrot.slane %v6720_v62, 5  ;;  %v7374_v19 = vunpack.c.l.b16 %v7071_v18  ;;  %v7272_v36 = vrot.slane %v7270_v32, 4  ;;  %v10801_v32 = vld [vmem:[#allocation3 + $0x6c] sm:$0xff] }
 0x537   : > { %v8189_v10 = vsel %vm11507_vm7, %v8187_v23, %v8188_v31  ;;  %v8484_v48 = vsel %vm1125_vm1, %v8444_v27, %v14979_v52  ;;  %v7081_v16 = vsel %vm11523_vm4, %v7076_v59, %v7080_v8  ;;  %v8369_v54 = vunpack.c.l.b16 %v8186_v13  ;;  %v15059_v27 = vld [vmem:[#allocation3 + $0xc8] sm:$0x1]  ;;  %v6704_v59 = vld [vmem:[#allocation3 + $0xb4] sm:$0xf] }
 0x538   : > { %v8370_v63 = vunpack.c.l.b16 %v8189_v10  ;;  %v7570_v43 = vsel %vm1125_vm1, %v14984_v9, %v14981_v49  ;;  %10569 = vmatmul.msk.bf16.gmra.mxu3 %vm8509_vm14, %v8484_v48  ;;  %v7375_v46 = vunpack.c.l.b16 %v7081_v16  ;;  %v7274_v2 = vsel %vm11507_vm7, %v7272_v36, %v7273_v58  ;;  %v7619_v49 = vld [vmem:[#allocation3 + $0xc0] sm:$0xf]  ;;  %v15044_v9 = vpop.permute.xlu1 %8405 }
 0x539   : > { %v7454_v35 = vunpack.c.l.b16 %v7271_v61  ;;  %v9361_v52 = vrot.slane %v8794_v55, 5  ;;  %10589 = vmatmul.msk.bf16.gmra.mxu0 %vm8509_vm14, %v7570_v43  ;;  %v7455_v14 = vunpack.c.l.b16 %v7274_v2  ;;  %v10612_v5 = vrot.slane %v9211_v38, 9  ;;  %v15066_v38 = vld [vmem:[#allocation3 + $0xb8] sm:$0xf]  ;;  %v15070_v2 = vld [vmem:[#allocation3 + $0xbc] sm:$0x1] }
 0x53a   : > { %v8387_v45 = vpack.c.b16 %v8370_v63, %v8369_v54  ;;  %v9150_v42 = vshrl.u32 %v8793_v29, 16  ;;  %v7392_v62 = vpack.c.b16 %v7375_v46, %v7374_v19  ;;  %v9364_v21 = vrot.slane %v8811_v7, 5 }
 0x53b   : > { %v9363_v17 = vrot.slane %v9361_v52, 4  ;;  %v9153_v44 = vshll.u32 %v8793_v29, 16  ;;  %v7472_v4 = vpack.c.b16 %v7455_v14, %v7454_v35  ;;  %v9362_v40 = vsel %vm11507_vm7, %v10612_v5, %v9361_v52 }
 0x53c   : > { %8417 = vrot.lane.b32.xlu1 %v8387_v45, %s10851_s19  ;;  %v9152_v50 = vrot.slane %v9150_v42, 4  ;;  %v9159_v30 = vshll.u32 %v8794_v55, 16  ;;  %7422 = vrot.lane.b32.xlu2 %v7392_v62, %s10849_s29  ;;  %v9163_v47 = vshrl.u32 %v8794_v55, 16  ;;  %v9169_v15 = vshll.u32 %v8811_v7, 16  ;;  %v15079_v62 = vpop.permute.xlu0 %8327 }
 0x53d   : > { %v9365_v12 = vsel %vm11507_vm7, %v9363_v17, %v9364_v21  ;;  %v9155_v3 = vrot.slane %v9153_v44, 5  ;;  %v7998_v26 = vshrl.u32 %v7619_v49, 16  ;;  %v8001_v22 = vshll.u32 %v7619_v49, 16 }
 0x53e   : > { %7502 = vrot.lane.b32.xlu0 %v7472_v4, %s10851_s19  ;;  %v9546_v1 = vunpack.c.l.b16 %v9365_v12  ;;  %v9161_v25 = vrot.slane %v9159_v30, 5  ;;  %v9545_v33 = vunpack.c.l.b16 %v9362_v40  ;;  %v9165_v20 = vrot.slane %v9163_v47, 4  ;;  %v8036_v12 = vld [vmem:[#allocation3 + $0xc0] sm:$0xe]  ;;  %v15088_v47 = vpop.permute.xlu2 %7412 }
 0x53f   : > { %v9156_v60 = vor.u32 %v9155_v3, %v9152_v50  ;;  %v8007_v0 = vshll.u32 %v15051_v6, 16  ;;  %v9171_v18 = vrot.slane %v9169_v15, 5  ;;  %v8000_v13 = vrot.slane %v7998_v26, 4  ;;  %v15086_v3 = vpop.f32.mrf.mxu1 }
 0x540   : > { %v8003_v23 = vrot.slane %v8001_v22, 5  ;;  %v8011_v31 = vshrl.u32 %v15051_v6, 16  ;;  %v9166_v61 = vor.u32 %v9165_v20, %v9161_v25  ;;  %v8017_v55 = vshll.u32 %v15059_v27, 16  ;;  %v15077_v42 = vpop.permute.xlu1 %9501  ;;  %v7121_v22 = vld [vmem:[#allocation3 + $0xb4] sm:$0xe] }
 0x541   : > { %v9157_v8 = vrot.slane %v9156_v60, 4  ;;  %v8009_v58 = vrot.slane %v8007_v0, 5  ;;  %v9563_v19 = vpack.c.b16 %v9546_v1, %v9545_v33  ;;  %v9620_v48 = vsel %vm7506_vm11, %v10801_v32, %v15012_v41  ;;  %v10785_v41 = vld [vmem:[#allocation3 + $0x6c] sm:$0xff] }
 0x542   : > { %v8004_v10 = vor.u32 %v8003_v23, %v8000_v13  ;;  %v8013_v36 = vrot.slane %v8011_v31, 4  ;;  %v9167_v16 = vrot.slane %v9166_v61, 4  ;;  %v8019_v54 = vrot.slane %v8017_v55, 5  ;;  %v10768_v23 = vld [vmem:[#allocation3 + $0x60] sm:$0xff]  ;;  %v8572_v31 = vpop.f32.mrf.mxu3 }
 0x543   : > { %v9162_v29 = vsel %vm11523_vm4, %v9157_v8, %v9161_v25  ;;  %v7083_v63 = vshrl.u32 %v6704_v59, 16  ;;  %v7086_v35 = vshll.u32 %v6704_v59, 16  ;;  %v7092_v14 = vshll.u32 %v15066_v38, 16 }
 0x544   : > { %v9465_v43 = vunpack.c.l.b16 %v9162_v29  ;;  %v8005_v7 = vrot.slane %v8004_v10, 4  ;;  %v8014_v46 = vor.u32 %v8013_v36, %v8009_v58  ;;  %9593 = vrot.lane.b32.xlu2 %v9563_v19, %s10851_s19  ;;  %v9172_v52 = vsel %vm11523_vm4, %v9167_v16, %v9171_v18  ;;  %v565_v36 = vld [vmem:[#allocation3 + $0xcc] sm:$0x1]  ;;  %v620_v16 = vld [vmem:[#allocation3 + $0xd4] sm:$0x1] }
 0x545   : > { %v7085_v45 = vrot.slane %v7083_v63, 4  ;;  %v7096_v5 = vshrl.u32 %v15066_v38, 16  ;;  %v9466_v17 = vunpack.c.l.b16 %v9172_v52  ;;  %v7088_v49 = vrot.slane %v7086_v35, 5 }
 0x546   : > { %v8010_v21 = vsel %vm11523_vm4, %v8005_v7, %v8009_v58  ;;  %v8015_v44 = vrot.slane %v8014_v46, 4  ;;  %v8447_v4 = vsel %vm7506_vm11, %v10785_v41, %v15014_v28  ;;  %v7094_v40 = vrot.slane %v7092_v14, 5  ;;  %v8701_v58 = vpop.f32.mrf.mxu0 }
 0x547   : > { %v7098_v50 = vrot.slane %v7096_v5, 4  ;;  %v7102_v30 = vshll.u32 %v15070_v2, 16  ;;  %v9483_v15 = vpack.c.b16 %v9466_v17, %v9465_v43  ;;  %v7089_v25 = vor.u32 %v7088_v49, %v7085_v45  ;;  %v15112_v43 = vpop.permute.xlu0 %7492 }
 0x548   : > { %v8020_v1 = vsel %vm11523_vm4, %v8015_v44, %v8019_v54  ;;  %v9660_v26 = vsel %vm1125_vm1, %v9620_v48, %v14989_v39  ;;  %v8291_v33 = vunpack.c.l.b16 %v8010_v21  ;;  %v10491_v32 = vrot.slane %v8036_v12, 9  ;;  %v8796_v54 = vld [vmem:[#allocation3 + $0xd0] sm:$0xf]  ;;  %v8408_v63 = vpop.permute.xlu1 %8407 }
 0x549   : > { %v8292_v28 = vunpack.c.l.b16 %v8020_v1  ;;  %v7099_v60 = vor.u32 %v7098_v50, %v7094_v40  ;;  %v7104_v20 = vrot.slane %v7102_v30, 5  ;;  %10691 = vmatmul.msk.bf16.gmra.mxu1 %vm8509_vm14, %v9660_v26  ;;  %9513 = vrot.lane.b32.xlu1 %v9483_v15, %s10849_s29  ;;  %v7090_v0 = vrot.slane %v7089_v25, 4  ;;  %v15128_v30 = vpop.permute.xlu2 %9583  ;;  %v10786_v25 = vld [vmem:[#allocation3 + $0x78] sm:$0xff] }
 0x54a   : > { %v8192_v18 = vrot.slane %v15051_v6, 5  ;;  %v8195_v13 = vrot.slane %v15059_v27, 5  ;;  %v10411_v39 = vrot.slane %v7121_v22, 9  ;;  %v7277_v61 = vrot.slane %v15066_v38, 5  ;;  %v8575_v22 = vpop.f32.mrf.mxu3 }
 0x54b   : > { %v8308_v59 = vpack.c.b16 %v8292_v28, %v8291_v33  ;;  %v7100_v8 = vrot.slane %v7099_v60, 4  ;;  %v7095_v55 = vsel %vm11523_vm4, %v7090_v0, %v7094_v40  ;;  %v8486_v6 = vsel %vm1125_vm1, %v8447_v4, %v15044_v9  ;;  %v9746_v40 = vpop.f32.mrf.mxu1 }
 0x54c   : > { %v8193_v19 = vsel %vm11507_vm7, %v10491_v32, %v8192_v18  ;;  %v8194_v10 = vrot.slane %v8192_v18, 4  ;;  %v7533_v27 = vsel %vm7506_vm11, %v10768_v23, %v15020_v57  ;;  %v7376_v38 = vunpack.c.l.b16 %v7095_v55  ;;  %10570 = vmatmul.msk.bf16.gmra.mxu3 %vm8509_vm14, %v8486_v6  ;;  %v15144_v32 = vld [vmem:[%s15348_s8] ss:$0 sm:$0xff] }
 0x54d   : > { %8339 = vrot.lane.b32.xlu0 %v8308_v59, %s10849_s29  ;;  %v7105_v48 = vsel %vm11523_vm4, %v7100_v8, %v7104_v20  ;;  %v7280_v29 = vrot.slane %v15070_v2, 5  ;;  %v7278_v57 = vsel %vm11507_vm7, %v10411_v39, %v7277_v61  ;;  %v7279_v46 = vrot.slane %v7277_v61, 4  ;;  %v15156_v8 = vld [vmem:[%s15349_s9] ss:$0 sm:$0xff] }
 0x54e   : > { %v7377_v9 = vunpack.c.l.b16 %v7105_v48  ;;  %v8196_v7 = vsel %vm11507_vm7, %v8194_v10, %v8195_v13  ;;  %v8371_v35 = vunpack.c.l.b16 %v8193_v19  ;;  %v7572_v2 = vsel %vm1125_vm1, %v7533_v27, %v15046_v11  ;;  %v10802_v11 = vld [vmem:[#allocation3 + $0x78] sm:$0xff]  ;;  %v8704_v33 = vpop.f32.mrf.mxu0 }
 0x54f   : > { %v8372_v52 = vunpack.c.l.b16 %v8196_v7  ;;  %v566_v41 = vsel %vm11325_vm10, 0, %v565_v36  ;;  %v7281_v14 = vsel %vm11507_vm7, %v7279_v46, %v7280_v29  ;;  %10590 = vmatmul.msk.bf16.gmra.mxu0 %vm8509_vm14, %v7572_v2  ;;  %v621_v5 = vsel %vm13435_vm3, 0, %v620_v16  ;;  %v10769_v16 = vld [vmem:[#allocation3 + $0x6c] sm:$0xff] }
 0x550   : > { %v7393_v45 = vpack.c.b16 %v7377_v9, %v7376_v38  ;;  %567 = vst [vmem:[#allocation3 + $0xcc] sm:$0x1] %v566_v41  ;;  %v9183_v17 = vshll.u32 %v8796_v54, 16  ;;  %v7456_v44 = vunpack.c.l.b16 %v7278_v57  ;;  %v7457_v49 = vunpack.c.l.b16 %v7281_v14  ;;  %v9504_v18 = vpop.permute.xlu1 %9503 }
 0x551   : > { %v8388_v21 = vpack.c.b16 %v8372_v52, %v8371_v35  ;;  %622 = vst [vmem:[#allocation3 + $0xd4] sm:$0x1] %v621_v5  ;;  %v9187_v4 = vshrl.u32 %v8796_v54, 16  ;;  %v8702_v50 = vadd.f32 %v8701_v58, %v8572_v31  ;;  %v9623_v1 = vsel %vm7506_vm11, %v10802_v11, %v15077_v42  ;;  %v7415_v52 = vpop.permute.xlu2 %7414 }
 0x552   : > { %7424 = vrot.lane.b32.xlu2 %v7393_v45, %s10849_s29  ;;  %v15130_v12 = vrot.slane %v9183_v17, 5  ;;  %v7473_v53 = vpack.c.b16 %v7457_v49, %v7456_v44  ;;  %v9815_v26 = vadd.f32 %v15086_v3, %v15007_v37  ;;  %v10613_v60 = vrot.slane %v9212_v51, 9  ;;  %v15147_v37 = vpop.permute.xlu0 %8329  ;;  %v8577_v17 = vpop.f32.mrf.mxu3 }
 0x553   : > { %8419 = vrot.lane.b32.xlu1 %v8388_v21, %s10851_s19  ;;  %v9189_v15 = vrot.slane %v9187_v4, 4  ;;  %v9816_v28 = vadd.f32 %v9746_v40, %v8702_v50  ;;  %v8450_v0 = vsel %vm7506_vm11, %v10786_v25, %v15079_v62  ;;  %v9368_v3 = vrot.slane %v8796_v54, 5  ;;  %v9749_v29 = vpop.f32.mrf.mxu1  ;;  %v10803_v50 = vld [vmem:[#allocation3 + $0x84] sm:$0xff] }
 0x554   : > { %v9851_v42 = vmul.f32 %v15144_v32, %v9815_v26  ;;  %v9662_v13 = vsel %vm1125_vm1, %v9623_v1, %v15056_v24  ;;  %v8488_v23 = vsel %vm1125_vm1, %v8450_v0, %v8408_v63  ;;  %v8705_v61 = vadd.f32 %v8704_v33, %v8575_v22 }
 0x555   : > { %7504 = vrot.lane.b32.xlu0 %v7473_v53, %s10851_s19  ;;  %v9190_v20 = vor.u32 %v9189_v15, %v15130_v12  ;;  %v9852_v31 = vmul.f32 %v15144_v32, %v9816_v28  ;;  %v9369_v58 = vsel %vm11507_vm7, %v10613_v60, %v9368_v3  ;;  %v9370_v6 = vrot.slane %v9368_v3, 4  ;;  %v10787_v60 = vld [vmem:[#allocation3 + $0x84] sm:$0xff] }
 0x556   : > { %v9887_v39 = vadd.f32 %v15156_v8, %v9851_v42  ;;  %v9547_v38 = vunpack.c.l.b16 %v9369_v58  ;;  %v9817_v7 = vadd.f32 %v9749_v29, %v8705_v61  ;;  %v7536_v35 = vsel %vm7506_vm11, %v10769_v16, %v15088_v47  ;;  %v8706_v4 = vpop.f32.mrf.mxu0  ;;  %v10788_v61 = vld [vmem:[#allocation3 + $0x90] sm:$0xff] }
 0x557   : > { %v8795_v59 = vld [vmem:[#allocation3 + $0xcc] sm:$0xf]  ;;  %v9191_v62 = vrot.slane %v9190_v20, 4  ;;  %v9888_v10 = vadd.f32 %v15156_v8, %v9852_v31  ;;  %v7574_v5 = vsel %vm1125_vm1, %v7536_v35, %v15112_v43  ;;  %v8707_v43 = vadd.f32 %v8706_v4, %v8577_v17 }
 0x558   : > { %v8812_v55 = vld [vmem:[#allocation3 + $0xd4] sm:$0x1]  ;;  %v9174_v19 = vshrl.u32 %v8795_v59, 16  ;;  %v9177_v24 = vshll.u32 %v8795_v59, 16  ;;  %v9919_v27 = vmax.f32 %v9887_v39, 0.0  ;;  %v9853_v45 = vmul.f32 %v15144_v32, %v9817_v7  ;;  %v8410_v56 = vpop.permute.xlu1 %8409  ;;  %v10789_v7 = vld [vmem:[#allocation3 + $0x9c] sm:$0xff] }
 0x559   : > { %v9193_v36 = vshll.u32 %v8812_v55, 16  ;;  %10692 = vmatmul.msk.bf16.gmra.mxu1 %vm8509_vm14, %v9662_v13  ;;  %v9371_v48 = vrot.slane %v8812_v55, 5  ;;  %v9920_v9 = vmax.f32 %v9888_v10, 0.0  ;;  %v9626_v26 = vsel %vm7506_vm11, %v10803_v50, %v9504_v18  ;;  %v9586_v28 = vpop.permute.xlu2 %9585  ;;  %v10770_v18 = vld [vmem:[#allocation3 + $0x78] sm:$0xff]  ;;  %v10804_v59 = vld [vmem:[#allocation3 + $0x90] sm:$0xff] }
 0x55a   : > { %v9176_v54 = vrot.slane %v9174_v19, 4  ;;  %v9179_v63 = vrot.slane %v9177_v24, 5  ;;  %9951 = vst.msk [vmem:[%s14747_s17 + $0x30] sm:$0xff] %vm7506_vm11, %v9919_v27  ;;  %v7495_v49 = vpop.permute.xlu0 %7494  ;;  %v9889_v11 = vadd.f32 %v15156_v8, %v9853_v45  ;;  %v8453_v0 = vsel %vm7506_vm11, %v10787_v60, %v15147_v37  ;;  %v10771_v19 = vld [vmem:[#allocation3 + $0x84] sm:$0xff] }
 0x55b   : > { %v9195_v57 = vrot.slane %v9193_v36, 5  ;;  %v9372_v46 = vsel %vm11507_vm7, %v9370_v6, %v9371_v48  ;;  %9952 = vst.msk [vmem:[%s14747_s17 + $0x38] sm:$0xff] %vm7506_vm11, %v9920_v9  ;;  %v9751_v15 = vpop.f32.mrf.mxu1  ;;  %v8490_v3 = vsel %vm1125_vm1, %v8453_v0, %v8410_v56  ;;  %v7539_v13 = vsel %vm7506_vm11, %v10770_v18, %v7415_v52  ;;  %v10805_v48 = vld [vmem:[#allocation3 + $0x9c] sm:$0xff] }
 0x55c   : > { %v9180_v2 = vor.u32 %v9179_v63, %v9176_v54  ;;  %v9548_v41 = vunpack.c.l.b16 %v9372_v46  ;;  %10571 = vmatmul.msk.bf16.gmra.mxu3 %vm8509_vm14, %v8488_v23  ;;  %v9921_v53 = vmax.f32 %v9889_v11, 0.0  ;;  %v9818_v1 = vadd.f32 %v9751_v15, %v8707_v43 }
 0x55d   : > { %v9196_v14 = vsel %vm11523_vm4, %v9191_v62, %v9195_v57 }
 0x55e   : > { %v9181_v21 = vrot.slane %v9180_v2, 4  ;;  %v9564_v44 = vpack.c.b16 %v9548_v41, %v9547_v38  ;;  %v9468_v47 = vunpack.c.l.b16 %v9196_v14  ;;  %9953 = vst.msk [vmem:[%s14747_s17 + $0x40] sm:$0xff] %vm7506_vm11, %v9921_v53  ;;  %v9854_v22 = vmul.f32 %v15144_v32, %v9818_v1  ;;  %v8709_v63 = vpop.f32.mrf.mxu0  ;;  %v10772_v2 = vld [vmem:[#allocation3 + $0x90] sm:$0xff] }
 0x55f   : > { %10591 = vmatmul.msk.bf16.gmra.mxu0 %vm8509_vm14, %v7574_v5 }
 0x560   : > { %v9186_v40 = vsel %vm11523_vm4, %v9181_v21, %v15130_v12  ;;  %9595 = vrot.lane.b32.xlu2 %v9564_v44, %s10851_s19  ;;  %v9506_v34 = vpop.permute.xlu1 %9505  ;;  %v9664_v12 = vsel %vm1125_vm1, %v9626_v26, %v15128_v30  ;;  %v9890_v33 = vadd.f32 %v15156_v8, %v9854_v22  ;;  %v7576_v30 = vsel %vm1125_vm1, %v7539_v13, %v7495_v49  ;;  %v10790_v26 = vld [vmem:[#allocation3 + $0xa8] sm:$0xff] }
 0x561   : > { %v9467_v51 = vunpack.c.l.b16 %v9186_v40  ;;  %v7417_v31 = vpop.permute.xlu2 %7416  ;;  %v9629_v37 = vsel %vm7506_vm11, %v10804_v59, %v9506_v34  ;;  %v8580_v29 = vpop.f32.mrf.mxu3  ;;  %v10806_v40 = vld [vmem:[#allocation3 + $0xa8] sm:$0xff] }
 0x562   : > { %v9922_v20 = vmax.f32 %v9890_v33, 0.0  ;;  %v8332_v42 = vpop.permute.xlu0 %8331  ;;  %v9666_v39 = vsel %vm1125_vm1, %v9629_v37, %v9586_v28  ;;  %v7542_v6 = vsel %vm7506_vm11, %v10771_v19, %v7417_v31  ;;  %v8710_v46 = vadd.f32 %v8709_v63, %v8580_v29  ;;  %v10773_v28 = vld [vmem:[#allocation3 + $0x9c] sm:$0xff] }
 0x563   : > { %v9484_v25 = vpack.c.b16 %v9468_v47, %v9467_v51  ;;  %v8456_v58 = vsel %vm7506_vm11, %v10788_v61, %v8332_v42 }
 0x564   : > { %9954 = vst.msk [vmem:[%s14747_s17 + $0x48] sm:$0xff] %vm7506_vm11, %v9922_v20 }
 0x565   : > { %9515 = vrot.lane.b32.xlu1 %v9484_v25, %s10849_s29 }
 0x566   : > { %v8711_v49 = vpop.f32.mrf.mxu0 }
 0x568   : > { %v8412_v23 = vpop.permute.xlu1 %8411 }
 0x569   : > { %10693 = vmatmul.msk.bf16.gmra.mxu1 %vm8509_vm14, %v9664_v12  ;;  %v8492_v24 = vsel %vm1125_vm1, %v8456_v58, %v8412_v23  ;;  %v9588_v10 = vpop.permute.xlu2 %9587  ;;  %v8582_v17 = vpop.f32.mrf.mxu3  ;;  %v10774_v58 = vld [vmem:[#allocation3 + $0xa8] sm:$0xff] }
 0x56a   : > { %v7497_v62 = vpop.permute.xlu0 %7496  ;;  %v8712_v4 = vadd.f32 %v8711_v49, %v8582_v17 }
 0x56b   : > { %v7578_v36 = vsel %vm1125_vm1, %v7542_v6, %v7497_v62  ;;  %v10791_v62 = vld [vmem:[#allocation3 + $0xb4] sm:$0xff] }
 0x56c   : > { %10572 = vmatmul.msk.bf16.gmra.mxu3 %vm8509_vm14, %v8490_v3  ;;  %v10807_v3 = vld [vmem:[#allocation3 + $0xb4] sm:$0xff] }
 0x56f   : > { %10592 = vmatmul.msk.bf16.gmra.mxu0 %vm8509_vm14, %v7576_v30 }
 0x571   : > { %v7419_v54 = vpop.permute.xlu2 %7418 }
 0x572   : > { %v7545_v14 = vsel %vm7506_vm11, %v10772_v2, %v7419_v54  ;;  %v10808_v2 = vld [vmem:[#allocation3 + $0xc0] sm:$0xff] }
 0x573   : > { %v9508_v55 = vpop.permute.xlu1 %9507 }
 0x574   : > { %v9632_v38 = vsel %vm7506_vm11, %v10805_v48, %v9508_v55 }
 0x575   : > { %v9668_v9 = vsel %vm1125_vm1, %v9632_v38, %v9588_v10 }
 0x578   : > { %v8334_v27 = vpop.permute.xlu0 %8333 }
 0x579   : > { %10694 = vmatmul.msk.bf16.gmra.mxu1 %vm8509_vm14, %v9666_v39  ;;  %v8459_v35 = vsel %vm7506_vm11, %v10789_v7, %v8334_v27  ;;  %v9590_v47 = vpop.permute.xlu2 %9589 }
 0x57c   : > { %10573 = vmatmul.msk.bf16.gmra.mxu3 %vm8509_vm14, %v8492_v24 }
 0x57e   : > { %v8414_v16 = vpop.permute.xlu1 %8413 }
 0x57f   : > { %10593 = vmatmul.msk.bf16.gmra.mxu0 %vm8509_vm14, %v7578_v36  ;;  %v8494_v41 = vsel %vm1125_vm1, %v8459_v35, %v8414_v16 }
 0x580   : > { %v7499_v57 = vpop.permute.xlu0 %7498 }
 0x581   : > { %v7580_v56 = vsel %vm1125_vm1, %v7545_v14, %v7499_v57  ;;  %v7421_v12 = vpop.permute.xlu2 %7420 }
 0x582   : > { %v7548_v0 = vsel %vm7506_vm11, %v10773_v28, %v7421_v12 }
 0x589   : > { %10695 = vmatmul.msk.bf16.gmra.mxu1 %vm8509_vm14, %v9668_v9  ;;  %v9754_v52 = vpop.f32.mrf.mxu1  ;;  %v9592_v18 = vpop.permute.xlu2 %9591 }
 0x58a   : > { %v9819_v45 = vadd.f32 %v9754_v52, %v8710_v46 }
 0x58c   : > { %v9855_v5 = vmul.f32 %v15144_v32, %v9819_v45  ;;  %10574 = vmatmul.msk.bf16.gmra.mxu3 %vm8509_vm14, %v8494_v41 }
 0x58d   : > { %v9510_v21 = vpop.permute.xlu1 %9509 }
 0x58e   : > { %v9891_v44 = vadd.f32 %v15156_v8, %v9855_v5  ;;  %v9635_v53 = vsel %vm7506_vm11, %v10806_v40, %v9510_v21 }
 0x58f   : > { %10594 = vmatmul.msk.bf16.gmra.mxu0 %vm8509_vm14, %v7580_v56  ;;  %v9670_v1 = vsel %vm1125_vm1, %v9635_v53, %v9590_v47 }
 0x590   : > { %v9923_v11 = vmax.f32 %v9891_v44, 0.0  ;;  %v10792_v44 = vld [vmem:[#allocation3 + $0xc0] sm:$0xff] }
 0x591   : > { %v8336_v43 = vpop.permute.xlu0 %8335  ;;  %v9756_v51 = vpop.f32.mrf.mxu1 }
 0x592   : > { %9955 = vst.msk [vmem:[%s14747_s17 + $0x50] sm:$0xff] %vm7506_vm11, %v9923_v11  ;;  %v9820_v50 = vadd.f32 %v9756_v51, %v8712_v4  ;;  %v8462_v33 = vsel %vm7506_vm11, %v10790_v26, %v8336_v43  ;;  %v10775_v11 = vld [vmem:[#allocation3 + $0xb4] sm:$0xff] }
 0x594   : > { %v9856_v15 = vmul.f32 %v15144_v32, %v9820_v50  ;;  %v8714_v23 = vpop.f32.mrf.mxu0 }
 0x596   : > { %v9892_v25 = vadd.f32 %v15156_v8, %v9856_v15  ;;  %v8416_v22 = vpop.permute.xlu1 %8415  ;;  %v7423_v39 = vpop.permute.xlu2 %7422 }
 0x597   : > { %v8496_v60 = vsel %vm1125_vm1, %v8462_v33, %v8416_v22  ;;  %v7551_v36 = vsel %vm7506_vm11, %v10774_v58, %v7423_v39 }
 0x598   : > { %v9924_v34 = vmax.f32 %v9892_v25, 0.0  ;;  %v8585_v37 = vpop.f32.mrf.mxu3 }
 0x599   : > { %10696 = vmatmul.msk.bf16.gmra.mxu1 %vm8509_vm14, %v9670_v1  ;;  %v8715_v61 = vadd.f32 %v8714_v23, %v8585_v37 }
 0x59a   : > { %v7501_v20 = vpop.permute.xlu0 %7500  ;;  %9956 = vst.msk [vmem:[%s14747_s17 + $0x58] sm:$0xff] %vm7506_vm11, %v9924_v34 }
 0x59b   : > { %v7582_v42 = vsel %vm1125_vm1, %v7548_v0, %v7501_v20 }
 0x59c   : > { %10575 = vmatmul.msk.bf16.gmra.mxu3 %vm8509_vm14, %v8496_v60  ;;  %v8716_v48 = vpop.f32.mrf.mxu0 }
 0x59e   : > { %v9594_v52 = vpop.permute.xlu2 %9593 }
 0x59f   : > { %10595 = vmatmul.msk.bf16.gmra.mxu0 %vm8509_vm14, %v7582_v42 }
 0x5a0   : > { %v8587_v16 = vpop.f32.mrf.mxu3 }
 0x5a1   : > { %v8717_v63 = vadd.f32 %v8716_v48, %v8587_v16 }
 0x5a5   : > { %v9512_v13 = vpop.permute.xlu1 %9511 }
 0x5a6   : > { %v9638_v30 = vsel %vm7506_vm11, %v10807_v3, %v9512_v13  ;;  %v10809_v13 = vld [vmem:[#allocation3 + $0xcc] sm:$0xff] }
 0x5a7   : > { %v9672_v31 = vsel %vm1125_vm1, %v9638_v30, %v9592_v18 }
 0x5a8   : > { %v8338_v59 = vpop.permute.xlu0 %8337 }
 0x5a9   : > { %10697 = vmatmul.msk.bf16.gmra.mxu1 %vm8509_vm14, %v9672_v31  ;;  %v8465_v55 = vsel %vm7506_vm11, %v10791_v62, %v8338_v59 }
 0x5ac   : > { %v7425_v4 = vpop.permute.xlu2 %7424 }
 0x5ad   : > { %v7554_v15 = vsel %vm7506_vm11, %v10775_v11, %v7425_v4 }
 0x5ae   : > { %v8418_v19 = vpop.permute.xlu1 %8417  ;;  %v9759_v24 = vpop.f32.mrf.mxu1 }
 0x5af   : > { %v8498_v10 = vsel %vm1125_vm1, %v8465_v55, %v8418_v19  ;;  %v9821_v6 = vadd.f32 %v9759_v24, %v8715_v61 }
 0x5b0   : > { %v7503_v27 = vpop.permute.xlu0 %7502  ;;  %10576 = vmatmul.msk.bf16.gmra.mxu3 %vm8509_vm14, %v8498_v10 }
 0x5b1   : > { %v7584_v38 = vsel %vm1125_vm1, %v7551_v36, %v7503_v27  ;;  %v9857_v29 = vmul.f32 %v15144_v32, %v9821_v6 }
 0x5b2   : > { %10596 = vmatmul.msk.bf16.gmra.mxu0 %vm8509_vm14, %v7584_v38 }
 0x5b3   : > { %v9893_v54 = vadd.f32 %v15156_v8, %v9857_v29 }
 0x5b5   : > { %v9925_v9 = vmax.f32 %v9893_v54, 0.0 }
 0x5b6   : > { %v9761_v7 = vpop.f32.mrf.mxu1  ;;  %v8719_v46 = vpop.f32.mrf.mxu0 }
 0x5b7   : > { %9957 = vst.msk [vmem:[%s14747_s17 + $0x60] sm:$0xff] %vm7506_vm11, %v9925_v9  ;;  %v9822_v57 = vadd.f32 %v9761_v7, %v8717_v63 }
 0x5b9   : > { %v9858_v35 = vmul.f32 %v15144_v32, %v9822_v57 }
 0x5ba   : > { %v9596_v31 = vpop.permute.xlu2 %9595 }
 0x5bb   : > { %v9894_v41 = vadd.f32 %v15156_v8, %v9858_v35  ;;  %v9514_v45 = vpop.permute.xlu1 %9513  ;;  %v8590_v14 = vpop.f32.mrf.mxu3 }
 0x5bc   : > { %v9641_v5 = vsel %vm7506_vm11, %v10808_v2, %v9514_v45  ;;  %v8720_v47 = vadd.f32 %v8719_v46, %v8590_v14 }
 0x5bd   : > { %v9926_v56 = vmax.f32 %v9894_v41, 0.0  ;;  %v9674_v17 = vsel %vm1125_vm1, %v9641_v5, %v9594_v52 }
 0x5be   : > { %10698 = vmatmul.msk.bf16.gmra.mxu1 %vm8509_vm14, %v9674_v17  ;;  %v8721_v49 = vpop.f32.mrf.mxu0 }
 0x5bf   : > { %v8340_v21 = vpop.permute.xlu0 %8339  ;;  %9958 = vst.msk [vmem:[%s14747_s17 + $0x68] sm:$0xff] %vm7506_vm11, %v9926_v56 }
 0x5c0   : > { %v8468_v40 = vsel %vm7506_vm11, %v10792_v44, %v8340_v21 }
 0x5c3   : > { %v8592_v53 = vpop.f32.mrf.mxu3 }
 0x5c4   : > { %v8722_v12 = vadd.f32 %v8721_v49, %v8592_v53 }
 0x5c5   : > { %v8420_v43 = vpop.permute.xlu1 %8419 }
 0x5c6   : > { %v8500_v51 = vsel %vm1125_vm1, %v8468_v40, %v8420_v43  ;;  %v9764_v50 = vpop.f32.mrf.mxu1 }
 0x5c7   : > { %v7505_v1 = vpop.permute.xlu0 %7504  ;;  %10577 = vmatmul.msk.bf16.gmra.mxu3 %vm8509_vm14, %v8500_v51  ;;  %v9823_v25 = vadd.f32 %v9764_v50, %v8720_v47 }
 0x5c8   : > { %v7586_v26 = vsel %vm1125_vm1, %v7554_v15, %v7505_v1 }
 0x5c9   : > { %10597 = vmatmul.msk.bf16.gmra.mxu0 %vm8509_vm14, %v7586_v26  ;;  %v9859_v22 = vmul.f32 %v15144_v32, %v9823_v25 }
 0x5cb   : > { %v9895_v34 = vadd.f32 %v15156_v8, %v9859_v22 }
 0x5cc   : > { %v8724_v28 = vpop.f32.mrf.mxu0 }
 0x5cd   : > { %v9927_v33 = vmax.f32 %v9895_v34, 0.0 }
 0x5ce   : > { %v9766_v60 = vpop.f32.mrf.mxu1 }
 0x5cf   : > { %9959 = vst.msk [vmem:[%s14747_s17 + $0x70] sm:$0xff] %vm7506_vm11, %v9927_v33  ;;  %v9824_v20 = vadd.f32 %v9766_v60, %v8722_v12  ;;  %v8595_v0 = vpop.f32.mrf.mxu3 }
 0x5d0   : > { %v8725_v3 = vadd.f32 %v8724_v28, %v8595_v0 }
 0x5d1   : > { %v9860_v42 = vmul.f32 %v15144_v32, %v9824_v20 }
 0x5d3   : > { %v9896_v18 = vadd.f32 %v15156_v8, %v9860_v42 }
 0x5d4   : > { %v8726_v23 = vpop.f32.mrf.mxu0 }
 0x5d5   : > { %v9928_v30 = vmax.f32 %v9896_v18, 0.0 }
 0x5d6   : > { %v9769_v59 = vpop.f32.mrf.mxu1 }
 0x5d7   : > { %v9516_v37 = vpop.permute.xlu1 %9515  ;;  %9960 = vst.msk [vmem:[%s14747_s17 + $0x78] sm:$0xff] %vm7506_vm11, %v9928_v30  ;;  %v9825_v62 = vadd.f32 %v9769_v59, %v8725_v3  ;;  %v8597_v61 = vpop.f32.mrf.mxu3 }
 0x5d8   : > { %v9644_v39 = vsel %vm7506_vm11, %v10809_v13, %v9516_v37  ;;  %v8727_v24 = vadd.f32 %v8726_v23, %v8597_v61 }
 0x5d9   : > { %v9676_v58 = vsel %vm1125_vm1, %v9644_v39, %v9596_v31  ;;  %v9861_v55 = vmul.f32 %v15144_v32, %v9825_v62 }
 0x5da   : > { %10699 = vmatmul.msk.bf16.gmra.mxu1 %vm8509_vm14, %v9676_v58 }
 0x5db   : > { %v9897_v19 = vadd.f32 %v15156_v8, %v9861_v55 }
 0x5dc   : > { %v8729_v6 = vpop.f32.mrf.mxu0 }
 0x5dd   : > { %v9929_v10 = vmax.f32 %v9897_v19, 0.0 }
 0x5de   : > { %v9771_v36 = vpop.f32.mrf.mxu1 }
 0x5df   : > { %9961 = vst.msk [vmem:[%s14747_s17 + $0x80] sm:$0xff] %vm7506_vm11, %v9929_v10  ;;  %v9826_v27 = vadd.f32 %v9771_v36, %v8727_v24  ;;  %v8600_v48 = vpop.f32.mrf.mxu3 }
 0x5e0   : > { %v8730_v16 = vadd.f32 %v8729_v6, %v8600_v48 }
 0x5e1   : > { %v9862_v38 = vmul.f32 %v15144_v32, %v9826_v27 }
 0x5e3   : > { %v9898_v29 = vadd.f32 %v15156_v8, %v9862_v38 }
 0x5e4   : > { %v8731_v63 = vpop.f32.mrf.mxu0 }
 0x5e5   : > { %v9930_v54 = vmax.f32 %v9898_v29, 0.0 }
 0x5e6   : > { %v9774_v9 = vpop.f32.mrf.mxu1 }
 0x5e7   : > { %9962 = vst.msk [vmem:[%s14747_s17 + $0x88] sm:$0xff] %vm7506_vm11, %v9930_v54  ;;  %v9827_v7 = vadd.f32 %v9774_v9, %v8730_v16  ;;  %v8602_v57 = vpop.f32.mrf.mxu3 }
 0x5e8   : > { %v8732_v52 = vadd.f32 %v8731_v63, %v8602_v57 }
 0x5e9   : > { %v9863_v46 = vmul.f32 %v15144_v32, %v9827_v7 }
 0x5eb   : > { %v9899_v35 = vadd.f32 %v15156_v8, %v9863_v46 }
 0x5ec   : > { %v8734_v41 = vpop.f32.mrf.mxu0 }
 0x5ed   : > { %v9931_v2 = vmax.f32 %v9899_v35, 0.0 }
 0x5ee   : > { %v9776_v45 = vpop.f32.mrf.mxu1 }
 0x5ef   : > { %9963 = vst.msk [vmem:[%s14747_s17 + $0x90] sm:$0xff] %vm7506_vm11, %v9931_v2  ;;  %v9828_v14 = vadd.f32 %v9776_v45, %v8732_v52  ;;  %v8605_v5 = vpop.f32.mrf.mxu3 }
 0x5f0   : > { %v8735_v21 = vadd.f32 %v8734_v41, %v8605_v5 }
 0x5f1   : > { %v9864_v56 = vmul.f32 %v15144_v32, %v9828_v14 }
 0x5f3   : > { %v9900_v17 = vadd.f32 %v15156_v8, %v9864_v56 }
 0x5f4   : > { %v8736_v47 = vpop.f32.mrf.mxu0 }
 0x5f5   : > { %v9932_v44 = vmax.f32 %v9900_v17, 0.0 }
 0x5f6   : > { %v9779_v49 = vpop.f32.mrf.mxu1 }
 0x5f7   : > { %9964 = vst.msk [vmem:[%s14747_s17 + $0x98] sm:$0xff] %vm7506_vm11, %v9932_v44  ;;  %v9829_v4 = vadd.f32 %v9779_v49, %v8735_v21  ;;  %v8607_v11 = vpop.f32.mrf.mxu3 }
 0x5f8   : > { %v8737_v51 = vadd.f32 %v8736_v47, %v8607_v11 }
 0x5f9   : > { %v9865_v40 = vmul.f32 %v15144_v32, %v9829_v4 }
 0x5fb   : > { %v9901_v43 = vadd.f32 %v15156_v8, %v9865_v40 }
 0x5fc   : > { %v8739_v53 = vpop.f32.mrf.mxu0 }
 0x5fd   : > { %v9933_v50 = vmax.f32 %v9901_v43, 0.0 }
 0x5fe   : > { %v9781_v15 = vpop.f32.mrf.mxu1 }
 0x5ff   : > { %9965 = vst.msk [vmem:[%s14747_s17 + $0xa0] sm:$0xff] %vm7506_vm11, %v9933_v50  ;;  %v9830_v1 = vadd.f32 %v9781_v15, %v8737_v51  ;;  %v8610_v25 = vpop.f32.mrf.mxu3 }
 0x600   : > { %v8740_v34 = vadd.f32 %v8739_v53, %v8610_v25 }
 0x601   : > { %v9866_v26 = vmul.f32 %v15144_v32, %v9830_v1 }
 0x603   : > { %v9902_v22 = vadd.f32 %v15156_v8, %v9866_v26 }
 0x604   : > { %v8741_v33 = vpop.f32.mrf.mxu0 }
 0x605   : > { %v9934_v12 = vmax.f32 %v9902_v22, 0.0 }
 0x606   : > { %v9784_v28 = vpop.f32.mrf.mxu1 }
 0x607   : > { %9966 = vst.msk [vmem:[%s14747_s17 + $0xa8] sm:$0xff] %vm7506_vm11, %v9934_v12  ;;  %v9831_v60 = vadd.f32 %v9784_v28, %v8740_v34  ;;  %v8612_v20 = vpop.f32.mrf.mxu3 }
 0x608   : > { %v8742_v18 = vadd.f32 %v8741_v33, %v8612_v20 }
 0x609   : > { %v9867_v0 = vmul.f32 %v15144_v32, %v9831_v60 }
 0x60b   : > { %v9903_v42 = vadd.f32 %v15156_v8, %v9867_v0 }
 0x60c   : > { %v8744_v13 = vpop.f32.mrf.mxu0 }
 0x60d   : > { %v9935_v3 = vmax.f32 %v9903_v42, 0.0 }
 0x60e   : > { %v9786_v30 = vpop.f32.mrf.mxu1 }
 0x60f   : > { %9967 = vst.msk [vmem:[%s14747_s17 + $0xb0] sm:$0xff] %vm7506_vm11, %v9935_v3  ;;  %v9832_v23 = vadd.f32 %v9786_v30, %v8742_v18  ;;  %v8615_v31 = vpop.f32.mrf.mxu3 }
 0x610   : > { %v8745_v62 = vadd.f32 %v8744_v13, %v8615_v31 }
 0x611   : > { %v9868_v59 = vmul.f32 %v15144_v32, %v9832_v23 }
 0x613   : > { %v9904_v37 = vadd.f32 %v15156_v8, %v9868_v59 }
 0x614   : > { %v8746_v61 = vpop.f32.mrf.mxu0 }
 0x615   : > { %v9936_v39 = vmax.f32 %v9904_v37, 0.0 }
 0x616   : > { %v9789_v58 = vpop.f32.mrf.mxu1 }
 0x617   : > { %9968 = vst.msk [vmem:[%s14747_s17 + $0xb8] sm:$0xff] %vm7506_vm11, %v9936_v39  ;;  %v9833_v55 = vadd.f32 %v9789_v58, %v8745_v62  ;;  %v8617_v19 = vpop.f32.mrf.mxu3 }
 0x618   : > { %v8747_v6 = vadd.f32 %v8746_v61, %v8617_v19 }
 0x619   : > { %v9869_v24 = vmul.f32 %v15144_v32, %v9833_v55 }
 0x61b   : > { %v9905_v10 = vadd.f32 %v15156_v8, %v9869_v24 }
 0x61c   : > { %v8749_v38 = vpop.f32.mrf.mxu0 }
 0x61d   : > { %v9937_v36 = vmax.f32 %v9905_v10, 0.0 }
 0x61e   : > { %v9791_v27 = vpop.f32.mrf.mxu1 }
 0x61f   : > { %9969 = vst.msk [vmem:[%s14747_s17 + $0xc0] sm:$0xff] %vm7506_vm11, %v9937_v36  ;;  %v9834_v48 = vadd.f32 %v9791_v27, %v8747_v6  ;;  %v8620_v29 = vpop.f32.mrf.mxu3 }
 0x620   : > { %v8750_v63 = vadd.f32 %v8749_v38, %v8620_v29 }
 0x621   : > { %v9870_v16 = vmul.f32 %v15144_v32, %v9834_v48 }
 0x623   : > { %v9906_v54 = vadd.f32 %v15156_v8, %v9870_v16 }
 0x624   : > { %v8751_v52 = vpop.f32.mrf.mxu0 }
 0x625   : > { %v9938_v9 = vmax.f32 %v9906_v54, 0.0 }
 0x626   : > { %v9794_v7 = vpop.f32.mrf.mxu1 }
 0x627   : > { %9970 = vst.msk [vmem:[%s14747_s17 + $0xc8] sm:$0xff] %vm7506_vm11, %v9938_v9  ;;  %v9835_v57 = vadd.f32 %v9794_v7, %v8750_v63  ;;  %v8622_v46 = vpop.f32.mrf.mxu3 }
 0x628   : > { %v8752_v41 = vadd.f32 %v8751_v52, %v8622_v46 }
 0x629   : > { %v9871_v35 = vmul.f32 %v15144_v32, %v9835_v57 }
 0x62b   : > { %v9907_v2 = vadd.f32 %v15156_v8, %v9871_v35 }
 0x62d   : > { %v9939_v45 = vmax.f32 %v9907_v2, 0.0 }
 0x62e   : > { %v9796_v14 = vpop.f32.mrf.mxu1 }
 0x62f   : > { %9971 = vst.msk [vmem:[%s14747_s17 + $0xd0] sm:$0xff] %vm7506_vm11, %v9939_v45  ;;  %v9836_v5 = vadd.f32 %v9796_v14, %v8752_v41  ;;  %v8754_v47 = vpop.f32.mrf.mxu0 }
 0x631   : > { %v9872_v56 = vmul.f32 %v15144_v32, %v9836_v5 }
 0x633   : > { %v9908_v17 = vadd.f32 %v15156_v8, %v9872_v56  ;;  %v8625_v21 = vpop.f32.mrf.mxu3 }
 0x634   : > { %v8755_v49 = vadd.f32 %v8754_v47, %v8625_v21 }
 0x635   : > { %v9940_v44 = vmax.f32 %v9908_v17, 0.0 }
 0x637   : > { %9972 = vst.msk [vmem:[%s14747_s17 + $0xd8] sm:$0xff] %vm7506_vm11, %v9940_v44  ;;  %v8756_v51 = vpop.f32.mrf.mxu0 }
 0x63b   : > { %v9799_v4 = vpop.f32.mrf.mxu1  ;;  %v8627_v40 = vpop.f32.mrf.mxu3 }
 0x63c   : > { %v9837_v11 = vadd.f32 %v9799_v4, %v8755_v49  ;;  %v8757_v53 = vadd.f32 %v8756_v51, %v8627_v40 }
 0x63e   : > { %v9873_v43 = vmul.f32 %v15144_v32, %v9837_v11 }
 0x640   : > { %v9909_v50 = vadd.f32 %v15156_v8, %v9873_v43 }
 0x642   : > { %v9941_v15 = vmax.f32 %v9909_v50, 0.0 }
 0x643   : > { %v9801_v1 = vpop.f32.mrf.mxu1 }
 0x644   : > { %9973 = vst.msk [vmem:[%s14747_s17 + $0xe0] sm:$0xff] %vm7506_vm11, %v9941_v15  ;;  %v9838_v25 = vadd.f32 %v9801_v1, %v8757_v53 }
 0x646   : > { %v9874_v26 = vmul.f32 %v15144_v32, %v9838_v25  ;;  %v8759_v33 = vpop.f32.mrf.mxu0 }
 0x648   : > { %v9910_v22 = vadd.f32 %v15156_v8, %v9874_v26 }
 0x64a   : > { %v9942_v34 = vmax.f32 %v9910_v22, 0.0  ;;  %v8630_v12 = vpop.f32.mrf.mxu3 }
 0x64b   : > { %v8760_v28 = vadd.f32 %v8759_v33, %v8630_v12 }
 0x64c   : > { %9974 = vst.msk [vmem:[%s14747_s17 + $0xe8] sm:$0xff] %vm7506_vm11, %v9942_v34 }
 0x64e   : > { %v8761_v18 = vpop.f32.mrf.mxu0 }
 0x652   : > { %v8632_v0 = vpop.f32.mrf.mxu3 }
 0x653   : > { %v8762_v13 = vadd.f32 %v8761_v18, %v8632_v0 }
 0x657   : > { %v9804_v60 = vpop.f32.mrf.mxu1 }
 0x658   : > { %v9839_v20 = vadd.f32 %v9804_v60, %v8760_v28 }
 0x65a   : > { %v9875_v42 = vmul.f32 %v15144_v32, %v9839_v20 }
 0x65c   : > { %v9911_v3 = vadd.f32 %v15156_v8, %v9875_v42 }
 0x65e   : > { %v9943_v30 = vmax.f32 %v9911_v3, 0.0 }
 0x65f   : > { %v9806_v23 = vpop.f32.mrf.mxu1 }
 0x660   : > { %9975 = vst.msk [vmem:[%s14747_s17 + $0xf0] sm:$0xff] %vm7506_vm11, %v9943_v30  ;;  %v9840_v31 = vadd.f32 %v9806_v23, %v8762_v13 }
 0x662   : > { %v9876_v59 = vmul.f32 %v15144_v32, %v9840_v31 }
 0x664   : > { %v9912_v37 = vadd.f32 %v15156_v8, %v9876_v59 }
 0x666   : > { %v9944_v62 = vmax.f32 %v9912_v37, 0.0 }
 0x668   : > { %9976 = vst.msk [vmem:[%s14747_s17 + $0xf8] sm:$0xff] %vm7506_vm11, %v9944_v62 }
 0x669 PF: > { %s20_s13 = sadd.s32 1, %s10847_s13  }
 0x66a   : > { %p17_p4 = scmp.ge.s32.totalorder %s20_s13, 4  }
 0x66c   :  { %19 = sbr.rel (!%p17_p4) target bundleno = 1 (0x1), region = 113 }

</bundles_post_ra>
